<compile_context>
chip_gen: v6e
topology: v6e:2x2x1
jax: 0.10.0
libtpu: 0.0.40
codegen_flags: <defaults>
</compile_context>

<pallas_src>
import functools

import jax
import jax.numpy as jnp
from jax.experimental import pallas as pl
from jax.experimental.pallas import tpu as pltpu


# ----------------------------------------------------------------------------
# Kernels
# ----------------------------------------------------------------------------
def _matmul_bias_kernel(x_ref, w_ref, b_ref, o_ref, *, activation, valid_n):
    """out = x @ w + b (bf16 operands, f32 accumulate), optional fused
    ReLU or masked row-wise log_softmax."""
    acc = jnp.dot(x_ref[...], w_ref[...], preferred_element_type=jnp.float32)
    acc = acc + b_ref[...]
    if activation == "relu":
        acc = jnp.maximum(acc, 0.0)
    elif activation == "log_softmax":
        if valid_n is not None and valid_n < acc.shape[-1]:
            # Mask the padded output columns so they do not contribute to the
            # softmax normalizer.
            col = jax.lax.broadcasted_iota(jnp.int32, acc.shape, 1)
            acc = jnp.where(col < valid_n, acc, jnp.float32(-1e30))
        m = jnp.max(acc, axis=-1, keepdims=True)
        acc = acc - m
        acc = acc - jnp.log(jnp.sum(jnp.exp(acc), axis=-1, keepdims=True))
    o_ref[...] = acc


def matmul_bias(x, w, b, activation=None, valid_n=None):
    """x: (M, K) bf16, w: (K, N) bf16, b: (N,) f32 -> (M, N) f32.

    M is zero-padded up to a multiple of 128 and tiled over a parallel grid.
    N is always a multiple of 128 (lane-dense stores)."""
    M, K = x.shape
    N = w.shape[1]
    bm = 128
    Mp = ((M + bm - 1) // bm) * bm
    if Mp != M:
        x = jnp.pad(x, ((0, Mp - M), (0, 0)))
    kernel = functools.partial(
        _matmul_bias_kernel, activation=activation, valid_n=valid_n)
    out = pl.pallas_call(
        kernel,
        out_shape=jax.ShapeDtypeStruct((Mp, N), jnp.float32),
        grid=(Mp // bm,),
        in_specs=[
            pl.BlockSpec((bm, K), lambda i: (i, 0)),
            pl.BlockSpec((K, N), lambda i: (0, 0)),
            pl.BlockSpec((1, N), lambda i: (0, 0)),
        ],
        out_specs=pl.BlockSpec((bm, N), lambda i: (i, 0)),
        compiler_params=pltpu.CompilerParams(
            dimension_semantics=("parallel",)),
    )(x, w, b.reshape(1, N))
    return out[:M] if Mp != M else out


def _bn_relu_pool_kernel(x_ref, g_ref, b_ref, o_ref, *, C, OW, eps, n_rows):
    """Fused training-mode BatchNorm (batch stats) + ReLU + 2x2/2 maxpool.

    x_ref: (B*OH//2, 2*OW*C) f32 — each row holds two consecutive image rows.
    Column layout: [row_even: j=0..OW-1 each C channels | row_odd: same].
    Output: (B*OH//2, (OW//2)*C), stored bf16 (next stage's MXU operand).
    """
    x = x_ref[...]                                         # (Mp, 2*OW*C)
    # ---- per-channel batch statistics (global over all rows) ----
    col_sum = jnp.sum(x, axis=0, keepdims=True)            # (1, 2*OW*C)
    col_sq = jnp.sum(x * x, axis=0, keepdims=True)
    s = jnp.zeros((1, C), jnp.float32)
    sq = jnp.zeros((1, C), jnp.float32)
    for t in range(2 * OW):                                # lane-aligned slices
        s = s + col_sum[:, t * C:(t + 1) * C]
        sq = sq + col_sq[:, t * C:(t + 1) * C]
    inv_n = 1.0 / float(n_rows)
    mean = s * inv_n
    var = sq * inv_n - mean * mean                         # biased (torch train)
    scale = g_ref[...] * jax.lax.rsqrt(var + eps)          # (1, C)
    shift = b_ref[...] - mean * scale                      # (1, C)

    # ---- normalize + relu + 2x2 maxpool, written lane-dense ----
    OWC = OW * C

    def bn(v):
        return jnp.maximum(v * scale + shift, 0.0)

    for jj in range(OW // 2):
        c0 = (2 * jj) * C
        c1 = c0 + C
        c2 = c1 + C
        tl = bn(x[:, c0:c1])
        tr = bn(x[:, c1:c2])
        bl = bn(x[:, OWC + c0:OWC + c1])
        br = bn(x[:, OWC + c1:OWC + c2])
        o_ref[:, jj * C:(jj + 1) * C] = jnp.maximum(
            jnp.maximum(tl, tr), jnp.maximum(bl, br)).astype(o_ref.dtype)


def bn_relu_pool(y_flat, gamma, beta, B, OH, OW, C, eps=1e-5):
    """y_flat: (B*OH*OW, C) f32 conv+bias output -> (B, OH//2, OW//2, C) bf16."""
    Mp = B * OH // 2
    x2 = y_flat.reshape(Mp, 2 * OW * C)                    # free (contiguous) view
    # TODO(synk): for very large B*OH this single-block kernel should be split
    # into a two-pass (partial-sum stats) gridded version to stay within
    # v7x's 64 MiB VMEM; fine at these shapes.
    out = pl.pallas_call(
        functools.partial(_bn_relu_pool_kernel, C=C, OW=OW, eps=eps,
                          n_rows=B * OH * OW),
        out_shape=jax.ShapeDtypeStruct((Mp, (OW // 2) * C), jnp.bfloat16),
    )(x2, gamma.reshape(1, C), beta.reshape(1, C))
    return out.reshape(B, OH // 2, OW // 2, C)


# ----------------------------------------------------------------------------
# Glue (XLA): patch extraction + layout plumbing only
# ----------------------------------------------------------------------------
def im2col(x, kh, kw, pad_k_to=None):
    """x: (B, H, W, C) NHWC -> (B, OH, OW, kh*kw*C), flatten order (ki, kj, c).
    Lane-dense concat along the existing channel axis (no minor-axis stack)."""
    B, H, W, C = x.shape
    OH, OW = H - kh + 1, W - kw + 1
    cols = [x[:, i:i + OH, j:j + OW, :] for i in range(kh) for j in range(kw)]
    p = jnp.concatenate(cols, axis=-1)
    K = kh * kw * C
    if pad_k_to is not None and pad_k_to > K:
        p = jnp.pad(p, ((0, 0), (0, 0), (0, 0), (0, pad_k_to - K)))
    return p, OH, OW


def network_forward(x_nchw, params):
    B = x_nchw.shape[0]
    bf16 = jnp.bfloat16
    x = jnp.transpose(x_nchw, (0, 2, 3, 1))                # NCHW -> NHWC

    # conv1 (1->100 pad 128, k=5) + batchnorm1 + relu + pool1
    p, oh, ow = im2col(x, 5, 5, pad_k_to=32)               # (B,24,24,32)
    y = matmul_bias(p.reshape(B * oh * ow, 32).astype(bf16),
                    params["w1"], params["b1"])            # (B*576, 128) f32
    y = bn_relu_pool(y, params["g1"], params["bt1"], B, oh, ow, 128)  # (B,12,12,128) bf16

    # conv2 (100->80 pad 128, k=5) + batchnorm2 + relu + pool2
    p, oh, ow = im2col(y, 5, 5)                            # (B,8,8,3200) bf16
    y = matmul_bias(p.reshape(B * oh * ow, 25 * 128),
                    params["w2"], params["b2"])            # (B*64, 128) f32
    y = bn_relu_pool(y, params["g2"], params["bt2"], B, oh, ow, 128)  # (B,4,4,128) bf16

    # flatten in PyTorch NCHW .view order (c, h, w) over the padded channels
    y = jnp.transpose(y, (0, 3, 1, 2)).reshape(B, 128 * 16)           # (B, 2048) bf16

    y = matmul_bias(y, params["wf1"], params["bf1"], activation="relu")   # (B, 256)
    y = matmul_bias(y.astype(bf16), params["wf2"], params["bf2"],
                    activation="log_softmax", valid_n=25)                 # (B, 128)
    return y[:, :25]


# ----------------------------------------------------------------------------
# Parameters (random, stored pre-padded / pre-transposed for the kernels)
# ----------------------------------------------------------------------------
def init_params():
    key = jax.random.PRNGKey(0)
    ks = jax.random.split(key, 8)
    f32, bf16 = jnp.float32, jnp.bfloat16

    def col_mask(n, valid):
        return (jnp.arange(n) < valid).astype(f32)[None, :]

    def row_mask(n, valid):
        return (jnp.arange(n) < valid).astype(f32)[:, None]

    # conv1: torch (100,1,5,5) -> im2col rows ordered (ki*5+kj), K padded to 32,
    # out channels padded 100->128 with zero weights / zero gamma.
    w1 = jax.random.normal(ks[0], (32, 128), f32) * 0.1
    w1 = w1 * row_mask(32, 25) * col_mask(128, 100)
    b1 = jax.random.normal(ks[1], (128,), f32) * 0.01 * col_mask(128, 100)[0]
    g1 = jnp.where(jnp.arange(128) < 100, 1.0, 0.0).astype(f32)
    bt1 = jnp.zeros((128,), f32)

    # conv2: K rows ordered ((ki*5+kj)*128 + c) over the padded 128 in-channels.
    krow_c = jnp.arange(25 * 128) % 128
    w2 = jax.random.normal(ks[2], (25 * 128, 128), f32) * 0.02
    w2 = w2 * (krow_c < 100).astype(f32)[:, None] * col_mask(128, 80)
    b2 = jax.random.normal(ks[3], (128,), f32) * 0.01 * col_mask(128, 80)[0]
    g2 = jnp.where(jnp.arange(128) < 80, 1.0, 0.0).astype(f32)
    bt2 = jnp.zeros((128,), f32)

    # fc1: input rows ordered (c*16 + h*4 + w) over padded 128 channels;
    # rows for c>=80 and cols >= 250 are zero.
    frow_c = jnp.arange(128 * 16) // 16
    wf1 = jax.random.normal(ks[4], (128 * 16, 256), f32) * 0.02
    wf1 = wf1 * (frow_c < 80).astype(f32)[:, None] * col_mask(256, 250)
    bf1 = jax.random.normal(ks[5], (256,), f32) * 0.01 * col_mask(256, 250)[0]

    # fc2: 250->25, padded to 256->128.
    wf2 = jax.random.normal(ks[6], (256, 128), f32) * 0.05
    wf2 = wf2 * row_mask(256, 250) * col_mask(128, 25)
    bf2 = jax.random.normal(ks[7], (128,), f32) * 0.01 * col_mask(128, 25)[0]

    return {
        "w1": w1.astype(bf16), "b1": b1, "g1": g1, "bt1": bt1,
        "w2": w2.astype(bf16), "b2": b2, "g2": g2, "bt2": bt2,
        "wf1": wf1.astype(bf16), "bf1": bf1,
        "wf2": wf2.astype(bf16), "bf2": bf2,
    }


if __name__ == "__main__":
    params = init_params()
    # Input must be 28x28 single-channel so the flatten yields 1280 real
    # features (80 * 4 * 4), as the module's fc1 requires.
    x = jax.random.normal(jax.random.PRNGKey(0), (2, 1, 28, 28), jnp.float32)

    fwd = jax.jit(network_forward)
    out = jax.block_until_ready(fwd(x, params))

    assert out.shape == (2, 25), out.shape
    # log_softmax rows should exponentiate-sum to ~1
    assert jnp.allclose(jnp.exp(out).sum(axis=1), 1.0, atol=1e-3)
    print("KERNEL_OK")
</pallas_src>

<mosaic_0001>
module attributes {stable_mosaic.version = 11 : i64} {
  func.func @_matmul_bias_kernel(%arg0: i32, %arg1: memref<128x32xbf16, #tpu.memory_space<vmem>>, %arg2: memref<32x128xbf16, #tpu.memory_space<vmem>>, %arg3: memref<1x128xf32, #tpu.memory_space<vmem>>, %arg4: memref<128x128xf32, #tpu.memory_space<vmem>>) attributes {dimension_semantics = [#tpu.dimension_semantics<parallel>], iteration_bounds = array<i64: 9>, scalar_prefetch = 0 : i64, scratch_operands = 0 : i64, tpu.core_type = #tpu.core_type<tc>, window_params = [{transform_indices = @transform_0, window_bounds = array<i64: 128, 32>}, {pipeline_mode = #tpu.pipeline_mode<synchronous>, transform_indices = @transform_1, window_bounds = array<i64: 32, 128>}, {pipeline_mode = #tpu.pipeline_mode<synchronous>, transform_indices = @transform_2, window_bounds = array<i64: 1, 128>}, {transform_indices = @transform_3, window_bounds = array<i64: 128, 128>}]} {
    %c0 = arith.constant 0 : index
    %c0_0 = arith.constant 0 : index
    %0 = vector.load %arg1[%c0, %c0_0] : memref<128x32xbf16, #tpu.memory_space<vmem>>, vector<128x32xbf16>
    %c0_1 = arith.constant 0 : index
    %c0_2 = arith.constant 0 : index
    %1 = vector.load %arg2[%c0_1, %c0_2] : memref<32x128xbf16, #tpu.memory_space<vmem>>, vector<32x128xbf16>
    %cst = arith.constant dense<0.000000e+00> : vector<128x128xf32>
    %2 = tpu.matmul %0, %1, %cst {dimension_numbers = #tpu.dot_dimension_numbers<[1], [0], [0], [1], [0, 0, 1, 1], [], []>} : vector<128x32xbf16>, vector<32x128xbf16>, vector<128x128xf32> -> vector<128x128xf32>
    %c0_3 = arith.constant 0 : index
    %c0_4 = arith.constant 0 : index
    %3 = vector.load %arg3[%c0_3, %c0_4] : memref<1x128xf32, #tpu.memory_space<vmem>>, vector<1x128xf32>
    %4 = vector.broadcast %3 : vector<1x128xf32> to vector<128x128xf32>
    %5 = arith.addf %2, %4 : vector<128x128xf32>
    %c0_5 = arith.constant 0 : index
    %c0_6 = arith.constant 0 : index
    %6 = vector.load %arg4[%c0_5, %c0_6] : memref<128x128xf32, #tpu.memory_space<vmem>>, vector<128x128xf32>
    tpu.vector_store %arg4[%c0_5, %c0_6], %5 {strides = array<i32>} : memref<128x128xf32, #tpu.memory_space<vmem>>, vector<128x128xf32>,
    return
  }
  func.func @transform_0(%arg0: i32) -> (i32, i32) {
    %c0_i32 = arith.constant 0 : i32
    %c0_i32_0 = arith.constant 0 : i32
    return %arg0, %c0_i32 : i32, i32
  }
  func.func @transform_1(%arg0: i32) -> (i32, i32) {
    %c0_i32 = arith.constant 0 : i32
    %c0_i32_0 = arith.constant 0 : i32
    %c0_i32_1 = arith.constant 0 : i32
    return %c0_i32, %c0_i32_0 : i32, i32
  }
  func.func @transform_2(%arg0: i32) -> (i32, i32) {
    %c0_i32 = arith.constant 0 : i32
    %c0_i32_0 = arith.constant 0 : i32
    %c0_i32_1 = arith.constant 0 : i32
    return %c0_i32, %c0_i32_0 : i32, i32
  }
  func.func @transform_3(%arg0: i32) -> (i32, i32) {
    %c0_i32 = arith.constant 0 : i32
    %c0_i32_0 = arith.constant 0 : i32
    return %arg0, %c0_i32 : i32, i32
  }
}

module attributes {stable_mosaic.version = 11 : i64} {
  func.func @_bn_relu_pool_kernel(%arg0: memref<24x6144xf32, #tpu.memory_space<vmem>>, %arg1: memref<1x128xf32, #tpu.memory_space<vmem>>, %arg2: memref<1x128xf32, #tpu.memory_space<vmem>>, %arg3: memref<24x1536xbf16, #tpu.memory_space<vmem>>) attributes {dimension_semantics = [], scalar_prefetch = 0 : i64, scratch_operands = 0 : i64, tpu.core_type = #tpu.core_type<tc>} {
    %c0 = arith.constant 0 : index
    %c0_0 = arith.constant 0 : index
    %0 = vector.load %arg0[%c0, %c0_0] : memref<24x6144xf32, #tpu.memory_space<vmem>>, vector<24x6144xf32>
    %cst = arith.constant dense<0.000000e+00> : vector<6144xf32>
    %1 = vector.multi_reduction <add>, %0, %cst [0] : vector<24x6144xf32> to vector<6144xf32>
    %2 = vector.shape_cast %1 : vector<6144xf32> to vector<1x6144xf32>
    %3 = arith.mulf %0, %0 : vector<24x6144xf32>
    %cst_1 = arith.constant dense<0.000000e+00> : vector<6144xf32>
    %4 = vector.multi_reduction <add>, %3, %cst_1 [0] : vector<24x6144xf32> to vector<6144xf32>
    %5 = vector.shape_cast %4 : vector<6144xf32> to vector<1x6144xf32>
    %cst_2 = arith.constant 0.000000e+00 : f32
    %6 = vector.broadcast %cst_2 : f32 to vector<1x128xf32>
    %cst_3 = arith.constant 0.000000e+00 : f32
    %7 = vector.broadcast %cst_3 : f32 to vector<1x128xf32>
    %8 = vector.extract_strided_slice %2 {offsets = [0, 0], sizes = [1, 128], strides = [1, 1]} : vector<1x6144xf32> to vector<1x128xf32>
    %9 = arith.addf %6, %8 : vector<1x128xf32>
    %10 = vector.extract_strided_slice %5 {offsets = [0, 0], sizes = [1, 128], strides = [1, 1]} : vector<1x6144xf32> to vector<1x128xf32>
    %11 = arith.addf %7, %10 : vector<1x128xf32>
    %12 = vector.extract_strided_slice %2 {offsets = [0, 128], sizes = [1, 128], strides = [1, 1]} : vector<1x6144xf32> to vector<1x128xf32>
    %13 = arith.addf %9, %12 : vector<1x128xf32>
    %14 = vector.extract_strided_slice %5 {offsets = [0, 128], sizes = [1, 128], strides = [1, 1]} : vector<1x6144xf32> to vector<1x128xf32>
    %15 = arith.addf %11, %14 : vector<1x128xf32>
    %16 = vector.extract_strided_slice %2 {offsets = [0, 256], sizes = [1, 128], strides = [1, 1]} : vector<1x6144xf32> to vector<1x128xf32>
    %17 = arith.addf %13, %16 : vector<1x128xf32>
    %18 = vector.extract_strided_slice %5 {offsets = [0, 256], sizes = [1, 128], strides = [1, 1]} : vector<1x6144xf32> to vector<1x128xf32>
    %19 = arith.addf %15, %18 : vector<1x128xf32>
    %20 = vector.extract_strided_slice %2 {offsets = [0, 384], sizes = [1, 128], strides = [1, 1]} : vector<1x6144xf32> to vector<1x128xf32>
    %21 = arith.addf %17, %20 : vector<1x128xf32>
    %22 = vector.extract_strided_slice %5 {offsets = [0, 384], sizes = [1, 128], strides = [1, 1]} : vector<1x6144xf32> to vector<1x128xf32>
    %23 = arith.addf %19, %22 : vector<1x128xf32>
    %24 = vector.extract_strided_slice %2 {offsets = [0, 512], sizes = [1, 128], strides = [1, 1]} : vector<1x6144xf32> to vector<1x128xf32>
    %25 = arith.addf %21, %24 : vector<1x128xf32>
    %26 = vector.extract_strided_slice %5 {offsets = [0, 512], sizes = [1, 128], strides = [1, 1]} : vector<1x6144xf32> to vector<1x128xf32>
    %27 = arith.addf %23, %26 : vector<1x128xf32>
    %28 = vector.extract_strided_slice %2 {offsets = [0, 640], sizes = [1, 128], strides = [1, 1]} : vector<1x6144xf32> to vector<1x128xf32>
    %29 = arith.addf %25, %28 : vector<1x128xf32>
    %30 = vector.extract_strided_slice %5 {offsets = [0, 640], sizes = [1, 128], strides = [1, 1]} : vector<1x6144xf32> to vector<1x128xf32>
    %31 = arith.addf %27, %30 : vector<1x128xf32>
    %32 = vector.extract_strided_slice %2 {offsets = [0, 768], sizes = [1, 128], strides = [1, 1]} : vector<1x6144xf32> to vector<1x128xf32>
    %33 = arith.addf %29, %32 : vector<1x128xf32>
    %34 = vector.extract_strided_slice %5 {offsets = [0, 768], sizes = [1, 128], strides = [1, 1]} : vector<1x6144xf32> to vector<1x128xf32>
    %35 = arith.addf %31, %34 : vector<1x128xf32>
    %36 = vector.extract_strided_slice %2 {offsets = [0, 896], sizes = [1, 128], strides = [1, 1]} : vector<1x6144xf32> to vector<1x128xf32>
    %37 = arith.addf %33, %36 : vector<1x128xf32>
    %38 = vector.extract_strided_slice %5 {offsets = [0, 896], sizes = [1, 128], strides = [1, 1]} : vector<1x6144xf32> to vector<1x128xf32>
    %39 = arith.addf %35, %38 : vector<1x128xf32>
    %40 = vector.extract_strided_slice %2 {offsets = [0, 1024], sizes = [1, 128], strides = [1, 1]} : vector<1x6144xf32> to vector<1x128xf32>
    %41 = arith.addf %37, %40 : vector<1x128xf32>
    %42 = vector.extract_strided_slice %5 {offsets = [0, 1024], sizes = [1, 128], strides = [1, 1]} : vector<1x6144xf32> to vector<1x128xf32>
    %43 = arith.addf %39, %42 : vector<1x128xf32>
    %44 = vector.extract_strided_slice %2 {offsets = [0, 1152], sizes = [1, 128], strides = [1, 1]} : vector<1x6144xf32> to vector<1x128xf32>
    %45 = arith.addf %41, %44 : vector<1x128xf32>
    %46 = vector.extract_strided_slice %5 {offsets = [0, 1152], sizes = [1, 128], strides = [1, 1]} : vector<1x6144xf32> to vector<1x128xf32>
    %47 = arith.addf %43, %46 : vector<1x128xf32>
    %48 = vector.extract_strided_slice %2 {offsets = [0, 1280], sizes = [1, 128], strides = [1, 1]} : vector<1x6144xf32> to vector<1x128xf32>
    %49 = arith.addf %45, %48 : vector<1x128xf32>
    %50 = vector.extract_strided_slice %5 {offsets = [0, 1280], sizes = [1, 128], strides = [1, 1]} : vector<1x6144xf32> to vector<1x128xf32>
    %51 = arith.addf %47, %50 : vector<1x128xf32>
    %52 = vector.extract_strided_slice %2 {offsets = [0, 1408], sizes = [1, 128], strides = [1, 1]} : vector<1x6144xf32> to vector<1x128xf32>
    %53 = arith.addf %49, %52 : vector<1x128xf32>
    %54 = vector.extract_strided_slice %5 {offsets = [0, 1408], sizes = [1, 128], strides = [1, 1]} : vector<1x6144xf32> to vector<1x128xf32>
    %55 = arith.addf %51, %54 : vector<1x128xf32>
    %56 = vector.extract_strided_slice %2 {offsets = [0, 1536], sizes = [1, 128], strides = [1, 1]} : vector<1x6144xf32> to vector<1x128xf32>
    %57 = arith.addf %53, %56 : vector<1x128xf32>
    %58 = vector.extract_strided_slice %5 {offsets = [0, 1536], sizes = [1, 128], strides = [1, 1]} : vector<1x6144xf32> to vector<1x128xf32>
    %59 = arith.addf %55, %58 : vector<1x128xf32>
    %60 = vector.extract_strided_slice %2 {offsets = [0, 1664], sizes = [1, 128], strides = [1, 1]} : vector<1x6144xf32> to vector<1x128xf32>
    %61 = arith.addf %57, %60 : vector<1x128xf32>
    %62 = vector.extract_strided_slice %5 {offsets = [0, 1664], sizes = [1, 128], strides = [1, 1]} : vector<1x6144xf32> to vector<1x128xf32>
    %63 = arith.addf %59, %62 : vector<1x128xf32>
    %64 = vector.extract_strided_slice %2 {offsets = [0, 1792], sizes = [1, 128], strides = [1, 1]} : vector<1x6144xf32> to vector<1x128xf32>
    %65 = arith.addf %61, %64 : vector<1x128xf32>
    %66 = vector.extract_strided_slice %5 {offsets = [0, 1792], sizes = [1, 128], strides = [1, 1]} : vector<1x6144xf32> to vector<1x128xf32>
    %67 = arith.addf %63, %66 : vector<1x128xf32>
    %68 = vector.extract_strided_slice %2 {offsets = [0, 1920], sizes = [1, 128], strides = [1, 1]} : vector<1x6144xf32> to vector<1x128xf32>
    %69 = arith.addf %65, %68 : vector<1x128xf32>
    %70 = vector.extract_strided_slice %5 {offsets = [0, 1920], sizes = [1, 128], strides = [1, 1]} : vector<1x6144xf32> to vector<1x128xf32>
    %71 = arith.addf %67, %70 : vector<1x128xf32>
    %72 = vector.extract_strided_slice %2 {offsets = [0, 2048], sizes = [1, 128], strides = [1, 1]} : vector<1x6144xf32> to vector<1x128xf32>
    %73 = arith.addf %69, %72 : vector<1x128xf32>
    %74 = vector.extract_strided_slice %5 {offsets = [0, 2048], sizes = [1, 128], strides = [1, 1]} : vector<1x6144xf32> to vector<1x128xf32>
    %75 = arith.addf %71, %74 : vector<1x128xf32>
    %76 = vector.extract_strided_slice %2 {offsets = [0, 2176], sizes = [1, 128], strides = [1, 1]} : vector<1x6144xf32> to vector<1x128xf32>
    %77 = arith.addf %73, %76 : vector<1x128xf32>
    %78 = vector.extract_strided_slice %5 {offsets = [0, 2176], sizes = [1, 128], strides = [1, 1]} : vector<1x6144xf32> to vector<1x128xf32>
    %79 = arith.addf %75, %78 : vector<1x128xf32>
    %80 = vector.extract_strided_slice %2 {offsets = [0, 2304], sizes = [1, 128], strides = [1, 1]} : vector<1x6144xf32> to vector<1x128xf32>
    %81 = arith.addf %77, %80 : vector<1x128xf32>
    %82 = vector.extract_strided_slice %5 {offsets = [0, 2304], sizes = [1, 128], strides = [1, 1]} : vector<1x6144xf32> to vector<1x128xf32>
    %83 = arith.addf %79, %82 : vector<1x128xf32>
    %84 = vector.extract_strided_slice %2 {offsets = [0, 2432], sizes = [1, 128], strides = [1, 1]} : vector<1x6144xf32> to vector<1x128xf32>
    %85 = arith.addf %81, %84 : vector<1x128xf32>
    %86 = vector.extract_strided_slice %5 {offsets = [0, 2432], sizes = [1, 128], strides = [1, 1]} : vector<1x6144xf32> to vector<1x128xf32>
    %87 = arith.addf %83, %86 : vector<1x128xf32>
    %88 = vector.extract_strided_slice %2 {offsets = [0, 2560], sizes = [1, 128], strides = [1, 1]} : vector<1x6144xf32> to vector<1x128xf32>
    %89 = arith.addf %85, %88 : vector<1x128xf32>
    %90 = vector.extract_strided_slice %5 {offsets = [0, 2560], sizes = [1, 128], strides = [1, 1]} : vector<1x6144xf32> to vector<1x128xf32>
    %91 = arith.addf %87, %90 : vector<1x128xf32>
    %92 = vector.extract_strided_slice %2 {offsets = [0, 2688], sizes = [1, 128], strides = [1, 1]} : vector<1x6144xf32> to vector<1x128xf32>
    %93 = arith.addf %89, %92 : vector<1x128xf32>
    %94 = vector.extract_strided_slice %5 {offsets = [0, 2688], sizes = [1, 128], strides = [1, 1]} : vector<1x6144xf32> to vector<1x128xf32>
    %95 = arith.addf %91, %94 : vector<1x128xf32>
    %96 = vector.extract_strided_slice %2 {offsets = [0, 2816], sizes = [1, 128], strides = [1, 1]} : vector<1x6144xf32> to vector<1x128xf32>
    %97 = arith.addf %93, %96 : vector<1x128xf32>
    %98 = vector.extract_strided_slice %5 {offsets = [0, 2816], sizes = [1, 128], strides = [1, 1]} : vector<1x6144xf32> to vector<1x128xf32>
    %99 = arith.addf %95, %98 : vector<1x128xf32>
    %100 = vector.extract_strided_slice %2 {offsets = [0, 2944], sizes = [1, 128], strides = [1, 1]} : vector<1x6144xf32> to vector<1x128xf32>
    %101 = arith.addf %97, %100 : vector<1x128xf32>
    %102 = vector.extract_strided_slice %5 {offsets = [0, 2944], sizes = [1, 128], strides = [1, 1]} : vector<1x6144xf32> to vector<1x128xf32>
    %103 = arith.addf %99, %102 : vector<1x128xf32>
    %104 = vector.extract_strided_slice %2 {offsets = [0, 3072], sizes = [1, 128], strides = [1, 1]} : vector<1x6144xf32> to vector<1x128xf32>
    %105 = arith.addf %101, %104 : vector<1x128xf32>
    %106 = vector.extract_strided_slice %5 {offsets = [0, 3072], sizes = [1, 128], strides = [1, 1]} : vector<1x6144xf32> to vector<1x128xf32>
    %107 = arith.addf %103, %106 : vector<1x128xf32>
    %108 = vector.extract_strided_slice %2 {offsets = [0, 3200], sizes = [1, 128], strides = [1, 1]} : vector<1x6144xf32> to vector<1x128xf32>
    %109 = arith.addf %105, %108 : vector<1x128xf32>
    %110 = vector.extract_strided_slice %5 {offsets = [0, 3200], sizes = [1, 128], strides = [1, 1]} : vector<1x6144xf32> to vector<1x128xf32>
    %111 = arith.addf %107, %110 : vector<1x128xf32>
    %112 = vector.extract_strided_slice %2 {offsets = [0, 3328], sizes = [1, 128], strides = [1, 1]} : vector<1x6144xf32> to vector<1x128xf32>
    %113 = arith.addf %109, %112 : vector<1x128xf32>
    %114 = vector.extract_strided_slice %5 {offsets = [0, 3328], sizes = [1, 128], strides = [1, 1]} : vector<1x6144xf32> to vector<1x128xf32>
    %115 = arith.addf %111, %114 : vector<1x128xf32>
    %116 = vector.extract_strided_slice %2 {offsets = [0, 3456], sizes = [1, 128], strides = [1, 1]} : vector<1x6144xf32> to vector<1x128xf32>
    %117 = arith.addf %113, %116 : vector<1x128xf32>
    %118 = vector.extract_strided_slice %5 {offsets = [0, 3456], sizes = [1, 128], strides = [1, 1]} : vector<1x6144xf32> to vector<1x128xf32>
    %119 = arith.addf %115, %118 : vector<1x128xf32>
    %120 = vector.extract_strided_slice %2 {offsets = [0, 3584], sizes = [1, 128], strides = [1, 1]} : vector<1x6144xf32> to vector<1x128xf32>
    %121 = arith.addf %117, %120 : vector<1x128xf32>
    %122 = vector.extract_strided_slice %5 {offsets = [0, 3584], sizes = [1, 128], strides = [1, 1]} : vector<1x6144xf32> to vector<1x128xf32>
    %123 = arith.addf %119, %122 : vector<1x128xf32>
    %124 = vector.extract_strided_slice %2 {offsets = [0, 3712], sizes = [1, 128], strides = [1, 1]} : vector<1x6144xf32> to vector<1x128xf32>
    %125 = arith.addf %121, %124 : vector<1x128xf32>
    %126 = vector.extract_strided_slice %5 {offsets = [0, 3712], sizes = [1, 128], strides = [1, 1]} : vector<1x6144xf32> to vector<1x128xf32>
    %127 = arith.addf %123, %126 : vector<1x128xf32>
    %128 = vector.extract_strided_slice %2 {offsets = [0, 3840], sizes = [1, 128], strides = [1, 1]} : vector<1x6144xf32> to vector<1x128xf32>
    %129 = arith.addf %125, %128 : vector<1x128xf32>
    %130 = vector.extract_strided_slice %5 {offsets = [0, 3840], sizes = [1, 128], strides = [1, 1]} : vector<1x6144xf32> to vector<1x128xf32>
    %131 = arith.addf %127, %130 : vector<1x128xf32>
    %132 = vector.extract_strided_slice %2 {offsets = [0, 3968], sizes = [1, 128], strides = [1, 1]} : vector<1x6144xf32> to vector<1x128xf32>
    %133 = arith.addf %129, %132 : vector<1x128xf32>
    %134 = vector.extract_strided_slice %5 {offsets = [0, 3968], sizes = [1, 128], strides = [1, 1]} : vector<1x6144xf32> to vector<1x128xf32>
    %135 = arith.addf %131, %134 : vector<1x128xf32>
    %136 = vector.extract_strided_slice %2 {offsets = [0, 4096], sizes = [1, 128], strides = [1, 1]} : vector<1x6144xf32> to vector<1x128xf32>
    %137 = arith.addf %133, %136 : vector<1x128xf32>
    %138 = vector.extract_strided_slice %5 {offsets = [0, 4096], sizes = [1, 128], strides = [1, 1]} : vector<1x6144xf32> to vector<1x128xf32>
    %139 = arith.addf %135, %138 : vector<1x128xf32>
    %140 = vector.extract_strided_slice %2 {offsets = [0, 4224], sizes = [1, 128], strides = [1, 1]} : vector<1x6144xf32> to vector<1x128xf32>
    %141 = arith.addf %137, %140 : vector<1x128xf32>
    %142 = vector.extract_strided_slice %5 {offsets = [0, 4224], sizes = [1, 128], strides = [1, 1]} : vector<1x6144xf32> to vector<1x128xf32>
    %143 = arith.addf %139, %142 : vector<1x128xf32>
    %144 = vector.extract_strided_slice %2 {offsets = [0, 4352], sizes = [1, 128], strides = [1, 1]} : vector<1x6144xf32> to vector<1x128xf32>
    %145 = arith.addf %141, %144 : vector<1x128xf32>
    %146 = vector.extract_strided_slice %5 {offsets = [0, 4352], sizes = [1, 128], strides = [1, 1]} : vector<1x6144xf32> to vector<1x128xf32>
    %147 = arith.addf %143, %146 : vector<1x128xf32>
    %148 = vector.extract_strided_slice %2 {offsets = [0, 4480], sizes = [1, 128], strides = [1, 1]} : vector<1x6144xf32> to vector<1x128xf32>
    %149 = arith.addf %145, %148 : vector<1x128xf32>
    %150 = vector.extract_strided_slice %5 {offsets = [0, 4480], sizes = [1, 128], strides = [1, 1]} : vector<1x6144xf32> to vector<1x128xf32>
    %151 = arith.addf %147, %150 : vector<1x128xf32>
    %152 = vector.extract_strided_slice %2 {offsets = [0, 4608], sizes = [1, 128], strides = [1, 1]} : vector<1x6144xf32> to vector<1x128xf32>
    %153 = arith.addf %149, %152 : vector<1x128xf32>
    %154 = vector.extract_strided_slice %5 {offsets = [0, 4608], sizes = [1, 128], strides = [1, 1]} : vector<1x6144xf32> to vector<1x128xf32>
    %155 = arith.addf %151, %154 : vector<1x128xf32>
    %156 = vector.extract_strided_slice %2 {offsets = [0, 4736], sizes = [1, 128], strides = [1, 1]} : vector<1x6144xf32> to vector<1x128xf32>
    %157 = arith.addf %153, %156 : vector<1x128xf32>
    %158 = vector.extract_strided_slice %5 {offsets = [0, 4736], sizes = [1, 128], strides = [1, 1]} : vector<1x6144xf32> to vector<1x128xf32>
    %159 = arith.addf %155, %158 : vector<1x128xf32>
    %160 = vector.extract_strided_slice %2 {offsets = [0, 4864], sizes = [1, 128], strides = [1, 1]} : vector<1x6144xf32> to vector<1x128xf32>
    %161 = arith.addf %157, %160 : vector<1x128xf32>
    %162 = vector.extract_strided_slice %5 {offsets = [0, 4864], sizes = [1, 128], strides = [1, 1]} : vector<1x6144xf32> to vector<1x128xf32>
    %163 = arith.addf %159, %162 : vector<1x128xf32>
    %164 = vector.extract_strided_slice %2 {offsets = [0, 4992], sizes = [1, 128], strides = [1, 1]} : vector<1x6144xf32> to vector<1x128xf32>
    %165 = arith.addf %161, %164 : vector<1x128xf32>
    %166 = vector.extract_strided_slice %5 {offsets = [0, 4992], sizes = [1, 128], strides = [1, 1]} : vector<1x6144xf32> to vector<1x128xf32>
    %167 = arith.addf %163, %166 : vector<1x128xf32>
    %168 = vector.extract_strided_slice %2 {offsets = [0, 5120], sizes = [1, 128], strides = [1, 1]} : vector<1x6144xf32> to vector<1x128xf32>
    %169 = arith.addf %165, %168 : vector<1x128xf32>
    %170 = vector.extract_strided_slice %5 {offsets = [0, 5120], sizes = [1, 128], strides = [1, 1]} : vector<1x6144xf32> to vector<1x128xf32>
    %171 = arith.addf %167, %170 : vector<1x128xf32>
    %172 = vector.extract_strided_slice %2 {offsets = [0, 5248], sizes = [1, 128], strides = [1, 1]} : vector<1x6144xf32> to vector<1x128xf32>
    %173 = arith.addf %169, %172 : vector<1x128xf32>
    %174 = vector.extract_strided_slice %5 {offsets = [0, 5248], sizes = [1, 128], strides = [1, 1]} : vector<1x6144xf32> to vector<1x128xf32>
    %175 = arith.addf %171, %174 : vector<1x128xf32>
    %176 = vector.extract_strided_slice %2 {offsets = [0, 5376], sizes = [1, 128], strides = [1, 1]} : vector<1x6144xf32> to vector<1x128xf32>
    %177 = arith.addf %173, %176 : vector<1x128xf32>
    %178 = vector.extract_strided_slice %5 {offsets = [0, 5376], sizes = [1, 128], strides = [1, 1]} : vector<1x6144xf32> to vector<1x128xf32>
    %179 = arith.addf %175, %178 : vector<1x128xf32>
    %180 = vector.extract_strided_slice %2 {offsets = [0, 5504], sizes = [1, 128], strides = [1, 1]} : vector<1x6144xf32> to vector<1x128xf32>
    %181 = arith.addf %177, %180 : vector<1x128xf32>
    %182 = vector.extract_strided_slice %5 {offsets = [0, 5504], sizes = [1, 128], strides = [1, 1]} : vector<1x6144xf32> to vector<1x128xf32>
    %183 = arith.addf %179, %182 : vector<1x128xf32>
    %184 = vector.extract_strided_slice %2 {offsets = [0, 5632], sizes = [1, 128], strides = [1, 1]} : vector<1x6144xf32> to vector<1x128xf32>
    %185 = arith.addf %181, %184 : vector<1x128xf32>
    %186 = vector.extract_strided_slice %5 {offsets = [0, 5632], sizes = [1, 128], strides = [1, 1]} : vector<1x6144xf32> to vector<1x128xf32>
    %187 = arith.addf %183, %186 : vector<1x128xf32>
    %188 = vector.extract_strided_slice %2 {offsets = [0, 5760], sizes = [1, 128], strides = [1, 1]} : vector<1x6144xf32> to vector<1x128xf32>
    %189 = arith.addf %185, %188 : vector<1x128xf32>
    %190 = vector.extract_strided_slice %5 {offsets = [0, 5760], sizes = [1, 128], strides = [1, 1]} : vector<1x6144xf32> to vector<1x128xf32>
    %191 = arith.addf %187, %190 : vector<1x128xf32>
    %192 = vector.extract_strided_slice %2 {offsets = [0, 5888], sizes = [1, 128], strides = [1, 1]} : vector<1x6144xf32> to vector<1x128xf32>
    %193 = arith.addf %189, %192 : vector<1x128xf32>
    %194 = vector.extract_strided_slice %5 {offsets = [0, 5888], sizes = [1, 128], strides = [1, 1]} : vector<1x6144xf32> to vector<1x128xf32>
    %195 = arith.addf %191, %194 : vector<1x128xf32>
    %196 = vector.extract_strided_slice %2 {offsets = [0, 6016], sizes = [1, 128], strides = [1, 1]} : vector<1x6144xf32> to vector<1x128xf32>
    %197 = arith.addf %193, %196 : vector<1x128xf32>
    %198 = vector.extract_strided_slice %5 {offsets = [0, 6016], sizes = [1, 128], strides = [1, 1]} : vector<1x6144xf32> to vector<1x128xf32>
    %199 = arith.addf %195, %198 : vector<1x128xf32>
    %cst_4 = arith.constant 8.68055562E-4 : f32
    %200 = vector.broadcast %cst_4 : f32 to vector<1x128xf32>
    %201 = arith.mulf %197, %200 : vector<1x128xf32>
    %cst_5 = arith.constant 8.68055562E-4 : f32
    %202 = vector.broadcast %cst_5 : f32 to vector<1x128xf32>
    %203 = arith.mulf %199, %202 : vector<1x128xf32>
    %204 = arith.mulf %201, %201 : vector<1x128xf32>
    %205 = arith.subf %203, %204 : vector<1x128xf32>
    %c0_6 = arith.constant 0 : index
    %c0_7 = arith.constant 0 : index
    %206 = vector.load %arg1[%c0_6, %c0_7] : memref<1x128xf32, #tpu.memory_space<vmem>>, vector<1x128xf32>
    %cst_8 = arith.constant 9.99999974E-6 : f32
    %207 = vector.broadcast %cst_8 : f32 to vector<1x128xf32>
    %208 = arith.addf %205, %207 : vector<1x128xf32>
    %209 = math.rsqrt %208 : vector<1x128xf32>
    %210 = arith.mulf %206, %209 : vector<1x128xf32>
    %c0_9 = arith.constant 0 : index
    %c0_10 = arith.constant 0 : index
    %211 = vector.load %arg2[%c0_9, %c0_10] : memref<1x128xf32, #tpu.memory_space<vmem>>, vector<1x128xf32>
    %212 = arith.mulf %201, %210 : vector<1x128xf32>
    %213 = arith.subf %211, %212 : vector<1x128xf32>
    %214 = vector.extract_strided_slice %0 {offsets = [0, 0], sizes = [24, 128], strides = [1, 1]} : vector<24x6144xf32> to vector<24x128xf32>
    %215 = vector.broadcast %210 : vector<1x128xf32> to vector<24x128xf32>
    %216 = arith.mulf %214, %215 : vector<24x128xf32>
    %217 = vector.broadcast %213 : vector<1x128xf32> to vector<24x128xf32>
    %218 = arith.addf %216, %217 : vector<24x128xf32>
    %cst_11 = arith.constant 0.000000e+00 : f32
    %219 = vector.broadcast %cst_11 : f32 to vector<24x128xf32>
    %220 = arith.maximumf %218, %219 : vector<24x128xf32>
    %221 = vector.extract_strided_slice %0 {offsets = [0, 128], sizes = [24, 128], strides = [1, 1]} : vector<24x6144xf32> to vector<24x128xf32>
    %222 = vector.broadcast %210 : vector<1x128xf32> to vector<24x128xf32>
    %223 = arith.mulf %221, %222 : vector<24x128xf32>
    %224 = vector.broadcast %213 : vector<1x128xf32> to vector<24x128xf32>
    %225 = arith.addf %223, %224 : vector<24x128xf32>
    %cst_12 = arith.constant 0.000000e+00 : f32
    %226 = vector.broadcast %cst_12 : f32 to vector<24x128xf32>
    %227 = arith.maximumf %225, %226 : vector<24x128xf32>
    %228 = vector.extract_strided_slice %0 {offsets = [0, 3072], sizes = [24, 128], strides = [1, 1]} : vector<24x6144xf32> to vector<24x128xf32>
    %229 = vector.broadcast %210 : vector<1x128xf32> to vector<24x128xf32>
    %230 = arith.mulf %228, %229 : vector<24x128xf32>
    %231 = vector.broadcast %213 : vector<1x128xf32> to vector<24x128xf32>
    %232 = arith.addf %230, %231 : vector<24x128xf32>
    %cst_13 = arith.constant 0.000000e+00 : f32
    %233 = vector.broadcast %cst_13 : f32 to vector<24x128xf32>
    %234 = arith.maximumf %232, %233 : vector<24x128xf32>
    %235 = vector.extract_strided_slice %0 {offsets = [0, 3200], sizes = [24, 128], strides = [1, 1]} : vector<24x6144xf32> to vector<24x128xf32>
    %236 = vector.broadcast %210 : vector<1x128xf32> to vector<24x128xf32>
    %237 = arith.mulf %235, %236 : vector<24x128xf32>
    %238 = vector.broadcast %213 : vector<1x128xf32> to vector<24x128xf32>
    %239 = arith.addf %237, %238 : vector<24x128xf32>
    %cst_14 = arith.constant 0.000000e+00 : f32
    %240 = vector.broadcast %cst_14 : f32 to vector<24x128xf32>
    %241 = arith.maximumf %239, %240 : vector<24x128xf32>
    %242 = arith.maximumf %220, %227 : vector<24x128xf32>
    %243 = arith.maximumf %234, %241 : vector<24x128xf32>
    %244 = arith.maximumf %242, %243 : vector<24x128xf32>
    %245 = arith.truncf %244 : vector<24x128xf32> to vector<24x128xbf16>
    %c0_15 = arith.constant 0 : index
    %c0_16 = arith.constant 0 : index
    %246 = vector.load %arg3[%c0_15, %c0_16] : memref<24x1536xbf16, #tpu.memory_space<vmem>>, vector<24x128xbf16>
    tpu.vector_store %arg3[%c0_15, %c0_16], %245 {strides = array<i32>} : memref<24x1536xbf16, #tpu.memory_space<vmem>>, vector<24x128xbf16>,
    %247 = vector.extract_strided_slice %0 {offsets = [0, 256], sizes = [24, 128], strides = [1, 1]} : vector<24x6144xf32> to vector<24x128xf32>
    %248 = vector.broadcast %210 : vector<1x128xf32> to vector<24x128xf32>
    %249 = arith.mulf %247, %248 : vector<24x128xf32>
    %250 = vector.broadcast %213 : vector<1x128xf32> to vector<24x128xf32>
    %251 = arith.addf %249, %250 : vector<24x128xf32>
    %cst_17 = arith.constant 0.000000e+00 : f32
    %252 = vector.broadcast %cst_17 : f32 to vector<24x128xf32>
    %253 = arith.maximumf %251, %252 : vector<24x128xf32>
    %254 = vector.extract_strided_slice %0 {offsets = [0, 384], sizes = [24, 128], strides = [1, 1]} : vector<24x6144xf32> to vector<24x128xf32>
    %255 = vector.broadcast %210 : vector<1x128xf32> to vector<24x128xf32>
    %256 = arith.mulf %254, %255 : vector<24x128xf32>
    %257 = vector.broadcast %213 : vector<1x128xf32> to vector<24x128xf32>
    %258 = arith.addf %256, %257 : vector<24x128xf32>
    %cst_18 = arith.constant 0.000000e+00 : f32
    %259 = vector.broadcast %cst_18 : f32 to vector<24x128xf32>
    %260 = arith.maximumf %258, %259 : vector<24x128xf32>
    %261 = vector.extract_strided_slice %0 {offsets = [0, 3328], sizes = [24, 128], strides = [1, 1]} : vector<24x6144xf32> to vector<24x128xf32>
    %262 = vector.broadcast %210 : vector<1x128xf32> to vector<24x128xf32>
    %263 = arith.mulf %261, %262 : vector<24x128xf32>
    %264 = vector.broadcast %213 : vector<1x128xf32> to vector<24x128xf32>
    %265 = arith.addf %263, %264 : vector<24x128xf32>
    %cst_19 = arith.constant 0.000000e+00 : f32
    %266 = vector.broadcast %cst_19 : f32 to vector<24x128xf32>
    %267 = arith.maximumf %265, %266 : vector<24x128xf32>
    %268 = vector.extract_strided_slice %0 {offsets = [0, 3456], sizes = [24, 128], strides = [1, 1]} : vector<24x6144xf32> to vector<24x128xf32>
    %269 = vector.broadcast %210 : vector<1x128xf32> to vector<24x128xf32>
    %270 = arith.mulf %268, %269 : vector<24x128xf32>
    %271 = vector.broadcast %213 : vector<1x128xf32> to vector<24x128xf32>
    %272 = arith.addf %270, %271 : vector<24x128xf32>
    %cst_20 = arith.constant 0.000000e+00 : f32
    %273 = vector.broadcast %cst_20 : f32 to vector<24x128xf32>
    %274 = arith.maximumf %272, %273 : vector<24x128xf32>
    %275 = arith.maximumf %253, %260 : vector<24x128xf32>
    %276 = arith.maximumf %267, %274 : vector<24x128xf32>
    %277 = arith.maximumf %275, %276 : vector<24x128xf32>
    %278 = arith.truncf %277 : vector<24x128xf32> to vector<24x128xbf16>
    %c0_21 = arith.constant 0 : index
    %c128 = arith.constant 128 : index
    %279 = vector.load %arg3[%c0_21, %c128] : memref<24x1536xbf16, #tpu.memory_space<vmem>>, vector<24x128xbf16>
    tpu.vector_store %arg3[%c0_21, %c128], %278 {strides = array<i32>} : memref<24x1536xbf16, #tpu.memory_space<vmem>>, vector<24x128xbf16>,
    %280 = vector.extract_strided_slice %0 {offsets = [0, 512], sizes = [24, 128], strides = [1, 1]} : vector<24x6144xf32> to vector<24x128xf32>
    %281 = vector.broadcast %210 : vector<1x128xf32> to vector<24x128xf32>
    %282 = arith.mulf %280, %281 : vector<24x128xf32>
    %283 = vector.broadcast %213 : vector<1x128xf32> to vector<24x128xf32>
    %284 = arith.addf %282, %283 : vector<24x128xf32>
    %cst_22 = arith.constant 0.000000e+00 : f32
    %285 = vector.broadcast %cst_22 : f32 to vector<24x128xf32>
    %286 = arith.maximumf %284, %285 : vector<24x128xf32>
    %287 = vector.extract_strided_slice %0 {offsets = [0, 640], sizes = [24, 128], strides = [1, 1]} : vector<24x6144xf32> to vector<24x128xf32>
    %288 = vector.broadcast %210 : vector<1x128xf32> to vector<24x128xf32>
    %289 = arith.mulf %287, %288 : vector<24x128xf32>
    %290 = vector.broadcast %213 : vector<1x128xf32> to vector<24x128xf32>
    %291 = arith.addf %289, %290 : vector<24x128xf32>
    %cst_23 = arith.constant 0.000000e+00 : f32
    %292 = vector.broadcast %cst_23 : f32 to vector<24x128xf32>
    %293 = arith.maximumf %291, %292 : vector<24x128xf32>
    %294 = vector.extract_strided_slice %0 {offsets = [0, 3584], sizes = [24, 128], strides = [1, 1]} : vector<24x6144xf32> to vector<24x128xf32>
    %295 = vector.broadcast %210 : vector<1x128xf32> to vector<24x128xf32>
    %296 = arith.mulf %294, %295 : vector<24x128xf32>
    %297 = vector.broadcast %213 : vector<1x128xf32> to vector<24x128xf32>
    %298 = arith.addf %296, %297 : vector<24x128xf32>
    %cst_24 = arith.constant 0.000000e+00 : f32
    %299 = vector.broadcast %cst_24 : f32 to vector<24x128xf32>
    %300 = arith.maximumf %298, %299 : vector<24x128xf32>
    %301 = vector.extract_strided_slice %0 {offsets = [0, 3712], sizes = [24, 128], strides = [1, 1]} : vector<24x6144xf32> to vector<24x128xf32>
    %302 = vector.broadcast %210 : vector<1x128xf32> to vector<24x128xf32>
    %303 = arith.mulf %301, %302 : vector<24x128xf32>
    %304 = vector.broadcast %213 : vector<1x128xf32> to vector<24x128xf32>
    %305 = arith.addf %303, %304 : vector<24x128xf32>
    %cst_25 = arith.constant 0.000000e+00 : f32
    %306 = vector.broadcast %cst_25 : f32 to vector<24x128xf32>
    %307 = arith.maximumf %305, %306 : vector<24x128xf32>
    %308 = arith.maximumf %286, %293 : vector<24x128xf32>
    %309 = arith.maximumf %300, %307 : vector<24x128xf32>
    %310 = arith.maximumf %308, %309 : vector<24x128xf32>
    %311 = arith.truncf %310 : vector<24x128xf32> to vector<24x128xbf16>
    %c0_26 = arith.constant 0 : index
    %c256 = arith.constant 256 : index
    %312 = vector.load %arg3[%c0_26, %c256] : memref<24x1536xbf16, #tpu.memory_space<vmem>>, vector<24x128xbf16>
    tpu.vector_store %arg3[%c0_26, %c256], %311 {strides = array<i32>} : memref<24x1536xbf16, #tpu.memory_space<vmem>>, vector<24x128xbf16>,
    %313 = vector.extract_strided_slice %0 {offsets = [0, 768], sizes = [24, 128], strides = [1, 1]} : vector<24x6144xf32> to vector<24x128xf32>
    %314 = vector.broadcast %210 : vector<1x128xf32> to vector<24x128xf32>
    %315 = arith.mulf %313, %314 : vector<24x128xf32>
    %316 = vector.broadcast %213 : vector<1x128xf32> to vector<24x128xf32>
    %317 = arith.addf %315, %316 : vector<24x128xf32>
    %cst_27 = arith.constant 0.000000e+00 : f32
    %318 = vector.broadcast %cst_27 : f32 to vector<24x128xf32>
    %319 = arith.maximumf %317, %318 : vector<24x128xf32>
    %320 = vector.extract_strided_slice %0 {offsets = [0, 896], sizes = [24, 128], strides = [1, 1]} : vector<24x6144xf32> to vector<24x128xf32>
    %321 = vector.broadcast %210 : vector<1x128xf32> to vector<24x128xf32>
    %322 = arith.mulf %320, %321 : vector<24x128xf32>
    %323 = vector.broadcast %213 : vector<1x128xf32> to vector<24x128xf32>
    %324 = arith.addf %322, %323 : vector<24x128xf32>
    %cst_28 = arith.constant 0.000000e+00 : f32
    %325 = vector.broadcast %cst_28 : f32 to vector<24x128xf32>
    %326 = arith.maximumf %324, %325 : vector<24x128xf32>
    %327 = vector.extract_strided_slice %0 {offsets = [0, 3840], sizes = [24, 128], strides = [1, 1]} : vector<24x6144xf32> to vector<24x128xf32>
    %328 = vector.broadcast %210 : vector<1x128xf32> to vector<24x128xf32>
    %329 = arith.mulf %327, %328 : vector<24x128xf32>
    %330 = vector.broadcast %213 : vector<1x128xf32> to vector<24x128xf32>
    %331 = arith.addf %329, %330 : vector<24x128xf32>
    %cst_29 = arith.constant 0.000000e+00 : f32
    %332 = vector.broadcast %cst_29 : f32 to vector<24x128xf32>
    %333 = arith.maximumf %331, %332 : vector<24x128xf32>
    %334 = vector.extract_strided_slice %0 {offsets = [0, 3968], sizes = [24, 128], strides = [1, 1]} : vector<24x6144xf32> to vector<24x128xf32>
    %335 = vector.broadcast %210 : vector<1x128xf32> to vector<24x128xf32>
    %336 = arith.mulf %334, %335 : vector<24x128xf32>
    %337 = vector.broadcast %213 : vector<1x128xf32> to vector<24x128xf32>
    %338 = arith.addf %336, %337 : vector<24x128xf32>
    %cst_30 = arith.constant 0.000000e+00 : f32
    %339 = vector.broadcast %cst_30 : f32 to vector<24x128xf32>
    %340 = arith.maximumf %338, %339 : vector<24x128xf32>
    %341 = arith.maximumf %319, %326 : vector<24x128xf32>
    %342 = arith.maximumf %333, %340 : vector<24x128xf32>
    %343 = arith.maximumf %341, %342 : vector<24x128xf32>
    %344 = arith.truncf %343 : vector<24x128xf32> to vector<24x128xbf16>
    %c0_31 = arith.constant 0 : index
    %c384 = arith.constant 384 : index
    %345 = vector.load %arg3[%c0_31, %c384] : memref<24x1536xbf16, #tpu.memory_space<vmem>>, vector<24x128xbf16>
    tpu.vector_store %arg3[%c0_31, %c384], %344 {strides = array<i32>} : memref<24x1536xbf16, #tpu.memory_space<vmem>>, vector<24x128xbf16>,
    %346 = vector.extract_strided_slice %0 {offsets = [0, 1024], sizes = [24, 128], strides = [1, 1]} : vector<24x6144xf32> to vector<24x128xf32>
    %347 = vector.broadcast %210 : vector<1x128xf32> to vector<24x128xf32>
    %348 = arith.mulf %346, %347 : vector<24x128xf32>
    %349 = vector.broadcast %213 : vector<1x128xf32> to vector<24x128xf32>
    %350 = arith.addf %348, %349 : vector<24x128xf32>
    %cst_32 = arith.constant 0.000000e+00 : f32
    %351 = vector.broadcast %cst_32 : f32 to vector<24x128xf32>
    %352 = arith.maximumf %350, %351 : vector<24x128xf32>
    %353 = vector.extract_strided_slice %0 {offsets = [0, 1152], sizes = [24, 128], strides = [1, 1]} : vector<24x6144xf32> to vector<24x128xf32>
    %354 = vector.broadcast %210 : vector<1x128xf32> to vector<24x128xf32>
    %355 = arith.mulf %353, %354 : vector<24x128xf32>
    %356 = vector.broadcast %213 : vector<1x128xf32> to vector<24x128xf32>
    %357 = arith.addf %355, %356 : vector<24x128xf32>
    %cst_33 = arith.constant 0.000000e+00 : f32
    %358 = vector.broadcast %cst_33 : f32 to vector<24x128xf32>
    %359 = arith.maximumf %357, %358 : vector<24x128xf32>
    %360 = vector.extract_strided_slice %0 {offsets = [0, 4096], sizes = [24, 128], strides = [1, 1]} : vector<24x6144xf32> to vector<24x128xf32>
    %361 = vector.broadcast %210 : vector<1x128xf32> to vector<24x128xf32>
    %362 = arith.mulf %360, %361 : vector<24x128xf32>
    %363 = vector.broadcast %213 : vector<1x128xf32> to vector<24x128xf32>
    %364 = arith.addf %362, %363 : vector<24x128xf32>
    %cst_34 = arith.constant 0.000000e+00 : f32
    %365 = vector.broadcast %cst_34 : f32 to vector<24x128xf32>
    %366 = arith.maximumf %364, %365 : vector<24x128xf32>
    %367 = vector.extract_strided_slice %0 {offsets = [0, 4224], sizes = [24, 128], strides = [1, 1]} : vector<24x6144xf32> to vector<24x128xf32>
    %368 = vector.broadcast %210 : vector<1x128xf32> to vector<24x128xf32>
    %369 = arith.mulf %367, %368 : vector<24x128xf32>
    %370 = vector.broadcast %213 : vector<1x128xf32> to vector<24x128xf32>
    %371 = arith.addf %369, %370 : vector<24x128xf32>
    %cst_35 = arith.constant 0.000000e+00 : f32
    %372 = vector.broadcast %cst_35 : f32 to vector<24x128xf32>
    %373 = arith.maximumf %371, %372 : vector<24x128xf32>
    %374 = arith.maximumf %352, %359 : vector<24x128xf32>
    %375 = arith.maximumf %366, %373 : vector<24x128xf32>
    %376 = arith.maximumf %374, %375 : vector<24x128xf32>
    %377 = arith.truncf %376 : vector<24x128xf32> to vector<24x128xbf16>
    %c0_36 = arith.constant 0 : index
    %c512 = arith.constant 512 : index
    %378 = vector.load %arg3[%c0_36, %c512] : memref<24x1536xbf16, #tpu.memory_space<vmem>>, vector<24x128xbf16>
    tpu.vector_store %arg3[%c0_36, %c512], %377 {strides = array<i32>} : memref<24x1536xbf16, #tpu.memory_space<vmem>>, vector<24x128xbf16>,
    %379 = vector.extract_strided_slice %0 {offsets = [0, 1280], sizes = [24, 128], strides = [1, 1]} : vector<24x6144xf32> to vector<24x128xf32>
    %380 = vector.broadcast %210 : vector<1x128xf32> to vector<24x128xf32>
    %381 = arith.mulf %379, %380 : vector<24x128xf32>
    %382 = vector.broadcast %213 : vector<1x128xf32> to vector<24x128xf32>
    %383 = arith.addf %381, %382 : vector<24x128xf32>
    %cst_37 = arith.constant 0.000000e+00 : f32
    %384 = vector.broadcast %cst_37 : f32 to vector<24x128xf32>
    %385 = arith.maximumf %383, %384 : vector<24x128xf32>
    %386 = vector.extract_strided_slice %0 {offsets = [0, 1408], sizes = [24, 128], strides = [1, 1]} : vector<24x6144xf32> to vector<24x128xf32>
    %387 = vector.broadcast %210 : vector<1x128xf32> to vector<24x128xf32>
    %388 = arith.mulf %386, %387 : vector<24x128xf32>
    %389 = vector.broadcast %213 : vector<1x128xf32> to vector<24x128xf32>
    %390 = arith.addf %388, %389 : vector<24x128xf32>
    %cst_38 = arith.constant 0.000000e+00 : f32
    %391 = vector.broadcast %cst_38 : f32 to vector<24x128xf32>
    %392 = arith.maximumf %390, %391 : vector<24x128xf32>
    %393 = vector.extract_strided_slice %0 {offsets = [0, 4352], sizes = [24, 128], strides = [1, 1]} : vector<24x6144xf32> to vector<24x128xf32>
    %394 = vector.broadcast %210 : vector<1x128xf32> to vector<24x128xf32>
    %395 = arith.mulf %393, %394 : vector<24x128xf32>
    %396 = vector.broadcast %213 : vector<1x128xf32> to vector<24x128xf32>
    %397 = arith.addf %395, %396 : vector<24x128xf32>
    %cst_39 = arith.constant 0.000000e+00 : f32
    %398 = vector.broadcast %cst_39 : f32 to vector<24x128xf32>
    %399 = arith.maximumf %397, %398 : vector<24x128xf32>
    %400 = vector.extract_strided_slice %0 {offsets = [0, 4480], sizes = [24, 128], strides = [1, 1]} : vector<24x6144xf32> to vector<24x128xf32>
    %401 = vector.broadcast %210 : vector<1x128xf32> to vector<24x128xf32>
    %402 = arith.mulf %400, %401 : vector<24x128xf32>
    %403 = vector.broadcast %213 : vector<1x128xf32> to vector<24x128xf32>
    %404 = arith.addf %402, %403 : vector<24x128xf32>
    %cst_40 = arith.constant 0.000000e+00 : f32
    %405 = vector.broadcast %cst_40 : f32 to vector<24x128xf32>
    %406 = arith.maximumf %404, %405 : vector<24x128xf32>
    %407 = arith.maximumf %385, %392 : vector<24x128xf32>
    %408 = arith.maximumf %399, %406 : vector<24x128xf32>
    %409 = arith.maximumf %407, %408 : vector<24x128xf32>
    %410 = arith.truncf %409 : vector<24x128xf32> to vector<24x128xbf16>
    %c0_41 = arith.constant 0 : index
    %c640 = arith.constant 640 : index
    %411 = vector.load %arg3[%c0_41, %c640] : memref<24x1536xbf16, #tpu.memory_space<vmem>>, vector<24x128xbf16>
    tpu.vector_store %arg3[%c0_41, %c640], %410 {strides = array<i32>} : memref<24x1536xbf16, #tpu.memory_space<vmem>>, vector<24x128xbf16>,
    %412 = vector.extract_strided_slice %0 {offsets = [0, 1536], sizes = [24, 128], strides = [1, 1]} : vector<24x6144xf32> to vector<24x128xf32>
    %413 = vector.broadcast %210 : vector<1x128xf32> to vector<24x128xf32>
    %414 = arith.mulf %412, %413 : vector<24x128xf32>
    %415 = vector.broadcast %213 : vector<1x128xf32> to vector<24x128xf32>
    %416 = arith.addf %414, %415 : vector<24x128xf32>
    %cst_42 = arith.constant 0.000000e+00 : f32
    %417 = vector.broadcast %cst_42 : f32 to vector<24x128xf32>
    %418 = arith.maximumf %416, %417 : vector<24x128xf32>
    %419 = vector.extract_strided_slice %0 {offsets = [0, 1664], sizes = [24, 128], strides = [1, 1]} : vector<24x6144xf32> to vector<24x128xf32>
    %420 = vector.broadcast %210 : vector<1x128xf32> to vector<24x128xf32>
    %421 = arith.mulf %419, %420 : vector<24x128xf32>
    %422 = vector.broadcast %213 : vector<1x128xf32> to vector<24x128xf32>
    %423 = arith.addf %421, %422 : vector<24x128xf32>
    %cst_43 = arith.constant 0.000000e+00 : f32
    %424 = vector.broadcast %cst_43 : f32 to vector<24x128xf32>
    %425 = arith.maximumf %423, %424 : vector<24x128xf32>
    %426 = vector.extract_strided_slice %0 {offsets = [0, 4608], sizes = [24, 128], strides = [1, 1]} : vector<24x6144xf32> to vector<24x128xf32>
    %427 = vector.broadcast %210 : vector<1x128xf32> to vector<24x128xf32>
    %428 = arith.mulf %426, %427 : vector<24x128xf32>
    %429 = vector.broadcast %213 : vector<1x128xf32> to vector<24x128xf32>
    %430 = arith.addf %428, %429 : vector<24x128xf32>
    %cst_44 = arith.constant 0.000000e+00 : f32
    %431 = vector.broadcast %cst_44 : f32 to vector<24x128xf32>
    %432 = arith.maximumf %430, %431 : vector<24x128xf32>
    %433 = vector.extract_strided_slice %0 {offsets = [0, 4736], sizes = [24, 128], strides = [1, 1]} : vector<24x6144xf32> to vector<24x128xf32>
    %434 = vector.broadcast %210 : vector<1x128xf32> to vector<24x128xf32>
    %435 = arith.mulf %433, %434 : vector<24x128xf32>
    %436 = vector.broadcast %213 : vector<1x128xf32> to vector<24x128xf32>
    %437 = arith.addf %435, %436 : vector<24x128xf32>
    %cst_45 = arith.constant 0.000000e+00 : f32
    %438 = vector.broadcast %cst_45 : f32 to vector<24x128xf32>
    %439 = arith.maximumf %437, %438 : vector<24x128xf32>
    %440 = arith.maximumf %418, %425 : vector<24x128xf32>
    %441 = arith.maximumf %432, %439 : vector<24x128xf32>
    %442 = arith.maximumf %440, %441 : vector<24x128xf32>
    %443 = arith.truncf %442 : vector<24x128xf32> to vector<24x128xbf16>
    %c0_46 = arith.constant 0 : index
    %c768 = arith.constant 768 : index
    %444 = vector.load %arg3[%c0_46, %c768] : memref<24x1536xbf16, #tpu.memory_space<vmem>>, vector<24x128xbf16>
    tpu.vector_store %arg3[%c0_46, %c768], %443 {strides = array<i32>} : memref<24x1536xbf16, #tpu.memory_space<vmem>>, vector<24x128xbf16>,
    %445 = vector.extract_strided_slice %0 {offsets = [0, 1792], sizes = [24, 128], strides = [1, 1]} : vector<24x6144xf32> to vector<24x128xf32>
    %446 = vector.broadcast %210 : vector<1x128xf32> to vector<24x128xf32>
    %447 = arith.mulf %445, %446 : vector<24x128xf32>
    %448 = vector.broadcast %213 : vector<1x128xf32> to vector<24x128xf32>
    %449 = arith.addf %447, %448 : vector<24x128xf32>
    %cst_47 = arith.constant 0.000000e+00 : f32
    %450 = vector.broadcast %cst_47 : f32 to vector<24x128xf32>
    %451 = arith.maximumf %449, %450 : vector<24x128xf32>
    %452 = vector.extract_strided_slice %0 {offsets = [0, 1920], sizes = [24, 128], strides = [1, 1]} : vector<24x6144xf32> to vector<24x128xf32>
    %453 = vector.broadcast %210 : vector<1x128xf32> to vector<24x128xf32>
    %454 = arith.mulf %452, %453 : vector<24x128xf32>
    %455 = vector.broadcast %213 : vector<1x128xf32> to vector<24x128xf32>
    %456 = arith.addf %454, %455 : vector<24x128xf32>
    %cst_48 = arith.constant 0.000000e+00 : f32
    %457 = vector.broadcast %cst_48 : f32 to vector<24x128xf32>
    %458 = arith.maximumf %456, %457 : vector<24x128xf32>
    %459 = vector.extract_strided_slice %0 {offsets = [0, 4864], sizes = [24, 128], strides = [1, 1]} : vector<24x6144xf32> to vector<24x128xf32>
    %460 = vector.broadcast %210 : vector<1x128xf32> to vector<24x128xf32>
    %461 = arith.mulf %459, %460 : vector<24x128xf32>
    %462 = vector.broadcast %213 : vector<1x128xf32> to vector<24x128xf32>
    %463 = arith.addf %461, %462 : vector<24x128xf32>
    %cst_49 = arith.constant 0.000000e+00 : f32
    %464 = vector.broadcast %cst_49 : f32 to vector<24x128xf32>
    %465 = arith.maximumf %463, %464 : vector<24x128xf32>
    %466 = vector.extract_strided_slice %0 {offsets = [0, 4992], sizes = [24, 128], strides = [1, 1]} : vector<24x6144xf32> to vector<24x128xf32>
    %467 = vector.broadcast %210 : vector<1x128xf32> to vector<24x128xf32>
    %468 = arith.mulf %466, %467 : vector<24x128xf32>
    %469 = vector.broadcast %213 : vector<1x128xf32> to vector<24x128xf32>
    %470 = arith.addf %468, %469 : vector<24x128xf32>
    %cst_50 = arith.constant 0.000000e+00 : f32
    %471 = vector.broadcast %cst_50 : f32 to vector<24x128xf32>
    %472 = arith.maximumf %470, %471 : vector<24x128xf32>
    %473 = arith.maximumf %451, %458 : vector<24x128xf32>
    %474 = arith.maximumf %465, %472 : vector<24x128xf32>
    %475 = arith.maximumf %473, %474 : vector<24x128xf32>
    %476 = arith.truncf %475 : vector<24x128xf32> to vector<24x128xbf16>
    %c0_51 = arith.constant 0 : index
    %c896 = arith.constant 896 : index
    %477 = vector.load %arg3[%c0_51, %c896] : memref<24x1536xbf16, #tpu.memory_space<vmem>>, vector<24x128xbf16>
    tpu.vector_store %arg3[%c0_51, %c896], %476 {strides = array<i32>} : memref<24x1536xbf16, #tpu.memory_space<vmem>>, vector<24x128xbf16>,
    %478 = vector.extract_strided_slice %0 {offsets = [0, 2048], sizes = [24, 128], strides = [1, 1]} : vector<24x6144xf32> to vector<24x128xf32>
    %479 = vector.broadcast %210 : vector<1x128xf32> to vector<24x128xf32>
    %480 = arith.mulf %478, %479 : vector<24x128xf32>
    %481 = vector.broadcast %213 : vector<1x128xf32> to vector<24x128xf32>
    %482 = arith.addf %480, %481 : vector<24x128xf32>
    %cst_52 = arith.constant 0.000000e+00 : f32
    %483 = vector.broadcast %cst_52 : f32 to vector<24x128xf32>
    %484 = arith.maximumf %482, %483 : vector<24x128xf32>
    %485 = vector.extract_strided_slice %0 {offsets = [0, 2176], sizes = [24, 128], strides = [1, 1]} : vector<24x6144xf32> to vector<24x128xf32>
    %486 = vector.broadcast %210 : vector<1x128xf32> to vector<24x128xf32>
    %487 = arith.mulf %485, %486 : vector<24x128xf32>
    %488 = vector.broadcast %213 : vector<1x128xf32> to vector<24x128xf32>
    %489 = arith.addf %487, %488 : vector<24x128xf32>
    %cst_53 = arith.constant 0.000000e+00 : f32
    %490 = vector.broadcast %cst_53 : f32 to vector<24x128xf32>
    %491 = arith.maximumf %489, %490 : vector<24x128xf32>
    %492 = vector.extract_strided_slice %0 {offsets = [0, 5120], sizes = [24, 128], strides = [1, 1]} : vector<24x6144xf32> to vector<24x128xf32>
    %493 = vector.broadcast %210 : vector<1x128xf32> to vector<24x128xf32>
    %494 = arith.mulf %492, %493 : vector<24x128xf32>
    %495 = vector.broadcast %213 : vector<1x128xf32> to vector<24x128xf32>
    %496 = arith.addf %494, %495 : vector<24x128xf32>
    %cst_54 = arith.constant 0.000000e+00 : f32
    %497 = vector.broadcast %cst_54 : f32 to vector<24x128xf32>
    %498 = arith.maximumf %496, %497 : vector<24x128xf32>
    %499 = vector.extract_strided_slice %0 {offsets = [0, 5248], sizes = [24, 128], strides = [1, 1]} : vector<24x6144xf32> to vector<24x128xf32>
    %500 = vector.broadcast %210 : vector<1x128xf32> to vector<24x128xf32>
    %501 = arith.mulf %499, %500 : vector<24x128xf32>
    %502 = vector.broadcast %213 : vector<1x128xf32> to vector<24x128xf32>
    %503 = arith.addf %501, %502 : vector<24x128xf32>
    %cst_55 = arith.constant 0.000000e+00 : f32
    %504 = vector.broadcast %cst_55 : f32 to vector<24x128xf32>
    %505 = arith.maximumf %503, %504 : vector<24x128xf32>
    %506 = arith.maximumf %484, %491 : vector<24x128xf32>
    %507 = arith.maximumf %498, %505 : vector<24x128xf32>
    %508 = arith.maximumf %506, %507 : vector<24x128xf32>
    %509 = arith.truncf %508 : vector<24x128xf32> to vector<24x128xbf16>
    %c0_56 = arith.constant 0 : index
    %c1024 = arith.constant 1024 : index
    %510 = vector.load %arg3[%c0_56, %c1024] : memref<24x1536xbf16, #tpu.memory_space<vmem>>, vector<24x128xbf16>
    tpu.vector_store %arg3[%c0_56, %c1024], %509 {strides = array<i32>} : memref<24x1536xbf16, #tpu.memory_space<vmem>>, vector<24x128xbf16>,
    %511 = vector.extract_strided_slice %0 {offsets = [0, 2304], sizes = [24, 128], strides = [1, 1]} : vector<24x6144xf32> to vector<24x128xf32>
    %512 = vector.broadcast %210 : vector<1x128xf32> to vector<24x128xf32>
    %513 = arith.mulf %511, %512 : vector<24x128xf32>
    %514 = vector.broadcast %213 : vector<1x128xf32> to vector<24x128xf32>
    %515 = arith.addf %513, %514 : vector<24x128xf32>
    %cst_57 = arith.constant 0.000000e+00 : f32
    %516 = vector.broadcast %cst_57 : f32 to vector<24x128xf32>
    %517 = arith.maximumf %515, %516 : vector<24x128xf32>
    %518 = vector.extract_strided_slice %0 {offsets = [0, 2432], sizes = [24, 128], strides = [1, 1]} : vector<24x6144xf32> to vector<24x128xf32>
    %519 = vector.broadcast %210 : vector<1x128xf32> to vector<24x128xf32>
    %520 = arith.mulf %518, %519 : vector<24x128xf32>
    %521 = vector.broadcast %213 : vector<1x128xf32> to vector<24x128xf32>
    %522 = arith.addf %520, %521 : vector<24x128xf32>
    %cst_58 = arith.constant 0.000000e+00 : f32
    %523 = vector.broadcast %cst_58 : f32 to vector<24x128xf32>
    %524 = arith.maximumf %522, %523 : vector<24x128xf32>
    %525 = vector.extract_strided_slice %0 {offsets = [0, 5376], sizes = [24, 128], strides = [1, 1]} : vector<24x6144xf32> to vector<24x128xf32>
    %526 = vector.broadcast %210 : vector<1x128xf32> to vector<24x128xf32>
    %527 = arith.mulf %525, %526 : vector<24x128xf32>
    %528 = vector.broadcast %213 : vector<1x128xf32> to vector<24x128xf32>
    %529 = arith.addf %527, %528 : vector<24x128xf32>
    %cst_59 = arith.constant 0.000000e+00 : f32
    %530 = vector.broadcast %cst_59 : f32 to vector<24x128xf32>
    %531 = arith.maximumf %529, %530 : vector<24x128xf32>
    %532 = vector.extract_strided_slice %0 {offsets = [0, 5504], sizes = [24, 128], strides = [1, 1]} : vector<24x6144xf32> to vector<24x128xf32>
    %533 = vector.broadcast %210 : vector<1x128xf32> to vector<24x128xf32>
    %534 = arith.mulf %532, %533 : vector<24x128xf32>
    %535 = vector.broadcast %213 : vector<1x128xf32> to vector<24x128xf32>
    %536 = arith.addf %534, %535 : vector<24x128xf32>
    %cst_60 = arith.constant 0.000000e+00 : f32
    %537 = vector.broadcast %cst_60 : f32 to vector<24x128xf32>
    %538 = arith.maximumf %536, %537 : vector<24x128xf32>
    %539 = arith.maximumf %517, %524 : vector<24x128xf32>
    %540 = arith.maximumf %531, %538 : vector<24x128xf32>
    %541 = arith.maximumf %539, %540 : vector<24x128xf32>
    %542 = arith.truncf %541 : vector<24x128xf32> to vector<24x128xbf16>
    %c0_61 = arith.constant 0 : index
    %c1152 = arith.constant 1152 : index
    %543 = vector.load %arg3[%c0_61, %c1152] : memref<24x1536xbf16, #tpu.memory_space<vmem>>, vector<24x128xbf16>
    tpu.vector_store %arg3[%c0_61, %c1152], %542 {strides = array<i32>} : memref<24x1536xbf16, #tpu.memory_space<vmem>>, vector<24x128xbf16>,
    %544 = vector.extract_strided_slice %0 {offsets = [0, 2560], sizes = [24, 128], strides = [1, 1]} : vector<24x6144xf32> to vector<24x128xf32>
    %545 = vector.broadcast %210 : vector<1x128xf32> to vector<24x128xf32>
    %546 = arith.mulf %544, %545 : vector<24x128xf32>
    %547 = vector.broadcast %213 : vector<1x128xf32> to vector<24x128xf32>
    %548 = arith.addf %546, %547 : vector<24x128xf32>
    %cst_62 = arith.constant 0.000000e+00 : f32
    %549 = vector.broadcast %cst_62 : f32 to vector<24x128xf32>
    %550 = arith.maximumf %548, %549 : vector<24x128xf32>
    %551 = vector.extract_strided_slice %0 {offsets = [0, 2688], sizes = [24, 128], strides = [1, 1]} : vector<24x6144xf32> to vector<24x128xf32>
    %552 = vector.broadcast %210 : vector<1x128xf32> to vector<24x128xf32>
    %553 = arith.mulf %551, %552 : vector<24x128xf32>
    %554 = vector.broadcast %213 : vector<1x128xf32> to vector<24x128xf32>
    %555 = arith.addf %553, %554 : vector<24x128xf32>
    %cst_63 = arith.constant 0.000000e+00 : f32
    %556 = vector.broadcast %cst_63 : f32 to vector<24x128xf32>
    %557 = arith.maximumf %555, %556 : vector<24x128xf32>
    %558 = vector.extract_strided_slice %0 {offsets = [0, 5632], sizes = [24, 128], strides = [1, 1]} : vector<24x6144xf32> to vector<24x128xf32>
    %559 = vector.broadcast %210 : vector<1x128xf32> to vector<24x128xf32>
    %560 = arith.mulf %558, %559 : vector<24x128xf32>
    %561 = vector.broadcast %213 : vector<1x128xf32> to vector<24x128xf32>
    %562 = arith.addf %560, %561 : vector<24x128xf32>
    %cst_64 = arith.constant 0.000000e+00 : f32
    %563 = vector.broadcast %cst_64 : f32 to vector<24x128xf32>
    %564 = arith.maximumf %562, %563 : vector<24x128xf32>
    %565 = vector.extract_strided_slice %0 {offsets = [0, 5760], sizes = [24, 128], strides = [1, 1]} : vector<24x6144xf32> to vector<24x128xf32>
    %566 = vector.broadcast %210 : vector<1x128xf32> to vector<24x128xf32>
    %567 = arith.mulf %565, %566 : vector<24x128xf32>
    %568 = vector.broadcast %213 : vector<1x128xf32> to vector<24x128xf32>
    %569 = arith.addf %567, %568 : vector<24x128xf32>
    %cst_65 = arith.constant 0.000000e+00 : f32
    %570 = vector.broadcast %cst_65 : f32 to vector<24x128xf32>
    %571 = arith.maximumf %569, %570 : vector<24x128xf32>
    %572 = arith.maximumf %550, %557 : vector<24x128xf32>
    %573 = arith.maximumf %564, %571 : vector<24x128xf32>
    %574 = arith.maximumf %572, %573 : vector<24x128xf32>
    %575 = arith.truncf %574 : vector<24x128xf32> to vector<24x128xbf16>
    %c0_66 = arith.constant 0 : index
    %c1280 = arith.constant 1280 : index
    %576 = vector.load %arg3[%c0_66, %c1280] : memref<24x1536xbf16, #tpu.memory_space<vmem>>, vector<24x128xbf16>
    tpu.vector_store %arg3[%c0_66, %c1280], %575 {strides = array<i32>} : memref<24x1536xbf16, #tpu.memory_space<vmem>>, vector<24x128xbf16>,
    %577 = vector.extract_strided_slice %0 {offsets = [0, 2816], sizes = [24, 128], strides = [1, 1]} : vector<24x6144xf32> to vector<24x128xf32>
    %578 = vector.broadcast %210 : vector<1x128xf32> to vector<24x128xf32>
    %579 = arith.mulf %577, %578 : vector<24x128xf32>
    %580 = vector.broadcast %213 : vector<1x128xf32> to vector<24x128xf32>
    %581 = arith.addf %579, %580 : vector<24x128xf32>
    %cst_67 = arith.constant 0.000000e+00 : f32
    %582 = vector.broadcast %cst_67 : f32 to vector<24x128xf32>
    %583 = arith.maximumf %581, %582 : vector<24x128xf32>
    %584 = vector.extract_strided_slice %0 {offsets = [0, 2944], sizes = [24, 128], strides = [1, 1]} : vector<24x6144xf32> to vector<24x128xf32>
    %585 = vector.broadcast %210 : vector<1x128xf32> to vector<24x128xf32>
    %586 = arith.mulf %584, %585 : vector<24x128xf32>
    %587 = vector.broadcast %213 : vector<1x128xf32> to vector<24x128xf32>
    %588 = arith.addf %586, %587 : vector<24x128xf32>
    %cst_68 = arith.constant 0.000000e+00 : f32
    %589 = vector.broadcast %cst_68 : f32 to vector<24x128xf32>
    %590 = arith.maximumf %588, %589 : vector<24x128xf32>
    %591 = vector.extract_strided_slice %0 {offsets = [0, 5888], sizes = [24, 128], strides = [1, 1]} : vector<24x6144xf32> to vector<24x128xf32>
    %592 = vector.broadcast %210 : vector<1x128xf32> to vector<24x128xf32>
    %593 = arith.mulf %591, %592 : vector<24x128xf32>
    %594 = vector.broadcast %213 : vector<1x128xf32> to vector<24x128xf32>
    %595 = arith.addf %593, %594 : vector<24x128xf32>
    %cst_69 = arith.constant 0.000000e+00 : f32
    %596 = vector.broadcast %cst_69 : f32 to vector<24x128xf32>
    %597 = arith.maximumf %595, %596 : vector<24x128xf32>
    %598 = vector.extract_strided_slice %0 {offsets = [0, 6016], sizes = [24, 128], strides = [1, 1]} : vector<24x6144xf32> to vector<24x128xf32>
    %599 = vector.broadcast %210 : vector<1x128xf32> to vector<24x128xf32>
    %600 = arith.mulf %598, %599 : vector<24x128xf32>
    %601 = vector.broadcast %213 : vector<1x128xf32> to vector<24x128xf32>
    %602 = arith.addf %600, %601 : vector<24x128xf32>
    %cst_70 = arith.constant 0.000000e+00 : f32
    %603 = vector.broadcast %cst_70 : f32 to vector<24x128xf32>
    %604 = arith.maximumf %602, %603 : vector<24x128xf32>
    %605 = arith.maximumf %583, %590 : vector<24x128xf32>
    %606 = arith.maximumf %597, %604 : vector<24x128xf32>
    %607 = arith.maximumf %605, %606 : vector<24x128xf32>
    %608 = arith.truncf %607 : vector<24x128xf32> to vector<24x128xbf16>
    %c0_71 = arith.constant 0 : index
    %c1408 = arith.constant 1408 : index
    %609 = vector.load %arg3[%c0_71, %c1408] : memref<24x1536xbf16, #tpu.memory_space<vmem>>, vector<24x128xbf16>
    tpu.vector_store %arg3[%c0_71, %c1408], %608 {strides = array<i32>} : memref<24x1536xbf16, #tpu.memory_space<vmem>>, vector<24x128xbf16>,
    return
  }
}

module attributes {stable_mosaic.version = 11 : i64} {
  func.func @_matmul_bias_kernel(%arg0: i32, %arg1: memref<128x3200xbf16, #tpu.memory_space<vmem>>, %arg2: memref<3200x128xbf16, #tpu.memory_space<vmem>>, %arg3: memref<1x128xf32, #tpu.memory_space<vmem>>, %arg4: memref<128x128xf32, #tpu.memory_space<vmem>>) attributes {dimension_semantics = [#tpu.dimension_semantics<parallel>], iteration_bounds = array<i64: 1>, scalar_prefetch = 0 : i64, scratch_operands = 0 : i64, tpu.core_type = #tpu.core_type<tc>, window_params = [{transform_indices = @transform_0, window_bounds = array<i64: 128, 3200>}, {pipeline_mode = #tpu.pipeline_mode<synchronous>, transform_indices = @transform_1, window_bounds = array<i64: 3200, 128>}, {pipeline_mode = #tpu.pipeline_mode<synchronous>, transform_indices = @transform_2, window_bounds = array<i64: 1, 128>}, {transform_indices = @transform_3, window_bounds = array<i64: 128, 128>}]} {
    %c0 = arith.constant 0 : index
    %c0_0 = arith.constant 0 : index
    %0 = vector.load %arg1[%c0, %c0_0] : memref<128x3200xbf16, #tpu.memory_space<vmem>>, vector<128x3200xbf16>
    %c0_1 = arith.constant 0 : index
    %c0_2 = arith.constant 0 : index
    %1 = vector.load %arg2[%c0_1, %c0_2] : memref<3200x128xbf16, #tpu.memory_space<vmem>>, vector<3200x128xbf16>
    %cst = arith.constant dense<0.000000e+00> : vector<128x128xf32>
    %2 = tpu.matmul %0, %1, %cst {dimension_numbers = #tpu.dot_dimension_numbers<[1], [0], [0], [1], [0, 0, 1, 1], [], []>} : vector<128x3200xbf16>, vector<3200x128xbf16>, vector<128x128xf32> -> vector<128x128xf32>
    %c0_3 = arith.constant 0 : index
    %c0_4 = arith.constant 0 : index
    %3 = vector.load %arg3[%c0_3, %c0_4] : memref<1x128xf32, #tpu.memory_space<vmem>>, vector<1x128xf32>
    %4 = vector.broadcast %3 : vector<1x128xf32> to vector<128x128xf32>
    %5 = arith.addf %2, %4 : vector<128x128xf32>
    %c0_5 = arith.constant 0 : index
    %c0_6 = arith.constant 0 : index
    %6 = vector.load %arg4[%c0_5, %c0_6] : memref<128x128xf32, #tpu.memory_space<vmem>>, vector<128x128xf32>
    tpu.vector_store %arg4[%c0_5, %c0_6], %5 {strides = array<i32>} : memref<128x128xf32, #tpu.memory_space<vmem>>, vector<128x128xf32>,
    return
  }
  func.func @transform_0(%arg0: i32) -> (i32, i32) {
    %c0_i32 = arith.constant 0 : i32
    %c0_i32_0 = arith.constant 0 : i32
    return %arg0, %c0_i32 : i32, i32
  }
  func.func @transform_1(%arg0: i32) -> (i32, i32) {
    %c0_i32 = arith.constant 0 : i32
    %c0_i32_0 = arith.constant 0 : i32
    %c0_i32_1 = arith.constant 0 : i32
    return %c0_i32, %c0_i32_0 : i32, i32
  }
  func.func @transform_2(%arg0: i32) -> (i32, i32) {
    %c0_i32 = arith.constant 0 : i32
    %c0_i32_0 = arith.constant 0 : i32
    %c0_i32_1 = arith.constant 0 : i32
    return %c0_i32, %c0_i32_0 : i32, i32
  }
  func.func @transform_3(%arg0: i32) -> (i32, i32) {
    %c0_i32 = arith.constant 0 : i32
    %c0_i32_0 = arith.constant 0 : i32
    return %arg0, %c0_i32 : i32, i32
  }
}

module attributes {stable_mosaic.version = 11 : i64} {
  func.func @_bn_relu_pool_kernel(%arg0: memref<8x2048xf32, #tpu.memory_space<vmem>>, %arg1: memref<1x128xf32, #tpu.memory_space<vmem>>, %arg2: memref<1x128xf32, #tpu.memory_space<vmem>>, %arg3: memref<8x512xbf16, #tpu.memory_space<vmem>>) attributes {dimension_semantics = [], scalar_prefetch = 0 : i64, scratch_operands = 0 : i64, tpu.core_type = #tpu.core_type<tc>} {
    %c0 = arith.constant 0 : index
    %c0_0 = arith.constant 0 : index
    %0 = vector.load %arg0[%c0, %c0_0] : memref<8x2048xf32, #tpu.memory_space<vmem>>, vector<8x2048xf32>
    %cst = arith.constant dense<0.000000e+00> : vector<2048xf32>
    %1 = vector.multi_reduction <add>, %0, %cst [0] : vector<8x2048xf32> to vector<2048xf32>
    %2 = vector.shape_cast %1 : vector<2048xf32> to vector<1x2048xf32>
    %3 = arith.mulf %0, %0 : vector<8x2048xf32>
    %cst_1 = arith.constant dense<0.000000e+00> : vector<2048xf32>
    %4 = vector.multi_reduction <add>, %3, %cst_1 [0] : vector<8x2048xf32> to vector<2048xf32>
    %5 = vector.shape_cast %4 : vector<2048xf32> to vector<1x2048xf32>
    %cst_2 = arith.constant 0.000000e+00 : f32
    %6 = vector.broadcast %cst_2 : f32 to vector<1x128xf32>
    %cst_3 = arith.constant 0.000000e+00 : f32
    %7 = vector.broadcast %cst_3 : f32 to vector<1x128xf32>
    %8 = vector.extract_strided_slice %2 {offsets = [0, 0], sizes = [1, 128], strides = [1, 1]} : vector<1x2048xf32> to vector<1x128xf32>
    %9 = arith.addf %6, %8 : vector<1x128xf32>
    %10 = vector.extract_strided_slice %5 {offsets = [0, 0], sizes = [1, 128], strides = [1, 1]} : vector<1x2048xf32> to vector<1x128xf32>
    %11 = arith.addf %7, %10 : vector<1x128xf32>
    %12 = vector.extract_strided_slice %2 {offsets = [0, 128], sizes = [1, 128], strides = [1, 1]} : vector<1x2048xf32> to vector<1x128xf32>
    %13 = arith.addf %9, %12 : vector<1x128xf32>
    %14 = vector.extract_strided_slice %5 {offsets = [0, 128], sizes = [1, 128], strides = [1, 1]} : vector<1x2048xf32> to vector<1x128xf32>
    %15 = arith.addf %11, %14 : vector<1x128xf32>
    %16 = vector.extract_strided_slice %2 {offsets = [0, 256], sizes = [1, 128], strides = [1, 1]} : vector<1x2048xf32> to vector<1x128xf32>
    %17 = arith.addf %13, %16 : vector<1x128xf32>
    %18 = vector.extract_strided_slice %5 {offsets = [0, 256], sizes = [1, 128], strides = [1, 1]} : vector<1x2048xf32> to vector<1x128xf32>
    %19 = arith.addf %15, %18 : vector<1x128xf32>
    %20 = vector.extract_strided_slice %2 {offsets = [0, 384], sizes = [1, 128], strides = [1, 1]} : vector<1x2048xf32> to vector<1x128xf32>
    %21 = arith.addf %17, %20 : vector<1x128xf32>
    %22 = vector.extract_strided_slice %5 {offsets = [0, 384], sizes = [1, 128], strides = [1, 1]} : vector<1x2048xf32> to vector<1x128xf32>
    %23 = arith.addf %19, %22 : vector<1x128xf32>
    %24 = vector.extract_strided_slice %2 {offsets = [0, 512], sizes = [1, 128], strides = [1, 1]} : vector<1x2048xf32> to vector<1x128xf32>
    %25 = arith.addf %21, %24 : vector<1x128xf32>
    %26 = vector.extract_strided_slice %5 {offsets = [0, 512], sizes = [1, 128], strides = [1, 1]} : vector<1x2048xf32> to vector<1x128xf32>
    %27 = arith.addf %23, %26 : vector<1x128xf32>
    %28 = vector.extract_strided_slice %2 {offsets = [0, 640], sizes = [1, 128], strides = [1, 1]} : vector<1x2048xf32> to vector<1x128xf32>
    %29 = arith.addf %25, %28 : vector<1x128xf32>
    %30 = vector.extract_strided_slice %5 {offsets = [0, 640], sizes = [1, 128], strides = [1, 1]} : vector<1x2048xf32> to vector<1x128xf32>
    %31 = arith.addf %27, %30 : vector<1x128xf32>
    %32 = vector.extract_strided_slice %2 {offsets = [0, 768], sizes = [1, 128], strides = [1, 1]} : vector<1x2048xf32> to vector<1x128xf32>
    %33 = arith.addf %29, %32 : vector<1x128xf32>
    %34 = vector.extract_strided_slice %5 {offsets = [0, 768], sizes = [1, 128], strides = [1, 1]} : vector<1x2048xf32> to vector<1x128xf32>
    %35 = arith.addf %31, %34 : vector<1x128xf32>
    %36 = vector.extract_strided_slice %2 {offsets = [0, 896], sizes = [1, 128], strides = [1, 1]} : vector<1x2048xf32> to vector<1x128xf32>
    %37 = arith.addf %33, %36 : vector<1x128xf32>
    %38 = vector.extract_strided_slice %5 {offsets = [0, 896], sizes = [1, 128], strides = [1, 1]} : vector<1x2048xf32> to vector<1x128xf32>
    %39 = arith.addf %35, %38 : vector<1x128xf32>
    %40 = vector.extract_strided_slice %2 {offsets = [0, 1024], sizes = [1, 128], strides = [1, 1]} : vector<1x2048xf32> to vector<1x128xf32>
    %41 = arith.addf %37, %40 : vector<1x128xf32>
    %42 = vector.extract_strided_slice %5 {offsets = [0, 1024], sizes = [1, 128], strides = [1, 1]} : vector<1x2048xf32> to vector<1x128xf32>
    %43 = arith.addf %39, %42 : vector<1x128xf32>
    %44 = vector.extract_strided_slice %2 {offsets = [0, 1152], sizes = [1, 128], strides = [1, 1]} : vector<1x2048xf32> to vector<1x128xf32>
    %45 = arith.addf %41, %44 : vector<1x128xf32>
    %46 = vector.extract_strided_slice %5 {offsets = [0, 1152], sizes = [1, 128], strides = [1, 1]} : vector<1x2048xf32> to vector<1x128xf32>
    %47 = arith.addf %43, %46 : vector<1x128xf32>
    %48 = vector.extract_strided_slice %2 {offsets = [0, 1280], sizes = [1, 128], strides = [1, 1]} : vector<1x2048xf32> to vector<1x128xf32>
    %49 = arith.addf %45, %48 : vector<1x128xf32>
    %50 = vector.extract_strided_slice %5 {offsets = [0, 1280], sizes = [1, 128], strides = [1, 1]} : vector<1x2048xf32> to vector<1x128xf32>
    %51 = arith.addf %47, %50 : vector<1x128xf32>
    %52 = vector.extract_strided_slice %2 {offsets = [0, 1408], sizes = [1, 128], strides = [1, 1]} : vector<1x2048xf32> to vector<1x128xf32>
    %53 = arith.addf %49, %52 : vector<1x128xf32>
    %54 = vector.extract_strided_slice %5 {offsets = [0, 1408], sizes = [1, 128], strides = [1, 1]} : vector<1x2048xf32> to vector<1x128xf32>
    %55 = arith.addf %51, %54 : vector<1x128xf32>
    %56 = vector.extract_strided_slice %2 {offsets = [0, 1536], sizes = [1, 128], strides = [1, 1]} : vector<1x2048xf32> to vector<1x128xf32>
    %57 = arith.addf %53, %56 : vector<1x128xf32>
    %58 = vector.extract_strided_slice %5 {offsets = [0, 1536], sizes = [1, 128], strides = [1, 1]} : vector<1x2048xf32> to vector<1x128xf32>
    %59 = arith.addf %55, %58 : vector<1x128xf32>
    %60 = vector.extract_strided_slice %2 {offsets = [0, 1664], sizes = [1, 128], strides = [1, 1]} : vector<1x2048xf32> to vector<1x128xf32>
    %61 = arith.addf %57, %60 : vector<1x128xf32>
    %62 = vector.extract_strided_slice %5 {offsets = [0, 1664], sizes = [1, 128], strides = [1, 1]} : vector<1x2048xf32> to vector<1x128xf32>
    %63 = arith.addf %59, %62 : vector<1x128xf32>
    %64 = vector.extract_strided_slice %2 {offsets = [0, 1792], sizes = [1, 128], strides = [1, 1]} : vector<1x2048xf32> to vector<1x128xf32>
    %65 = arith.addf %61, %64 : vector<1x128xf32>
    %66 = vector.extract_strided_slice %5 {offsets = [0, 1792], sizes = [1, 128], strides = [1, 1]} : vector<1x2048xf32> to vector<1x128xf32>
    %67 = arith.addf %63, %66 : vector<1x128xf32>
    %68 = vector.extract_strided_slice %2 {offsets = [0, 1920], sizes = [1, 128], strides = [1, 1]} : vector<1x2048xf32> to vector<1x128xf32>
    %69 = arith.addf %65, %68 : vector<1x128xf32>
    %70 = vector.extract_strided_slice %5 {offsets = [0, 1920], sizes = [1, 128], strides = [1, 1]} : vector<1x2048xf32> to vector<1x128xf32>
    %71 = arith.addf %67, %70 : vector<1x128xf32>
    %cst_4 = arith.constant 7.812500e-03 : f32
    %72 = vector.broadcast %cst_4 : f32 to vector<1x128xf32>
    %73 = arith.mulf %69, %72 : vector<1x128xf32>
    %cst_5 = arith.constant 7.812500e-03 : f32
    %74 = vector.broadcast %cst_5 : f32 to vector<1x128xf32>
    %75 = arith.mulf %71, %74 : vector<1x128xf32>
    %76 = arith.mulf %73, %73 : vector<1x128xf32>
    %77 = arith.subf %75, %76 : vector<1x128xf32>
    %c0_6 = arith.constant 0 : index
    %c0_7 = arith.constant 0 : index
    %78 = vector.load %arg1[%c0_6, %c0_7] : memref<1x128xf32, #tpu.memory_space<vmem>>, vector<1x128xf32>
    %cst_8 = arith.constant 9.99999974E-6 : f32
    %79 = vector.broadcast %cst_8 : f32 to vector<1x128xf32>
    %80 = arith.addf %77, %79 : vector<1x128xf32>
    %81 = math.rsqrt %80 : vector<1x128xf32>
    %82 = arith.mulf %78, %81 : vector<1x128xf32>
    %c0_9 = arith.constant 0 : index
    %c0_10 = arith.constant 0 : index
    %83 = vector.load %arg2[%c0_9, %c0_10] : memref<1x128xf32, #tpu.memory_space<vmem>>, vector<1x128xf32>
    %84 = arith.mulf %73, %82 : vector<1x128xf32>
    %85 = arith.subf %83, %84 : vector<1x128xf32>
    %86 = vector.extract_strided_slice %0 {offsets = [0, 0], sizes = [8, 128], strides = [1, 1]} : vector<8x2048xf32> to vector<8x128xf32>
    %87 = vector.broadcast %82 : vector<1x128xf32> to vector<8x128xf32>
    %88 = arith.mulf %86, %87 : vector<8x128xf32>
    %89 = vector.broadcast %85 : vector<1x128xf32> to vector<8x128xf32>
    %90 = arith.addf %88, %89 : vector<8x128xf32>
    %cst_11 = arith.constant 0.000000e+00 : f32
    %91 = vector.broadcast %cst_11 : f32 to vector<8x128xf32>
    %92 = arith.maximumf %90, %91 : vector<8x128xf32>
    %93 = vector.extract_strided_slice %0 {offsets = [0, 128], sizes = [8, 128], strides = [1, 1]} : vector<8x2048xf32> to vector<8x128xf32>
    %94 = vector.broadcast %82 : vector<1x128xf32> to vector<8x128xf32>
    %95 = arith.mulf %93, %94 : vector<8x128xf32>
    %96 = vector.broadcast %85 : vector<1x128xf32> to vector<8x128xf32>
    %97 = arith.addf %95, %96 : vector<8x128xf32>
    %cst_12 = arith.constant 0.000000e+00 : f32
    %98 = vector.broadcast %cst_12 : f32 to vector<8x128xf32>
    %99 = arith.maximumf %97, %98 : vector<8x128xf32>
    %100 = vector.extract_strided_slice %0 {offsets = [0, 1024], sizes = [8, 128], strides = [1, 1]} : vector<8x2048xf32> to vector<8x128xf32>
    %101 = vector.broadcast %82 : vector<1x128xf32> to vector<8x128xf32>
    %102 = arith.mulf %100, %101 : vector<8x128xf32>
    %103 = vector.broadcast %85 : vector<1x128xf32> to vector<8x128xf32>
    %104 = arith.addf %102, %103 : vector<8x128xf32>
    %cst_13 = arith.constant 0.000000e+00 : f32
    %105 = vector.broadcast %cst_13 : f32 to vector<8x128xf32>
    %106 = arith.maximumf %104, %105 : vector<8x128xf32>
    %107 = vector.extract_strided_slice %0 {offsets = [0, 1152], sizes = [8, 128], strides = [1, 1]} : vector<8x2048xf32> to vector<8x128xf32>
    %108 = vector.broadcast %82 : vector<1x128xf32> to vector<8x128xf32>
    %109 = arith.mulf %107, %108 : vector<8x128xf32>
    %110 = vector.broadcast %85 : vector<1x128xf32> to vector<8x128xf32>
    %111 = arith.addf %109, %110 : vector<8x128xf32>
    %cst_14 = arith.constant 0.000000e+00 : f32
    %112 = vector.broadcast %cst_14 : f32 to vector<8x128xf32>
    %113 = arith.maximumf %111, %112 : vector<8x128xf32>
    %114 = arith.maximumf %92, %99 : vector<8x128xf32>
    %115 = arith.maximumf %106, %113 : vector<8x128xf32>
    %116 = arith.maximumf %114, %115 : vector<8x128xf32>
    %117 = arith.truncf %116 : vector<8x128xf32> to vector<8x128xbf16>
    %c0_15 = arith.constant 0 : index
    %c0_16 = arith.constant 0 : index
    %118 = vector.load %arg3[%c0_15, %c0_16] : memref<8x512xbf16, #tpu.memory_space<vmem>>, vector<8x128xbf16>
    tpu.vector_store %arg3[%c0_15, %c0_16], %117 {strides = array<i32>} : memref<8x512xbf16, #tpu.memory_space<vmem>>, vector<8x128xbf16>,
    %119 = vector.extract_strided_slice %0 {offsets = [0, 256], sizes = [8, 128], strides = [1, 1]} : vector<8x2048xf32> to vector<8x128xf32>
    %120 = vector.broadcast %82 : vector<1x128xf32> to vector<8x128xf32>
    %121 = arith.mulf %119, %120 : vector<8x128xf32>
    %122 = vector.broadcast %85 : vector<1x128xf32> to vector<8x128xf32>
    %123 = arith.addf %121, %122 : vector<8x128xf32>
    %cst_17 = arith.constant 0.000000e+00 : f32
    %124 = vector.broadcast %cst_17 : f32 to vector<8x128xf32>
    %125 = arith.maximumf %123, %124 : vector<8x128xf32>
    %126 = vector.extract_strided_slice %0 {offsets = [0, 384], sizes = [8, 128], strides = [1, 1]} : vector<8x2048xf32> to vector<8x128xf32>
    %127 = vector.broadcast %82 : vector<1x128xf32> to vector<8x128xf32>
    %128 = arith.mulf %126, %127 : vector<8x128xf32>
    %129 = vector.broadcast %85 : vector<1x128xf32> to vector<8x128xf32>
    %130 = arith.addf %128, %129 : vector<8x128xf32>
    %cst_18 = arith.constant 0.000000e+00 : f32
    %131 = vector.broadcast %cst_18 : f32 to vector<8x128xf32>
    %132 = arith.maximumf %130, %131 : vector<8x128xf32>
    %133 = vector.extract_strided_slice %0 {offsets = [0, 1280], sizes = [8, 128], strides = [1, 1]} : vector<8x2048xf32> to vector<8x128xf32>
    %134 = vector.broadcast %82 : vector<1x128xf32> to vector<8x128xf32>
    %135 = arith.mulf %133, %134 : vector<8x128xf32>
    %136 = vector.broadcast %85 : vector<1x128xf32> to vector<8x128xf32>
    %137 = arith.addf %135, %136 : vector<8x128xf32>
    %cst_19 = arith.constant 0.000000e+00 : f32
    %138 = vector.broadcast %cst_19 : f32 to vector<8x128xf32>
    %139 = arith.maximumf %137, %138 : vector<8x128xf32>
    %140 = vector.extract_strided_slice %0 {offsets = [0, 1408], sizes = [8, 128], strides = [1, 1]} : vector<8x2048xf32> to vector<8x128xf32>
    %141 = vector.broadcast %82 : vector<1x128xf32> to vector<8x128xf32>
    %142 = arith.mulf %140, %141 : vector<8x128xf32>
    %143 = vector.broadcast %85 : vector<1x128xf32> to vector<8x128xf32>
    %144 = arith.addf %142, %143 : vector<8x128xf32>
    %cst_20 = arith.constant 0.000000e+00 : f32
    %145 = vector.broadcast %cst_20 : f32 to vector<8x128xf32>
    %146 = arith.maximumf %144, %145 : vector<8x128xf32>
    %147 = arith.maximumf %125, %132 : vector<8x128xf32>
    %148 = arith.maximumf %139, %146 : vector<8x128xf32>
    %149 = arith.maximumf %147, %148 : vector<8x128xf32>
    %150 = arith.truncf %149 : vector<8x128xf32> to vector<8x128xbf16>
    %c0_21 = arith.constant 0 : index
    %c128 = arith.constant 128 : index
    %151 = vector.load %arg3[%c0_21, %c128] : memref<8x512xbf16, #tpu.memory_space<vmem>>, vector<8x128xbf16>
    tpu.vector_store %arg3[%c0_21, %c128], %150 {strides = array<i32>} : memref<8x512xbf16, #tpu.memory_space<vmem>>, vector<8x128xbf16>,
    %152 = vector.extract_strided_slice %0 {offsets = [0, 512], sizes = [8, 128], strides = [1, 1]} : vector<8x2048xf32> to vector<8x128xf32>
    %153 = vector.broadcast %82 : vector<1x128xf32> to vector<8x128xf32>
    %154 = arith.mulf %152, %153 : vector<8x128xf32>
    %155 = vector.broadcast %85 : vector<1x128xf32> to vector<8x128xf32>
    %156 = arith.addf %154, %155 : vector<8x128xf32>
    %cst_22 = arith.constant 0.000000e+00 : f32
    %157 = vector.broadcast %cst_22 : f32 to vector<8x128xf32>
    %158 = arith.maximumf %156, %157 : vector<8x128xf32>
    %159 = vector.extract_strided_slice %0 {offsets = [0, 640], sizes = [8, 128], strides = [1, 1]} : vector<8x2048xf32> to vector<8x128xf32>
    %160 = vector.broadcast %82 : vector<1x128xf32> to vector<8x128xf32>
    %161 = arith.mulf %159, %160 : vector<8x128xf32>
    %162 = vector.broadcast %85 : vector<1x128xf32> to vector<8x128xf32>
    %163 = arith.addf %161, %162 : vector<8x128xf32>
    %cst_23 = arith.constant 0.000000e+00 : f32
    %164 = vector.broadcast %cst_23 : f32 to vector<8x128xf32>
    %165 = arith.maximumf %163, %164 : vector<8x128xf32>
    %166 = vector.extract_strided_slice %0 {offsets = [0, 1536], sizes = [8, 128], strides = [1, 1]} : vector<8x2048xf32> to vector<8x128xf32>
    %167 = vector.broadcast %82 : vector<1x128xf32> to vector<8x128xf32>
    %168 = arith.mulf %166, %167 : vector<8x128xf32>
    %169 = vector.broadcast %85 : vector<1x128xf32> to vector<8x128xf32>
    %170 = arith.addf %168, %169 : vector<8x128xf32>
    %cst_24 = arith.constant 0.000000e+00 : f32
    %171 = vector.broadcast %cst_24 : f32 to vector<8x128xf32>
    %172 = arith.maximumf %170, %171 : vector<8x128xf32>
    %173 = vector.extract_strided_slice %0 {offsets = [0, 1664], sizes = [8, 128], strides = [1, 1]} : vector<8x2048xf32> to vector<8x128xf32>
    %174 = vector.broadcast %82 : vector<1x128xf32> to vector<8x128xf32>
    %175 = arith.mulf %173, %174 : vector<8x128xf32>
    %176 = vector.broadcast %85 : vector<1x128xf32> to vector<8x128xf32>
    %177 = arith.addf %175, %176 : vector<8x128xf32>
    %cst_25 = arith.constant 0.000000e+00 : f32
    %178 = vector.broadcast %cst_25 : f32 to vector<8x128xf32>
    %179 = arith.maximumf %177, %178 : vector<8x128xf32>
    %180 = arith.maximumf %158, %165 : vector<8x128xf32>
    %181 = arith.maximumf %172, %179 : vector<8x128xf32>
    %182 = arith.maximumf %180, %181 : vector<8x128xf32>
    %183 = arith.truncf %182 : vector<8x128xf32> to vector<8x128xbf16>
    %c0_26 = arith.constant 0 : index
    %c256 = arith.constant 256 : index
    %184 = vector.load %arg3[%c0_26, %c256] : memref<8x512xbf16, #tpu.memory_space<vmem>>, vector<8x128xbf16>
    tpu.vector_store %arg3[%c0_26, %c256], %183 {strides = array<i32>} : memref<8x512xbf16, #tpu.memory_space<vmem>>, vector<8x128xbf16>,
    %185 = vector.extract_strided_slice %0 {offsets = [0, 768], sizes = [8, 128], strides = [1, 1]} : vector<8x2048xf32> to vector<8x128xf32>
    %186 = vector.broadcast %82 : vector<1x128xf32> to vector<8x128xf32>
    %187 = arith.mulf %185, %186 : vector<8x128xf32>
    %188 = vector.broadcast %85 : vector<1x128xf32> to vector<8x128xf32>
    %189 = arith.addf %187, %188 : vector<8x128xf32>
    %cst_27 = arith.constant 0.000000e+00 : f32
    %190 = vector.broadcast %cst_27 : f32 to vector<8x128xf32>
    %191 = arith.maximumf %189, %190 : vector<8x128xf32>
    %192 = vector.extract_strided_slice %0 {offsets = [0, 896], sizes = [8, 128], strides = [1, 1]} : vector<8x2048xf32> to vector<8x128xf32>
    %193 = vector.broadcast %82 : vector<1x128xf32> to vector<8x128xf32>
    %194 = arith.mulf %192, %193 : vector<8x128xf32>
    %195 = vector.broadcast %85 : vector<1x128xf32> to vector<8x128xf32>
    %196 = arith.addf %194, %195 : vector<8x128xf32>
    %cst_28 = arith.constant 0.000000e+00 : f32
    %197 = vector.broadcast %cst_28 : f32 to vector<8x128xf32>
    %198 = arith.maximumf %196, %197 : vector<8x128xf32>
    %199 = vector.extract_strided_slice %0 {offsets = [0, 1792], sizes = [8, 128], strides = [1, 1]} : vector<8x2048xf32> to vector<8x128xf32>
    %200 = vector.broadcast %82 : vector<1x128xf32> to vector<8x128xf32>
    %201 = arith.mulf %199, %200 : vector<8x128xf32>
    %202 = vector.broadcast %85 : vector<1x128xf32> to vector<8x128xf32>
    %203 = arith.addf %201, %202 : vector<8x128xf32>
    %cst_29 = arith.constant 0.000000e+00 : f32
    %204 = vector.broadcast %cst_29 : f32 to vector<8x128xf32>
    %205 = arith.maximumf %203, %204 : vector<8x128xf32>
    %206 = vector.extract_strided_slice %0 {offsets = [0, 1920], sizes = [8, 128], strides = [1, 1]} : vector<8x2048xf32> to vector<8x128xf32>
    %207 = vector.broadcast %82 : vector<1x128xf32> to vector<8x128xf32>
    %208 = arith.mulf %206, %207 : vector<8x128xf32>
    %209 = vector.broadcast %85 : vector<1x128xf32> to vector<8x128xf32>
    %210 = arith.addf %208, %209 : vector<8x128xf32>
    %cst_30 = arith.constant 0.000000e+00 : f32
    %211 = vector.broadcast %cst_30 : f32 to vector<8x128xf32>
    %212 = arith.maximumf %210, %211 : vector<8x128xf32>
    %213 = arith.maximumf %191, %198 : vector<8x128xf32>
    %214 = arith.maximumf %205, %212 : vector<8x128xf32>
    %215 = arith.maximumf %213, %214 : vector<8x128xf32>
    %216 = arith.truncf %215 : vector<8x128xf32> to vector<8x128xbf16>
    %c0_31 = arith.constant 0 : index
    %c384 = arith.constant 384 : index
    %217 = vector.load %arg3[%c0_31, %c384] : memref<8x512xbf16, #tpu.memory_space<vmem>>, vector<8x128xbf16>
    tpu.vector_store %arg3[%c0_31, %c384], %216 {strides = array<i32>} : memref<8x512xbf16, #tpu.memory_space<vmem>>, vector<8x128xbf16>,
    return
  }
}

module attributes {stable_mosaic.version = 11 : i64} {
  func.func @_matmul_bias_kernel(%arg0: i32, %arg1: memref<128x2048xbf16, #tpu.memory_space<vmem>>, %arg2: memref<2048x256xbf16, #tpu.memory_space<vmem>>, %arg3: memref<1x256xf32, #tpu.memory_space<vmem>>, %arg4: memref<128x256xf32, #tpu.memory_space<vmem>>) attributes {dimension_semantics = [#tpu.dimension_semantics<parallel>], iteration_bounds = array<i64: 1>, scalar_prefetch = 0 : i64, scratch_operands = 0 : i64, tpu.core_type = #tpu.core_type<tc>, window_params = [{transform_indices = @transform_0, window_bounds = array<i64: 128, 2048>}, {pipeline_mode = #tpu.pipeline_mode<synchronous>, transform_indices = @transform_1, window_bounds = array<i64: 2048, 256>}, {pipeline_mode = #tpu.pipeline_mode<synchronous>, transform_indices = @transform_2, window_bounds = array<i64: 1, 256>}, {transform_indices = @transform_3, window_bounds = array<i64: 128, 256>}]} {
    %c0 = arith.constant 0 : index
    %c0_0 = arith.constant 0 : index
    %0 = vector.load %arg1[%c0, %c0_0] : memref<128x2048xbf16, #tpu.memory_space<vmem>>, vector<128x2048xbf16>
    %c0_1 = arith.constant 0 : index
    %c0_2 = arith.constant 0 : index
    %1 = vector.load %arg2[%c0_1, %c0_2] : memref<2048x256xbf16, #tpu.memory_space<vmem>>, vector<2048x256xbf16>
    %cst = arith.constant dense<0.000000e+00> : vector<128x256xf32>
    %2 = tpu.matmul %0, %1, %cst {dimension_numbers = #tpu.dot_dimension_numbers<[1], [0], [0], [1], [0, 0, 1, 1], [], []>} : vector<128x2048xbf16>, vector<2048x256xbf16>, vector<128x256xf32> -> vector<128x256xf32>
    %c0_3 = arith.constant 0 : index
    %c0_4 = arith.constant 0 : index
    %3 = vector.load %arg3[%c0_3, %c0_4] : memref<1x256xf32, #tpu.memory_space<vmem>>, vector<1x256xf32>
    %4 = vector.broadcast %3 : vector<1x256xf32> to vector<128x256xf32>
    %5 = arith.addf %2, %4 : vector<128x256xf32>
    %cst_5 = arith.constant 0.000000e+00 : f32
    %6 = vector.broadcast %cst_5 : f32 to vector<128x256xf32>
    %7 = arith.maximumf %5, %6 : vector<128x256xf32>
    %c0_6 = arith.constant 0 : index
    %c0_7 = arith.constant 0 : index
    %8 = vector.load %arg4[%c0_6, %c0_7] : memref<128x256xf32, #tpu.memory_space<vmem>>, vector<128x256xf32>
    tpu.vector_store %arg4[%c0_6, %c0_7], %7 {strides = array<i32>} : memref<128x256xf32, #tpu.memory_space<vmem>>, vector<128x256xf32>,
    return
  }
  func.func @transform_0(%arg0: i32) -> (i32, i32) {
    %c0_i32 = arith.constant 0 : i32
    %c0_i32_0 = arith.constant 0 : i32
    return %arg0, %c0_i32 : i32, i32
  }
  func.func @transform_1(%arg0: i32) -> (i32, i32) {
    %c0_i32 = arith.constant 0 : i32
    %c0_i32_0 = arith.constant 0 : i32
    %c0_i32_1 = arith.constant 0 : i32
    return %c0_i32, %c0_i32_0 : i32, i32
  }
  func.func @transform_2(%arg0: i32) -> (i32, i32) {
    %c0_i32 = arith.constant 0 : i32
    %c0_i32_0 = arith.constant 0 : i32
    %c0_i32_1 = arith.constant 0 : i32
    return %c0_i32, %c0_i32_0 : i32, i32
  }
  func.func @transform_3(%arg0: i32) -> (i32, i32) {
    %c0_i32 = arith.constant 0 : i32
    %c0_i32_0 = arith.constant 0 : i32
    return %arg0, %c0_i32 : i32, i32
  }
}

module attributes {stable_mosaic.version = 11 : i64} {
  func.func @_matmul_bias_kernel(%arg0: i32, %arg1: memref<128x256xbf16, #tpu.memory_space<vmem>>, %arg2: memref<256x128xbf16, #tpu.memory_space<vmem>>, %arg3: memref<1x128xf32, #tpu.memory_space<vmem>>, %arg4: memref<128x128xf32, #tpu.memory_space<vmem>>) attributes {dimension_semantics = [#tpu.dimension_semantics<parallel>], iteration_bounds = array<i64: 1>, scalar_prefetch = 0 : i64, scratch_operands = 0 : i64, tpu.core_type = #tpu.core_type<tc>, window_params = [{transform_indices = @transform_0, window_bounds = array<i64: 128, 256>}, {pipeline_mode = #tpu.pipeline_mode<synchronous>, transform_indices = @transform_1, window_bounds = array<i64: 256, 128>}, {pipeline_mode = #tpu.pipeline_mode<synchronous>, transform_indices = @transform_2, window_bounds = array<i64: 1, 128>}, {transform_indices = @transform_3, window_bounds = array<i64: 128, 128>}]} {
    %c0 = arith.constant 0 : index
    %c0_0 = arith.constant 0 : index
    %0 = vector.load %arg1[%c0, %c0_0] : memref<128x256xbf16, #tpu.memory_space<vmem>>, vector<128x256xbf16>
    %c0_1 = arith.constant 0 : index
    %c0_2 = arith.constant 0 : index
    %1 = vector.load %arg2[%c0_1, %c0_2] : memref<256x128xbf16, #tpu.memory_space<vmem>>, vector<256x128xbf16>
    %cst = arith.constant dense<0.000000e+00> : vector<128x128xf32>
    %2 = tpu.matmul %0, %1, %cst {dimension_numbers = #tpu.dot_dimension_numbers<[1], [0], [0], [1], [0, 0, 1, 1], [], []>} : vector<128x256xbf16>, vector<256x128xbf16>, vector<128x128xf32> -> vector<128x128xf32>
    %c0_3 = arith.constant 0 : index
    %c0_4 = arith.constant 0 : index
    %3 = vector.load %arg3[%c0_3, %c0_4] : memref<1x128xf32, #tpu.memory_space<vmem>>, vector<1x128xf32>
    %4 = vector.broadcast %3 : vector<1x128xf32> to vector<128x128xf32>
    %5 = arith.addf %2, %4 : vector<128x128xf32>
    %6 = tpu.iota {dimensions = array<i32: 1>} : vector<128x128xi32>
    %c25_i32 = arith.constant 25 : i32
    %7 = vector.broadcast %c25_i32 : i32 to vector<128x128xi32>
    %8 = arith.cmpi slt, %6, %7 : vector<128x128xi32>
    %cst_5 = arith.constant -1.000000e+30 : f32
    %9 = vector.broadcast %cst_5 : f32 to vector<128x128xf32>
    %10 = arith.select %8, %5, %9 : vector<128x128xi1>, vector<128x128xf32>
    %cst_6 = arith.constant dense<0xFF800000> : vector<128xf32>
    %11 = vector.multi_reduction <maximumf>, %10, %cst_6 [1] : vector<128x128xf32> to vector<128xf32>
    %12 = vector.shape_cast %11 : vector<128xf32> to vector<128x1xf32>
    %13 = vector.broadcast %12 : vector<128x1xf32> to vector<128x128xf32>
    %14 = arith.subf %10, %13 : vector<128x128xf32>
    %15 = math.exp %14 : vector<128x128xf32>
    %cst_7 = arith.constant dense<0.000000e+00> : vector<128xf32>
    %16 = vector.multi_reduction <add>, %15, %cst_7 [1] : vector<128x128xf32> to vector<128xf32>
    %17 = vector.shape_cast %16 : vector<128xf32> to vector<128x1xf32>
    %18 = math.log %17 : vector<128x1xf32>
    %19 = vector.broadcast %18 : vector<128x1xf32> to vector<128x128xf32>
    %20 = arith.subf %14, %19 : vector<128x128xf32>
    %c0_8 = arith.constant 0 : index
    %c0_9 = arith.constant 0 : index
    %21 = vector.load %arg4[%c0_8, %c0_9] : memref<128x128xf32, #tpu.memory_space<vmem>>, vector<128x128xf32>
    tpu.vector_store %arg4[%c0_8, %c0_9], %20 {strides = array<i32>} : memref<128x128xf32, #tpu.memory_space<vmem>>, vector<128x128xf32>,
    return
  }
  func.func @transform_0(%arg0: i32) -> (i32, i32) {
    %c0_i32 = arith.constant 0 : i32
    %c0_i32_0 = arith.constant 0 : i32
    return %arg0, %c0_i32 : i32, i32
  }
  func.func @transform_1(%arg0: i32) -> (i32, i32) {
    %c0_i32 = arith.constant 0 : i32
    %c0_i32_0 = arith.constant 0 : i32
    %c0_i32_1 = arith.constant 0 : i32
    return %c0_i32, %c0_i32_0 : i32, i32
  }
  func.func @transform_2(%arg0: i32) -> (i32, i32) {
    %c0_i32 = arith.constant 0 : i32
    %c0_i32_0 = arith.constant 0 : i32
    %c0_i32_1 = arith.constant 0 : i32
    return %c0_i32, %c0_i32_0 : i32, i32
  }
  func.func @transform_3(%arg0: i32) -> (i32, i32) {
    %c0_i32 = arith.constant 0 : i32
    %c0_i32_0 = arith.constant 0 : i32
    return %arg0, %c0_i32 : i32, i32
  }
}

</mosaic_0001>

<bundles_post_ra>
// kernel: network_forward.6
= control target key start
LH: loop header
LB: loop body
LE: loop exit
PB: predicated region body
PF: predicated region fallthrough
CT: control target
= control target key end

     0   :  { %s558_s12 = smov 0   ;;  %s610_s0 = inlined_call_operand.vmem [shape: bf16[1152,32], index: 0, kind: input, shape index: {}]   ;;  %s611_s1 = inlined_call_operand.vmem [shape: bf16[32,128], index: 1, kind: input, shape index: {}]   ;;  %s612_s2 = inlined_call_operand.vmem [shape: f32[1,128], index: 2, kind: input, shape index: {}]   ;;  %s613_s3 = inlined_call_operand.vmem [shape: f32[1152,128], index: 3, kind: output, shape index: {}]  }
   0x1 LB: > { %s448_s13 = sadd.s32 4294967295, %s536_s12   ;;  %p452_p0 = scmp.ge.s32.totalorder %s536_s12, 1  ;;  %s536_s12 = sphi %s558_s12, %s13_s12  }
   0x2   : > { %p138_p1 = scmp.lt.s32.totalorder %s536_s12, 10 }
   0x4   : > { %p139_p2 = pnand %p452_p0, %p138_p1 }
   0x5   : > { %s453_s16 = sshll.u32 (!%p139_p2), %s448_s13, 4 }
   0x6   : > { %142 = sbr.rel (%p139_p2) target bundleno = 230 (0xe6), region = 32  ;;  %p163_p3 = scmp.lt.s32.totalorder (!%p139_p2), %s453_s16, 143 }
   0xb   : > { %v520_v0 = vld [vmem:[%s611_s1 + $0x8] sm:$0xff]   ;;  %v521_v1 = vld [vmem:[%s611_s1] sm:$0xff]   ;;  %s615_s16 = smov (!%p163_p3, %s453_s16), 143  ;;  %vm254_vm0 = vcmask 261120  }
   0xc   : > { %488 = vmatprep.subr.bf16.mxu0 %v520_v0  ;;  %508 = vmatprep.subr.bf16.mxu1 %v520_v0  ;;  %s454_s19 = sshll.u32 %s615_s16, 2  ;;  %s456_s23 = sshll.u32 %s615_s16, 3  ;;  %v457_v10 = vld [vmem:[%s612_s2] ss:$0 sm:$0xff] }
   0xd   : > { %489 = vmatpush3.bf16.msra.mxu0 %v520_v0  ;;  %510 = vmatpush3.bf16.msra.mxu1 %v520_v0  ;;  %s166_s22 = scalar_lea.vmem %s610_s0, %s454_s19  ;;  %s589_s28 = scalar_lea.vmem %s613_s3, %s456_s23 }
   0xe   : > { %490 = vmatprep.subr.bf16.mxu0 %v521_v1  ;;  %509 = vmatprep.subr.bf16.mxu1 %v521_v1  ;;  %v522_v2 = vld [vmem:[%s166_s22] sm:$0xff]   ;;  %v524_v4 = vld [vmem:[%s166_s22 + $0x8] sm:$0xff]   ;;  %v526_v6 = vld [vmem:[%s166_s22 + $0x10] sm:$0xff]  }
   0xf   : > { %v523_v3 = vld [vmem:[%s166_s22 + $0x20] sm:$0xff]   ;;  %492 = vmatprep.mubr.msk.bf16.mxu0 %vm254_vm0, %v522_v2  ;;  %v525_v5 = vld [vmem:[%s166_s22 + $0x28] sm:$0xff]   ;;  %v527_v7 = vld [vmem:[%s166_s22 + $0x30] sm:$0xff]  }
  0x10   : > { %500 = vmatprep.mubr.msk.bf16.mxu1 %vm254_vm0, %v523_v3  ;;  %v528_v8 = vld [vmem:[%s166_s22 + $0x18] sm:$0xff]  }
  0x11   : > { %491 = vmatpush3.bf16.msra.mxu0 %v521_v1  ;;  %511 = vmatpush3.bf16.msra.mxu1 %v521_v1  ;;  %v529_v9 = vld [vmem:[%s166_s22 + $0x38] sm:$0xff]  }
  0x14   : > { %493 = vmatmul.mubr.msk.bf16.vlgmr.msra.gmra.mxu0 %vm254_vm0, %v524_v4  ;;  %501 = vmatmul.mubr.msk.bf16.vlgmr.msra.gmra.mxu1 %vm254_vm0, %v525_v5 }
  0x15   : > { %496 = vmatprep.mubr.msk.bf16.mxu0 %vm254_vm0, %v526_v6  ;;  %504 = vmatprep.mubr.msk.bf16.mxu1 %vm254_vm0, %v527_v7 }
  0x1c   : > { %497 = vmatmul.mubr.msk.bf16.gmra.mxu0 %vm254_vm0, %v528_v8  ;;  %505 = vmatmul.mubr.msk.bf16.gmra.mxu1 %vm254_vm0, %v529_v9 }
  0xd4   : > { %v494_v11 = vpop.f32.mrf.mxu0  ;;  %v502_v13 = vpop.f32.mrf.mxu1 }
  0xd5   : > { %v322_v12 = vadd.f32 %v494_v11, %v457_v10  ;;  %v354_v14 = vadd.f32 %v502_v13, %v457_v10 }
  0xd6   : > { %v313_v15 = vpop.f32.mrf.mxu0  ;;  %v345_v17 = vpop.f32.mrf.mxu1 }
  0xd7   : > { %378 = vst [vmem:[%s589_s28 + $0x10] sm:$0xff] %v322_v12  ;;  %v314_v16 = vadd.f32 %v457_v10, %v313_v15  ;;  %386 = vst [vmem:[%s589_s28 + $0x50] sm:$0xff] %v354_v14  ;;  %v346_v18 = vadd.f32 %v457_v10, %v345_v17 }
  0xd8   : > { %v495_v19 = vpop.f32.mrf.mxu0  ;;  %v503_v21 = vpop.f32.mrf.mxu1 }
  0xd9   : > { %376 = vst [vmem:[%s589_s28] sm:$0xff] %v314_v16  ;;  %v325_v20 = vadd.f32 %v495_v19, %v457_v10  ;;  %384 = vst [vmem:[%s589_s28 + $0x40] sm:$0xff] %v346_v18  ;;  %v357_v22 = vadd.f32 %v503_v21, %v457_v10 }
  0xda   : > { %v316_v23 = vpop.f32.mrf.mxu0  ;;  %v348_v25 = vpop.f32.mrf.mxu1 }
  0xdb   : > { %379 = vst [vmem:[%s589_s28 + $0x18] sm:$0xff] %v325_v20  ;;  %v317_v24 = vadd.f32 %v457_v10, %v316_v23  ;;  %387 = vst [vmem:[%s589_s28 + $0x58] sm:$0xff] %v357_v22  ;;  %v349_v26 = vadd.f32 %v457_v10, %v348_v25 }
  0xdc   : > { %v498_v27 = vpop.f32.mrf.mxu0  ;;  %v506_v29 = vpop.f32.mrf.mxu1 }
  0xdd   : > { %377 = vst [vmem:[%s589_s28 + $0x8] sm:$0xff] %v317_v24  ;;  %v338_v28 = vadd.f32 %v498_v27, %v457_v10  ;;  %385 = vst [vmem:[%s589_s28 + $0x48] sm:$0xff] %v349_v26  ;;  %v370_v30 = vadd.f32 %v506_v29, %v457_v10 }
  0xde   : > { %v329_v31 = vpop.f32.mrf.mxu0  ;;  %v361_v33 = vpop.f32.mrf.mxu1 }
  0xdf   : > { %382 = vst [vmem:[%s589_s28 + $0x30] sm:$0xff] %v338_v28  ;;  %v330_v32 = vadd.f32 %v457_v10, %v329_v31  ;;  %390 = vst [vmem:[%s589_s28 + $0x70] sm:$0xff] %v370_v30  ;;  %v362_v34 = vadd.f32 %v457_v10, %v361_v33 }
  0xe0   : > { %v499_v35 = vpop.f32.mrf.mxu0  ;;  %v507_v37 = vpop.f32.mrf.mxu1 }
  0xe1   : > { %380 = vst [vmem:[%s589_s28 + $0x20] sm:$0xff] %v330_v32  ;;  %v341_v36 = vadd.f32 %v499_v35, %v457_v10  ;;  %388 = vst [vmem:[%s589_s28 + $0x60] sm:$0xff] %v362_v34  ;;  %v373_v38 = vadd.f32 %v507_v37, %v457_v10 }
  0xe2   : > { %v332_v39 = vpop.f32.mrf.mxu0  ;;  %v364_v41 = vpop.f32.mrf.mxu1 }
  0xe3   : > { %383 = vst [vmem:[%s589_s28 + $0x38] sm:$0xff] %v341_v36  ;;  %v333_v40 = vadd.f32 %v457_v10, %v332_v39  ;;  %391 = vst [vmem:[%s589_s28 + $0x78] sm:$0xff] %v373_v38  ;;  %v365_v42 = vadd.f32 %v457_v10, %v364_v41 }
  0xe5   : > { %381 = vst [vmem:[%s589_s28 + $0x28] sm:$0xff] %v333_v40  ;;  %389 = vst [vmem:[%s589_s28 + $0x68] sm:$0xff] %v365_v42 }
  0xe6 PF: > { %s13_s12 = sadd.s32 1, %s536_s12  }
  0xe7   : > { %p10_p4 = scmp.ge.s32.totalorder %s13_s12, 11  }
  0xe9   :  { %12 = sbr.rel (!%p10_p4) target bundleno = 1 (0x1), region = 62 }

// kernel: network_forward.7
= control target key start
LH: loop header
LB: loop body
LE: loop exit
PB: predicated region body
PF: predicated region fallthrough
CT: control target
= control target key end

     0   :  { %s4914_s0 = inlined_call_operand.vmem [shape: f32[24,6144], index: 0, kind: input, shape index: {}]   ;;  %s4915_s1 = inlined_call_operand.vmem [shape: f32[1,128], index: 1, kind: input, shape index: {}]   ;;  %s4916_s2 = inlined_call_operand.vmem [shape: f32[1,128], index: 2, kind: input, shape index: {}]   ;;  %s4917_s3 = inlined_call_operand.vmem [shape: bf16[24,1536], index: 3, kind: output, shape index: {}]  }
   0x1   :  { %v2166_v0 = vld [vmem:[%s4914_s0] sm:$0xff]  ;;  %v2171_v1 = vld [vmem:[%s4914_s0 + $0x8] sm:$0xff]  ;;  %v2176_v2 = vld [vmem:[%s4914_s0 + $0x10] sm:$0xff] }
   0x2   :  { %v2181_v3 = vld [vmem:[%s4914_s0 + $0x18] sm:$0xff]  ;;  %v2186_v4 = vld [vmem:[%s4914_s0 + $0x20] sm:$0xff]  ;;  %v2191_v5 = vld [vmem:[%s4914_s0 + $0x28] sm:$0xff]  ;;  %v2275_v22 = vmul.f32 %v2166_v0, %v2166_v0  ;;  %v2279_v23 = vmul.f32 %v2171_v1, %v2171_v1  ;;  %v2303_v28 = vmul.f32 %v2176_v2, %v2176_v2 }
   0x3   :  { %v2196_v6 = vld [vmem:[%s4914_s0 + $0x30] sm:$0xff]  ;;  %v2201_v7 = vld [vmem:[%s4914_s0 + $0x38] sm:$0xff]  ;;  %v2206_v8 = vld [vmem:[%s4914_s0 + $0x40] sm:$0xff]  ;;  %v2307_v29 = vmul.f32 %v2181_v3, %v2181_v3  ;;  %v2311_v30 = vmul.f32 %v2186_v4, %v2186_v4  ;;  %v2315_v31 = vmul.f32 %v2191_v5, %v2191_v5 }
   0x4   :  { %v2211_v9 = vld [vmem:[%s4914_s0 + $0x48] sm:$0xff]  ;;  %v2216_v10 = vld [vmem:[%s4914_s0 + $0x50] sm:$0xff]  ;;  %v2221_v11 = vld [vmem:[%s4914_s0 + $0x58] sm:$0xff]  ;;  %4998 = vst [vmem:[#allocation2_spill] sm:$0xff] %v2275_v22  ;;  %v2339_v36 = vmul.f32 %v2196_v6, %v2196_v6  ;;  %v2343_v37 = vmul.f32 %v2201_v7, %v2201_v7  ;;  %v2347_v38 = vmul.f32 %v2206_v8, %v2206_v8 }
   0x5   :  { %v2226_v12 = vld [vmem:[%s4914_s0 + $0x60] sm:$0xff]  ;;  %v2231_v13 = vld [vmem:[%s4914_s0 + $0x68] sm:$0xff]  ;;  %v2236_v14 = vld [vmem:[%s4914_s0 + $0x70] sm:$0xff]  ;;  %4999 = vst [vmem:[#allocation3_spill] sm:$0xff] %v2279_v23  ;;  %v2351_v39 = vmul.f32 %v2211_v9, %v2211_v9  ;;  %v2370_v43 = vmul.f32 %v2216_v10, %v2216_v10  ;;  %v2374_v44 = vmul.f32 %v2221_v11, %v2221_v11 }
   0x6   :  { %v2241_v15 = vld [vmem:[%s4914_s0 + $0x78] sm:$0xff]  ;;  %v2246_v16 = vld [vmem:[%s4914_s0 + $0x80] sm:$0xff]  ;;  %v2251_v17 = vld [vmem:[%s4914_s0 + $0x88] sm:$0xff]  ;;  %5000 = vst [vmem:[#allocation4_spill] sm:$0xff] %v2303_v28  ;;  %v2378_v45 = vmul.f32 %v2226_v12, %v2226_v12  ;;  %v2382_v46 = vmul.f32 %v2231_v13, %v2231_v13  ;;  %v2401_v50 = vmul.f32 %v2236_v14, %v2236_v14 }
   0x7   :  { %v2256_v18 = vld [vmem:[%s4914_s0 + $0x90] sm:$0xff]  ;;  %v2261_v19 = vld [vmem:[%s4914_s0 + $0x98] sm:$0xff]  ;;  %v2266_v20 = vld [vmem:[%s4914_s0 + $0xa0] sm:$0xff]  ;;  %5001 = vst [vmem:[#allocation5_spill] sm:$0xff] %v2307_v29  ;;  %v2405_v51 = vmul.f32 %v2241_v15, %v2241_v15  ;;  %v2409_v52 = vmul.f32 %v2246_v16, %v2246_v16  ;;  %v2413_v53 = vmul.f32 %v2251_v17, %v2251_v17 }
   0x8   :  { %v2271_v21 = vld [vmem:[%s4914_s0 + $0xa8] sm:$0xff]  ;;  %v2284_v24 = vld [vmem:[%s4914_s0 + $0xb0] sm:$0xff]  ;;  %v2289_v25 = vld [vmem:[%s4914_s0 + $0xb8] sm:$0xff]  ;;  %5002 = vst [vmem:[#allocation6_spill] sm:$0xff] %v2311_v30  ;;  %v2432_v57 = vmul.f32 %v2256_v18, %v2256_v18  ;;  %v2436_v58 = vmul.f32 %v2261_v19, %v2261_v19  ;;  %v2440_v59 = vmul.f32 %v2266_v20, %v2266_v20 }
   0x9   :  { %v2294_v26 = vld [vmem:[%s4914_s0 + $0xc0] sm:$0xff]  ;;  %v2299_v27 = vld [vmem:[%s4914_s0 + $0xc8] sm:$0xff]  ;;  %5003 = vst [vmem:[#allocation7_spill] sm:$0xff] %v2315_v31  ;;  %v2320_v32 = vld [vmem:[%s4914_s0 + $0xd0] sm:$0xff]  ;;  %v2444_v60 = vmul.f32 %v2271_v21, %v2271_v21 }
   0xa   :  { %v2325_v33 = vld [vmem:[%s4914_s0 + $0xd8] sm:$0xff]  ;;  %v2330_v34 = vld [vmem:[%s4914_s0 + $0xe0] sm:$0xff]  ;;  %v2335_v35 = vld [vmem:[%s4914_s0 + $0xe8] sm:$0xff]  ;;  %5004 = vst [vmem:[#allocation8_spill] sm:$0xff] %v2339_v36 }
   0xb   :  { %5005 = vst [vmem:[#allocation9_spill] sm:$0xff] %v2343_v37  ;;  %5006 = vst [vmem:[#allocation10_spill] sm:$0xff] %v2347_v38  ;;  %v2356_v40 = vld [vmem:[%s4914_s0 + $0xf0] sm:$0xff]  ;;  %v2361_v41 = vld [vmem:[%s4914_s0 + $0xf8] sm:$0xff] }
   0xc   :  { %5007 = vst [vmem:[#allocation11_spill] sm:$0xff] %v2351_v39  ;;  %v2366_v42 = vld [vmem:[%s4914_s0 + $0x100] sm:$0xff]  ;;  %5008 = vst [vmem:[#allocation12_spill] sm:$0xff] %v2370_v43  ;;  %v2387_v47 = vld [vmem:[%s4914_s0 + $0x108] sm:$0xff] }
   0xd   :  { %5009 = vst [vmem:[#allocation13_spill] sm:$0xff] %v2374_v44  ;;  %5010 = vst [vmem:[#allocation14_spill] sm:$0xff] %v2378_v45  ;;  %v2392_v48 = vld [vmem:[%s4914_s0 + $0x110] sm:$0xff]  ;;  %v2397_v49 = vld [vmem:[%s4914_s0 + $0x118] sm:$0xff]  ;;  %v2537_v45 = vmul.f32 %v2387_v47, %v2387_v47 }
   0xe   :  { %5011 = vst [vmem:[#allocation15_spill] sm:$0xff] %v2382_v46  ;;  %5012 = vst [vmem:[#allocation16_spill] sm:$0xff] %v2401_v50  ;;  %v2418_v54 = vld [vmem:[%s4914_s0 + $0x120] sm:$0xff]  ;;  %v2423_v55 = vld [vmem:[%s4914_s0 + $0x128] sm:$0xff]  ;;  %v2533_v46 = vmul.f32 %v2366_v42, %v2366_v42  ;;  %v2550_v43 = vmul.f32 %v2392_v48, %v2392_v48 }
   0xf   :  { %5013 = vst [vmem:[#allocation17_spill] sm:$0xff] %v2405_v51  ;;  %5014 = vst [vmem:[#allocation18_spill] sm:$0xff] %v2409_v52  ;;  %v2428_v56 = vld [vmem:[%s4914_s0 + $0x130] sm:$0xff]  ;;  %v2449_v61 = vld [vmem:[%s4914_s0 + $0x138] sm:$0xff]  ;;  %v2502_v52 = vmul.f32 %v2330_v34, %v2330_v34  ;;  %v2506_v51 = vmul.f32 %v2335_v35, %v2335_v35  ;;  %v2562_v39 = vmul.f32 %v2423_v55, %v2423_v55 }
  0x10   :  { %5015 = vst [vmem:[#allocation19_spill] sm:$0xff] %v2413_v53  ;;  %5016 = vst [vmem:[#allocation20_spill] sm:$0xff] %v2432_v57  ;;  %v2454_v62 = vld [vmem:[%s4914_s0 + $0x140] sm:$0xff]  ;;  %v2459_v63 = vld [vmem:[%s4914_s0 + $0x148] sm:$0xff]  ;;  %v2475_v57 = vmul.f32 %v2299_v27, %v2299_v27  ;;  %v2575_v37 = vmul.f32 %v2428_v56, %v2428_v56 }
  0x11   :  { %5017 = vst [vmem:[#allocation21_spill] sm:$0xff] %v2436_v58  ;;  %5018 = vst [vmem:[#allocation22_spill] sm:$0xff] %v2440_v59  ;;  %v2463_v59 = vmul.f32 %v2284_v24, %v2284_v24  ;;  %v2471_v58 = vmul.f32 %v2294_v26, %v2294_v26  ;;  %v2480_v53 = vld [vmem:[%s4914_s0 + $0x150] sm:$0xff]  ;;  %v2511_v50 = vld [vmem:[%s4914_s0 + $0x168] sm:$0xff]  ;;  %v2587_v36 = vmul.f32 %v2459_v63, %v2459_v63 }
  0x12   :  { %5019 = vst [vmem:[#allocation23_spill] sm:$0xff] %v2444_v60  ;;  %5020 = vst [vmem:[#allocation24_spill] sm:$0xff] %v2454_v62  ;;  %v2467_v60 = vmul.f32 %v2289_v25, %v2289_v25  ;;  %v62_v44 = vld [vmem:[%s4914_s0 + $0x180] sm:$0xff]  ;;  %v65_v38 = vld [vmem:[%s4914_s0 + $0x198] sm:$0xff]  ;;  %v2616_v29 = vmul.f32 %v2511_v50, %v2511_v50 }
  0x13   :  { %5021 = vst [vmem:[#allocation25_spill] sm:$0xff] %v2459_v63  ;;  %5022 = vst [vmem:[#allocation26_spill] sm:$0xff] %v2463_v59  ;;  %v2485_v59 = vld [vmem:[%s4914_s0 + $0x158] sm:$0xff]  ;;  %v68_v31 = vld [vmem:[%s4914_s0 + $0x1b0] sm:$0xff] }
  0x14   :  { %5023 = vst [vmem:[#allocation27_spill] sm:$0xff] %v2467_v60  ;;  %5024 = vst [vmem:[#allocation28_spill] sm:$0xff] %v2471_v58  ;;  %v2490_v60 = vld [vmem:[%s4914_s0 + $0x160] sm:$0xff]  ;;  %v2494_v58 = vmul.f32 %v2320_v32, %v2320_v32  ;;  %v2621_v28 = vld [vmem:[%s4914_s0 + $0x1c8] sm:$0xff] }
  0x15   :  { %5025 = vst [vmem:[#allocation29_spill] sm:$0xff] %v2475_v57  ;;  %5026 = vst [vmem:[#allocation30_spill] sm:$0xff] %v2480_v53  ;;  %v2498_v57 = vmul.f32 %v2325_v33, %v2325_v33  ;;  %v2612_v30 = vmul.f32 %v2490_v60, %v2490_v60  ;;  %v2708_v63 = vld [vmem:[%s4914_s0 + $0x218] sm:$0xff] }
  0x16   :  { %5027 = vst [vmem:[#allocation31_spill] sm:$0xff] %v2485_v59  ;;  %5028 = vst [vmem:[#allocation32_spill] sm:$0xff] %v2490_v60  ;;  %v2676_v60 = vld [vmem:[%s4914_s0 + $0x1f8] sm:$0xff] }
  0x17   :  { %5029 = vst [vmem:[#allocation33_spill] sm:$0xff] %v2494_v58  ;;  %5030 = vst [vmem:[#allocation34_spill] sm:$0xff] %v2498_v57  ;;  %v2516_v58 = vld [vmem:[%s4914_s0 + $0x170] sm:$0xff]  ;;  %v2521_v57 = vld [vmem:[%s4914_s0 + $0x178] sm:$0xff] }
  0x18   :  { %5031 = vst [vmem:[#allocation35_spill] sm:$0xff] %v2502_v52  ;;  %5032 = vst [vmem:[#allocation36_spill] sm:$0xff] %v2506_v51  ;;  %v2525_v52 = vmul.f32 %v2356_v40, %v2356_v40  ;;  %v2529_v51 = vmul.f32 %v2361_v41, %v2361_v41  ;;  %v2641_v23 = vmul.f32 %v2516_v58, %v2516_v58 }
  0x19   :  { %5033 = vst [vmem:[#allocation37_spill] sm:$0xff] %v2511_v50  ;;  %5034 = vst [vmem:[#allocation38_spill] sm:$0xff] %v2516_v58  ;;  %v2645_v22 = vmul.f32 %v2521_v57, %v2521_v57  ;;  %v2650_v50 = vld [vmem:[%s4914_s0 + $0x1e0] sm:$0xff]  ;;  %v2671_v58 = vmul.f32 %v62_v44, %v62_v44 }
  0x1a   :  { %5035 = vst [vmem:[#allocation39_spill] sm:$0xff] %v2521_v57  ;;  %5036 = vst [vmem:[#allocation40_spill] sm:$0xff] %v2525_v52  ;;  %v63_v52 = vld [vmem:[%s4914_s0 + $0x188] sm:$0xff] }
  0x1b   :  { %5037 = vst [vmem:[#allocation41_spill] sm:$0xff] %v2529_v51  ;;  %5038 = vst [vmem:[#allocation42_spill] sm:$0xff] %v2533_v46  ;;  %v64_v51 = vld [vmem:[%s4914_s0 + $0x190] sm:$0xff]  ;;  %v2554_v46 = vmul.f32 %v2397_v49, %v2397_v49 }
  0x1c   :  { %5039 = vst [vmem:[#allocation43_spill] sm:$0xff] %v2537_v45  ;;  %5040 = vst [vmem:[#allocation44_spill] sm:$0xff] %v2550_v43  ;;  %v2558_v45 = vmul.f32 %v2418_v54, %v2418_v54  ;;  %v66_v43 = vld [vmem:[%s4914_s0 + $0x1a0] sm:$0xff] }
  0x1d   :  { %5041 = vst [vmem:[#allocation45_spill] sm:$0xff] %v2554_v46  ;;  %5043 = vst [vmem:[#allocation47_spill] sm:$0xff] %v2562_v39  ;;  %v67_v46 = vld [vmem:[%s4914_s0 + $0x1a8] sm:$0xff]  ;;  %v2583_v39 = vmul.f32 %v2454_v62, %v2454_v62  ;;  %v2669_v57 = vadd.f32 %v66_v43, %v2186_v4  ;;  %v2692_v4 = vadd.f32 %v68_v31, %v2196_v6 }
  0x1e   :  { %5042 = vst [vmem:[#allocation46_spill] sm:$0xff] %v2558_v45  ;;  %5044 = vst [vmem:[#allocation48_spill] sm:$0xff] %v2575_v37  ;;  %v2579_v45 = vmul.f32 %v2449_v61, %v2449_v61  ;;  %v2595_v37 = vld [vmem:[%s4914_s0 + $0x1b8] sm:$0xff]  ;;  %v2732_v62 = vld [vmem:[%s4914_s0 + $0x228] sm:$0xff] }
  0x1f   :  { %5046 = vst [vmem:[#allocation50_spill] sm:$0xff] %v2583_v39  ;;  %5047 = vst [vmem:[#allocation51_spill] sm:$0xff] %v2587_v36  ;;  %v2604_v39 = vmul.f32 %v2480_v53, %v2480_v53  ;;  %v2608_v36 = vmul.f32 %v2485_v59, %v2485_v59  ;;  %v2681_v59 = vld [vmem:[%s4914_s0 + $0x200] sm:$0xff]  ;;  %v2703_v53 = vld [vmem:[%s4914_s0 + $0x210] sm:$0xff] }
  0x20   :  { %5045 = vst [vmem:[#allocation49_spill] sm:$0xff] %v2579_v45  ;;  %v2600_v45 = vld [vmem:[%s4914_s0 + $0x1c0] sm:$0xff]  ;;  %5050 = vst [vmem:[#allocation54_spill] sm:$0xff] %v2612_v30  ;;  %v2634_v30 = vadd.f32 %v62_v44, %v2166_v0  ;;  %v2655_v0 = vld [vmem:[%s4914_s0 + $0x1e8] sm:$0xff]  ;;  %v2696_v44 = vadd.f32 %v2595_v37, %v2201_v7  ;;  %v2721_v7 = vadd.f32 %v2621_v28, %v2211_v9 }
  0x21   :  { %5048 = vst [vmem:[#allocation52_spill] sm:$0xff] %v2604_v39  ;;  %5049 = vst [vmem:[#allocation53_spill] sm:$0xff] %v2608_v36  ;;  %v2626_v39 = vld [vmem:[%s4914_s0 + $0x1d0] sm:$0xff]  ;;  %v2631_v36 = vld [vmem:[%s4914_s0 + $0x1d8] sm:$0xff]  ;;  %v2717_v6 = vadd.f32 %v2600_v45, %v2206_v8 }
  0x22   :  { %5051 = vst [vmem:[#allocation55_spill] sm:$0xff] %v2616_v29  ;;  %v2637_v29 = vadd.f32 %v63_v52, %v2171_v1  ;;  %5052 = vst [vmem:[#allocation56_spill] sm:$0xff] %v2641_v23  ;;  %v2660_v1 = vld [vmem:[%s4914_s0 + $0x1f0] sm:$0xff]  ;;  %v2663_v23 = vadd.f32 %v64_v51, %v2176_v2  ;;  %v2686_v2 = vld [vmem:[%s4914_s0 + $0x208] sm:$0xff] }
  0x23   :  { %5053 = vst [vmem:[#allocation57_spill] sm:$0xff] %v2645_v22  ;;  %v2666_v22 = vadd.f32 %v65_v38, %v2181_v3  ;;  %5054 = vst [vmem:[#allocation58_spill] sm:$0xff] %v2671_v58  ;;  %v2689_v3 = vadd.f32 %v67_v46, %v2191_v5  ;;  %v2698_v58 = vmul.f32 %v63_v52, %v63_v52  ;;  %v2713_v5 = vld [vmem:[%s4914_s0 + $0x220] sm:$0xff]  ;;  %v2737_v8 = vld [vmem:[%s4914_s0 + $0x230] sm:$0xff] }
  0x24   :  { %5056 = vst [vmem:[#allocation60_spill] sm:$0xff] %v2703_v53  ;;  %5057 = vst [vmem:[#allocation61_spill] sm:$0xff] %v2708_v63  ;;  %v2725_v52 = vadd.f32 %v2626_v39, %v2216_v10  ;;  %v2742_v9 = vld [vmem:[%s4914_s0 + $0x238] sm:$0xff]  ;;  %v2746_v10 = vadd.f32 %v2631_v36, %v2221_v11  ;;  %v2766_v11 = vld [vmem:[%s4914_s0 + $0x248] sm:$0xff] }
  0x25   :  { %5055 = vst [vmem:[#allocation59_spill] sm:$0xff] %v2698_v58  ;;  %5058 = vst [vmem:[#allocation62_spill] sm:$0xff] %v2713_v5  ;;  %v2727_v58 = vmul.f32 %v64_v51, %v64_v51  ;;  %v2750_v51 = vadd.f32 %v2650_v50, %v2226_v12  ;;  %v2771_v12 = vld [vmem:[%s4914_s0 + $0x250] sm:$0xff] }
  0x26   :  { %5059 = vst [vmem:[#allocation63_spill] sm:$0xff] %v2721_v7  ;;  %5060 = vst [vmem:[#allocation64_spill] sm:$0xff] %v2725_v52  ;;  %v2756_v52 = vmul.f32 %v65_v38, %v65_v38  ;;  %v2761_v7 = vld [vmem:[%s4914_s0 + $0x240] sm:$0xff]  ;;  %v2779_v38 = vadd.f32 %v2676_v60, %v2241_v15  ;;  %v2800_v15 = vld [vmem:[%s4914_s0 + $0x268] sm:$0xff] }
  0x27   :  { %5061 = vst [vmem:[#allocation65_spill] sm:$0xff] %v2727_v58  ;;  %5062 = vst [vmem:[#allocation66_spill] sm:$0xff] %v2732_v62  ;;  %v2754_v58 = vadd.f32 %v2655_v0, %v2231_v13  ;;  %v2775_v13 = vadd.f32 %v2660_v1, %v2236_v14  ;;  %v2795_v14 = vld [vmem:[%s4914_s0 + $0x260] sm:$0xff] }
  0x28   :  { %5063 = vst [vmem:[#allocation67_spill] sm:$0xff] %v2737_v8  ;;  %5064 = vst [vmem:[#allocation68_spill] sm:$0xff] %v2742_v9 }
  0x29   :  { %5065 = vst [vmem:[#allocation69_spill] sm:$0xff] %v2750_v51  ;;  %5066 = vst [vmem:[#allocation70_spill] sm:$0xff] %v2754_v58  ;;  %v2785_v58 = vmul.f32 %v66_v43, %v66_v43  ;;  %v2790_v51 = vld [vmem:[%s4914_s0 + $0x258] sm:$0xff]  ;;  %v2808_v43 = vadd.f32 %v2703_v53, %v2256_v18  ;;  %v2829_v18 = vld [vmem:[%s4914_s0 + $0x280] sm:$0xff] }
  0x2a   :  { %5067 = vst [vmem:[#allocation71_spill] sm:$0xff] %v2756_v52  ;;  %5068 = vst [vmem:[#allocation72_spill] sm:$0xff] %v2761_v7  ;;  %v2783_v52 = vadd.f32 %v2681_v59, %v2246_v16  ;;  %v2804_v16 = vadd.f32 %v2686_v2, %v2251_v17  ;;  %v2824_v17 = vld [vmem:[%s4914_s0 + $0x278] sm:$0xff]  ;;  %v2848_v53 = vld [vmem:[%s4914_s0 + $0x288] sm:$0xff] }
  0x2b   :  { %5069 = vst [vmem:[#allocation73_spill] sm:$0xff] %v2766_v11  ;;  %5070 = vst [vmem:[#allocation74_spill] sm:$0xff] %v2771_v12 }
  0x2c   :  { %5071 = vst [vmem:[#allocation75_spill] sm:$0xff] %v2779_v38  ;;  %5072 = vst [vmem:[#allocation76_spill] sm:$0xff] %v2783_v52  ;;  %v2814_v52 = vmul.f32 %v67_v46, %v67_v46  ;;  %v2819_v38 = vld [vmem:[%s4914_s0 + $0x270] sm:$0xff]  ;;  %v2837_v46 = vadd.f32 %v2732_v62, %v2271_v21  ;;  %v2858_v21 = vld [vmem:[%s4914_s0 + $0x298] sm:$0xff] }
  0x2d   :  { %5073 = vst [vmem:[#allocation77_spill] sm:$0xff] %v2785_v58  ;;  %5074 = vst [vmem:[#allocation78_spill] sm:$0xff] %v2790_v51  ;;  %v2812_v58 = vadd.f32 %v2708_v63, %v2261_v19  ;;  %v2833_v19 = vadd.f32 %v2713_v5, %v2266_v20  ;;  %v2843_v63 = vmul.f32 %v68_v31, %v68_v31  ;;  %v2853_v20 = vld [vmem:[%s4914_s0 + $0x290] sm:$0xff]  ;;  %v2879_v62 = vld [vmem:[%s4914_s0 + $0x2a0] sm:$0xff] }
  0x2e   :  { %5075 = vst [vmem:[#allocation79_spill] sm:$0xff] %v2795_v14  ;;  %5076 = vst [vmem:[#allocation80_spill] sm:$0xff] %v2800_v15  ;;  %v2866_v31 = vadd.f32 %v2761_v7, %v2294_v26  ;;  %v2889_v26 = vld [vmem:[%s4914_s0 + $0x308] sm:$0xff]  ;;  %v2910_v7 = vmul.f32 %v2600_v45, %v2600_v45  ;;  %v2933_v45 = vadd.f32 %v2819_v38, %v2356_v40  ;;  %v2956_v40 = vld [vmem:[%s4914_s0 + $0x338] sm:$0xff] }
  0x2f   :  { %5077 = vst [vmem:[#allocation81_spill] sm:$0xff] %v2814_v52  ;;  %5078 = vst [vmem:[#allocation82_spill] sm:$0xff] %v2819_v38  ;;  %v2841_v52 = vadd.f32 %v2737_v8, %v2284_v24  ;;  %v2862_v24 = vadd.f32 %v2742_v9, %v2289_v25  ;;  %v2874_v8 = vmul.f32 %v2595_v37, %v2595_v37  ;;  %v2884_v25 = vld [vmem:[%s4914_s0 + $0x300] sm:$0xff]  ;;  %v2915_v9 = vld [vmem:[%s4914_s0 + $0x318] sm:$0xff] }
  0x30   :  { %5079 = vst [vmem:[#allocation83_spill] sm:$0xff] %v2824_v17  ;;  %5080 = vst [vmem:[#allocation84_spill] sm:$0xff] %v2829_v18  ;;  %v2898_v37 = vadd.f32 %v2771_v12, %v2320_v32  ;;  %v2920_v32 = vld [vmem:[%s4914_s0 + $0x320] sm:$0xff]  ;;  %v2977_v38 = vld [vmem:[%s4914_s0 + $0x2b0] sm:$0xff]  ;;  %v3112_v12 = vmul.f32 %v2660_v1, %v2660_v1 }
  0x31   :  { %5081 = vst [vmem:[#allocation85_spill] sm:$0xff] %v2843_v63  ;;  %5082 = vst [vmem:[#allocation86_spill] sm:$0xff] %v2848_v53  ;;  %v2870_v63 = vadd.f32 %v2766_v11, %v2299_v27  ;;  %v2894_v27 = vld [vmem:[%s4914_s0 + $0x310] sm:$0xff]  ;;  %v2906_v11 = vadd.f32 %v2795_v14, %v2330_v34  ;;  %v2929_v34 = vadd.f32 %v2800_v15, %v2335_v35 }
  0x32   :  { %5083 = vst [vmem:[#allocation87_spill] sm:$0xff] %v2853_v20  ;;  %5084 = vst [vmem:[#allocation88_spill] sm:$0xff] %v2858_v21  ;;  %v2941_v14 = vmul.f32 %v2621_v28, %v2621_v28  ;;  %v2951_v35 = vld [vmem:[%s4914_s0 + $0x330] sm:$0xff]  ;;  %v2964_v28 = vadd.f32 %v2848_v53, %v2387_v47  ;;  %v2987_v47 = vld [vmem:[%s4914_s0 + $0x2c0] sm:$0xff] }
  0x33   :  { %5085 = vst [vmem:[#allocation89_spill] sm:$0xff] %v2874_v8  ;;  %5086 = vst [vmem:[#allocation90_spill] sm:$0xff] %v2879_v62  ;;  %v2902_v8 = vadd.f32 %v2790_v51, %v2325_v33  ;;  %v2925_v33 = vld [vmem:[%s4914_s0 + $0x328] sm:$0xff]  ;;  %v3117_v5 = vld [vmem:[%s4914_s0 + $0x350] sm:$0xff] }
  0x34   :  { %5087 = vst [vmem:[#allocation91_spill] sm:$0xff] %v2884_v25  ;;  %5088 = vst [vmem:[#allocation92_spill] sm:$0xff] %v2889_v26  ;;  %v2946_v51 = vld [vmem:[%s4914_s0 + $0x2a8] sm:$0xff] }
  0x35   :  { %5089 = vst [vmem:[#allocation93_spill] sm:$0xff] %v2894_v27  ;;  %5090 = vst [vmem:[#allocation94_spill] sm:$0xff] %v2910_v7  ;;  %v2937_v7 = vadd.f32 %v2824_v17, %v2361_v41  ;;  %v2960_v41 = vadd.f32 %v2829_v18, %v2366_v42  ;;  %v2972_v17 = vmul.f32 %v2626_v39, %v2626_v39  ;;  %v2982_v42 = vld [vmem:[%s4914_s0 + $0x2b8] sm:$0xff]  ;;  %v3004_v53 = vld [vmem:[%s4914_s0 + $0x2c8] sm:$0xff] }
  0x36   :  { %5091 = vst [vmem:[#allocation95_spill] sm:$0xff] %v2915_v9  ;;  %5092 = vst [vmem:[#allocation96_spill] sm:$0xff] %v2920_v32  ;;  %v167_v39 = vadd.f32 %v2637_v29, %v2889_v26  ;;  %v175_v18 = vadd.f32 %v2663_v23, %v2894_v27  ;;  %v191_v29 = vadd.f32 %v2669_v57, %v2920_v32  ;;  %v3034_v57 = vld [vmem:[%s4914_s0 + $0x2d8] sm:$0xff] }
  0x37   :  { %5093 = vst [vmem:[#allocation97_spill] sm:$0xff] %v2925_v33  ;;  %5094 = vst [vmem:[#allocation98_spill] sm:$0xff] %v2941_v14  ;;  %v2968_v14 = vadd.f32 %v2853_v20, %v2392_v48  ;;  %v159_v48 = vadd.f32 %v2634_v30, %v2884_v25  ;;  %v2999_v20 = vmul.f32 %v2631_v36, %v2631_v36  ;;  %v3078_v32 = vld [vmem:[%s4914_s0 + $0x2f8] sm:$0xff] }
  0x38   :  { %5095 = vst [vmem:[#allocation99_spill] sm:$0xff] %v2946_v51  ;;  %5096 = vst [vmem:[#allocation100_spill] sm:$0xff] %v2951_v35  ;;  %v183_v30 = vadd.f32 %v2666_v22, %v2915_v9  ;;  %v207_v36 = vadd.f32 %v2692_v4, %v2951_v35  ;;  %v3020_v26 = vadd.f32 %v2879_v62, %v2418_v54  ;;  %v3029_v22 = vld [vmem:[%s4914_s0 + $0x2d0] sm:$0xff]  ;;  %v168_v35 = vrot.slane %v167_v39, 4 }
  0x39   :  { %5097 = vst [vmem:[#allocation101_spill] sm:$0xff] %v2956_v40  ;;  %5098 = vst [vmem:[#allocation102_spill] sm:$0xff] %v2960_v41  ;;  %v3024_v23 = vadd.f32 %v2946_v51, %v2423_v55  ;;  %v3042_v54 = vadd.f32 %v2982_v42, %v2449_v61  ;;  %v5114_v55 = vld [vmem:[#allocation24_spill] sm:$0xff]  ;;  %v176_v9 = vrot.slane %v175_v18, 4  ;;  %v192_v25 = vrot.slane %v191_v29, 4  ;;  %v5124_v51 = vld [vmem:[#allocation30_spill] sm:$0xff] }
  0x3a   :  { %5099 = vst [vmem:[#allocation103_spill] sm:$0xff] %v2964_v28  ;;  %5100 = vst [vmem:[#allocation104_spill] sm:$0xff] %v2968_v14  ;;  %v3046_v4 = vadd.f32 %v2987_v47, %v5114_v55  ;;  %v3065_v61 = vld [vmem:[%s4914_s0 + $0x2f0] sm:$0xff]  ;;  %v160_v55 = vrot.slane %v159_v48, 4  ;;  %v184_v27 = vrot.slane %v183_v30, 4  ;;  %v3082_v62 = vadd.f32 %v3029_v22, %v5124_v51  ;;  %v5132_v51 = vld [vmem:[#allocation37_spill] sm:$0xff] }
  0x3b   :  { %5101 = vst [vmem:[#allocation105_spill] sm:$0xff] %v2972_v17  ;;  %5102 = vst [vmem:[#allocation106_spill] sm:$0xff] %v2977_v38  ;;  %v2995_v17 = vadd.f32 %v2858_v21, %v2397_v49  ;;  %v199_v49 = vadd.f32 %v2689_v3, %v2925_v33  ;;  %v3038_v3 = vadd.f32 %v2977_v38, %v2428_v56  ;;  %v3060_v56 = vld [vmem:[%s4914_s0 + $0x2e8] sm:$0xff]  ;;  %v5120_v33 = vld [vmem:[#allocation25_spill] sm:$0xff] }
  0x3c   :  { %5103 = vst [vmem:[#allocation107_spill] sm:$0xff] %v2982_v42  ;;  %5104 = vst [vmem:[#allocation108_spill] sm:$0xff] %v2987_v47  ;;  %v208_v42 = vrot.slane %v207_v36, 4  ;;  %v5130_v21 = vld [vmem:[#allocation32_spill] sm:$0xff] }
  0x3d   :  { %5105 = vst [vmem:[#allocation109_spill] sm:$0xff] %v2995_v17  ;;  %5106 = vst [vmem:[#allocation110_spill] sm:$0xff] %v2999_v20  ;;  %v215_v20 = vadd.f32 %v2696_v44, %v2956_v40  ;;  %v3050_v44 = vmul.f32 %v2650_v50, %v2650_v50  ;;  %v3055_v40 = vld [vmem:[%s4914_s0 + $0x2e0] sm:$0xff]  ;;  %v3069_v50 = vadd.f32 %v3004_v53, %v5120_v33  ;;  %v200_v47 = vrot.slane %v199_v49, 4  ;;  %v5126_v33 = vld [vmem:[#allocation31_spill] sm:$0xff] }
  0x3e   :  { %5107 = vst [vmem:[#allocation111_spill] sm:$0xff] %v3004_v53  ;;  %5108 = vst [vmem:[#allocation112_spill] sm:$0xff] %v3020_v26  ;;  %v3086_v53 = vadd.f32 %v3034_v57, %v5126_v33  ;;  %v3100_v15 = vadd.f32 %v3055_v40, %v5130_v21  ;;  %v5134_v33 = vld [vmem:[#allocation38_spill] sm:$0xff]  ;;  %v3122_v21 = vld [vmem:[%s4914_s0 + $0x358] sm:$0xff] }
  0x3f   :  { %5109 = vst [vmem:[#allocation113_spill] sm:$0xff] %v3024_v23  ;;  %5110 = vst [vmem:[#allocation114_spill] sm:$0xff] %v3029_v22  ;;  %v216_v38 = vrot.slane %v215_v20, 4  ;;  %v3104_v22 = vadd.f32 %v3060_v56, %v5132_v51  ;;  %v3127_v51 = vld [vmem:[%s4914_s0 + $0x360] sm:$0xff] }
  0x40   :  { %5111 = vst [vmem:[#allocation115_spill] sm:$0xff] %v3034_v57  ;;  %5112 = vst [vmem:[#allocation116_spill] sm:$0xff] %v3038_v3  ;;  %v3108_v57 = vadd.f32 %v3065_v61, %v5134_v33  ;;  %v161_v33 = vadd.f32 %v160_v55, %v159_v48 }
  0x41   :  { %5113 = vst [vmem:[#allocation117_spill] sm:$0xff] %v3042_v54  ;;  %5115 = vst [vmem:[#allocation24_spill] sm:$0xff] %v3046_v4  ;;  %v217_v48 = vadd.f32 %v216_v38, %v215_v20 }
  0x42   :  { %5116 = vst [vmem:[#allocation118_spill] sm:$0xff] %v3050_v44  ;;  %5117 = vst [vmem:[#allocation119_spill] sm:$0xff] %v3055_v40  ;;  %v3073_v44 = vmul.f32 %v2655_v0, %v2655_v0  ;;  %v3091_v0 = vld [vmem:[%s4914_s0 + $0x340] sm:$0xff]  ;;  %v3140_v40 = vld [vmem:[%s4914_s0 + $0x368] sm:$0xff]  ;;  %v162_v38 = vrot.slane %v161_v33, 2 }
  0x43   :  { %5118 = vst [vmem:[#allocation120_spill] sm:$0xff] %v3060_v56  ;;  %5119 = vst [vmem:[#allocation121_spill] sm:$0xff] %v3065_v61  ;;  %v169_v61 = vadd.f32 %v168_v35, %v167_v39  ;;  %v5140_v56 = vld [vmem:[#allocation39_spill] sm:$0xff]  ;;  %v223_v35 = vadd.f32 %v2717_v6, %v3091_v0  ;;  %v3159_v6 = vld [vmem:[%s4914_s0 + $0x370] sm:$0xff] }
  0x44   :  { %5121 = vst [vmem:[#allocation25_spill] sm:$0xff] %v3069_v50  ;;  %5122 = vst [vmem:[#allocation122_spill] sm:$0xff] %v3073_v44  ;;  %v3096_v44 = vld [vmem:[%s4914_s0 + $0x348] sm:$0xff]  ;;  %v3131_v1 = vadd.f32 %v3078_v32, %v5140_v56 }
  0x45   :  { %5123 = vst [vmem:[#allocation123_spill] sm:$0xff] %v3078_v32  ;;  %5125 = vst [vmem:[#allocation30_spill] sm:$0xff] %v3082_v62  ;;  %v209_v62 = vadd.f32 %v208_v42, %v207_v36  ;;  %v5144_v39 = vld [vmem:[#allocation63_spill] sm:$0xff]  ;;  %v5146_v32 = vld [vmem:[#allocation69_spill] sm:$0xff]  ;;  %v170_v20 = vrot.slane %v169_v61, 2  ;;  %v224_v36 = vrot.slane %v223_v35, 4 }
  0x46   :  { %5127 = vst [vmem:[#allocation31_spill] sm:$0xff] %v3086_v53  ;;  %5128 = vst [vmem:[#allocation124_spill] sm:$0xff] %v3091_v0  ;;  %v201_v53 = vadd.f32 %v200_v47, %v199_v49  ;;  %v231_v56 = vadd.f32 %v5144_v39, %v3096_v44  ;;  %v218_v49 = vrot.slane %v217_v48, 2 }
  0x47   :  { %5129 = vst [vmem:[#allocation125_spill] sm:$0xff] %v3096_v44  ;;  %5131 = vst [vmem:[#allocation32_spill] sm:$0xff] %v3100_v15  ;;  %v193_v15 = vadd.f32 %v192_v25, %v191_v29  ;;  %v5149_v25 = vld [vmem:[#allocation70_spill] sm:$0xff]  ;;  %v210_v29 = vrot.slane %v209_v62, 2  ;;  %v225_v3 = vadd.f32 %v224_v36, %v223_v35 }
  0x48   :  { %5133 = vst [vmem:[#allocation37_spill] sm:$0xff] %v3104_v22  ;;  %5135 = vst [vmem:[#allocation38_spill] sm:$0xff] %v3108_v57  ;;  %v177_v57 = vadd.f32 %v176_v9, %v175_v18  ;;  %v185_v22 = vadd.f32 %v184_v27, %v183_v30  ;;  %v255_v9 = vadd.f32 %v5146_v32, %v3127_v51  ;;  %v3170_v32 = vld [vmem:[%s4914_s0 + $0x378] sm:$0xff]  ;;  %v202_v30 = vrot.slane %v201_v53, 2 }
  0x49   :  { %5136 = vst [vmem:[#allocation126_spill] sm:$0xff] %v3112_v12  ;;  %5137 = vst [vmem:[#allocation127_spill] sm:$0xff] %v3117_v5  ;;  %v3135_v12 = vmul.f32 %v2676_v60, %v2676_v60  ;;  %v5145_v60 = vld [vmem:[#allocation64_spill] sm:$0xff]  ;;  %v3154_v18 = vmul.f32 %v2681_v59, %v2681_v59  ;;  %v263_v27 = vadd.f32 %v5149_v25, %v3140_v40  ;;  %v194_v47 = vrot.slane %v193_v15, 2 }
  0x4a   :  { %5138 = vst [vmem:[#allocation128_spill] sm:$0xff] %v3122_v21  ;;  %5139 = vst [vmem:[#allocation129_spill] sm:$0xff] %v3127_v51  ;;  %v239_v55 = vadd.f32 %v5145_v60, %v3117_v5  ;;  %v178_v59 = vrot.slane %v177_v57, 2  ;;  %v186_v42 = vrot.slane %v185_v22, 2  ;;  %v232_v39 = vrot.slane %v231_v56, 4 }
  0x4b   :  { %5141 = vst [vmem:[#allocation39_spill] sm:$0xff] %v3131_v1  ;;  %5142 = vst [vmem:[#allocation130_spill] sm:$0xff] %v3135_v12  ;;  %v247_v12 = vadd.f32 %v2746_v10, %v3122_v21  ;;  %v3165_v10 = vmul.f32 %v2686_v2, %v2686_v2  ;;  %v256_v25 = vrot.slane %v255_v9, 4  ;;  %v271_v2 = vadd.f32 %v2775_v13, %v3159_v6  ;;  %v5151_v21 = vld [vmem:[#allocation75_spill] sm:$0xff] }
  0x4c   :  { %5143 = vst [vmem:[#allocation131_spill] sm:$0xff] %v3140_v40  ;;  %5147 = vst [vmem:[#allocation63_spill] sm:$0xff] %v3154_v18  ;;  %v240_v60 = vrot.slane %v239_v55, 4  ;;  %v171_v40 = vadd.f32 %v170_v20, %v169_v61  ;;  %v264_v51 = vrot.slane %v263_v27, 4  ;;  %v279_v5 = vadd.f32 %v5151_v21, %v3170_v32 }
  0x4d   :  { %5148 = vst [vmem:[#allocation64_spill] sm:$0xff] %v3159_v6  ;;  %5150 = vst [vmem:[#allocation69_spill] sm:$0xff] %v3165_v10  ;;  %v248_v18 = vrot.slane %v247_v12, 4  ;;  %v163_v10 = vadd.f32 %v162_v38, %v161_v33  ;;  %v179_v44 = vadd.f32 %v178_v59, %v177_v57  ;;  %v187_v0 = vadd.f32 %v186_v42, %v185_v22  ;;  %v3206_v59 = vld [vmem:[%s4914_s0 + $0x398] sm:$0xff]  ;;  %v3211_v42 = vld [vmem:[%s4914_s0 + $0x3a0] sm:$0xff] }
  0x4e   :  { %v195_v1 = vadd.f32 %v194_v47, %v193_v15  ;;  %v203_v50 = vadd.f32 %v202_v30, %v201_v53  ;;  %v211_v4 = vadd.f32 %v210_v29, %v209_v62  ;;  %v219_v54 = vadd.f32 %v218_v49, %v217_v48  ;;  %v3225_v47 = vld [vmem:[%s4914_s0 + $0x3b0] sm:$0xff]  ;;  %v3230_v30 = vld [vmem:[%s4914_s0 + $0x3b8] sm:$0xff] }
  0x4f   :  { %v233_v23 = vadd.f32 %v232_v39, %v231_v56  ;;  %v241_v26 = vadd.f32 %v240_v60, %v239_v55  ;;  %v249_v17 = vadd.f32 %v248_v18, %v247_v12  ;;  %v257_v14 = vadd.f32 %v256_v25, %v255_v9 }
  0x50   :  { %v272_v28 = vrot.slane %v271_v2, 4  ;;  %v164_v41 = vrot.slane %v163_v10, 1  ;;  %v172_v13 = vrot.slane %v171_v40, 1  ;;  %v265_v33 = vadd.f32 %v264_v51, %v263_v27  ;;  %v3183_v51 = vld [vmem:[%s4914_s0 + $0x380] sm:$0xff]  ;;  %v3188_v27 = vld [vmem:[%s4914_s0 + $0x388] sm:$0xff] }
  0x51   :  { %v280_v61 = vrot.slane %v279_v5, 4  ;;  %v180_v38 = vrot.slane %v179_v44, 1  ;;  %v188_v20 = vrot.slane %v187_v0, 1  ;;  %v196_v6 = vrot.slane %v195_v1, 1 }
  0x52   :  { %v204_v21 = vrot.slane %v203_v50, 1  ;;  %v212_v57 = vrot.slane %v211_v4, 1  ;;  %v220_v22 = vrot.slane %v219_v54, 1  ;;  %v226_v15 = vrot.slane %v225_v3, 2 }
  0x53   :  { %v234_v53 = vrot.slane %v233_v23, 2  ;;  %v242_v62 = vrot.slane %v241_v26, 2  ;;  %v250_v48 = vrot.slane %v249_v17, 2  ;;  %v258_v35 = vrot.slane %v257_v14, 2 }
  0x54   :  { %v273_v56 = vadd.f32 %v272_v28, %v271_v2  ;;  %v3176_v55 = vadd.f32 %v164_v41, %v163_v10  ;;  %v3178_v12 = vadd.f32 %v172_v13, %v171_v40  ;;  %v266_v9 = vrot.slane %v265_v33, 2  ;;  %v3193_v28 = vld [vmem:[%s4914_s0 + $0x390] sm:$0xff] }
  0x55   :  { %v281_v18 = vadd.f32 %v280_v61, %v279_v5  ;;  %v3195_v41 = vadd.f32 %v180_v38, %v179_v44  ;;  %v3197_v40 = vadd.f32 %v188_v20, %v187_v0  ;;  %v3199_v5 = vadd.f32 %v196_v6, %v195_v1  ;;  %v3216_v44 = vld [vmem:[%s4914_s0 + $0x3a8] sm:$0xff] }
  0x56   :  { %5152 = vst [vmem:[#allocation70_spill] sm:$0xff] %v3176_v55  ;;  %5153 = vst [vmem:[#allocation75_spill] sm:$0xff] %v3178_v12  ;;  %v3201_v10 = vadd.f32 %v204_v21, %v203_v50  ;;  %v3218_v0 = vadd.f32 %v212_v57, %v211_v4  ;;  %v3220_v1 = vadd.f32 %v220_v22, %v219_v54  ;;  %v274_v39 = vrot.slane %v273_v56, 2  ;;  %v5160_v54 = vld [vmem:[#allocation76_spill] sm:$0xff] }
  0x57   :  { %5154 = vst [vmem:[#allocation132_spill] sm:$0xff] %v3195_v41  ;;  %5155 = vst [vmem:[#allocation133_spill] sm:$0xff] %v3197_v40  ;;  %v227_v50 = vadd.f32 %v226_v15, %v225_v3  ;;  %v235_v6 = vadd.f32 %v234_v53, %v233_v23  ;;  %v243_v29 = vadd.f32 %v242_v62, %v241_v26  ;;  %v282_v60 = vrot.slane %v281_v18, 2 }
  0x58   :  { %5156 = vst [vmem:[#allocation134_spill] sm:$0xff] %v3199_v5  ;;  %5157 = vst [vmem:[#allocation135_spill] sm:$0xff] %v3201_v10  ;;  %v251_v49 = vadd.f32 %v250_v48, %v249_v17  ;;  %v259_v36 = vadd.f32 %v258_v35, %v257_v14  ;;  %v267_v4 = vadd.f32 %v266_v9, %v265_v33 }
  0x59   :  { %5158 = vst [vmem:[#allocation136_spill] sm:$0xff] %v3218_v0  ;;  %5159 = vst [vmem:[#allocation137_spill] sm:$0xff] %v3220_v1  ;;  %v287_v3 = vadd.f32 %v5160_v54, %v3183_v51  ;;  %v295_v23 = vadd.f32 %v2804_v16, %v3188_v27  ;;  %v303_v25 = vadd.f32 %v2808_v43, %v3193_v28  ;;  %v228_v17 = vrot.slane %v227_v50, 1 }
  0x5a   :  { %v311_v2 = vadd.f32 %v2812_v58, %v3206_v59  ;;  %v319_v26 = vadd.f32 %v2833_v19, %v3211_v42  ;;  %v327_v14 = vadd.f32 %v2837_v46, %v3216_v44  ;;  %v236_v13 = vrot.slane %v235_v6, 1 }
  0x5b   :  { %v335_v33 = vadd.f32 %v2841_v52, %v3225_v47  ;;  %v343_v16 = vadd.f32 %v2862_v24, %v3230_v30  ;;  %v244_v61 = vrot.slane %v243_v29, 1  ;;  %v252_v38 = vrot.slane %v251_v49, 1  ;;  %v3255_v24 = vld [vmem:[%s4914_s0 + $0x3c0] sm:$0xff] }
  0x5c   :  { %v260_v43 = vrot.slane %v259_v36, 1  ;;  %v275_v20 = vadd.f32 %v274_v39, %v273_v56  ;;  %v268_v21 = vrot.slane %v267_v4, 1  ;;  %v283_v58 = vadd.f32 %v282_v60, %v281_v18  ;;  %v3260_v56 = vld [vmem:[%s4914_s0 + $0x3c8] sm:$0xff]  ;;  %v3271_v39 = vld [vmem:[%s4914_s0 + $0x3d0] sm:$0xff]  ;;  %v3276_v60 = vld [vmem:[%s4914_s0 + $0x3d8] sm:$0xff] }
  0x5d   :  { %v288_v57 = vrot.slane %v287_v3, 4  ;;  %v296_v22 = vrot.slane %v295_v23, 4  ;;  %v304_v19 = vrot.slane %v303_v25, 4  ;;  %v312_v15 = vrot.slane %v311_v2, 4 }
  0x5e   :  { %v320_v53 = vrot.slane %v319_v26, 4  ;;  %v328_v46 = vrot.slane %v327_v14, 4  ;;  %v3248_v62 = vadd.f32 %v228_v17, %v227_v50  ;;  %v3250_v48 = vadd.f32 %v236_v13, %v235_v6  ;;  %v3288_v13 = vld [vmem:[%s4914_s0 + $0x3e8] sm:$0xff] }
  0x5f   :  { %v336_v52 = vrot.slane %v335_v33, 4  ;;  %v344_v35 = vrot.slane %v343_v16, 4  ;;  %v3262_v9 = vadd.f32 %v244_v61, %v243_v29  ;;  %v3264_v18 = vadd.f32 %v252_v38, %v251_v49  ;;  %v3281_v29 = vld [vmem:[%s4914_s0 + $0x3e0] sm:$0xff] }
  0x60   :  { %5161 = vst [vmem:[#allocation76_spill] sm:$0xff] %v3248_v62  ;;  %5162 = vst [vmem:[#allocation138_spill] sm:$0xff] %v3250_v48  ;;  %v3266_v50 = vadd.f32 %v260_v43, %v259_v36  ;;  %v276_v6 = vrot.slane %v275_v20, 1  ;;  %v3283_v49 = vadd.f32 %v268_v21, %v267_v4  ;;  %v284_v36 = vrot.slane %v283_v58, 1 }
  0x61   :  { %5163 = vst [vmem:[#allocation139_spill] sm:$0xff] %v3262_v9  ;;  %5164 = vst [vmem:[#allocation140_spill] sm:$0xff] %v3264_v18  ;;  %v289_v54 = vadd.f32 %v288_v57, %v287_v3  ;;  %v297_v17 = vadd.f32 %v296_v22, %v295_v23  ;;  %v305_v61 = vadd.f32 %v304_v19, %v303_v25 }
  0x62   :  { %5165 = vst [vmem:[#allocation141_spill] sm:$0xff] %v3266_v50  ;;  %5166 = vst [vmem:[#allocation142_spill] sm:$0xff] %v3283_v49  ;;  %v313_v38 = vadd.f32 %v312_v15, %v311_v2  ;;  %v321_v43 = vadd.f32 %v320_v53, %v319_v26  ;;  %v329_v50 = vadd.f32 %v328_v46, %v327_v14  ;;  %v3305_v2 = vld [vmem:[%s4914_s0 + $0x3f0] sm:$0xff] }
  0x63   :  { %v337_v18 = vadd.f32 %v336_v52, %v335_v33  ;;  %v345_v9 = vadd.f32 %v344_v35, %v343_v16  ;;  %v351_v48 = vadd.f32 %v2866_v31, %v3255_v24  ;;  %v359_v4 = vadd.f32 %v2870_v63, %v3260_v56  ;;  %5168 = vst [vmem:[#allocation144_spill] sm:$0xff] %v3305_v2 }
  0x64   :  { %v3294_v21 = vadd.f32 %v276_v6, %v275_v20  ;;  %v367_v3 = vadd.f32 %v2898_v37, %v3271_v39  ;;  %v375_v23 = vadd.f32 %v2902_v8, %v3276_v60  ;;  %v383_v25 = vadd.f32 %v2906_v11, %v3281_v29  ;;  %v3314_v37 = vld [vmem:[%s4914_s0 + $0x3f8] sm:$0xff] }
  0x65   :  { %v3307_v31 = vadd.f32 %v284_v36, %v283_v58  ;;  %v290_v26 = vrot.slane %v289_v54, 2  ;;  %v298_v63 = vrot.slane %v297_v17, 2  ;;  %v391_v14 = vadd.f32 %v2929_v34, %v3288_v13  ;;  %5170 = vst [vmem:[#allocation146_spill] sm:$0xff] %v3314_v37 }
  0x66   :  { %5167 = vst [vmem:[#allocation143_spill] sm:$0xff] %v3294_v21  ;;  %v306_v8 = vrot.slane %v305_v61, 2  ;;  %v314_v33 = vrot.slane %v313_v38, 2  ;;  %v322_v11 = vrot.slane %v321_v43, 2  ;;  %v330_v16 = vrot.slane %v329_v50, 2 }
  0x67   :  { %5169 = vst [vmem:[#allocation145_spill] sm:$0xff] %v3307_v31  ;;  %v338_v20 = vrot.slane %v337_v18, 2  ;;  %v346_v57 = vrot.slane %v345_v9, 2  ;;  %v352_v22 = vrot.slane %v351_v48, 4  ;;  %v360_v19 = vrot.slane %v359_v4, 4 }
  0x68   :  { %v368_v58 = vrot.slane %v367_v3, 4  ;;  %v376_v15 = vrot.slane %v375_v23, 4  ;;  %v384_v53 = vrot.slane %v383_v25, 4  ;;  %v399_v46 = vadd.f32 %v2933_v45, %v3305_v2 }
  0x69   :  { %v291_v34 = vadd.f32 %v290_v26, %v289_v54  ;;  %v299_v52 = vadd.f32 %v298_v63, %v297_v17  ;;  %v392_v35 = vrot.slane %v391_v14, 4  ;;  %v407_v6 = vadd.f32 %v2937_v7, %v3314_v37 }
  0x6a   :  { %v307_v36 = vadd.f32 %v306_v8, %v305_v61  ;;  %v315_v31 = vadd.f32 %v314_v33, %v313_v38  ;;  %v323_v21 = vadd.f32 %v322_v11, %v321_v43  ;;  %v331_v49 = vadd.f32 %v330_v16, %v329_v50  ;;  %v3332_v33 = vld [vmem:[%s4914_s0 + $0x408] sm:$0xff] }
  0x6b   :  { %v339_v62 = vadd.f32 %v338_v20, %v337_v18  ;;  %v347_v1 = vadd.f32 %v346_v57, %v345_v9  ;;  %v353_v0 = vadd.f32 %v352_v22, %v351_v48  ;;  %v361_v10 = vadd.f32 %v360_v19, %v359_v4  ;;  %5174 = vst [vmem:[#allocation150_spill] sm:$0xff] %v3332_v33  ;;  %v3350_v57 = vld [vmem:[%s4914_s0 + $0x418] sm:$0xff]  ;;  %v3355_v22 = vld [vmem:[%s4914_s0 + $0x420] sm:$0xff]  ;;  %v3360_v19 = vld [vmem:[%s4914_s0 + $0x428] sm:$0xff] }
  0x6c   :  { %v369_v5 = vadd.f32 %v368_v58, %v367_v3  ;;  %v377_v40 = vadd.f32 %v376_v15, %v375_v23  ;;  %v385_v41 = vadd.f32 %v384_v53, %v383_v25  ;;  %v400_v12 = vrot.slane %v399_v46, 4  ;;  %5180 = vst [vmem:[#allocation156_spill] sm:$0xff] %v3350_v57  ;;  %5181 = vst [vmem:[#allocation157_spill] sm:$0xff] %v3355_v22  ;;  %v3369_v58 = vld [vmem:[%s4914_s0 + $0x430] sm:$0xff]  ;;  %v3374_v15 = vld [vmem:[%s4914_s0 + $0x438] sm:$0xff] }
  0x6d   :  { %v292_v55 = vrot.slane %v291_v34, 1  ;;  %v300_v45 = vrot.slane %v299_v52, 1  ;;  %v393_v54 = vadd.f32 %v392_v35, %v391_v14  ;;  %v408_v17 = vrot.slane %v407_v6, 4  ;;  %v3327_v14 = vld [vmem:[%s4914_s0 + $0x400] sm:$0xff]  ;;  %5182 = vst [vmem:[#allocation158_spill] sm:$0xff] %v3360_v19  ;;  %5185 = vst [vmem:[#allocation161_spill] sm:$0xff] %v3369_v58 }
  0x6e   :  { %v308_v26 = vrot.slane %v307_v36, 1  ;;  %v316_v63 = vrot.slane %v315_v31, 1  ;;  %v324_v2 = vrot.slane %v323_v21, 1  ;;  %v332_v7 = vrot.slane %v331_v49, 1  ;;  %5173 = vst [vmem:[#allocation149_spill] sm:$0xff] %v3327_v14  ;;  %5186 = vst [vmem:[#allocation162_spill] sm:$0xff] %v3374_v15 }
  0x6f   :  { %v340_v61 = vrot.slane %v339_v62, 1  ;;  %v348_v38 = vrot.slane %v347_v1, 1  ;;  %v354_v43 = vrot.slane %v353_v0, 2  ;;  %v362_v50 = vrot.slane %v361_v10, 2 }
  0x70   :  { %v370_v18 = vrot.slane %v369_v5, 2  ;;  %v378_v9 = vrot.slane %v377_v40, 2  ;;  %v386_v48 = vrot.slane %v385_v41, 2  ;;  %v401_v4 = vadd.f32 %v400_v12, %v399_v46  ;;  %v3337_v12 = vld [vmem:[%s4914_s0 + $0x410] sm:$0xff] }
  0x71   :  { %v3320_v3 = vadd.f32 %v292_v55, %v291_v34  ;;  %v3322_v23 = vadd.f32 %v300_v45, %v299_v52  ;;  %v394_v25 = vrot.slane %v393_v54, 2  ;;  %v409_v8 = vadd.f32 %v408_v17, %v407_v6  ;;  %5175 = vst [vmem:[#allocation151_spill] sm:$0xff] %v3337_v12  ;;  %v5190_v17 = vld [vmem:[#allocation109_spill] sm:$0xff] }
  0x72   :  { %v3339_v55 = vadd.f32 %v308_v26, %v307_v36  ;;  %v3341_v11 = vadd.f32 %v316_v63, %v315_v31  ;;  %v3343_v16 = vadd.f32 %v324_v2, %v323_v21  ;;  %v3345_v20 = vadd.f32 %v332_v7, %v331_v49  ;;  %v5189_v36 = vld [vmem:[#allocation104_spill] sm:$0xff] }
  0x73   :  { %5171 = vst [vmem:[#allocation147_spill] sm:$0xff] %v3320_v3  ;;  %5172 = vst [vmem:[#allocation148_spill] sm:$0xff] %v3322_v23  ;;  %v3362_v31 = vadd.f32 %v340_v61, %v339_v62  ;;  %v3364_v21 = vadd.f32 %v348_v38, %v347_v1  ;;  %v355_v49 = vadd.f32 %v354_v43, %v353_v0  ;;  %v402_v52 = vrot.slane %v401_v4, 2  ;;  %v5187_v1 = vld [vmem:[#allocation102_spill] sm:$0xff]  ;;  %v5191_v63 = vld [vmem:[#allocation112_spill] sm:$0xff] }
  0x74   :  { %5176 = vst [vmem:[#allocation152_spill] sm:$0xff] %v3339_v55  ;;  %5177 = vst [vmem:[#allocation153_spill] sm:$0xff] %v3341_v11  ;;  %v363_v2 = vadd.f32 %v362_v50, %v361_v10  ;;  %v371_v53 = vadd.f32 %v370_v18, %v369_v5  ;;  %v379_v46 = vadd.f32 %v378_v9, %v377_v40  ;;  %v410_v35 = vrot.slane %v409_v8, 2  ;;  %v5188_v10 = vld [vmem:[#allocation103_spill] sm:$0xff]  ;;  %v5193_v61 = vld [vmem:[#allocation116_spill] sm:$0xff] }
  0x75   :  { %5178 = vst [vmem:[#allocation154_spill] sm:$0xff] %v3343_v16  ;;  %5179 = vst [vmem:[#allocation155_spill] sm:$0xff] %v3345_v20  ;;  %v387_v34 = vadd.f32 %v386_v48, %v385_v41  ;;  %v395_v62 = vadd.f32 %v394_v25, %v393_v54  ;;  %v415_v0 = vadd.f32 %v5187_v1, %v3327_v14  ;;  %v5192_v41 = vld [vmem:[#allocation113_spill] sm:$0xff]  ;;  %v356_v54 = vrot.slane %v355_v49, 1  ;;  %v5207_v55 = vld [vmem:[#allocation24_spill] sm:$0xff] }
  0x76   :  { %5183 = vst [vmem:[#allocation159_spill] sm:$0xff] %v3362_v31  ;;  %5184 = vst [vmem:[#allocation160_spill] sm:$0xff] %v3364_v21  ;;  %v423_v6 = vadd.f32 %v5188_v10, %v3332_v33  ;;  %v431_v45 = vadd.f32 %v5189_v36, %v3337_v12  ;;  %v439_v26 = vadd.f32 %v5190_v17, %v3350_v57  ;;  %v364_v7 = vrot.slane %v363_v2, 1  ;;  %v5194_v43 = vld [vmem:[#allocation117_spill] sm:$0xff] }
  0x77   :  { %v447_v5 = vadd.f32 %v5191_v63, %v3355_v22  ;;  %v455_v40 = vadd.f32 %v5192_v41, %v3360_v19  ;;  %v463_v38 = vadd.f32 %v5193_v61, %v3369_v58  ;;  %v471_v50 = vadd.f32 %v5194_v43, %v3374_v15  ;;  %v3399_v43 = vld [vmem:[%s4914_s0 + $0x440] sm:$0xff] }
  0x78   :  { %v372_v18 = vrot.slane %v371_v53, 1  ;;  %v380_v9 = vrot.slane %v379_v46, 1  ;;  %v388_v48 = vrot.slane %v387_v34, 1  ;;  %v403_v25 = vadd.f32 %v402_v52, %v401_v4  ;;  %5197 = vst [vmem:[#allocation104_spill] sm:$0xff] %v3399_v43  ;;  %v3404_v4 = vld [vmem:[%s4914_s0 + $0x448] sm:$0xff] }
  0x79   :  { %v396_v1 = vrot.slane %v395_v62, 1  ;;  %v411_v10 = vadd.f32 %v410_v35, %v409_v8  ;;  %v416_v36 = vrot.slane %v415_v0, 4  ;;  %v424_v17 = vrot.slane %v423_v6, 4  ;;  %5198 = vst [vmem:[#allocation109_spill] sm:$0xff] %v3404_v4  ;;  %v3415_v35 = vld [vmem:[%s4914_s0 + $0x450] sm:$0xff] }
  0x7a   :  { %v432_v63 = vrot.slane %v431_v45, 4  ;;  %v440_v21 = vrot.slane %v439_v26, 4  ;;  %v448_v31 = vrot.slane %v447_v5, 4  ;;  %v456_v41 = vrot.slane %v455_v40, 4  ;;  %5202 = vst [vmem:[#allocation117_spill] sm:$0xff] %v3415_v35 }
  0x7b   :  { %v3392_v20 = vadd.f32 %v356_v54, %v355_v49  ;;  %v3394_v16 = vadd.f32 %v364_v7, %v363_v2  ;;  %v464_v61 = vrot.slane %v463_v38, 4  ;;  %v472_v11 = vrot.slane %v471_v50, 4  ;;  %v3420_v54 = vld [vmem:[%s4914_s0 + $0x458] sm:$0xff] }
  0x7c   :  { %v3406_v8 = vadd.f32 %v372_v18, %v371_v53  ;;  %v3408_v52 = vadd.f32 %v380_v9, %v379_v46  ;;  %v3410_v49 = vadd.f32 %v388_v48, %v387_v34  ;;  %v404_v2 = vrot.slane %v403_v25, 1  ;;  %5203 = vst [vmem:[#allocation163_spill] sm:$0xff] %v3420_v54  ;;  %v3425_v53 = vld [vmem:[%s4914_s0 + $0x460] sm:$0xff]  ;;  %v3432_v9 = vld [vmem:[%s4914_s0 + $0x468] sm:$0xff] }
  0x7d   :  { %5195 = vst [vmem:[#allocation102_spill] sm:$0xff] %v3392_v20  ;;  %5196 = vst [vmem:[#allocation103_spill] sm:$0xff] %v3394_v16  ;;  %v3427_v46 = vadd.f32 %v396_v1, %v395_v62  ;;  %v412_v34 = vrot.slane %v411_v10, 1  ;;  %v417_v7 = vadd.f32 %v416_v36, %v415_v0  ;;  %v425_v18 = vadd.f32 %v424_v17, %v423_v6  ;;  %v5208_v62 = vld [vmem:[#allocation25_spill] sm:$0xff]  ;;  %v5210_v0 = vld [vmem:[#allocation30_spill] sm:$0xff] }
  0x7e   :  { %5199 = vst [vmem:[#allocation112_spill] sm:$0xff] %v3406_v8  ;;  %5200 = vst [vmem:[#allocation113_spill] sm:$0xff] %v3408_v52  ;;  %v433_v48 = vadd.f32 %v432_v63, %v431_v45  ;;  %v449_v52 = vadd.f32 %v448_v31, %v447_v5  ;;  %v457_v8 = vadd.f32 %v456_v41, %v455_v40  ;;  %v5211_v36 = vld [vmem:[#allocation31_spill] sm:$0xff]  ;;  %v5215_v5 = vld [vmem:[#allocation37_spill] sm:$0xff] }
  0x7f   :  { %5201 = vst [vmem:[#allocation116_spill] sm:$0xff] %v3410_v49  ;;  %5204 = vst [vmem:[#allocation164_spill] sm:$0xff] %v3425_v53  ;;  %v441_v49 = vadd.f32 %v440_v21, %v439_v26  ;;  %v465_v16 = vadd.f32 %v464_v61, %v463_v38  ;;  %v473_v20 = vadd.f32 %v472_v11, %v471_v50  ;;  %v5212_v21 = vld [vmem:[#allocation32_spill] sm:$0xff]  ;;  %v418_v45 = vrot.slane %v417_v7, 2  ;;  %v3458_v38 = vld [vmem:[%s4914_s0 + $0x478] sm:$0xff] }
  0x80   :  { %5205 = vst [vmem:[#allocation165_spill] sm:$0xff] %v3427_v46  ;;  %5206 = vst [vmem:[#allocation166_spill] sm:$0xff] %v3432_v9  ;;  %v479_v23 = vadd.f32 %v5207_v55, %v3399_v43  ;;  %v487_v1 = vadd.f32 %v5208_v62, %v3404_v4  ;;  %v3438_v46 = vadd.f32 %v404_v2, %v403_v25  ;;  %v3449_v11 = vld [vmem:[%s4914_s0 + $0x470] sm:$0xff]  ;;  %v426_v26 = vrot.slane %v425_v18, 2 }
  0x81   :  { %v495_v6 = vadd.f32 %v5210_v0, %v3415_v35  ;;  %v503_v17 = vadd.f32 %v5211_v36, %v3420_v54  ;;  %v511_v31 = vadd.f32 %v5212_v21, %v3425_v53  ;;  %5213 = vst [vmem:[#allocation25_spill] sm:$0xff] %v3449_v11  ;;  %v3451_v55 = vadd.f32 %v412_v34, %v411_v10  ;;  %v5216_v21 = vld [vmem:[#allocation38_spill] sm:$0xff] }
  0x82   :  { %5209 = vst [vmem:[#allocation24_spill] sm:$0xff] %v3438_v46  ;;  %v519_v40 = vadd.f32 %v5215_v5, %v3432_v9  ;;  %v434_v50 = vrot.slane %v433_v48, 2  ;;  %v442_v25 = vrot.slane %v441_v49, 2  ;;  %v450_v63 = vrot.slane %v449_v52, 2  ;;  %v5217_v9 = vld [vmem:[#allocation39_spill] sm:$0xff] }
  0x83   :  { %5214 = vst [vmem:[#allocation30_spill] sm:$0xff] %v3451_v55  ;;  %v458_v41 = vrot.slane %v457_v8, 2  ;;  %v466_v61 = vrot.slane %v465_v16, 2  ;;  %v474_v2 = vrot.slane %v473_v20, 2  ;;  %v480_v62 = vrot.slane %v479_v23, 4 }
  0x84   :  { %v488_v0 = vrot.slane %v487_v1, 4  ;;  %v496_v10 = vrot.slane %v495_v6, 4  ;;  %v504_v34 = vrot.slane %v503_v17, 4  ;;  %v512_v36 = vrot.slane %v511_v31, 4 }
  0x85   :  { %v527_v55 = vadd.f32 %v5216_v21, %v3449_v11  ;;  %v419_v5 = vadd.f32 %v418_v45, %v417_v7  ;;  %v427_v46 = vadd.f32 %v426_v26, %v425_v18  ;;  %v520_v3 = vrot.slane %v519_v40, 4 }
  0x86   :  { %v535_v53 = vadd.f32 %v5217_v9, %v3458_v38  ;;  %v435_v54 = vadd.f32 %v434_v50, %v433_v48  ;;  %v443_v35 = vadd.f32 %v442_v25, %v441_v49  ;;  %v451_v4 = vadd.f32 %v450_v63, %v449_v52 }
  0x87   :  { %v459_v43 = vadd.f32 %v458_v41, %v457_v8  ;;  %v467_v15 = vadd.f32 %v466_v61, %v465_v16  ;;  %v475_v58 = vadd.f32 %v474_v2, %v473_v20  ;;  %v481_v19 = vadd.f32 %v480_v62, %v479_v23  ;;  %v5239_v62 = vld [vmem:[#allocation68_spill] sm:$0xff] }
  0x88   :  { %v489_v22 = vadd.f32 %v488_v0, %v487_v1  ;;  %v497_v57 = vadd.f32 %v496_v10, %v495_v6  ;;  %v505_v12 = vadd.f32 %v504_v34, %v503_v17  ;;  %v513_v33 = vadd.f32 %v512_v36, %v511_v31  ;;  %v5240_v10 = vld [vmem:[#allocation72_spill] sm:$0xff]  ;;  %v5241_v36 = vld [vmem:[#allocation73_spill] sm:$0xff] }
  0x89   :  { %v528_v14 = vrot.slane %v527_v55, 4  ;;  %v420_v37 = vrot.slane %v419_v5, 1  ;;  %v428_v21 = vrot.slane %v427_v46, 1  ;;  %v521_v7 = vadd.f32 %v520_v3, %v519_v40 }
  0x8a   :  { %v536_v18 = vrot.slane %v535_v53, 4  ;;  %v436_v45 = vrot.slane %v435_v54, 1  ;;  %v444_v26 = vrot.slane %v443_v35, 1  ;;  %v452_v11 = vrot.slane %v451_v4, 1 }
  0x8b   :  { %v460_v9 = vrot.slane %v459_v43, 1  ;;  %v468_v48 = vrot.slane %v467_v15, 1  ;;  %v476_v49 = vrot.slane %v475_v58, 1  ;;  %v482_v52 = vrot.slane %v481_v19, 2 }
  0x8c   :  { %v490_v8 = vrot.slane %v489_v22, 2  ;;  %v498_v16 = vrot.slane %v497_v57, 2  ;;  %v506_v20 = vrot.slane %v505_v12, 2  ;;  %v514_v23 = vrot.slane %v513_v33, 2 }
  0x8d   :  { %v3464_v1 = vadd.f32 %v528_v14, %v527_v55  ;;  %v3466_v6 = vadd.f32 %v420_v37, %v419_v5  ;;  %v3468_v17 = vadd.f32 %v428_v21, %v427_v46  ;;  %v522_v31 = vrot.slane %v521_v7, 2  ;;  %v5238_v55 = vld [vmem:[#allocation67_spill] sm:$0xff]  ;;  %v5242_v21 = vld [vmem:[#allocation74_spill] sm:$0xff] }
  0x8e   :  { %v3470_v3 = vadd.f32 %v536_v18, %v535_v53  ;;  %v3472_v40 = vadd.f32 %v436_v45, %v435_v54  ;;  %v3474_v50 = vadd.f32 %v444_v26, %v443_v35  ;;  %v3476_v25 = vadd.f32 %v452_v11, %v451_v4  ;;  %v5243_v18 = vld [vmem:[#allocation78_spill] sm:$0xff]  ;;  %v5245_v26 = vld [vmem:[#allocation79_spill] sm:$0xff] }
  0x8f   :  { %5218 = vst [vmem:[#allocation31_spill] sm:$0xff] %v3464_v1  ;;  %5219 = vst [vmem:[#allocation32_spill] sm:$0xff] %v3466_v6  ;;  %v3478_v63 = vadd.f32 %v460_v9, %v459_v43  ;;  %v3480_v41 = vadd.f32 %v468_v48, %v467_v15  ;;  %v3482_v61 = vadd.f32 %v476_v49, %v475_v58  ;;  %v5234_v15 = vld [vmem:[#allocation60_spill] sm:$0xff]  ;;  %v5275_v43 = vld [vmem:[#allocation115_spill] sm:$0xff] }
  0x90   :  { %5220 = vst [vmem:[#allocation37_spill] sm:$0xff] %v3468_v17  ;;  %5221 = vst [vmem:[#allocation38_spill] sm:$0xff] %v3470_v3  ;;  %v3484_v14 = vadd.f32 %v482_v52, %v481_v19  ;;  %v3486_v37 = vadd.f32 %v490_v8, %v489_v22  ;;  %v3488_v46 = vadd.f32 %v498_v16, %v497_v57  ;;  %v5235_v19 = vld [vmem:[#allocation61_spill] sm:$0xff]  ;;  %v5236_v57 = vld [vmem:[#allocation62_spill] sm:$0xff] }
  0x91   :  { %5222 = vst [vmem:[#allocation39_spill] sm:$0xff] %v3472_v40  ;;  %5223 = vst [vmem:[#allocation167_spill] sm:$0xff] %v3474_v50  ;;  %v3490_v53 = vadd.f32 %v506_v20, %v505_v12  ;;  %v3492_v54 = vadd.f32 %v514_v23, %v513_v33  ;;  %v3495_v4 = vadd.f32 %v522_v31, %v521_v7  ;;  %v5237_v33 = vld [vmem:[#allocation66_spill] sm:$0xff]  ;;  %v5247_v48 = vld [vmem:[#allocation80_spill] sm:$0xff] }
  0x92   :  { %5224 = vst [vmem:[#allocation168_spill] sm:$0xff] %v3476_v25  ;;  %5225 = vst [vmem:[#allocation169_spill] sm:$0xff] %v3478_v63  ;;  %v3500_v58 = vmul.f32 %v5234_v15, %v5234_v15  ;;  %v3504_v22 = vmul.f32 %v5235_v19, %v5235_v19  ;;  %v3508_v12 = vmul.f32 %v5236_v57, %v5236_v57  ;;  %v5249_v52 = vld [vmem:[#allocation82_spill] sm:$0xff]  ;;  %v5251_v16 = vld [vmem:[#allocation83_spill] sm:$0xff] }
  0x93   :  { %5226 = vst [vmem:[#allocation170_spill] sm:$0xff] %v3480_v41  ;;  %5227 = vst [vmem:[#allocation171_spill] sm:$0xff] %v3482_v61  ;;  %v3512_v11 = vmul.f32 %v5237_v33, %v5237_v33  ;;  %v3516_v2 = vmul.f32 %v5238_v55, %v5238_v55  ;;  %v3520_v0 = vmul.f32 %v5239_v62, %v5239_v62  ;;  %v5253_v23 = vld [vmem:[#allocation84_spill] sm:$0xff]  ;;  %v5255_v15 = vld [vmem:[#allocation86_spill] sm:$0xff] }
  0x94   :  { %5228 = vst [vmem:[#allocation172_spill] sm:$0xff] %v3484_v14  ;;  %5229 = vst [vmem:[#allocation173_spill] sm:$0xff] %v3486_v37  ;;  %v3524_v34 = vmul.f32 %v5240_v10, %v5240_v10  ;;  %v3528_v5 = vmul.f32 %v5241_v36, %v5241_v36  ;;  %v3532_v7 = vmul.f32 %v5242_v21, %v5242_v21  ;;  %v5257_v57 = vld [vmem:[#allocation87_spill] sm:$0xff]  ;;  %v5259_v55 = vld [vmem:[#allocation88_spill] sm:$0xff] }
  0x95   :  { %5230 = vst [vmem:[#allocation174_spill] sm:$0xff] %v3488_v46  ;;  %5231 = vst [vmem:[#allocation175_spill] sm:$0xff] %v3490_v53  ;;  %v3536_v45 = vmul.f32 %v5243_v18, %v5243_v18  ;;  %v3540_v9 = vmul.f32 %v5245_v26, %v5245_v26  ;;  %v3544_v49 = vmul.f32 %v5247_v48, %v5247_v48  ;;  %v5261_v10 = vld [vmem:[#allocation90_spill] sm:$0xff]  ;;  %v5263_v21 = vld [vmem:[#allocation99_spill] sm:$0xff] }
  0x96   :  { %5232 = vst [vmem:[#allocation176_spill] sm:$0xff] %v3492_v54  ;;  %5233 = vst [vmem:[#allocation177_spill] sm:$0xff] %v3495_v4  ;;  %v3548_v8 = vmul.f32 %v5249_v52, %v5249_v52  ;;  %v3552_v20 = vmul.f32 %v5251_v16, %v5251_v16  ;;  %v3556_v31 = vmul.f32 %v5253_v23, %v5253_v23  ;;  %v5265_v26 = vld [vmem:[#allocation106_spill] sm:$0xff]  ;;  %v5267_v52 = vld [vmem:[#allocation107_spill] sm:$0xff] }
  0x97   :  { %5244 = vst [vmem:[#allocation60_spill] sm:$0xff] %v3536_v45  ;;  %5246 = vst [vmem:[#allocation61_spill] sm:$0xff] %v3540_v9  ;;  %v3560_v19 = vmul.f32 %v5255_v15, %v5255_v15  ;;  %v3564_v33 = vmul.f32 %v5257_v57, %v5257_v57  ;;  %v3568_v62 = vmul.f32 %v5259_v55, %v5259_v55  ;;  %v5269_v23 = vld [vmem:[#allocation108_spill] sm:$0xff]  ;;  %v5271_v57 = vld [vmem:[#allocation111_spill] sm:$0xff] }
  0x98   :  { %5248 = vst [vmem:[#allocation62_spill] sm:$0xff] %v3544_v49  ;;  %5250 = vst [vmem:[#allocation66_spill] sm:$0xff] %v3548_v8  ;;  %v3572_v36 = vmul.f32 %v5261_v10, %v5261_v10  ;;  %v3576_v18 = vmul.f32 %v5263_v21, %v5263_v21  ;;  %v3580_v48 = vmul.f32 %v5265_v26, %v5265_v26  ;;  %v5273_v10 = vld [vmem:[#allocation114_spill] sm:$0xff]  ;;  %v5277_v35 = vld [vmem:[#allocation119_spill] sm:$0xff] }
  0x99   :  { %5252 = vst [vmem:[#allocation67_spill] sm:$0xff] %v3552_v20  ;;  %5254 = vst [vmem:[#allocation68_spill] sm:$0xff] %v3556_v31  ;;  %v3584_v16 = vmul.f32 %v5267_v52, %v5267_v52  ;;  %v3588_v15 = vmul.f32 %v5269_v23, %v5269_v23  ;;  %v3592_v55 = vmul.f32 %v5271_v57, %v5271_v57  ;;  %v5279_v3 = vld [vmem:[#allocation120_spill] sm:$0xff]  ;;  %v5281_v4 = vld [vmem:[#allocation121_spill] sm:$0xff] }
  0x9a   :  { %5256 = vst [vmem:[#allocation72_spill] sm:$0xff] %v3560_v19  ;;  %5258 = vst [vmem:[#allocation73_spill] sm:$0xff] %v3564_v33  ;;  %v3596_v21 = vmul.f32 %v5273_v10, %v5273_v10  ;;  %v3600_v26 = vmul.f32 %v5275_v43, %v5275_v43  ;;  %v3604_v52 = vmul.f32 %v5277_v35, %v5277_v35  ;;  %v5283_v1 = vld [vmem:[#allocation123_spill] sm:$0xff]  ;;  %v5286_v61 = vld [vmem:[#allocation92_spill] sm:$0xff] }
  0x9b   :  { %5260 = vst [vmem:[#allocation74_spill] sm:$0xff] %v3568_v62  ;;  %5262 = vst [vmem:[#allocation78_spill] sm:$0xff] %v3572_v36  ;;  %v3608_v23 = vmul.f32 %v5279_v3, %v5279_v3  ;;  %v3612_v57 = vmul.f32 %v5281_v4, %v5281_v4  ;;  %v3616_v10 = vmul.f32 %v5283_v1, %v5283_v1  ;;  %v5285_v54 = vld [vmem:[#allocation91_spill] sm:$0xff]  ;;  %v5287_v35 = vld [vmem:[#allocation93_spill] sm:$0xff] }
  0x9c   :  { %5264 = vst [vmem:[#allocation79_spill] sm:$0xff] %v3576_v18  ;;  %5266 = vst [vmem:[#allocation80_spill] sm:$0xff] %v3580_v48  ;;  %v638_v43 = vmul.f32 %v5285_v54, %v5285_v54  ;;  %v639_v53 = vmul.f32 %v5286_v61, %v5286_v61  ;;  %v640_v41 = vmul.f32 %v5287_v35, %v5287_v35  ;;  %v5288_v46 = vld [vmem:[#allocation95_spill] sm:$0xff]  ;;  %v5289_v63 = vld [vmem:[#allocation96_spill] sm:$0xff] }
  0x9d   :  { %5268 = vst [vmem:[#allocation82_spill] sm:$0xff] %v3584_v16  ;;  %5270 = vst [vmem:[#allocation83_spill] sm:$0xff] %v3588_v15  ;;  %v641_v3 = vmul.f32 %v5288_v46, %v5288_v46  ;;  %v642_v4 = vmul.f32 %v5289_v63, %v5289_v63  ;;  %v5290_v37 = vld [vmem:[#allocation97_spill] sm:$0xff]  ;;  %v5291_v1 = vld [vmem:[#allocation100_spill] sm:$0xff] }
  0x9e   :  { %5272 = vst [vmem:[#allocation84_spill] sm:$0xff] %v3592_v55  ;;  %5274 = vst [vmem:[#allocation86_spill] sm:$0xff] %v3596_v21  ;;  %v643_v25 = vmul.f32 %v5290_v37, %v5290_v37  ;;  %v644_v14 = vmul.f32 %v5291_v1, %v5291_v1  ;;  %v5292_v50 = vld [vmem:[#allocation101_spill] sm:$0xff]  ;;  %v5293_v40 = vld [vmem:[#allocation124_spill] sm:$0xff] }
  0x9f   :  { %5276 = vst [vmem:[#allocation87_spill] sm:$0xff] %v3600_v26  ;;  %5278 = vst [vmem:[#allocation88_spill] sm:$0xff] %v3604_v52  ;;  %v645_v54 = vmul.f32 %v5292_v50, %v5292_v50  ;;  %v3636_v61 = vmul.f32 %v5293_v40, %v5293_v40  ;;  %v5294_v35 = vld [vmem:[#allocation125_spill] sm:$0xff]  ;;  %v5295_v46 = vld [vmem:[#allocation127_spill] sm:$0xff] }
  0xa0   :  { %5280 = vst [vmem:[#allocation90_spill] sm:$0xff] %v3608_v23  ;;  %5282 = vst [vmem:[#allocation99_spill] sm:$0xff] %v3612_v57  ;;  %v3640_v17 = vmul.f32 %v5294_v35, %v5294_v35  ;;  %v3644_v63 = vmul.f32 %v5295_v46, %v5295_v46  ;;  %v5296_v6 = vld [vmem:[#allocation128_spill] sm:$0xff]  ;;  %v5297_v1 = vld [vmem:[#allocation129_spill] sm:$0xff]  ;;  %v3664_v46 = vmul.f32 %v3170_v32, %v3170_v32 }
  0xa1   :  { %5284 = vst [vmem:[#allocation106_spill] sm:$0xff] %v3616_v10  ;;  %v3648_v37 = vmul.f32 %v5296_v6, %v5296_v6  ;;  %v3652_v10 = vmul.f32 %v5297_v1, %v5297_v1  ;;  %v5298_v50 = vld [vmem:[#allocation131_spill] sm:$0xff]  ;;  %v5299_v57 = vld [vmem:[#allocation64_spill] sm:$0xff]  ;;  %v5300_v23 = vld [vmem:[#allocation2_spill] sm:$0xff]  ;;  %v3680_v32 = vmul.f32 %v3188_v27, %v3188_v27 }
  0xa2   :  { %v3656_v40 = vmul.f32 %v5298_v50, %v5298_v50  ;;  %v3660_v35 = vmul.f32 %v5299_v57, %v5299_v57  ;;  %v5301_v52 = vld [vmem:[#allocation58_spill] sm:$0xff]  ;;  %v5302_v26 = vld [vmem:[#allocation3_spill] sm:$0xff]  ;;  %v5304_v1 = vld [vmem:[#allocation4_spill] sm:$0xff]  ;;  %v3676_v57 = vmul.f32 %v3183_v51, %v3183_v51  ;;  %v3696_v51 = vmul.f32 %v3216_v44, %v3216_v44 }
  0xa3   :  { %v686_v6 = vadd.f32 %v5301_v52, %v5300_v23  ;;  %v5303_v21 = vld [vmem:[#allocation59_spill] sm:$0xff]  ;;  %v5305_v15 = vld [vmem:[#allocation65_spill] sm:$0xff]  ;;  %v3684_v52 = vmul.f32 %v3193_v28, %v3193_v28  ;;  %v3704_v28 = vmul.f32 %v3225_v47, %v3225_v47  ;;  %v3720_v47 = vmul.f32 %v3260_v56, %v3260_v56  ;;  %v5322_v56 = vld [vmem:[#allocation144_spill] sm:$0xff] }
  0xa4   :  { %v694_v55 = vadd.f32 %v5303_v21, %v5302_v26  ;;  %v702_v16 = vadd.f32 %v5305_v15, %v5304_v1  ;;  %v5306_v48 = vld [vmem:[#allocation5_spill] sm:$0xff]  ;;  %v5307_v50 = vld [vmem:[#allocation71_spill] sm:$0xff]  ;;  %v3688_v21 = vmul.f32 %v3206_v59, %v3206_v59  ;;  %v3692_v15 = vmul.f32 %v3211_v42, %v3211_v42  ;;  %v5312_v42 = vld [vmem:[#allocation8_spill] sm:$0xff] }
  0xa5   :  { %v710_v18 = vadd.f32 %v5307_v50, %v5306_v48  ;;  %v5308_v48 = vld [vmem:[#allocation6_spill] sm:$0xff]  ;;  %v5309_v26 = vld [vmem:[#allocation77_spill] sm:$0xff]  ;;  %v5310_v23 = vld [vmem:[#allocation7_spill] sm:$0xff]  ;;  %v3708_v59 = vmul.f32 %v3230_v30, %v3230_v30  ;;  %v687_v31 = vadd.f32 %v686_v6, %v638_v43  ;;  %5317 = vst [vmem:[#allocation108_spill] sm:$0xff] %v3720_v47  ;;  %v3724_v30 = vmul.f32 %v3271_v39, %v3271_v39 }
  0xa6   :  { %v718_v27 = vadd.f32 %v5309_v26, %v5308_v48  ;;  %v5311_v1 = vld [vmem:[#allocation81_spill] sm:$0xff]  ;;  %v695_v20 = vadd.f32 %v694_v55, %v639_v53  ;;  %v703_v48 = vadd.f32 %v702_v16, %v640_v41  ;;  %v3732_v41 = vmul.f32 %v3281_v29, %v3281_v29  ;;  %v5324_v39 = vld [vmem:[#allocation146_spill] sm:$0xff] }
  0xa7   :  { %v726_v50 = vadd.f32 %v5311_v1, %v5310_v23  ;;  %v5313_v36 = vld [vmem:[#allocation85_spill] sm:$0xff]  ;;  %v711_v26 = vadd.f32 %v710_v18, %v641_v3  ;;  %v3716_v23 = vmul.f32 %v3255_v24, %v3255_v24  ;;  %5318 = vst [vmem:[#allocation111_spill] sm:$0xff] %v3724_v30  ;;  %v3736_v24 = vmul.f32 %v3288_v13, %v3288_v13 }
  0xa8   :  { %v734_v62 = vadd.f32 %v5313_v36, %v5312_v42  ;;  %v5314_v33 = vld [vmem:[#allocation9_spill] sm:$0xff]  ;;  %v3728_v36 = vmul.f32 %v3276_v60, %v3276_v60  ;;  %5320 = vst [vmem:[#allocation115_spill] sm:$0xff] %v3732_v41  ;;  %v719_v53 = vadd.f32 %v718_v27, %v642_v4  ;;  %v3740_v18 = vmul.f32 %v5322_v56, %v5322_v56  ;;  %v5328_v4 = vld [vmem:[#allocation150_spill] sm:$0xff]  ;;  %v5330_v27 = vld [vmem:[#allocation151_spill] sm:$0xff] }
  0xa9   :  { %v5315_v44 = vld [vmem:[#allocation89_spill] sm:$0xff]  ;;  %5316 = vst [vmem:[#allocation107_spill] sm:$0xff] %v3716_v23  ;;  %5321 = vst [vmem:[#allocation119_spill] sm:$0xff] %v3736_v24  ;;  %v3744_v16 = vmul.f32 %v5324_v39, %v5324_v39  ;;  %v688_v43 = vrot.slane %v687_v31, 4  ;;  %v696_v3 = vrot.slane %v695_v20, 4  ;;  %v704_v29 = vrot.slane %v703_v48, 4 }
  0xaa   :  { %v742_v19 = vadd.f32 %v5315_v44, %v5314_v33  ;;  %5319 = vst [vmem:[#allocation114_spill] sm:$0xff] %v3728_v36  ;;  %v727_v33 = vadd.f32 %v726_v50, %v643_v25  ;;  %5323 = vst [vmem:[#allocation120_spill] sm:$0xff] %v3740_v18  ;;  %v735_v60 = vadd.f32 %v734_v62, %v644_v14  ;;  %v712_v6 = vrot.slane %v711_v26, 4  ;;  %v5326_v1 = vld [vmem:[#allocation149_spill] sm:$0xff]  ;;  %v5332_v42 = vld [vmem:[#allocation156_spill] sm:$0xff] }
  0xab   :  { %5325 = vst [vmem:[#allocation121_spill] sm:$0xff] %v3744_v16  ;;  %v3748_v13 = vmul.f32 %v5326_v1, %v5326_v1  ;;  %v3752_v25 = vmul.f32 %v5328_v4, %v5328_v4  ;;  %v3756_v50 = vmul.f32 %v5330_v27, %v5330_v27  ;;  %v3760_v14 = vmul.f32 %v5332_v42, %v5332_v42  ;;  %v5338_v1 = vld [vmem:[#allocation161_spill] sm:$0xff]  ;;  %v5340_v27 = vld [vmem:[#allocation162_spill] sm:$0xff]  ;;  %v5342_v16 = vld [vmem:[#allocation104_spill] sm:$0xff] }
  0xac   :  { %v743_v55 = vadd.f32 %v742_v19, %v645_v54  ;;  %v5334_v19 = vld [vmem:[#allocation157_spill] sm:$0xff]  ;;  %v5336_v54 = vld [vmem:[#allocation158_spill] sm:$0xff]  ;;  %v720_v56 = vrot.slane %v719_v53, 4  ;;  %v728_v39 = vrot.slane %v727_v33, 4  ;;  %v3772_v4 = vmul.f32 %v5338_v1, %v5338_v1 }
  0xad   :  { %5327 = vst [vmem:[#allocation123_spill] sm:$0xff] %v3748_v13  ;;  %5329 = vst [vmem:[#allocation91_spill] sm:$0xff] %v3752_v25  ;;  %v3764_v62 = vmul.f32 %v5334_v19, %v5334_v19  ;;  %v3768_v44 = vmul.f32 %v5336_v54, %v5336_v54  ;;  %v736_v42 = vrot.slane %v735_v60, 4  ;;  %v689_v25 = vadd.f32 %v688_v43, %v687_v31  ;;  %v5346_v1 = vld [vmem:[#allocation117_spill] sm:$0xff]  ;;  %v5350_v31 = vld [vmem:[#allocation164_spill] sm:$0xff] }
  0xae   :  { %5331 = vst [vmem:[#allocation92_spill] sm:$0xff] %v3756_v50  ;;  %5333 = vst [vmem:[#allocation93_spill] sm:$0xff] %v3760_v14  ;;  %v3776_v50 = vmul.f32 %v5340_v27, %v5340_v27  ;;  %v744_v14 = vrot.slane %v743_v55, 4  ;;  %v697_v13 = vadd.f32 %v696_v3, %v695_v20  ;;  %v705_v19 = vadd.f32 %v704_v29, %v703_v48  ;;  %v5348_v27 = vld [vmem:[#allocation163_spill] sm:$0xff]  ;;  %v5352_v48 = vld [vmem:[#allocation166_spill] sm:$0xff] }
  0xaf   :  { %5335 = vst [vmem:[#allocation95_spill] sm:$0xff] %v3764_v62  ;;  %5337 = vst [vmem:[#allocation96_spill] sm:$0xff] %v3768_v44  ;;  %v713_v62 = vadd.f32 %v712_v6, %v711_v26  ;;  %v3780_v54 = vmul.f32 %v5342_v16, %v5342_v16  ;;  %v5344_v44 = vld [vmem:[#allocation109_spill] sm:$0xff]  ;;  %v3796_v20 = vmul.f32 %v5350_v31, %v5350_v31  ;;  %v5368_v41 = vld [vmem:[#allocation122_spill] sm:$0xff] }
  0xb0   :  { %5339 = vst [vmem:[#allocation97_spill] sm:$0xff] %v3772_v4  ;;  %5341 = vst [vmem:[#allocation100_spill] sm:$0xff] %v3776_v50  ;;  %v3784_v18 = vmul.f32 %v5344_v44, %v5344_v44  ;;  %v3788_v4 = vmul.f32 %v5346_v1, %v5346_v1  ;;  %v3792_v50 = vmul.f32 %v5348_v27, %v5348_v27  ;;  %v5354_v3 = vld [vmem:[#allocation25_spill] sm:$0xff]  ;;  %v690_v27 = vrot.slane %v689_v25, 2 }
  0xb1   :  { %5343 = vst [vmem:[#allocation101_spill] sm:$0xff] %v3780_v54  ;;  %5351 = vst [vmem:[#allocation128_spill] sm:$0xff] %v3796_v20  ;;  %v3800_v26 = vmul.f32 %v5352_v48, %v5352_v48  ;;  %v721_v16 = vadd.f32 %v720_v56, %v719_v53  ;;  %v729_v43 = vadd.f32 %v728_v39, %v727_v33  ;;  %v706_v31 = vrot.slane %v705_v19, 2  ;;  %v5360_v53 = vld [vmem:[#allocation98_spill] sm:$0xff]  ;;  %v5361_v56 = vld [vmem:[#allocation12_spill] sm:$0xff] }
  0xb2   :  { %5345 = vst [vmem:[#allocation124_spill] sm:$0xff] %v3784_v18  ;;  %5347 = vst [vmem:[#allocation125_spill] sm:$0xff] %v3788_v4  ;;  %v3804_v29 = vmul.f32 %v5354_v3, %v5354_v3  ;;  %v3808_v6 = vmul.f32 %v3458_v38, %v3458_v38  ;;  %v737_v44 = vadd.f32 %v736_v42, %v735_v60  ;;  %v714_v20 = vrot.slane %v713_v62, 2  ;;  %v5357_v4 = vld [vmem:[#allocation10_spill] sm:$0xff]  ;;  %v5362_v39 = vld [vmem:[#allocation105_spill] sm:$0xff] }
  0xb3   :  { %5349 = vst [vmem:[#allocation127_spill] sm:$0xff] %v3792_v50  ;;  %5353 = vst [vmem:[#allocation129_spill] sm:$0xff] %v3800_v26  ;;  %v745_v1 = vadd.f32 %v744_v14, %v743_v55  ;;  %v698_v50 = vrot.slane %v697_v13, 2  ;;  %v5358_v18 = vld [vmem:[#allocation94_spill] sm:$0xff]  ;;  %v5359_v26 = vld [vmem:[#allocation11_spill] sm:$0xff]  ;;  %v766_v3 = vadd.f32 %v5362_v39, %v5361_v56  ;;  %v722_v38 = vrot.slane %v721_v16, 2 }
  0xb4   :  { %5355 = vst [vmem:[#allocation131_spill] sm:$0xff] %v3804_v29  ;;  %5356 = vst [vmem:[#allocation64_spill] sm:$0xff] %v3808_v6  ;;  %v750_v48 = vadd.f32 %v5358_v18, %v5357_v4  ;;  %v758_v33 = vadd.f32 %v5360_v53, %v5359_v26  ;;  %v5363_v29 = vld [vmem:[#allocation13_spill] sm:$0xff]  ;;  %v5364_v54 = vld [vmem:[#allocation110_spill] sm:$0xff]  ;;  %v730_v6 = vrot.slane %v729_v43, 2  ;;  %v738_v30 = vrot.slane %v737_v44, 2 }
  0xb5   :  { %v774_v24 = vadd.f32 %v5364_v54, %v5363_v29  ;;  %v5365_v60 = vld [vmem:[#allocation14_spill] sm:$0xff]  ;;  %v5367_v42 = vld [vmem:[#allocation15_spill] sm:$0xff]  ;;  %v746_v47 = vrot.slane %v745_v1, 2  ;;  %v5369_v18 = vld [vmem:[#allocation16_spill] sm:$0xff]  ;;  %v691_v56 = vadd.f32 %v690_v27, %v689_v25  ;;  %v699_v39 = vadd.f32 %v698_v50, %v697_v13 }
  0xb6   :  { %v5366_v55 = vld [vmem:[#allocation118_spill] sm:$0xff]  ;;  %v790_v36 = vadd.f32 %v5368_v41, %v5367_v42  ;;  %v5371_v26 = vld [vmem:[#allocation17_spill] sm:$0xff]  ;;  %v707_v49 = vadd.f32 %v706_v31, %v705_v19  ;;  %v715_v54 = vadd.f32 %v714_v20, %v713_v62  ;;  %v751_v29 = vadd.f32 %v750_v48, %v3636_v61 }
  0xb7   :  { %v782_v14 = vadd.f32 %v5366_v55, %v5365_v60  ;;  %v5370_v4 = vld [vmem:[#allocation126_spill] sm:$0xff]  ;;  %v759_v9 = vadd.f32 %v758_v33, %v3640_v17  ;;  %v767_v60 = vadd.f32 %v766_v3, %v3644_v63  ;;  %v775_v41 = vadd.f32 %v774_v24, %v3648_v37 }
  0xb8   :  { %v798_v23 = vadd.f32 %v5370_v4, %v5369_v18  ;;  %v5372_v53 = vld [vmem:[#allocation130_spill] sm:$0xff]  ;;  %v723_v55 = vadd.f32 %v722_v38, %v721_v16  ;;  %v731_v42 = vadd.f32 %v730_v6, %v729_v43  ;;  %v791_v18 = vadd.f32 %v790_v36, %v3656_v40 }
  0xb9   :  { %v806_v8 = vadd.f32 %v5372_v53, %v5371_v26  ;;  %v783_v45 = vadd.f32 %v782_v14, %v3652_v10  ;;  %v739_v4 = vadd.f32 %v738_v30, %v737_v44  ;;  %v747_v26 = vadd.f32 %v746_v47, %v745_v1 }
  0xba   :  { %v799_v13 = vadd.f32 %v798_v23, %v3660_v35  ;;  %v692_v50 = vrot.slane %v691_v56, 1  ;;  %v700_v61 = vrot.slane %v699_v39, 1  ;;  %v708_v62 = vrot.slane %v707_v49, 1 }
  0xbb   :  { %v807_v25 = vadd.f32 %v806_v8, %v3664_v46  ;;  %v716_v17 = vrot.slane %v715_v54, 1  ;;  %v752_v19 = vrot.slane %v751_v29, 4  ;;  %v760_v63 = vrot.slane %v759_v9, 4 }
  0xbc   :  { %v768_v20 = vrot.slane %v767_v60, 4  ;;  %v776_v37 = vrot.slane %v775_v41, 4  ;;  %v724_v24 = vrot.slane %v723_v55, 1  ;;  %v732_v16 = vrot.slane %v731_v42, 1 }
  0xbd   :  { %v784_v43 = vrot.slane %v783_v45, 4  ;;  %v792_v10 = vrot.slane %v791_v18, 4  ;;  %v740_v6 = vrot.slane %v739_v4, 1  ;;  %v748_v40 = vrot.slane %v747_v26, 1 }
  0xbe   :  { %v800_v30 = vrot.slane %v799_v13, 4  ;;  %v808_v47 = vrot.slane %v807_v25, 4  ;;  %v3834_v36 = vadd.f32 %v692_v50, %v691_v56  ;;  %v3836_v35 = vadd.f32 %v700_v61, %v699_v39  ;;  %v5374_v39 = vld [vmem:[#allocation63_spill] sm:$0xff] }
  0xbf   :  { %v3838_v8 = vadd.f32 %v708_v62, %v707_v49  ;;  %v3840_v46 = vadd.f32 %v716_v17, %v715_v54  ;;  %v753_v23 = vadd.f32 %v752_v19, %v751_v29  ;;  %v761_v44 = vadd.f32 %v760_v63, %v759_v9  ;;  %v5373_v49 = vld [vmem:[#allocation18_spill] sm:$0xff]  ;;  %v5375_v50 = vld [vmem:[#allocation19_spill] sm:$0xff]  ;;  %v5376_v29 = vld [vmem:[#allocation69_spill] sm:$0xff] }
  0xc0   :  { %v769_v1 = vadd.f32 %v768_v20, %v767_v60  ;;  %v777_v27 = vadd.f32 %v776_v37, %v775_v41  ;;  %v3842_v31 = vadd.f32 %v724_v24, %v723_v55  ;;  %v3844_v48 = vadd.f32 %v732_v16, %v731_v42  ;;  %v5377_v60 = vld [vmem:[#allocation20_spill] sm:$0xff]  ;;  %v5378_v55 = vld [vmem:[#allocation21_spill] sm:$0xff]  ;;  %v5380_v17 = vld [vmem:[#allocation23_spill] sm:$0xff] }
  0xc1   :  { %v785_v33 = vadd.f32 %v784_v43, %v783_v45  ;;  %v793_v3 = vadd.f32 %v792_v10, %v791_v18  ;;  %v3846_v38 = vadd.f32 %v740_v6, %v739_v4  ;;  %v3848_v14 = vadd.f32 %v748_v40, %v747_v26  ;;  %v5381_v37 = vld [vmem:[#allocation26_spill] sm:$0xff]  ;;  %v5382_v24 = vld [vmem:[#allocation27_spill] sm:$0xff] }
  0xc2   :  { %v801_v53 = vadd.f32 %v800_v30, %v799_v13  ;;  %v809_v56 = vadd.f32 %v808_v47, %v807_v25  ;;  %v814_v54 = vadd.f32 %v5374_v39, %v5373_v49  ;;  %v822_v9 = vadd.f32 %v5376_v29, %v5375_v50  ;;  %v5379_v13 = vld [vmem:[#allocation22_spill] sm:$0xff] }
  0xc3   :  { %v830_v41 = vadd.f32 %v3500_v58, %v5377_v60  ;;  %v838_v42 = vadd.f32 %v3504_v22, %v5378_v55  ;;  %v754_v45 = vrot.slane %v753_v23, 2  ;;  %v762_v18 = vrot.slane %v761_v44, 2 }
  0xc4   :  { %v770_v4 = vrot.slane %v769_v1, 2  ;;  %v778_v61 = vrot.slane %v777_v27, 2  ;;  %v786_v26 = vrot.slane %v785_v33, 2  ;;  %v794_v62 = vrot.slane %v793_v3, 2 }
  0xc5   :  { %v846_v25 = vadd.f32 %v3508_v12, %v5379_v13  ;;  %v854_v19 = vadd.f32 %v3512_v11, %v5380_v17  ;;  %v802_v63 = vrot.slane %v801_v53, 2  ;;  %v810_v20 = vrot.slane %v809_v56, 2 }
  0xc6   :  { %v862_v58 = vadd.f32 %v3516_v2, %v5381_v37  ;;  %v870_v22 = vadd.f32 %v3520_v0, %v5382_v24  ;;  %v815_v16 = vadd.f32 %v814_v54, %v3676_v57  ;;  %v823_v43 = vadd.f32 %v822_v9, %v3680_v32 }
  0xc7   :  { %v831_v10 = vadd.f32 %v830_v41, %v3684_v52  ;;  %v839_v6 = vadd.f32 %v838_v42, %v3688_v21  ;;  %v755_v12 = vadd.f32 %v754_v45, %v753_v23  ;;  %v763_v40 = vadd.f32 %v762_v18, %v761_v44  ;;  %v5383_v18 = vld [vmem:[#allocation70_spill] sm:$0xff] }
  0xc8   :  { %v771_v30 = vadd.f32 %v770_v4, %v769_v1  ;;  %v779_v11 = vadd.f32 %v778_v61, %v777_v27  ;;  %v787_v47 = vadd.f32 %v786_v26, %v785_v33  ;;  %v795_v49 = vadd.f32 %v794_v62, %v793_v3  ;;  %v5384_v4 = vld [vmem:[#allocation75_spill] sm:$0xff] }
  0xc9   :  { %v847_v39 = vadd.f32 %v846_v25, %v3692_v15  ;;  %v855_v2 = vadd.f32 %v854_v19, %v3696_v51  ;;  %v803_v50 = vadd.f32 %v802_v63, %v801_v53  ;;  %v811_v0 = vadd.f32 %v810_v20, %v809_v56  ;;  %v5385_v20 = vld [vmem:[#allocation132_spill] sm:$0xff] }
  0xca   :  { %v863_v57 = vadd.f32 %v862_v58, %v3704_v28  ;;  %v871_v32 = vadd.f32 %v870_v22, %v3708_v59  ;;  %v816_v54 = vrot.slane %v815_v16, 4  ;;  %v824_v52 = vrot.slane %v823_v43, 4 }
  0xcb   :  { %v832_v29 = vrot.slane %v831_v10, 4  ;;  %v840_v21 = vrot.slane %v839_v6, 4  ;;  %v756_v23 = vrot.slane %v755_v12, 1  ;;  %v764_v44 = vrot.slane %v763_v40, 1 }
  0xcc   :  { %v772_v1 = vrot.slane %v771_v30, 1  ;;  %v780_v27 = vrot.slane %v779_v11, 1  ;;  %v788_v33 = vrot.slane %v787_v47, 1  ;;  %v796_v3 = vrot.slane %v795_v49, 1 }
  0xcd   :  { %v848_v9 = vrot.slane %v847_v39, 4  ;;  %v856_v15 = vrot.slane %v855_v2, 4  ;;  %v804_v60 = vrot.slane %v803_v50, 1  ;;  %v812_v51 = vrot.slane %v811_v0, 1 }
  0xce   :  { %v864_v53 = vrot.slane %v863_v57, 4  ;;  %v872_v56 = vrot.slane %v871_v32, 4  ;;  %v817_v41 = vadd.f32 %v816_v54, %v815_v16  ;;  %v825_v28 = vadd.f32 %v824_v52, %v823_v43 }
  0xcf   :  { %v833_v55 = vadd.f32 %v832_v29, %v831_v10  ;;  %v841_v59 = vadd.f32 %v840_v21, %v839_v6  ;;  %v757_v42 = vadd.f32 %v756_v23, %v755_v12  ;;  %v3874_v45 = vadd.f32 %v764_v44, %v763_v40  ;;  %v5390_v23 = vld [vmem:[#allocation135_spill] sm:$0xff] }
  0xd0   :  { %v1072_v61 = vadd.f32 %v5384_v4, %v5383_v18  ;;  %v1073_v26 = vadd.f32 %v3836_v35, %v3834_v36  ;;  %v3880_v62 = vadd.f32 %v772_v1, %v771_v30  ;;  %v3882_v13 = vadd.f32 %v780_v27, %v779_v11  ;;  %v5386_v36 = vld [vmem:[#allocation133_spill] sm:$0xff] }
  0xd1   :  { %v849_v25 = vadd.f32 %v848_v9, %v847_v39  ;;  %v857_v17 = vadd.f32 %v856_v15, %v855_v2  ;;  %v865_v19 = vadd.f32 %v864_v53, %v863_v57  ;;  %v873_v63 = vadd.f32 %v872_v56, %v871_v32  ;;  %v5387_v57 = vld [vmem:[#allocation134_spill] sm:$0xff]  ;;  %v5393_v9 = vld [vmem:[#allocation60_spill] sm:$0xff] }
  0xd2   :  { %v1074_v37 = vadd.f32 %v1072_v61, %v5385_v20  ;;  %v1075_v58 = vadd.f32 %v1073_v26, %v3838_v8  ;;  %v818_v24 = vrot.slane %v817_v41, 2  ;;  %v826_v22 = vrot.slane %v825_v28, 2  ;;  %v5396_v56 = vld [vmem:[#allocation36_spill] sm:$0xff]  ;;  %v5401_v26 = vld [vmem:[#allocation41_spill] sm:$0xff] }
  0xd3   :  { %v834_v16 = vrot.slane %v833_v55, 2  ;;  %v842_v43 = vrot.slane %v841_v59, 2  ;;  %v3886_v10 = vadd.f32 %v788_v33, %v787_v47  ;;  %v3888_v6 = vadd.f32 %v796_v3, %v795_v49  ;;  %v5392_v3 = vld [vmem:[#allocation34_spill] sm:$0xff] }
  0xd4   :  { %v1076_v35 = vadd.f32 %v1074_v37, %v5386_v36  ;;  %v1077_v12 = vadd.f32 %v1075_v58, %v3840_v46  ;;  %v3892_v40 = vadd.f32 %v804_v60, %v803_v50  ;;  %v3894_v30 = vadd.f32 %v812_v51, %v811_v0  ;;  %v5388_v46 = vld [vmem:[#allocation28_spill] sm:$0xff]  ;;  %v5389_v0 = vld [vmem:[#allocation29_spill] sm:$0xff]  ;;  %v5394_v60 = vld [vmem:[#allocation35_spill] sm:$0xff] }
  0xd5   :  { %v850_v11 = vrot.slane %v849_v25, 2  ;;  %v858_v39 = vrot.slane %v857_v17, 2  ;;  %v866_v2 = vrot.slane %v865_v19, 2  ;;  %v874_v8 = vrot.slane %v873_v63, 2  ;;  %v5395_v51 = vld [vmem:[#allocation61_spill] sm:$0xff]  ;;  %v5403_v37 = vld [vmem:[#allocation107_spill] sm:$0xff] }
  0xd6   :  { %v1078_v32 = vadd.f32 %v1076_v35, %v5387_v57  ;;  %v1079_v54 = vadd.f32 %v1077_v12, %v3842_v31  ;;  %v819_v47 = vadd.f32 %v818_v24, %v817_v41  ;;  %v3898_v52 = vadd.f32 %v826_v22, %v825_v28  ;;  %v5391_v31 = vld [vmem:[#allocation33_spill] sm:$0xff]  ;;  %v5398_v28 = vld [vmem:[#allocation40_spill] sm:$0xff]  ;;  %v5406_v12 = vld [vmem:[#allocation111_spill] sm:$0xff] }
  0xd7   :  { %v3900_v49 = vadd.f32 %v834_v16, %v833_v55  ;;  %v3902_v29 = vadd.f32 %v842_v43, %v841_v59  ;;  %v878_v50 = vadd.f32 %v3524_v34, %v5388_v46  ;;  %v886_v21 = vadd.f32 %v3528_v5, %v5389_v0  ;;  %v5397_v34 = vld [vmem:[#allocation62_spill] sm:$0xff]  ;;  %v5400_v59 = vld [vmem:[#allocation136_spill] sm:$0xff]  ;;  %v5405_v16 = vld [vmem:[#allocation137_spill] sm:$0xff] }
  0xd8   :  { %v1080_v44 = vadd.f32 %v1078_v32, %v5390_v23  ;;  %v1081_v1 = vadd.f32 %v1079_v54, %v3844_v48  ;;  %v3910_v27 = vadd.f32 %v850_v11, %v849_v25  ;;  %v894_v33 = vadd.f32 %v3532_v7, %v5391_v31  ;;  %v5399_v5 = vld [vmem:[#allocation66_spill] sm:$0xff]  ;;  %v5402_v25 = vld [vmem:[#allocation67_spill] sm:$0xff]  ;;  %v5404_v24 = vld [vmem:[#allocation108_spill] sm:$0xff] }
  0xd9   :  { %v902_v15 = vadd.f32 %v5393_v9, %v5392_v3  ;;  %v910_v53 = vadd.f32 %v5395_v51, %v5394_v60  ;;  %v918_v41 = vadd.f32 %v5397_v34, %v5396_v56  ;;  %v926_v55 = vadd.f32 %v5399_v5, %v5398_v28  ;;  %v5411_v32 = vld [vmem:[#allocation76_spill] sm:$0xff]  ;;  %v5413_v31 = vld [vmem:[#allocation138_spill] sm:$0xff]  ;;  %v5414_v56 = vld [vmem:[#allocation139_spill] sm:$0xff] }
  0xda   :  { %v1082_v18 = vadd.f32 %v1080_v44, %v5400_v59  ;;  %v1083_v48 = vadd.f32 %v1081_v1, %v3846_v38  ;;  %v3924_v4 = vadd.f32 %v858_v39, %v857_v17  ;;  %v3926_v61 = vadd.f32 %v866_v2, %v865_v19  ;;  %v5407_v17 = vld [vmem:[#allocation114_spill] sm:$0xff]  ;;  %v5408_v19 = vld [vmem:[#allocation115_spill] sm:$0xff] }
  0xdb   :  { %v3928_v7 = vadd.f32 %v874_v8, %v873_v63  ;;  %v934_v20 = vadd.f32 %v5402_v25, %v5401_v26  ;;  %v879_v58 = vadd.f32 %v878_v50, %v5403_v37  ;;  %v887_v22 = vadd.f32 %v886_v21, %v5404_v24  ;;  %v5409_v63 = vld [vmem:[#allocation119_spill] sm:$0xff]  ;;  %v5410_v8 = vld [vmem:[#allocation120_spill] sm:$0xff]  ;;  %v5412_v21 = vld [vmem:[#allocation121_spill] sm:$0xff] }
  0xdc   :  { %v1084_v43 = vadd.f32 %v1082_v18, %v5405_v16  ;;  %v1085_v36 = vadd.f32 %v1083_v48, %v3848_v14  ;;  %v820_v35 = vrot.slane %v819_v47, 1  ;;  %v895_v38 = vadd.f32 %v894_v33, %v5406_v12  ;;  %v5415_v48 = vld [vmem:[#allocation140_spill] sm:$0xff] }
  0xdd   :  { %v903_v11 = vadd.f32 %v902_v15, %v5407_v17  ;;  %v911_v39 = vadd.f32 %v910_v53, %v5408_v19  ;;  %v919_v2 = vadd.f32 %v918_v41, %v5409_v63  ;;  %v927_v57 = vadd.f32 %v926_v55, %v5410_v8 }
  0xde   :  { %v1086_v54 = vadd.f32 %v1084_v43, %v5411_v32  ;;  %v1087_v46 = vadd.f32 %v1085_v36, %v757_v42  ;;  %v828_v50 = vrot.slane %v3898_v52, 1  ;;  %v836_v0 = vrot.slane %v3900_v49, 1 }
  0xdf   :  { %v844_v14 = vrot.slane %v3902_v29, 1  ;;  %v935_v23 = vadd.f32 %v934_v20, %v5412_v21  ;;  %v880_v44 = vrot.slane %v879_v58, 4  ;;  %v888_v1 = vrot.slane %v887_v22, 4 }
  0xe0   :  { %v1088_v33 = vadd.f32 %v1086_v54, %v5413_v31  ;;  %v1089_v3 = vadd.f32 %v1087_v46, %v3874_v45  ;;  %v852_v9 = vrot.slane %v3910_v27, 1  ;;  %v896_v15 = vrot.slane %v895_v38, 4  ;;  %v5418_v54 = vld [vmem:[#allocation143_spill] sm:$0xff] }
  0xe1   :  { %v904_v60 = vrot.slane %v903_v11, 4  ;;  %v912_v51 = vrot.slane %v911_v39, 4  ;;  %v920_v42 = vrot.slane %v919_v2, 4  ;;  %v928_v53 = vrot.slane %v927_v57, 4 }
  0xe2   :  { %v1090_v34 = vadd.f32 %v1088_v33, %v5414_v56  ;;  %v1091_v41 = vadd.f32 %v1089_v3, %v3880_v62  ;;  %v860_v28 = vrot.slane %v3924_v4, 1  ;;  %v868_v5 = vrot.slane %v3926_v61, 1  ;;  %v5416_v62 = vld [vmem:[#allocation141_spill] sm:$0xff]  ;;  %v5420_v33 = vld [vmem:[#allocation42_spill] sm:$0xff]  ;;  %v5421_v3 = vld [vmem:[#allocation68_spill] sm:$0xff] }
  0xe3   :  { %v876_v55 = vrot.slane %v3928_v7, 1  ;;  %v936_v59 = vrot.slane %v935_v23, 4  ;;  %v881_v18 = vadd.f32 %v880_v44, %v879_v58  ;;  %v889_v45 = vadd.f32 %v888_v1, %v887_v22  ;;  %v5425_v56 = vld [vmem:[#allocation44_spill] sm:$0xff] }
  0xe4   :  { %v1092_v26 = vadd.f32 %v1090_v34, %v5415_v48  ;;  %v1093_v25 = vadd.f32 %v1091_v41, %v3882_v13  ;;  %v821_v20 = vadd.f32 %v820_v35, %v819_v47  ;;  %v897_v37 = vadd.f32 %v896_v15, %v895_v38  ;;  %v5417_v13 = vld [vmem:[#allocation142_spill] sm:$0xff]  ;;  %v5426_v34 = vld [vmem:[#allocation73_spill] sm:$0xff] }
  0xe5   :  { %v905_v24 = vadd.f32 %v904_v60, %v903_v11  ;;  %v913_v16 = vadd.f32 %v912_v51, %v911_v39  ;;  %v921_v43 = vadd.f32 %v920_v42, %v919_v2  ;;  %v929_v36 = vadd.f32 %v928_v53, %v927_v57  ;;  %v5423_v51 = vld [vmem:[#allocation43_spill] sm:$0xff]  ;;  %v5424_v42 = vld [vmem:[#allocation72_spill] sm:$0xff]  ;;  %v5427_v41 = vld [vmem:[#allocation45_spill] sm:$0xff] }
  0xe6   :  { %v1094_v12 = vadd.f32 %v1092_v26, %v5416_v62  ;;  %v1095_v17 = vadd.f32 %v1093_v25, %v3886_v10  ;;  %v829_v19 = vadd.f32 %v828_v50, %v3898_v52  ;;  %v837_v63 = vadd.f32 %v836_v0, %v3900_v49  ;;  %v5430_v26 = vld [vmem:[#allocation123_spill] sm:$0xff]  ;;  %v5435_v62 = vld [vmem:[#allocation48_spill] sm:$0xff] }
  0xe7   :  { %v845_v58 = vadd.f32 %v844_v14, %v3902_v29  ;;  %v937_v22 = vadd.f32 %v936_v59, %v935_v23  ;;  %v882_v8 = vrot.slane %v881_v18, 2  ;;  %v890_v32 = vrot.slane %v889_v45, 2 }
  0xe8   :  { %v1096_v47 = vadd.f32 %v1094_v12, %v5417_v13  ;;  %v1097_v35 = vadd.f32 %v1095_v17, %v3888_v6  ;;  %v853_v38 = vadd.f32 %v852_v9, %v3910_v27  ;;  %v898_v11 = vrot.slane %v897_v37, 2  ;;  %v5419_v27 = vld [vmem:[#allocation145_spill] sm:$0xff]  ;;  %v5436_v12 = vld [vmem:[#allocation80_spill] sm:$0xff] }
  0xe9   :  { %v906_v39 = vrot.slane %v905_v24, 2  ;;  %v914_v2 = vrot.slane %v913_v16, 2  ;;  %v922_v57 = vrot.slane %v921_v43, 2  ;;  %v930_v10 = vrot.slane %v929_v36, 2 }
  0xea   :  { %v1098_v52 = vadd.f32 %v1096_v47, %v5418_v54  ;;  %v1099_v49 = vadd.f32 %v1097_v35, %v3892_v40  ;;  %v861_v29 = vadd.f32 %v860_v28, %v3924_v4  ;;  %v869_v46 = vadd.f32 %v868_v5, %v3926_v61  ;;  %v5422_v61 = vld [vmem:[#allocation147_spill] sm:$0xff]  ;;  %v5428_v28 = vld [vmem:[#allocation74_spill] sm:$0xff] }
  0xeb   :  { %v3969_v50 = vadd.f32 %v876_v55, %v3928_v7  ;;  %v938_v0 = vrot.slane %v937_v22, 2  ;;  %v883_v6 = vadd.f32 %v882_v8, %v881_v18  ;;  %v891_v14 = vadd.f32 %v890_v32, %v889_v45  ;;  %v5429_v18 = vld [vmem:[#allocation148_spill] sm:$0xff]  ;;  %v5438_v35 = vld [vmem:[#allocation91_spill] sm:$0xff]  ;;  %v5442_v54 = vld [vmem:[#allocation82_spill] sm:$0xff] }
  0xec   :  { %v1100_v21 = vadd.f32 %v1098_v52, %v5419_v27  ;;  %v1101_v23 = vadd.f32 %v1099_v49, %v3894_v30  ;;  %v899_v44 = vadd.f32 %v898_v11, %v897_v37  ;;  %v907_v1 = vadd.f32 %v906_v39, %v905_v24  ;;  %v5431_v37 = vld [vmem:[#allocation46_spill] sm:$0xff]  ;;  %v5437_v32 = vld [vmem:[#allocation152_spill] sm:$0xff]  ;;  %v5443_v27 = vld [vmem:[#allocation153_spill] sm:$0xff] }
  0xed   :  { %v915_v31 = vadd.f32 %v914_v2, %v913_v16  ;;  %v942_v40 = vadd.f32 %v5421_v3, %v5420_v33  ;;  %v923_v9 = vadd.f32 %v922_v57, %v921_v43  ;;  %v3975_v4 = vadd.f32 %v930_v10, %v929_v36  ;;  %v5433_v16 = vld [vmem:[#allocation47_spill] sm:$0xff]  ;;  %v5439_v39 = vld [vmem:[#allocation92_spill] sm:$0xff]  ;;  %v5440_v2 = vld [vmem:[#allocation93_spill] sm:$0xff] }
  0xee   :  { %v1102_v15 = vadd.f32 %v1100_v21, %v5422_v61  ;;  %v1103_v7 = vadd.f32 %v1101_v23, %v821_v20  ;;  %v3978_v60 = vadd.f32 %v938_v0, %v937_v22  ;;  %v950_v53 = vadd.f32 %v5424_v42, %v5423_v51  ;;  %v5432_v20 = vld [vmem:[#allocation78_spill] sm:$0xff]  ;;  %v5434_v43 = vld [vmem:[#allocation79_spill] sm:$0xff]  ;;  %v5441_v10 = vld [vmem:[#allocation49_spill] sm:$0xff] }
  0xef   :  { %v958_v30 = vadd.f32 %v5426_v34, %v5425_v56  ;;  %v966_v5 = vadd.f32 %v5428_v28, %v5427_v41  ;;  %v884_v55 = vrot.slane %v883_v6, 1  ;;  %v892_v59 = vrot.slane %v891_v14, 1  ;;  %v5444_v3 = vld [vmem:[#allocation95_spill] sm:$0xff]  ;;  %v5445_v61 = vld [vmem:[#allocation96_spill] sm:$0xff] }
  0xf0   :  { %v1104_v45 = vadd.f32 %v1102_v15, %v5429_v18  ;;  %v1105_v48 = vadd.f32 %v1103_v7, %v829_v19  ;;  %v943_v25 = vadd.f32 %v942_v40, %v5430_v26  ;;  %v974_v24 = vadd.f32 %v5432_v20, %v5431_v37 }
  0xf1   :  { %v982_v36 = vadd.f32 %v5434_v43, %v5433_v16  ;;  %v990_v17 = vadd.f32 %v5436_v12, %v5435_v62  ;;  %v900_v22 = vrot.slane %v899_v44, 1  ;;  %v908_v8 = vrot.slane %v907_v1, 1  ;;  %v5450_v12 = vld [vmem:[#allocation159_spill] sm:$0xff] }
  0xf2   :  { %v1106_v13 = vadd.f32 %v1104_v45, %v5437_v32  ;;  %v1107_v47 = vadd.f32 %v1105_v48, %v837_v63  ;;  %v951_v11 = vadd.f32 %v950_v53, %v5438_v35  ;;  %v959_v19 = vadd.f32 %v958_v30, %v5439_v39  ;;  %v5446_v63 = vld [vmem:[#allocation97_spill] sm:$0xff]  ;;  %v5447_v53 = vld [vmem:[#allocation154_spill] sm:$0xff]  ;;  %v5449_v48 = vld [vmem:[#allocation155_spill] sm:$0xff] }
  0xf3   :  { %v967_v57 = vadd.f32 %v966_v5, %v5440_v2  ;;  %v998_v52 = vadd.f32 %v5442_v54, %v5441_v10  ;;  %v916_v49 = vrot.slane %v915_v31, 1  ;;  %v924_v0 = vrot.slane %v923_v9, 1  ;;  %v5448_v5 = vld [vmem:[#allocation100_spill] sm:$0xff] }
  0xf4   :  { %v1108_v21 = vadd.f32 %v1106_v13, %v5443_v27  ;;  %v1109_v23 = vadd.f32 %v1107_v47, %v845_v58  ;;  %v944_v33 = vrot.slane %v943_v25, 4  ;;  %v975_v40 = vadd.f32 %v974_v24, %v5444_v3  ;;  %v5457_v27 = vld [vmem:[#allocation103_spill] sm:$0xff] }
  0xf5   :  { %v983_v15 = vadd.f32 %v982_v36, %v5445_v61  ;;  %v991_v7 = vadd.f32 %v990_v17, %v5446_v63  ;;  %v932_v51 = vrot.slane %v3975_v4, 1  ;;  %v940_v42 = vrot.slane %v3978_v60, 1  ;;  %v5458_v61 = vld [vmem:[#allocation101_spill] sm:$0xff]  ;;  %v5459_v63 = vld [vmem:[#allocation52_spill] sm:$0xff] }
  0xf6   :  { %v1110_v56 = vadd.f32 %v1108_v21, %v5447_v53  ;;  %v1111_v34 = vadd.f32 %v1109_v23, %v853_v38  ;;  %v952_v30 = vrot.slane %v951_v11, 4  ;;  %v960_v41 = vrot.slane %v959_v19, 4  ;;  %v5461_v53 = vld [vmem:[#allocation112_spill] sm:$0xff] }
  0xf7   :  { %v968_v28 = vrot.slane %v967_v57, 4  ;;  %v999_v18 = vadd.f32 %v998_v52, %v5448_v5  ;;  %v885_v58 = vadd.f32 %v884_v55, %v883_v6  ;;  %v893_v45 = vadd.f32 %v892_v59, %v891_v14  ;;  %v5451_v6 = vld [vmem:[#allocation160_spill] sm:$0xff] }
  0xf8   :  { %v1112_v26 = vadd.f32 %v1110_v56, %v5449_v48  ;;  %v1113_v37 = vadd.f32 %v1111_v34, %v861_v29  ;;  %v945_v20 = vadd.f32 %v944_v33, %v943_v25  ;;  %v976_v24 = vrot.slane %v975_v40, 4  ;;  %v5465_v48 = vld [vmem:[#allocation113_spill] sm:$0xff] }
  0xf9   :  { %v984_v16 = vrot.slane %v983_v15, 4  ;;  %v992_v43 = vrot.slane %v991_v7, 4  ;;  %v901_v36 = vadd.f32 %v900_v22, %v899_v44  ;;  %v909_v62 = vadd.f32 %v908_v8, %v907_v1  ;;  %v5452_v1 = vld [vmem:[#allocation50_spill] sm:$0xff]  ;;  %v5453_v22 = vld [vmem:[#allocation83_spill] sm:$0xff] }
  0xfa   :  { %v1114_v17 = vadd.f32 %v1112_v26, %v5450_v12  ;;  %v1115_v32 = vadd.f32 %v1113_v37, %v869_v46  ;;  %v953_v38 = vadd.f32 %v952_v30, %v951_v11  ;;  %v961_v13 = vadd.f32 %v960_v41, %v959_v19  ;;  %v5454_v46 = vld [vmem:[#allocation102_spill] sm:$0xff]  ;;  %v5467_v12 = vld [vmem:[#allocation88_spill] sm:$0xff] }
  0xfb   :  { %v969_v47 = vadd.f32 %v968_v28, %v967_v57  ;;  %v1000_v35 = vrot.slane %v999_v18, 4  ;;  %v917_v39 = vadd.f32 %v916_v49, %v915_v31  ;;  %v925_v2 = vadd.f32 %v924_v0, %v923_v9  ;;  %v5455_v49 = vld [vmem:[#allocation51_spill] sm:$0xff]  ;;  %v5462_v28 = vld [vmem:[#allocation124_spill] sm:$0xff] }
  0xfc   :  { %v1116_v14 = vadd.f32 %v1114_v17, %v5451_v6  ;;  %v1117_v55 = vadd.f32 %v1115_v32, %v3969_v50  ;;  %v946_v29 = vrot.slane %v945_v20, 2  ;;  %v977_v59 = vadd.f32 %v976_v24, %v975_v40  ;;  %v5456_v50 = vld [vmem:[#allocation84_spill] sm:$0xff] }
  0xfd   :  { %v985_v25 = vadd.f32 %v984_v16, %v983_v15  ;;  %v993_v10 = vadd.f32 %v992_v43, %v991_v7  ;;  %v933_v44 = vadd.f32 %v932_v51, %v3975_v4  ;;  %v1006_v8 = vadd.f32 %v5453_v22, %v5452_v1  ;;  %v5460_v7 = vld [vmem:[#allocation86_spill] sm:$0xff] }
  0xfe   :  { %v1118_v11 = vadd.f32 %v1116_v14, %v5454_v46  ;;  %v1119_v19 = vadd.f32 %v1117_v55, %v885_v58  ;;  %v954_v57 = vrot.slane %v953_v38, 2  ;;  %v962_v54 = vrot.slane %v961_v13, 2  ;;  %v5464_v58 = vld [vmem:[#allocation87_spill] sm:$0xff]  ;;  %v5466_v43 = vld [vmem:[#allocation54_spill] sm:$0xff] }
  0xff   :  { %v970_v31 = vrot.slane %v969_v47, 2  ;;  %v1001_v9 = vadd.f32 %v1000_v35, %v999_v18  ;;  %v941_v52 = vadd.f32 %v940_v42, %v3978_v60  ;;  %v1014_v0 = vadd.f32 %v5456_v50, %v5455_v49  ;;  %v5463_v18 = vld [vmem:[#allocation53_spill] sm:$0xff]  ;;  %v5471_v1 = vld [vmem:[#allocation90_spill] sm:$0xff]  ;;  %v5475_v49 = vld [vmem:[#allocation56_spill] sm:$0xff] }
 0x100   :  { %v1120_v21 = vadd.f32 %v1118_v11, %v5457_v27  ;;  %v1121_v23 = vadd.f32 %v1119_v19, %v893_v45  ;;  %v947_v33 = vadd.f32 %v946_v29, %v945_v20  ;;  %v978_v4 = vrot.slane %v977_v59, 2  ;;  %v5470_v29 = vld [vmem:[#allocation55_spill] sm:$0xff] }
 0x101   :  { %v986_v3 = vrot.slane %v985_v25, 2  ;;  %v994_v40 = vrot.slane %v993_v10, 2  ;;  %v1007_v15 = vadd.f32 %v1006_v8, %v5458_v61  ;;  %v1022_v51 = vadd.f32 %v5460_v7, %v5459_v63  ;;  %v5472_v8 = vld [vmem:[#allocation127_spill] sm:$0xff]  ;;  %v5479_v61 = vld [vmem:[#allocation57_spill] sm:$0xff]  ;;  %v5480_v63 = vld [vmem:[#allocation106_spill] sm:$0xff] }
 0x102   :  { %v1122_v56 = vadd.f32 %v1120_v21, %v5461_v53  ;;  %v1123_v34 = vadd.f32 %v1121_v23, %v901_v36  ;;  %v955_v30 = vadd.f32 %v954_v57, %v953_v38  ;;  %v963_v60 = vadd.f32 %v962_v54, %v961_v13  ;;  %v5468_v36 = vld [vmem:[#allocation125_spill] sm:$0xff]  ;;  %v5469_v13 = vld [vmem:[#allocation116_spill] sm:$0xff]  ;;  %v5476_v50 = vld [vmem:[#allocation99_spill] sm:$0xff] }
 0x103   :  { %v971_v42 = vadd.f32 %v970_v31, %v969_v47  ;;  %v1002_v41 = vrot.slane %v1001_v9, 2  ;;  %v1015_v5 = vadd.f32 %v1014_v0, %v5462_v28  ;;  %v1030_v45 = vadd.f32 %v5464_v58, %v5463_v18  ;;  %v5474_v54 = vld [vmem:[#allocation128_spill] sm:$0xff] }
 0x104   :  { %v1124_v26 = vadd.f32 %v1122_v56, %v5465_v48  ;;  %v1125_v37 = vadd.f32 %v1123_v34, %v909_v62  ;;  %v948_v20 = vrot.slane %v947_v33, 1  ;;  %v979_v24 = vadd.f32 %v978_v4, %v977_v59 }
 0x105   :  { %v987_v16 = vadd.f32 %v986_v3, %v985_v25  ;;  %v1038_v17 = vadd.f32 %v5467_v12, %v5466_v43  ;;  %v1008_v32 = vrot.slane %v1007_v15, 4  ;;  %v1023_v38 = vadd.f32 %v1022_v51, %v5468_v36  ;;  %v5473_v25 = vld [vmem:[#allocation165_spill] sm:$0xff]  ;;  %v5481_v51 = vld [vmem:[#allocation30_spill] sm:$0xff]  ;;  %v5484_v43 = vld [vmem:[#allocation64_spill] sm:$0xff] }
 0x106   :  { %v1126_v47 = vadd.f32 %v1124_v26, %v5469_v13  ;;  %v1127_v35 = vadd.f32 %v1125_v37, %v917_v39  ;;  %v956_v6 = vrot.slane %v955_v30, 1  ;;  %v995_v14 = vadd.f32 %v994_v40, %v993_v10  ;;  %v5478_v3 = vld [vmem:[#allocation129_spill] sm:$0xff] }
 0x107   :  { %v4032_v55 = vadd.f32 %v1002_v41, %v1001_v9  ;;  %v1046_v22 = vadd.f32 %v5471_v1, %v5470_v29  ;;  %v1016_v62 = vrot.slane %v1015_v5, 4  ;;  %v1031_v59 = vadd.f32 %v1030_v45, %v5472_v8  ;;  %v5477_v9 = vld [vmem:[#allocation24_spill] sm:$0xff] }
 0x108   :  { %v1128_v46 = vadd.f32 %v1126_v47, %v5473_v25  ;;  %v1129_v11 = vadd.f32 %v1127_v35, %v925_v2  ;;  %v949_v19 = vadd.f32 %v948_v20, %v947_v33  ;;  %v964_v57 = vrot.slane %v963_v60, 1 }
 0x109   :  { %v1039_v31 = vadd.f32 %v1038_v17, %v5474_v54  ;;  %v1054_v39 = vadd.f32 %v5476_v50, %v5475_v49  ;;  %v1009_v0 = vadd.f32 %v1008_v32, %v1007_v15  ;;  %v1024_v10 = vrot.slane %v1023_v38, 4  ;;  %v5482_v15 = vld [vmem:[#allocation131_spill] sm:$0xff]  ;;  %v5485_v32 = vld [vmem:[#allocation37_spill] sm:$0xff]  ;;  %v5488_v54 = vld [vmem:[#allocation172_spill] sm:$0xff] }
 0x10a   :  { %v1130_v27 = vadd.f32 %v1128_v46, %v5477_v9  ;;  %v1131_v21 = vadd.f32 %v1129_v11, %v933_v44  ;;  %v957_v23 = vadd.f32 %v956_v6, %v955_v30  ;;  %v972_v4 = vrot.slane %v971_v42, 1  ;;  %v5483_v44 = vld [vmem:[#allocation32_spill] sm:$0xff] }
 0x10b   :  { %v1047_v40 = vadd.f32 %v1046_v22, %v5478_v3  ;;  %v1062_v7 = vadd.f32 %v5480_v63, %v5479_v61  ;;  %v1017_v2 = vadd.f32 %v1016_v62, %v1015_v5  ;;  %v1032_v33 = vrot.slane %v1031_v59, 4  ;;  %v5491_v63 = vld [vmem:[#allocation169_spill] sm:$0xff] }
 0x10c   :  { %v1132_v53 = vadd.f32 %v1130_v27, %v5481_v51  ;;  %v1133_v56 = vadd.f32 %v1131_v21, %v941_v52  ;;  %v965_v34 = vadd.f32 %v964_v57, %v963_v60  ;;  %v980_v41 = vrot.slane %v979_v24, 1 }
 0x10d   :  { %v1040_v28 = vrot.slane %v1039_v31, 4  ;;  %v1055_v18 = vadd.f32 %v1054_v39, %v5482_v15  ;;  %v1010_v58 = vrot.slane %v1009_v0, 2  ;;  %v1025_v45 = vadd.f32 %v1024_v10, %v1023_v38  ;;  %v5486_v38 = vld [vmem:[#allocation39_spill] sm:$0xff]  ;;  %v5489_v10 = vld [vmem:[#allocation168_spill] sm:$0xff] }
 0x10e   :  { %v1134_v30 = vadd.f32 %v1132_v53, %v5483_v44  ;;  %v1135_v48 = vadd.f32 %v1133_v56, %v949_v19  ;;  %v973_v26 = vadd.f32 %v972_v4, %v971_v42  ;;  %v988_v37 = vrot.slane %v987_v16, 1 }
 0x10f   :  { %v1048_v20 = vrot.slane %v1047_v40, 4  ;;  %v1063_v12 = vadd.f32 %v1062_v7, %v5484_v43  ;;  %v1018_v5 = vrot.slane %v1017_v2, 2  ;;  %v1033_v17 = vadd.f32 %v1032_v33, %v1031_v59  ;;  %v5487_v59 = vld [vmem:[#allocation167_spill] sm:$0xff]  ;;  %v5492_v33 = vld [vmem:[#allocation174_spill] sm:$0xff] }
 0x110   :  { %v1136_v36 = vadd.f32 %v1134_v30, %v5485_v32  ;;  %v1137_v52 = vadd.f32 %v1135_v48, %v957_v23  ;;  %v981_v60 = vadd.f32 %v980_v41, %v979_v24  ;;  %v996_v13 = vrot.slane %v995_v14, 1  ;;  %v5497_v32 = vld [vmem:[#allocation31_spill] sm:$0xff] }
 0x111   :  { %v1041_v47 = vadd.f32 %v1040_v28, %v1039_v31  ;;  %v1056_v35 = vrot.slane %v1055_v18, 4  ;;  %v1011_v6 = vadd.f32 %v1010_v58, %v1009_v0  ;;  %v1026_v29 = vrot.slane %v1025_v45, 2  ;;  %v5493_v28 = vld [vmem:[#allocation170_spill] sm:$0xff]  ;;  %v5494_v58 = vld [vmem:[#allocation175_spill] sm:$0xff] }
 0x112   :  { %v1138_v1 = vadd.f32 %v1136_v36, %v5486_v38  ;;  %v1139_v22 = vadd.f32 %v1137_v52, %v965_v34  ;;  %v989_v62 = vadd.f32 %v988_v37, %v987_v16  ;;  %v1004_v42 = vrot.slane %v4032_v55, 1  ;;  %v5490_v16 = vld [vmem:[#allocation173_spill] sm:$0xff]  ;;  %v5495_v37 = vld [vmem:[#allocation171_spill] sm:$0xff] }
 0x113   :  { %v1049_v8 = vadd.f32 %v1048_v20, %v1047_v40  ;;  %v1064_v25 = vrot.slane %v1063_v12, 4  ;;  %v1019_v46 = vadd.f32 %v1018_v5, %v1017_v2  ;;  %v1034_v11 = vrot.slane %v1033_v17, 2  ;;  %v5496_v5 = vld [vmem:[#allocation176_spill] sm:$0xff]  ;;  %v5499_v38 = vld [vmem:[#allocation177_spill] sm:$0xff] }
 0x114   :  { %v1140_v19 = vadd.f32 %v1138_v1, %v5487_v59  ;;  %v1141_v57 = vadd.f32 %v1139_v22, %v973_v26  ;;  %v484_v24 = vrot.slane %v5488_v54, 1  ;;  %v997_v49 = vadd.f32 %v996_v13, %v995_v14  ;;  %v5500_v22 = vld [vmem:[#allocation38_spill] sm:$0xff] }
 0x115   :  { %v1042_v31 = vrot.slane %v1041_v47, 2  ;;  %v1057_v50 = vadd.f32 %v1056_v35, %v1055_v18  ;;  %v1012_v39 = vrot.slane %v1011_v6, 1  ;;  %v1027_v0 = vadd.f32 %v1026_v29, %v1025_v45 }
 0x116   :  { %v1142_v9 = vadd.f32 %v1140_v19, %v5489_v10  ;;  %v1143_v27 = vadd.f32 %v1141_v57, %v981_v60  ;;  %v492_v21 = vrot.slane %v5490_v16, 1  ;;  %v1005_v23 = vadd.f32 %v1004_v42, %v4032_v55 }
 0x117   :  { %v1050_v4 = vrot.slane %v1049_v8, 2  ;;  %v1065_v3 = vadd.f32 %v1064_v25, %v1063_v12  ;;  %v1020_v40 = vrot.slane %v1019_v46, 1  ;;  %v1035_v61 = vadd.f32 %v1034_v11, %v1033_v17 }
 0x118   :  { %v1144_v7 = vadd.f32 %v1142_v9, %v5491_v63  ;;  %v1145_v2 = vadd.f32 %v1143_v27, %v989_v62  ;;  %v485_v14 = vadd.f32 %v484_v24, %v5488_v54  ;;  %v500_v51 = vrot.slane %v5492_v33, 1 }
 0x119   :  { %v1043_v53 = vadd.f32 %v1042_v31, %v1041_v47  ;;  %v1058_v56 = vrot.slane %v1057_v50, 2  ;;  %v1013_v34 = vadd.f32 %v1012_v39, %v1011_v6  ;;  %v1028_v41 = vrot.slane %v1027_v0, 1 }
 0x11a   :  { %v1146_v15 = vadd.f32 %v1144_v7, %v5493_v28  ;;  %v1147_v18 = vadd.f32 %v1145_v2, %v997_v49  ;;  %v493_v55 = vadd.f32 %v492_v21, %v5490_v16  ;;  %v508_v45 = vrot.slane %v5494_v58, 1 }
 0x11b   :  { %v1051_v44 = vadd.f32 %v1050_v4, %v1049_v8  ;;  %v1066_v30 = vrot.slane %v1065_v3, 2  ;;  %v1021_v48 = vadd.f32 %v1020_v40, %v1019_v46  ;;  %v1036_v26 = vrot.slane %v1035_v61, 1 }
 0x11c   :  { %v1148_v20 = vadd.f32 %v1146_v15, %v5495_v37  ;;  %v1149_v43 = vadd.f32 %v1147_v18, %v1005_v23  ;;  %v501_v12 = vadd.f32 %v500_v51, %v5492_v33  ;;  %v516_v17 = vrot.slane %v5496_v5, 1  ;;  %v1170_v18 = vld [vmem:[%s4915_s1] sm:$0x1] }
 0x11d   :  { %v5498_v36 = vrot.slane %v5497_v32, 2  ;;  %v1059_v60 = vadd.f32 %v1058_v56, %v1057_v50  ;;  %v1029_v13 = vadd.f32 %v1028_v41, %v1027_v0  ;;  %v1044_v47 = vrot.slane %v1043_v53, 1  ;;  %v1999_v37 = vld [vmem:[%s4914_s0] sm:$0xff] }
 0x11e   :  { %v1150_v35 = vadd.f32 %v1148_v20, %v485_v14  ;;  %v1151_v6 = vadd.f32 %v1149_v43, %v1013_v34  ;;  %v509_v29 = vadd.f32 %v508_v45, %v5494_v58  ;;  %v524_v1 = vrot.slane %v5499_v38, 1  ;;  %v2000_v43 = vld [vmem:[%s4914_s0 + $0x8] sm:$0xff] }
 0x11f   :  { %v531_v52 = vadd.f32 %v5498_v36, %v5497_v32  ;;  %v5501_v62 = vrot.slane %v5500_v22, 2  ;;  %v1067_v8 = vadd.f32 %v1066_v30, %v1065_v3  ;;  %v1037_v25 = vadd.f32 %v1036_v26, %v1035_v61  ;;  %v2002_v32 = vld [vmem:[%s4914_s0 + $0xc8] sm:$0xff] }
 0x120   :  { %v1052_v46 = vrot.slane %v1051_v44, 1  ;;  %v1152_v11 = vadd.f32 %v1150_v35, %v493_v55  ;;  %v1153_v59 = vadd.f32 %v1151_v6, %v1021_v48  ;;  %v517_v19 = vadd.f32 %v516_v17, %v5496_v5  ;;  %v2001_v5 = vld [vmem:[%s4914_s0 + $0xc0] sm:$0xff] }
 0x121   :  { %v539_v42 = vadd.f32 %v5501_v62, %v5500_v22  ;;  %v532_v57 = vrot.slane %v531_v52, 1  ;;  %v1045_v54 = vadd.f32 %v1044_v47, %v1043_v53  ;;  %v1060_v24 = vrot.slane %v1059_v60, 1  ;;  %v2005_v35 = vld [vmem:[%s4914_s0 + $0x240] sm:$0xff] }
 0x122   :  { %v1154_v49 = vadd.f32 %v1152_v11, %v501_v12  ;;  %v1155_v31 = vadd.f32 %v1153_v59, %v1029_v13  ;;  %v525_v50 = vadd.f32 %v524_v1, %v5499_v38  ;;  %v1053_v0 = vadd.f32 %v1052_v46, %v1051_v44  ;;  %v1174_v44 = vld [vmem:[%s4916_s2] sm:$0x1]  ;;  %v2004_v13 = vld [vmem:[%s4914_s0 + $0x188] sm:$0xff] }
 0x123   :  { %v540_v39 = vrot.slane %v539_v42, 1  ;;  %v1068_v10 = vrot.slane %v1067_v8, 1  ;;  %v533_v16 = vadd.f32 %v532_v57, %v531_v52  ;;  %v1061_v21 = vadd.f32 %v1060_v24, %v1059_v60  ;;  %v2003_v52 = vld [vmem:[%s4914_s0 + $0x180] sm:$0xff]  ;;  %v2006_v38 = vld [vmem:[%s4914_s0 + $0x248] sm:$0xff] }
 0x124   :  { %v1156_v9 = vadd.f32 %v1154_v49, %v509_v29  ;;  %v1157_v27 = vadd.f32 %v1155_v31, %v1037_v25  ;;  %v1178_v28 = vlaneseq  ;;  %v2007_v22 = vld [vmem:[%s4914_s0 + $0x300] sm:$0xff]  ;;  %v2010_v11 = vld [vmem:[%s4914_s0 + $0x3c8] sm:$0xff] }
 0x125   :  { %v541_v3 = vadd.f32 %v540_v39, %v539_v42  ;;  %v1069_v40 = vadd.f32 %v1068_v10, %v1067_v8  ;;  %v2008_v42 = vld [vmem:[%s4914_s0 + $0x308] sm:$0xff]  ;;  %v2009_v25 = vld [vmem:[%s4914_s0 + $0x3c0] sm:$0xff] }
 0x126   :  { %v1158_v23 = vadd.f32 %v1156_v9, %v517_v19  ;;  %v1159_v4 = vadd.f32 %v1157_v27, %v1045_v54  ;;  %v1179_v15 = vshrl.u32 %v1178_v28, 7  ;;  %v2011_v19 = vld [vmem:[%s4914_s0 + $0x10] sm:$0xff]  ;;  %v2012_v54 = vld [vmem:[%s4914_s0 + $0x18] sm:$0xff] }
 0x128   :  { %v1160_v61 = vadd.f32 %v1158_v23, %v525_v50  ;;  %v1161_v63 = vadd.f32 %v1159_v4, %v1053_v0  ;;  %v1180_v55 = vsub.s32 0, %v1179_v15 }
 0x12a   :  { %v1162_v7 = vadd.f32 %v1160_v61, %v533_v16  ;;  %v1163_v2 = vadd.f32 %v1161_v63, %v1061_v21 }
 0x12c   :  { %v1164_v14 = vadd.f32 %v1162_v7, %v541_v3  ;;  %v1165_v33 = vadd.f32 %v1163_v2, %v1069_v40 }
 0x12e   :  { %v1166_v51 = vmul.f32 0.00086805556, %v1164_v14  ;;  %v1167_v53 = vmul.f32 0.00086805556, %v1165_v33 }
 0x130   :  { %v1168_v56 = vmul.f32 %v1166_v51, %v1166_v51 }
 0x132   :  { %v1169_v34 = vsub.f32 %v1167_v53, %v1168_v56 }
 0x134   :  { %v1171_v41 = vadd.f32 1e-05, %v1169_v34 }
 0x136   :  { %1997 = vrsqrt.f32 %v1171_v41 }
 0x143   :  { %v1998_v58 = vpop.eup %1997 }
 0x144   :  { %v1173_v45 = vmul.f32 %v1998_v58, %v1170_v18 }
 0x146   :  { %v1175_v30 = vmul.f32 %v1173_v45, %v1166_v51  ;;  %v4082_v48 = vrot.slane %v1173_v45, %v1180_v55 }
 0x148   :  { %v1176_v26 = vsub.f32 %v1174_v44, %v1175_v30  ;;  %v1183_v20 = vmul.f32 %v1999_v37, %v4082_v48  ;;  %v1198_v12 = vmul.f32 %v2000_v43, %v4082_v48  ;;  %v1207_v17 = vmul.f32 %v2001_v5, %v4082_v48 }
 0x149   :  { %v1216_v36 = vmul.f32 %v2002_v32, %v4082_v48  ;;  %v1184_v60 = vmul.f32 %v2003_v52, %v4082_v48  ;;  %v1199_v47 = vmul.f32 %v2004_v13, %v4082_v48  ;;  %v1208_v6 = vmul.f32 %v2005_v35, %v4082_v48  ;;  %v2014_v32 = vld [vmem:[%s4914_s0 + $0xd8] sm:$0xff] }
 0x14a   :  { %v4112_v29 = vrot.slane %v1176_v26, %v1180_v55  ;;  %v1217_v1 = vmul.f32 %v2006_v38, %v4082_v48  ;;  %v1185_v62 = vmul.f32 %v2007_v22, %v4082_v48  ;;  %v1200_v8 = vmul.f32 %v2008_v42, %v4082_v48  ;;  %v2018_v42 = vld [vmem:[%s4914_s0 + $0x258] sm:$0xff] }
 0x14b   :  { %v1209_v46 = vmul.f32 %v2009_v25, %v4082_v48  ;;  %v1218_v59 = vmul.f32 %v2010_v11, %v4082_v48  ;;  %v1250_v57 = vmul.f32 %v2011_v19, %v4082_v48  ;;  %v1259_v24 = vmul.f32 %v2012_v54, %v4082_v48 }
 0x14c   :  { %v1192_v49 = vadd.f32 %v4112_v29, %v1183_v20  ;;  %v1201_v31 = vadd.f32 %v1198_v12, %v4112_v29  ;;  %v1210_v50 = vadd.f32 %v1207_v17, %v4112_v29  ;;  %v1219_v39 = vadd.f32 %v1216_v36, %v4112_v29  ;;  %v2013_v20 = vld [vmem:[%s4914_s0 + $0xd0] sm:$0xff] }
 0x14d   :  { %v1193_v0 = vadd.f32 %v4112_v29, %v1184_v60  ;;  %v1202_v10 = vadd.f32 %v1199_v47, %v4112_v29  ;;  %v1211_v9 = vadd.f32 %v1208_v6, %v4112_v29  ;;  %v1220_v27 = vadd.f32 %v1217_v1, %v4112_v29  ;;  %v2015_v60 = vld [vmem:[%s4914_s0 + $0x190] sm:$0xff]  ;;  %v2016_v47 = vld [vmem:[%s4914_s0 + $0x198] sm:$0xff] }
 0x14e   :  { %v1195_v16 = vmax.f32 %v1192_v49, 0.0  ;;  %v1204_v21 = vmax.f32 %v1201_v31, 0.0  ;;  %v1213_v23 = vmax.f32 %v1210_v50, 0.0  ;;  %v1222_v4 = vmax.f32 %v1219_v39, 0.0  ;;  %v2017_v6 = vld [vmem:[%s4914_s0 + $0x250] sm:$0xff] }
 0x14f   :  { %v1196_v3 = vmax.f32 %v1193_v0, 0.0  ;;  %v1205_v40 = vmax.f32 %v1202_v10, 0.0  ;;  %v1214_v61 = vmax.f32 %v1211_v9, 0.0  ;;  %v1223_v63 = vmax.f32 %v1220_v27, 0.0  ;;  %v2020_v0 = vld [vmem:[%s4914_s0 + $0x318] sm:$0xff] }
 0x150   :  { %v1225_v7 = vmax.f32 %v1195_v16, %v1204_v21  ;;  %v1228_v2 = vmax.f32 %v1213_v23, %v1222_v4  ;;  %v1194_v14 = vadd.f32 %v4112_v29, %v1185_v62  ;;  %v1203_v33 = vadd.f32 %v1200_v8, %v4112_v29  ;;  %v2021_v21 = vld [vmem:[%s4914_s0 + $0x3d0] sm:$0xff] }
 0x151   :  { %v1226_v51 = vmax.f32 %v1196_v3, %v1205_v40  ;;  %v1229_v53 = vmax.f32 %v1214_v61, %v1223_v63  ;;  %v1212_v56 = vadd.f32 %v1209_v46, %v4112_v29  ;;  %v1221_v34 = vadd.f32 %v1218_v59, %v4112_v29  ;;  %v2022_v40 = vld [vmem:[%s4914_s0 + $0x3d8] sm:$0xff]  ;;  %v2023_v63 = vld [vmem:[%s4914_s0 + $0x20] sm:$0xff] }
 0x152   :  { %v1231_v41 = vmax.f32 %v1225_v7, %v1228_v2  ;;  %v1197_v28 = vmax.f32 %v1194_v14, 0.0  ;;  %v1206_v15 = vmax.f32 %v1203_v33, 0.0  ;;  %v1253_v18 = vadd.f32 %v1250_v57, %v4112_v29 }
 0x153   :  { %v1232_v55 = vmax.f32 %v1226_v51, %v1229_v53  ;;  %v1215_v58 = vmax.f32 %v1212_v56, 0.0  ;;  %v1224_v45 = vmax.f32 %v1221_v34, 0.0  ;;  %v1262_v44 = vadd.f32 %v1259_v24, %v4112_v29  ;;  %v2019_v24 = vld [vmem:[%s4914_s0 + $0x310] sm:$0xff] }
 0x154   :  { %v1961_v30 = vpack.c.bf16 %v1231_v41, %v1231_v41  ;;  %v1227_v26 = vmax.f32 %v1197_v28, %v1206_v15  ;;  %v1256_v37 = vmax.f32 %v1253_v18, 0.0  ;;  %v1268_v43 = vmul.f32 %v2013_v20, %v4082_v48  ;;  %v2024_v41 = vld [vmem:[%s4914_s0 + $0x28] sm:$0xff] }
 0x155   :  { %v1962_v12 = vpack.c.bf16 %v1232_v55, %v1232_v55  ;;  %v1230_v5 = vmax.f32 %v1215_v58, %v1224_v45  ;;  %v1265_v17 = vmax.f32 %v1262_v44, 0.0  ;;  %v1277_v36 = vmul.f32 %v2014_v32, %v4082_v48  ;;  %v2025_v58 = vld [vmem:[%s4914_s0 + $0xe0] sm:$0xff] }
 0x156   :  { %1247 = vst [vmem:[%s4917_s3] sm:$0xf] %v1961_v30  ;;  %v1271_v52 = vadd.f32 %v1268_v43, %v4112_v29  ;;  %v1251_v13 = vmul.f32 %v2015_v60, %v4082_v48  ;;  %v1260_v35 = vmul.f32 %v2016_v47, %v4082_v48  ;;  %v1269_v38 = vmul.f32 %v2017_v6, %v4082_v48  ;;  %v2028_v60 = vld [vmem:[%s4914_s0 + $0x1a8] sm:$0xff]  ;;  %v2029_v47 = vld [vmem:[%s4914_s0 + $0x260] sm:$0xff] }
 0x157   :  { %1248 = vst [vmem:[%s4917_s3 + $0x30] sm:$0xf] %v1962_v12  ;;  %v1233_v1 = vmax.f32 %v1227_v26, %v1230_v5  ;;  %v1280_v22 = vadd.f32 %v1277_v36, %v4112_v29  ;;  %v1286_v62 = vmax.f32 %v1256_v37, %v1265_v17  ;;  %v1278_v8 = vmul.f32 %v2018_v42, %v4082_v48  ;;  %v2026_v12 = vld [vmem:[%s4914_s0 + $0xe8] sm:$0xff]  ;;  %v2027_v17 = vld [vmem:[%s4914_s0 + $0x1a0] sm:$0xff] }
 0x158   :  { %v1274_v25 = vmax.f32 %v1271_v52, 0.0  ;;  %v1254_v46 = vadd.f32 %v1251_v13, %v4112_v29  ;;  %v1263_v11 = vadd.f32 %v1260_v35, %v4112_v29  ;;  %v1272_v59 = vadd.f32 %v1269_v38, %v4112_v29 }
 0x159   :  { %v1963_v19 = vpack.c.bf16 %v1233_v1, %v1233_v1  ;;  %v1283_v57 = vmax.f32 %v1280_v22, 0.0  ;;  %v1281_v54 = vadd.f32 %v1278_v8, %v4112_v29  ;;  %v1252_v49 = vmul.f32 %v2019_v24, %v4082_v48  ;;  %v2030_v22 = vld [vmem:[%s4914_s0 + $0x268] sm:$0xff] }
 0x15a   :  { %v1257_v31 = vmax.f32 %v1254_v46, 0.0  ;;  %v1266_v50 = vmax.f32 %v1263_v11, 0.0  ;;  %v1275_v39 = vmax.f32 %v1272_v59, 0.0  ;;  %v1261_v10 = vmul.f32 %v2020_v0, %v4082_v48 }
 0x15b   :  { %1249 = vst [vmem:[%s4917_s3 + $0x60] sm:$0xf] %v1963_v19  ;;  %v1289_v9 = vmax.f32 %v1274_v25, %v1283_v57  ;;  %v1284_v27 = vmax.f32 %v1281_v54, 0.0  ;;  %v1255_v16 = vadd.f32 %v1252_v49, %v4112_v29  ;;  %v1270_v23 = vmul.f32 %v2021_v21, %v4082_v48  ;;  %v2031_v57 = vld [vmem:[%s4914_s0 + $0x320] sm:$0xff] }
 0x15c   :  { %v1287_v4 = vmax.f32 %v1257_v31, %v1266_v50  ;;  %v1264_v3 = vadd.f32 %v1261_v10, %v4112_v29  ;;  %v1279_v61 = vmul.f32 %v2022_v40, %v4082_v48  ;;  %v1311_v7 = vmul.f32 %v2023_v63, %v4082_v48  ;;  %v2032_v50 = vld [vmem:[%s4914_s0 + $0x328] sm:$0xff]  ;;  %v2035_v40 = vld [vmem:[%s4914_s0 + $0x30] sm:$0xff] }
 0x15d   :  { %v1292_v2 = vmax.f32 %v1286_v62, %v1289_v9  ;;  %v1290_v14 = vmax.f32 %v1275_v39, %v1284_v27  ;;  %v1258_v33 = vmax.f32 %v1255_v16, 0.0  ;;  %v1273_v51 = vadd.f32 %v1270_v23, %v4112_v29  ;;  %v2033_v27 = vld [vmem:[%s4914_s0 + $0x3e0] sm:$0xff] }
 0x15e   :  { %v1267_v53 = vmax.f32 %v1264_v3, 0.0  ;;  %v1282_v56 = vadd.f32 %v1279_v61, %v4112_v29  ;;  %v1314_v34 = vadd.f32 %v1311_v7, %v4112_v29  ;;  %v1320_v28 = vmul.f32 %v2024_v41, %v4082_v48 }
 0x15f   :  { %v1964_v15 = vpack.c.bf16 %v1292_v2, %v1292_v2  ;;  %v1293_v18 = vmax.f32 %v1287_v4, %v1290_v14  ;;  %v1276_v55 = vmax.f32 %v1273_v51, 0.0  ;;  %v1329_v45 = vmul.f32 %v2025_v58, %v4082_v48  ;;  %v2034_v4 = vld [vmem:[%s4914_s0 + $0x3e8] sm:$0xff] }
 0x160   :  { %v1285_v44 = vmax.f32 %v1282_v56, 0.0  ;;  %v1288_v30 = vmax.f32 %v1258_v33, %v1267_v53  ;;  %v1317_v26 = vmax.f32 %v1314_v34, 0.0  ;;  %v1323_v37 = vadd.f32 %v1320_v28, %v4112_v29  ;;  %v2036_v56 = vld [vmem:[%s4914_s0 + $0x38] sm:$0xff] }
 0x161   :  { %1308 = vst [vmem:[%s4917_s3 + $0x4] sm:$0xf] %v1964_v15  ;;  %v1965_v20 = vpack.c.bf16 %v1293_v18, %v1293_v18  ;;  %v1332_v43 = vadd.f32 %v1329_v45, %v4112_v29  ;;  %v1338_v5 = vmul.f32 %v2026_v12, %v4082_v48  ;;  %v1312_v32 = vmul.f32 %v2027_v17, %v4082_v48  ;;  %v2037_v18 = vld [vmem:[%s4914_s0 + $0xf0] sm:$0xff] }
 0x162   :  { %v1291_v36 = vmax.f32 %v1276_v55, %v1285_v44  ;;  %v1326_v52 = vmax.f32 %v1323_v37, 0.0  ;;  %v1321_v13 = vmul.f32 %v2028_v60, %v4082_v48  ;;  %v1330_v35 = vmul.f32 %v2029_v47, %v4082_v48  ;;  %v2039_v12 = vld [vmem:[%s4914_s0 + $0x1b0] sm:$0xff] }
 0x163   :  { %1309 = vst [vmem:[%s4917_s3 + $0x34] sm:$0xf] %v1965_v20  ;;  %v1335_v6 = vmax.f32 %v1332_v43, 0.0  ;;  %v1341_v38 = vadd.f32 %v1338_v5, %v4112_v29  ;;  %v1315_v1 = vadd.f32 %v1312_v32, %v4112_v29  ;;  %v1339_v62 = vmul.f32 %v2030_v22, %v4082_v48  ;;  %v2038_v20 = vld [vmem:[%s4914_s0 + $0xf8] sm:$0xff]  ;;  %v2041_v60 = vld [vmem:[%s4914_s0 + $0x270] sm:$0xff] }
 0x164   :  { %v1294_v42 = vmax.f32 %v1288_v30, %v1291_v36  ;;  %v1347_v8 = vmax.f32 %v1317_v26, %v1326_v52  ;;  %v1324_v25 = vadd.f32 %v1321_v13, %v4112_v29  ;;  %v1333_v46 = vadd.f32 %v1330_v35, %v4112_v29  ;;  %v2040_v36 = vld [vmem:[%s4914_s0 + $0x1b8] sm:$0xff] }
 0x165   :  { %v1344_v11 = vmax.f32 %v1341_v38, 0.0  ;;  %v1318_v59 = vmax.f32 %v1315_v1, 0.0  ;;  %v1342_v19 = vadd.f32 %v1339_v62, %v4112_v29  ;;  %v1313_v54 = vmul.f32 %v2031_v57, %v4082_v48  ;;  %v2042_v38 = vld [vmem:[%s4914_s0 + $0x278] sm:$0xff] }
 0x166   :  { %v1966_v24 = vpack.c.bf16 %v1294_v42, %v1294_v42  ;;  %v1327_v49 = vmax.f32 %v1324_v25, 0.0  ;;  %v1336_v31 = vmax.f32 %v1333_v46, 0.0  ;;  %v1322_v39 = vmul.f32 %v2032_v50, %v4082_v48 }
 0x167   :  { %v1350_v0 = vmax.f32 %v1335_v6, %v1344_v11  ;;  %v1345_v10 = vmax.f32 %v1342_v19, 0.0  ;;  %v1316_v9 = vadd.f32 %v1313_v54, %v4112_v29  ;;  %v1331_v16 = vmul.f32 %v2033_v27, %v4082_v48 }
 0x168   :  { %1310 = vst [vmem:[%s4917_s3 + $0x64] sm:$0xf] %v1966_v24  ;;  %v1348_v21 = vmax.f32 %v1318_v59, %v1327_v49  ;;  %v1325_v23 = vadd.f32 %v1322_v39, %v4112_v29  ;;  %v1340_v3 = vmul.f32 %v2034_v4, %v4082_v48  ;;  %v1372_v61 = vmul.f32 %v2035_v40, %v4082_v48  ;;  %v2043_v59 = vld [vmem:[%s4914_s0 + $0x330] sm:$0xff]  ;;  %v2044_v49 = vld [vmem:[%s4914_s0 + $0x338] sm:$0xff]  ;;  %v2047_v4 = vld [vmem:[%s4914_s0 + $0x40] sm:$0xff] }
 0x169   :  { %v1353_v63 = vmax.f32 %v1347_v8, %v1350_v0  ;;  %v1351_v7 = vmax.f32 %v1336_v31, %v1345_v10  ;;  %v1319_v2 = vmax.f32 %v1316_v9, 0.0  ;;  %v1334_v14 = vadd.f32 %v1331_v16, %v4112_v29  ;;  %v2045_v10 = vld [vmem:[%s4914_s0 + $0x3f0] sm:$0xff] }
 0x16a   :  { %v1328_v33 = vmax.f32 %v1325_v23, 0.0  ;;  %v1343_v51 = vadd.f32 %v1340_v3, %v4112_v29  ;;  %v1375_v53 = vadd.f32 %v1372_v61, %v4112_v29  ;;  %v1381_v34 = vmul.f32 %v2036_v56, %v4082_v48 }
 0x16b   :  { %v1967_v41 = vpack.c.bf16 %v1353_v63, %v1353_v63  ;;  %v1354_v28 = vmax.f32 %v1348_v21, %v1351_v7  ;;  %v1337_v15 = vmax.f32 %v1334_v14, 0.0  ;;  %v1390_v55 = vmul.f32 %v2037_v18, %v4082_v48  ;;  %v2046_v21 = vld [vmem:[%s4914_s0 + $0x3f8] sm:$0xff] }
 0x16c   :  { %v1346_v58 = vmax.f32 %v1343_v51, 0.0  ;;  %v1349_v45 = vmax.f32 %v1319_v2, %v1328_v33  ;;  %v1378_v44 = vmax.f32 %v1375_v53, 0.0  ;;  %v1384_v30 = vadd.f32 %v1381_v34, %v4112_v29  ;;  %v2048_v51 = vld [vmem:[%s4914_s0 + $0x48] sm:$0xff] }
 0x16d   :  { %1369 = vst [vmem:[%s4917_s3 + $0x8] sm:$0xf] %v1967_v41  ;;  %v1968_v26 = vpack.c.bf16 %v1354_v28, %v1354_v28  ;;  %v1393_v37 = vadd.f32 %v1390_v55, %v4112_v29  ;;  %v1399_v43 = vmul.f32 %v2038_v20, %v4082_v48  ;;  %v1373_v5 = vmul.f32 %v2039_v12, %v4082_v48  ;;  %v2049_v28 = vld [vmem:[%s4914_s0 + $0x100] sm:$0xff] }
 0x16e   :  { %v1352_v17 = vmax.f32 %v1337_v15, %v1346_v58  ;;  %v1387_v32 = vmax.f32 %v1384_v30, 0.0  ;;  %v1382_v52 = vmul.f32 %v2040_v36, %v4082_v48  ;;  %v1391_v13 = vmul.f32 %v2041_v60, %v4082_v48  ;;  %v2051_v20 = vld [vmem:[%s4914_s0 + $0x1c0] sm:$0xff] }
 0x16f   :  { %1370 = vst [vmem:[%s4917_s3 + $0x38] sm:$0xf] %v1968_v26  ;;  %v1396_v47 = vmax.f32 %v1393_v37, 0.0  ;;  %v1402_v35 = vadd.f32 %v1399_v43, %v4112_v29  ;;  %v1376_v6 = vadd.f32 %v1373_v5, %v4112_v29  ;;  %v1400_v1 = vmul.f32 %v2042_v38, %v4082_v48  ;;  %v2050_v26 = vld [vmem:[%s4914_s0 + $0x108] sm:$0xff]  ;;  %v2053_v36 = vld [vmem:[%s4914_s0 + $0x280] sm:$0xff] }
 0x170   :  { %v1355_v22 = vmax.f32 %v1349_v45, %v1352_v17  ;;  %v1408_v62 = vmax.f32 %v1378_v44, %v1387_v32  ;;  %v1385_v42 = vadd.f32 %v1382_v52, %v4112_v29  ;;  %v1394_v8 = vadd.f32 %v1391_v13, %v4112_v29  ;;  %v2052_v17 = vld [vmem:[%s4914_s0 + $0x1c8] sm:$0xff] }
 0x171   :  { %v1405_v25 = vmax.f32 %v1402_v35, 0.0  ;;  %v1379_v46 = vmax.f32 %v1376_v6, 0.0  ;;  %v1403_v11 = vadd.f32 %v1400_v1, %v4112_v29  ;;  %v1374_v19 = vmul.f32 %v2043_v59, %v4082_v48  ;;  %v2054_v35 = vld [vmem:[%s4914_s0 + $0x288] sm:$0xff] }
 0x172   :  { %v1969_v57 = vpack.c.bf16 %v1355_v22, %v1355_v22  ;;  %v1388_v54 = vmax.f32 %v1385_v42, 0.0  ;;  %v1397_v24 = vmax.f32 %v1394_v8, 0.0  ;;  %v1383_v31 = vmul.f32 %v2044_v49, %v4082_v48 }
 0x173   :  { %v1411_v50 = vmax.f32 %v1396_v47, %v1405_v25  ;;  %v1406_v39 = vmax.f32 %v1403_v11, 0.0  ;;  %v1377_v0 = vadd.f32 %v1374_v19, %v4112_v29  ;;  %v1392_v9 = vmul.f32 %v2045_v10, %v4082_v48 }
 0x174   :  { %1371 = vst [vmem:[%s4917_s3 + $0x68] sm:$0xf] %v1969_v57  ;;  %v1409_v27 = vmax.f32 %v1379_v46, %v1388_v54  ;;  %v1386_v16 = vadd.f32 %v1383_v31, %v4112_v29  ;;  %v1401_v23 = vmul.f32 %v2046_v21, %v4082_v48  ;;  %v1433_v3 = vmul.f32 %v2047_v4, %v4082_v48  ;;  %v2055_v46 = vld [vmem:[%s4914_s0 + $0x340] sm:$0xff]  ;;  %v2056_v54 = vld [vmem:[%s4914_s0 + $0x348] sm:$0xff]  ;;  %v2059_v21 = vld [vmem:[%s4914_s0 + $0x50] sm:$0xff] }
 0x175   :  { %v1414_v40 = vmax.f32 %v1408_v62, %v1411_v50  ;;  %v1412_v61 = vmax.f32 %v1397_v24, %v1406_v39  ;;  %v1380_v63 = vmax.f32 %v1377_v0, 0.0  ;;  %v1395_v7 = vadd.f32 %v1392_v9, %v4112_v29  ;;  %v2057_v39 = vld [vmem:[%s4914_s0 + $0x400] sm:$0xff] }
 0x176   :  { %v1389_v2 = vmax.f32 %v1386_v16, 0.0  ;;  %v1404_v14 = vadd.f32 %v1401_v23, %v4112_v29  ;;  %v1436_v33 = vadd.f32 %v1433_v3, %v4112_v29  ;;  %v1442_v53 = vmul.f32 %v2048_v51, %v4082_v48 }
 0x177   :  { %v1970_v56 = vpack.c.bf16 %v1414_v40, %v1414_v40  ;;  %v1415_v34 = vmax.f32 %v1409_v27, %v1412_v61  ;;  %v1398_v41 = vmax.f32 %v1395_v7, 0.0  ;;  %v1451_v15 = vmul.f32 %v2049_v28, %v4082_v48  ;;  %v2058_v27 = vld [vmem:[%s4914_s0 + $0x408] sm:$0xff] }
 0x178   :  { %v1407_v18 = vmax.f32 %v1404_v14, 0.0  ;;  %v1410_v55 = vmax.f32 %v1380_v63, %v1389_v2  ;;  %v1439_v58 = vmax.f32 %v1436_v33, 0.0  ;;  %v1445_v45 = vadd.f32 %v1442_v53, %v4112_v29  ;;  %v2060_v14 = vld [vmem:[%s4914_s0 + $0x58] sm:$0xff] }
 0x179   :  { %1430 = vst [vmem:[%s4917_s3 + $0xc] sm:$0xf] %v1970_v56  ;;  %v1971_v44 = vpack.c.bf16 %v1415_v34, %v1415_v34  ;;  %v1454_v30 = vadd.f32 %v1451_v15, %v4112_v29  ;;  %v1460_v37 = vmul.f32 %v2050_v26, %v4082_v48  ;;  %v1434_v43 = vmul.f32 %v2051_v20, %v4082_v48  ;;  %v2061_v34 = vld [vmem:[%s4914_s0 + $0x110] sm:$0xff] }
 0x17a   :  { %v1413_v12 = vmax.f32 %v1398_v41, %v1407_v18  ;;  %v1448_v5 = vmax.f32 %v1445_v45, 0.0  ;;  %v1443_v32 = vmul.f32 %v2052_v17, %v4082_v48  ;;  %v1452_v52 = vmul.f32 %v2053_v36, %v4082_v48  ;;  %v2063_v26 = vld [vmem:[%s4914_s0 + $0x1d0] sm:$0xff] }
 0x17b   :  { %1431 = vst [vmem:[%s4917_s3 + $0x3c] sm:$0xf] %v1971_v44  ;;  %v1457_v60 = vmax.f32 %v1454_v30, 0.0  ;;  %v1463_v13 = vadd.f32 %v1460_v37, %v4112_v29  ;;  %v1437_v47 = vadd.f32 %v1434_v43, %v4112_v29  ;;  %v1461_v6 = vmul.f32 %v2054_v35, %v4082_v48  ;;  %v2062_v44 = vld [vmem:[%s4914_s0 + $0x118] sm:$0xff]  ;;  %v2065_v17 = vld [vmem:[%s4914_s0 + $0x290] sm:$0xff] }
 0x17c   :  { %v1416_v38 = vmax.f32 %v1410_v55, %v1413_v12  ;;  %v1469_v1 = vmax.f32 %v1439_v58, %v1448_v5  ;;  %v1446_v22 = vadd.f32 %v1443_v32, %v4112_v29  ;;  %v1455_v62 = vadd.f32 %v1452_v52, %v4112_v29  ;;  %v2064_v12 = vld [vmem:[%s4914_s0 + $0x1d8] sm:$0xff] }
 0x17d   :  { %v1466_v42 = vmax.f32 %v1463_v13, 0.0  ;;  %v1440_v8 = vmax.f32 %v1437_v47, 0.0  ;;  %v1464_v25 = vadd.f32 %v1461_v6, %v4112_v29  ;;  %v1435_v11 = vmul.f32 %v2055_v46, %v4082_v48  ;;  %v2066_v13 = vld [vmem:[%s4914_s0 + $0x298] sm:$0xff] }
 0x17e   :  { %v1972_v59 = vpack.c.bf16 %v1416_v38, %v1416_v38  ;;  %v1449_v19 = vmax.f32 %v1446_v22, 0.0  ;;  %v1458_v57 = vmax.f32 %v1455_v62, 0.0  ;;  %v1444_v24 = vmul.f32 %v2056_v54, %v4082_v48 }
 0x17f   :  { %v1472_v49 = vmax.f32 %v1457_v60, %v1466_v42  ;;  %v1467_v31 = vmax.f32 %v1464_v25, 0.0  ;;  %v1438_v50 = vadd.f32 %v1435_v11, %v4112_v29  ;;  %v1453_v0 = vmul.f32 %v2057_v39, %v4082_v48 }
 0x180   :  { %1432 = vst [vmem:[%s4917_s3 + $0x6c] sm:$0xf] %v1972_v59  ;;  %v1470_v10 = vmax.f32 %v1440_v8, %v1449_v19  ;;  %v1447_v9 = vadd.f32 %v1444_v24, %v4112_v29  ;;  %v1462_v16 = vmul.f32 %v2058_v27, %v4082_v48  ;;  %v1494_v23 = vmul.f32 %v2059_v21, %v4082_v48  ;;  %v2067_v8 = vld [vmem:[%s4914_s0 + $0x350] sm:$0xff]  ;;  %v2068_v19 = vld [vmem:[%s4914_s0 + $0x358] sm:$0xff]  ;;  %v2071_v27 = vld [vmem:[%s4914_s0 + $0x60] sm:$0xff] }
 0x181   :  { %v1475_v4 = vmax.f32 %v1469_v1, %v1472_v49  ;;  %v1473_v3 = vmax.f32 %v1458_v57, %v1467_v31  ;;  %v1441_v40 = vmax.f32 %v1438_v50, 0.0  ;;  %v1456_v61 = vadd.f32 %v1453_v0, %v4112_v29  ;;  %v2069_v31 = vld [vmem:[%s4914_s0 + $0x410] sm:$0xff] }
 0x182   :  { %v1450_v63 = vmax.f32 %v1447_v9, 0.0  ;;  %v1465_v7 = vadd.f32 %v1462_v16, %v4112_v29  ;;  %v1497_v2 = vadd.f32 %v1494_v23, %v4112_v29  ;;  %v1503_v33 = vmul.f32 %v2060_v14, %v4082_v48 }
 0x183   :  { %v1973_v51 = vpack.c.bf16 %v1475_v4, %v1475_v4  ;;  %v1476_v53 = vmax.f32 %v1470_v10, %v1473_v3  ;;  %v1459_v56 = vmax.f32 %v1456_v61, 0.0  ;;  %v1512_v41 = vmul.f32 %v2061_v34, %v4082_v48  ;;  %v2070_v10 = vld [vmem:[%s4914_s0 + $0x418] sm:$0xff] }
 0x184   :  { %v1468_v28 = vmax.f32 %v1465_v7, 0.0  ;;  %v1471_v15 = vmax.f32 %v1441_v40, %v1450_v63  ;;  %v1500_v18 = vmax.f32 %v1497_v2, 0.0  ;;  %v1506_v55 = vadd.f32 %v1503_v33, %v4112_v29  ;;  %v2072_v7 = vld [vmem:[%s4914_s0 + $0x68] sm:$0xff] }
 0x185   :  { %1491 = vst [vmem:[%s4917_s3 + $0x10] sm:$0xf] %v1973_v51  ;;  %v1974_v58 = vpack.c.bf16 %v1476_v53, %v1476_v53  ;;  %v1515_v45 = vadd.f32 %v1512_v41, %v4112_v29  ;;  %v1521_v30 = vmul.f32 %v2062_v44, %v4082_v48  ;;  %v1495_v37 = vmul.f32 %v2063_v26, %v4082_v48  ;;  %v2073_v53 = vld [vmem:[%s4914_s0 + $0x120] sm:$0xff] }
 0x186   :  { %v1474_v20 = vmax.f32 %v1459_v56, %v1468_v28  ;;  %v1509_v43 = vmax.f32 %v1506_v55, 0.0  ;;  %v1504_v5 = vmul.f32 %v2064_v12, %v4082_v48  ;;  %v1513_v32 = vmul.f32 %v2065_v17, %v4082_v48  ;;  %v2075_v44 = vld [vmem:[%s4914_s0 + $0x1e0] sm:$0xff] }
 0x187   :  { %1492 = vst [vmem:[%s4917_s3 + $0x40] sm:$0xf] %v1974_v58  ;;  %v1518_v36 = vmax.f32 %v1515_v45, 0.0  ;;  %v1524_v52 = vadd.f32 %v1521_v30, %v4112_v29  ;;  %v1498_v60 = vadd.f32 %v1495_v37, %v4112_v29  ;;  %v1522_v47 = vmul.f32 %v2066_v13, %v4082_v48  ;;  %v2074_v58 = vld [vmem:[%s4914_s0 + $0x128] sm:$0xff]  ;;  %v2077_v12 = vld [vmem:[%s4914_s0 + $0x2a0] sm:$0xff] }
 0x188   :  { %v1477_v35 = vmax.f32 %v1471_v15, %v1474_v20  ;;  %v1530_v6 = vmax.f32 %v1500_v18, %v1509_v43  ;;  %v1507_v38 = vadd.f32 %v1504_v5, %v4112_v29  ;;  %v1516_v1 = vadd.f32 %v1513_v32, %v4112_v29  ;;  %v2076_v20 = vld [vmem:[%s4914_s0 + $0x1e8] sm:$0xff] }
 0x189   :  { %v1527_v22 = vmax.f32 %v1524_v52, 0.0  ;;  %v1501_v62 = vmax.f32 %v1498_v60, 0.0  ;;  %v1525_v42 = vadd.f32 %v1522_v47, %v4112_v29  ;;  %v1496_v25 = vmul.f32 %v2067_v8, %v4082_v48  ;;  %v2078_v52 = vld [vmem:[%s4914_s0 + $0x2a8] sm:$0xff] }
 0x18a   :  { %v1975_v46 = vpack.c.bf16 %v1477_v35, %v1477_v35  ;;  %v1510_v11 = vmax.f32 %v1507_v38, 0.0  ;;  %v1519_v59 = vmax.f32 %v1516_v1, 0.0  ;;  %v1505_v57 = vmul.f32 %v2068_v19, %v4082_v48 }
 0x18b   :  { %v1533_v54 = vmax.f32 %v1518_v36, %v1527_v22  ;;  %v1528_v24 = vmax.f32 %v1525_v42, 0.0  ;;  %v1499_v49 = vadd.f32 %v1496_v25, %v4112_v29  ;;  %v1514_v50 = vmul.f32 %v2069_v31, %v4082_v48 }
 0x18c   :  { %1493 = vst [vmem:[%s4917_s3 + $0x70] sm:$0xf] %v1975_v46  ;;  %v1531_v39 = vmax.f32 %v1501_v62, %v1510_v11  ;;  %v1508_v0 = vadd.f32 %v1505_v57, %v4112_v29  ;;  %v1523_v9 = vmul.f32 %v2070_v10, %v4082_v48  ;;  %v1555_v16 = vmul.f32 %v2071_v27, %v4082_v48  ;;  %v2079_v62 = vld [vmem:[%s4914_s0 + $0x360] sm:$0xff]  ;;  %v2080_v11 = vld [vmem:[%s4914_s0 + $0x368] sm:$0xff]  ;;  %v2083_v10 = vld [vmem:[%s4914_s0 + $0x70] sm:$0xff] }
 0x18d   :  { %v1536_v21 = vmax.f32 %v1530_v6, %v1533_v54  ;;  %v1534_v23 = vmax.f32 %v1519_v59, %v1528_v24  ;;  %v1502_v4 = vmax.f32 %v1499_v49, 0.0  ;;  %v1517_v3 = vadd.f32 %v1514_v50, %v4112_v29  ;;  %v2081_v24 = vld [vmem:[%s4914_s0 + $0x420] sm:$0xff] }
 0x18e   :  { %v1511_v40 = vmax.f32 %v1508_v0, 0.0  ;;  %v1526_v61 = vadd.f32 %v1523_v9, %v4112_v29  ;;  %v1558_v63 = vadd.f32 %v1555_v16, %v4112_v29  ;;  %v1564_v2 = vmul.f32 %v2072_v7, %v4082_v48 }
 0x18f   :  { %v1976_v14 = vpack.c.bf16 %v1536_v21, %v1536_v21  ;;  %v1537_v33 = vmax.f32 %v1531_v39, %v1534_v23  ;;  %v1520_v51 = vmax.f32 %v1517_v3, 0.0  ;;  %v1573_v56 = vmul.f32 %v2073_v53, %v4082_v48  ;;  %v2082_v39 = vld [vmem:[%s4914_s0 + $0x428] sm:$0xff] }
 0x190   :  { %v1529_v34 = vmax.f32 %v1526_v61, 0.0  ;;  %v1532_v41 = vmax.f32 %v1502_v4, %v1511_v40  ;;  %v1561_v28 = vmax.f32 %v1558_v63, 0.0  ;;  %v1567_v15 = vadd.f32 %v1564_v2, %v4112_v29  ;;  %v2084_v61 = vld [vmem:[%s4914_s0 + $0x78] sm:$0xff] }
 0x191   :  { %1552 = vst [vmem:[%s4917_s3 + $0x14] sm:$0xf] %v1976_v14  ;;  %v1977_v18 = vpack.c.bf16 %v1537_v33, %v1537_v33  ;;  %v1576_v55 = vadd.f32 %v1573_v56, %v4112_v29  ;;  %v1582_v45 = vmul.f32 %v2074_v58, %v4082_v48  ;;  %v1556_v30 = vmul.f32 %v2075_v44, %v4082_v48  ;;  %v2085_v33 = vld [vmem:[%s4914_s0 + $0x130] sm:$0xff] }
 0x192   :  { %v1535_v26 = vmax.f32 %v1520_v51, %v1529_v34  ;;  %v1570_v37 = vmax.f32 %v1567_v15, 0.0  ;;  %v1565_v43 = vmul.f32 %v2076_v20, %v4082_v48  ;;  %v1574_v5 = vmul.f32 %v2077_v12, %v4082_v48  ;;  %v2087_v58 = vld [vmem:[%s4914_s0 + $0x1f0] sm:$0xff] }
 0x193   :  { %1553 = vst [vmem:[%s4917_s3 + $0x44] sm:$0xf] %v1977_v18  ;;  %v1579_v17 = vmax.f32 %v1576_v55, 0.0  ;;  %v1585_v32 = vadd.f32 %v1582_v45, %v4112_v29  ;;  %v1559_v36 = vadd.f32 %v1556_v30, %v4112_v29  ;;  %v1583_v60 = vmul.f32 %v2078_v52, %v4082_v48  ;;  %v2086_v18 = vld [vmem:[%s4914_s0 + $0x138] sm:$0xff]  ;;  %v2089_v20 = vld [vmem:[%s4914_s0 + $0x2b0] sm:$0xff] }
 0x194   :  { %v1538_v13 = vmax.f32 %v1532_v41, %v1535_v26  ;;  %v1591_v47 = vmax.f32 %v1561_v28, %v1570_v37  ;;  %v1568_v35 = vadd.f32 %v1565_v43, %v4112_v29  ;;  %v1577_v6 = vadd.f32 %v1574_v5, %v4112_v29  ;;  %v2088_v26 = vld [vmem:[%s4914_s0 + $0x1f8] sm:$0xff] }
 0x195   :  { %v1588_v38 = vmax.f32 %v1585_v32, 0.0  ;;  %v1562_v1 = vmax.f32 %v1559_v36, 0.0  ;;  %v1586_v22 = vadd.f32 %v1583_v60, %v4112_v29  ;;  %v1557_v42 = vmul.f32 %v2079_v62, %v4082_v48  ;;  %v2090_v32 = vld [vmem:[%s4914_s0 + $0x2b8] sm:$0xff] }
 0x196   :  { %v1978_v8 = vpack.c.bf16 %v1538_v13, %v1538_v13  ;;  %v1571_v25 = vmax.f32 %v1568_v35, 0.0  ;;  %v1580_v46 = vmax.f32 %v1577_v6, 0.0  ;;  %v1566_v59 = vmul.f32 %v2080_v11, %v4082_v48 }
 0x197   :  { %v1594_v19 = vmax.f32 %v1579_v17, %v1588_v38  ;;  %v1589_v57 = vmax.f32 %v1586_v22, 0.0  ;;  %v1560_v54 = vadd.f32 %v1557_v42, %v4112_v29  ;;  %v1575_v49 = vmul.f32 %v2081_v24, %v4082_v48 }
 0x198   :  { %1554 = vst [vmem:[%s4917_s3 + $0x74] sm:$0xf] %v1978_v8  ;;  %v1592_v31 = vmax.f32 %v1562_v1, %v1571_v25  ;;  %v1569_v50 = vadd.f32 %v1566_v59, %v4112_v29  ;;  %v1584_v0 = vmul.f32 %v2082_v39, %v4082_v48  ;;  %v1616_v9 = vmul.f32 %v2083_v10, %v4082_v48  ;;  %v2091_v1 = vld [vmem:[%s4914_s0 + $0x370] sm:$0xff]  ;;  %v2092_v25 = vld [vmem:[%s4914_s0 + $0x378] sm:$0xff]  ;;  %v2095_v39 = vld [vmem:[%s4914_s0 + $0x80] sm:$0xff] }
 0x199   :  { %v1597_v27 = vmax.f32 %v1591_v47, %v1594_v19  ;;  %v1595_v16 = vmax.f32 %v1580_v46, %v1589_v57  ;;  %v1563_v21 = vmax.f32 %v1560_v54, 0.0  ;;  %v1578_v23 = vadd.f32 %v1575_v49, %v4112_v29  ;;  %v2093_v57 = vld [vmem:[%s4914_s0 + $0x430] sm:$0xff] }
 0x19a   :  { %v1572_v4 = vmax.f32 %v1569_v50, 0.0  ;;  %v1587_v3 = vadd.f32 %v1584_v0, %v4112_v29  ;;  %v1619_v40 = vadd.f32 %v1616_v9, %v4112_v29  ;;  %v1625_v63 = vmul.f32 %v2084_v61, %v4082_v48 }
 0x19b   :  { %v1979_v7 = vpack.c.bf16 %v1597_v27, %v1597_v27  ;;  %v1598_v2 = vmax.f32 %v1592_v31, %v1595_v16  ;;  %v1581_v14 = vmax.f32 %v1578_v23, 0.0  ;;  %v1634_v51 = vmul.f32 %v2085_v33, %v4082_v48  ;;  %v2094_v31 = vld [vmem:[%s4914_s0 + $0x438] sm:$0xff] }
 0x19c   :  { %v1590_v53 = vmax.f32 %v1587_v3, 0.0  ;;  %v1593_v56 = vmax.f32 %v1563_v21, %v1572_v4  ;;  %v1622_v34 = vmax.f32 %v1619_v40, 0.0  ;;  %v1628_v41 = vadd.f32 %v1625_v63, %v4112_v29  ;;  %v2096_v3 = vld [vmem:[%s4914_s0 + $0x88] sm:$0xff] }
 0x19d   :  { %1613 = vst [vmem:[%s4917_s3 + $0x18] sm:$0xf] %v1979_v7  ;;  %v1980_v28 = vpack.c.bf16 %v1598_v2, %v1598_v2  ;;  %v1637_v15 = vadd.f32 %v1634_v51, %v4112_v29  ;;  %v1643_v55 = vmul.f32 %v2086_v18, %v4082_v48  ;;  %v1617_v45 = vmul.f32 %v2087_v58, %v4082_v48  ;;  %v2097_v2 = vld [vmem:[%s4914_s0 + $0x140] sm:$0xff] }
 0x19e   :  { %v1596_v44 = vmax.f32 %v1581_v14, %v1590_v53  ;;  %v1631_v30 = vmax.f32 %v1628_v41, 0.0  ;;  %v1626_v37 = vmul.f32 %v2088_v26, %v4082_v48  ;;  %v1635_v43 = vmul.f32 %v2089_v20, %v4082_v48  ;;  %v2099_v18 = vld [vmem:[%s4914_s0 + $0x200] sm:$0xff] }
 0x19f   :  { %1614 = vst [vmem:[%s4917_s3 + $0x48] sm:$0xf] %v1980_v28  ;;  %v1640_v12 = vmax.f32 %v1637_v15, 0.0  ;;  %v1646_v5 = vadd.f32 %v1643_v55, %v4112_v29  ;;  %v1620_v17 = vadd.f32 %v1617_v45, %v4112_v29  ;;  %v1644_v36 = vmul.f32 %v2090_v32, %v4082_v48  ;;  %v2098_v28 = vld [vmem:[%s4914_s0 + $0x148] sm:$0xff]  ;;  %v2101_v26 = vld [vmem:[%s4914_s0 + $0x2c0] sm:$0xff] }
 0x1a0   :  { %v1599_v52 = vmax.f32 %v1593_v56, %v1596_v44  ;;  %v1652_v60 = vmax.f32 %v1622_v34, %v1631_v30  ;;  %v1629_v13 = vadd.f32 %v1626_v37, %v4112_v29  ;;  %v1638_v47 = vadd.f32 %v1635_v43, %v4112_v29  ;;  %v2100_v44 = vld [vmem:[%s4914_s0 + $0x208] sm:$0xff] }
 0x1a1   :  { %v1649_v35 = vmax.f32 %v1646_v5, 0.0  ;;  %v1623_v6 = vmax.f32 %v1620_v17, 0.0  ;;  %v1647_v38 = vadd.f32 %v1644_v36, %v4112_v29  ;;  %v1618_v22 = vmul.f32 %v2091_v1, %v4082_v48  ;;  %v2102_v5 = vld [vmem:[%s4914_s0 + $0x2c8] sm:$0xff] }
 0x1a2   :  { %v1981_v62 = vpack.c.bf16 %v1599_v52, %v1599_v52  ;;  %v1632_v42 = vmax.f32 %v1629_v13, 0.0  ;;  %v1641_v8 = vmax.f32 %v1638_v47, 0.0  ;;  %v1627_v46 = vmul.f32 %v2092_v25, %v4082_v48 }
 0x1a3   :  { %v1655_v11 = vmax.f32 %v1640_v12, %v1649_v35  ;;  %v1650_v59 = vmax.f32 %v1647_v38, 0.0  ;;  %v1621_v19 = vadd.f32 %v1618_v22, %v4112_v29  ;;  %v1636_v54 = vmul.f32 %v2093_v57, %v4082_v48 }
 0x1a4   :  { %1615 = vst [vmem:[%s4917_s3 + $0x78] sm:$0xf] %v1981_v62  ;;  %v1653_v24 = vmax.f32 %v1623_v6, %v1632_v42  ;;  %v1630_v49 = vadd.f32 %v1627_v46, %v4112_v29  ;;  %v1645_v50 = vmul.f32 %v2094_v31, %v4082_v48  ;;  %v1677_v0 = vmul.f32 %v2095_v39, %v4082_v48  ;;  %v2103_v6 = vld [vmem:[%s4914_s0 + $0x380] sm:$0xff]  ;;  %v2104_v42 = vld [vmem:[%s4914_s0 + $0x388] sm:$0xff]  ;;  %v2107_v31 = vld [vmem:[%s4914_s0 + $0x90] sm:$0xff] }
 0x1a5   :  { %v1658_v10 = vmax.f32 %v1652_v60, %v1655_v11  ;;  %v1656_v9 = vmax.f32 %v1641_v8, %v1650_v59  ;;  %v1624_v27 = vmax.f32 %v1621_v19, 0.0  ;;  %v1639_v16 = vadd.f32 %v1636_v54, %v4112_v29  ;;  %v2105_v59 = vld [vmem:[%s4914_s0 + $0x440] sm:$0xff] }
 0x1a6   :  { %v1633_v21 = vmax.f32 %v1630_v49, 0.0  ;;  %v1648_v23 = vadd.f32 %v1645_v50, %v4112_v29  ;;  %v1680_v4 = vadd.f32 %v1677_v0, %v4112_v29  ;;  %v1686_v40 = vmul.f32 %v2096_v3, %v4082_v48 }
 0x1a7   :  { %v1982_v61 = vpack.c.bf16 %v1658_v10, %v1658_v10  ;;  %v1659_v63 = vmax.f32 %v1653_v24, %v1656_v9  ;;  %v1642_v7 = vmax.f32 %v1639_v16, 0.0  ;;  %v1695_v14 = vmul.f32 %v2097_v2, %v4082_v48  ;;  %v2106_v24 = vld [vmem:[%s4914_s0 + $0x448] sm:$0xff] }
 0x1a8   :  { %v1651_v33 = vmax.f32 %v1648_v23, 0.0  ;;  %v1654_v51 = vmax.f32 %v1624_v27, %v1633_v21  ;;  %v1683_v53 = vmax.f32 %v1680_v4, 0.0  ;;  %v1689_v56 = vadd.f32 %v1686_v40, %v4112_v29  ;;  %v2108_v23 = vld [vmem:[%s4914_s0 + $0x98] sm:$0xff] }
 0x1a9   :  { %1674 = vst [vmem:[%s4917_s3 + $0x1c] sm:$0xf] %v1982_v61  ;;  %v1983_v34 = vpack.c.bf16 %v1659_v63, %v1659_v63  ;;  %v1698_v41 = vadd.f32 %v1695_v14, %v4112_v29  ;;  %v1704_v15 = vmul.f32 %v2098_v28, %v4082_v48  ;;  %v1678_v55 = vmul.f32 %v2099_v18, %v4082_v48  ;;  %v2109_v63 = vld [vmem:[%s4914_s0 + $0x150] sm:$0xff] }
 0x1aa   :  { %v1657_v58 = vmax.f32 %v1642_v7, %v1651_v33  ;;  %v1692_v45 = vmax.f32 %v1689_v56, 0.0  ;;  %v1687_v30 = vmul.f32 %v2100_v44, %v4082_v48  ;;  %v1696_v37 = vmul.f32 %v2101_v26, %v4082_v48  ;;  %v2111_v28 = vld [vmem:[%s4914_s0 + $0x210] sm:$0xff] }
 0x1ab   :  { %1675 = vst [vmem:[%s4917_s3 + $0x4c] sm:$0xf] %v1983_v34  ;;  %v1701_v20 = vmax.f32 %v1698_v41, 0.0  ;;  %v1707_v43 = vadd.f32 %v1704_v15, %v4112_v29  ;;  %v1681_v12 = vadd.f32 %v1678_v55, %v4112_v29  ;;  %v1705_v17 = vmul.f32 %v2102_v5, %v4082_v48  ;;  %v2110_v34 = vld [vmem:[%s4914_s0 + $0x158] sm:$0xff]  ;;  %v2113_v44 = vld [vmem:[%s4914_s0 + $0x2d0] sm:$0xff] }
 0x1ac   :  { %v1660_v32 = vmax.f32 %v1654_v51, %v1657_v58  ;;  %v1713_v36 = vmax.f32 %v1683_v53, %v1692_v45  ;;  %v1690_v52 = vadd.f32 %v1687_v30, %v4112_v29  ;;  %v1699_v60 = vadd.f32 %v1696_v37, %v4112_v29  ;;  %v2112_v58 = vld [vmem:[%s4914_s0 + $0x218] sm:$0xff] }
 0x1ad   :  { %v1710_v13 = vmax.f32 %v1707_v43, 0.0  ;;  %v1684_v47 = vmax.f32 %v1681_v12, 0.0  ;;  %v1708_v35 = vadd.f32 %v1705_v17, %v4112_v29  ;;  %v1679_v38 = vmul.f32 %v2103_v6, %v4082_v48  ;;  %v2114_v43 = vld [vmem:[%s4914_s0 + $0x2d8] sm:$0xff] }
 0x1ae   :  { %v1984_v1 = vpack.c.bf16 %v1660_v32, %v1660_v32  ;;  %v1693_v22 = vmax.f32 %v1690_v52, 0.0  ;;  %v1702_v62 = vmax.f32 %v1699_v60, 0.0  ;;  %v1688_v8 = vmul.f32 %v2104_v42, %v4082_v48 }
 0x1af   :  { %v1716_v25 = vmax.f32 %v1701_v20, %v1710_v13  ;;  %v1711_v46 = vmax.f32 %v1708_v35, 0.0  ;;  %v1682_v11 = vadd.f32 %v1679_v38, %v4112_v29  ;;  %v1697_v19 = vmul.f32 %v2105_v59, %v4082_v48 }
 0x1b0   :  { %1676 = vst [vmem:[%s4917_s3 + $0x7c] sm:$0xf] %v1984_v1  ;;  %v1714_v57 = vmax.f32 %v1684_v47, %v1693_v22  ;;  %v1691_v54 = vadd.f32 %v1688_v8, %v4112_v29  ;;  %v1706_v49 = vmul.f32 %v2106_v24, %v4082_v48  ;;  %v1738_v50 = vmul.f32 %v2107_v31, %v4082_v48  ;;  %v2115_v47 = vld [vmem:[%s4914_s0 + $0x390] sm:$0xff]  ;;  %v2116_v22 = vld [vmem:[%s4914_s0 + $0x398] sm:$0xff]  ;;  %v2119_v24 = vld [vmem:[%s4914_s0 + $0xa0] sm:$0xff] }
 0x1b1   :  { %v1719_v39 = vmax.f32 %v1713_v36, %v1716_v25  ;;  %v1717_v0 = vmax.f32 %v1702_v62, %v1711_v46  ;;  %v1685_v10 = vmax.f32 %v1682_v11, 0.0  ;;  %v1700_v9 = vadd.f32 %v1697_v19, %v4112_v29  ;;  %v2117_v46 = vld [vmem:[%s4914_s0 + $0x450] sm:$0xff] }
 0x1b2   :  { %v1694_v27 = vmax.f32 %v1691_v54, 0.0  ;;  %v1709_v16 = vadd.f32 %v1706_v49, %v4112_v29  ;;  %v1741_v21 = vadd.f32 %v1738_v50, %v4112_v29  ;;  %v1747_v4 = vmul.f32 %v2108_v23, %v4082_v48 }
 0x1b3   :  { %v1985_v3 = vpack.c.bf16 %v1719_v39, %v1719_v39  ;;  %v1720_v40 = vmax.f32 %v1714_v57, %v1717_v0  ;;  %v1703_v61 = vmax.f32 %v1700_v9, 0.0  ;;  %v1756_v7 = vmul.f32 %v2109_v63, %v4082_v48  ;;  %v2118_v57 = vld [vmem:[%s4914_s0 + $0x458] sm:$0xff] }
 0x1b4   :  { %v1712_v2 = vmax.f32 %v1709_v16, 0.0  ;;  %v1715_v14 = vmax.f32 %v1685_v10, %v1694_v27  ;;  %v1744_v33 = vmax.f32 %v1741_v21, 0.0  ;;  %v1750_v51 = vadd.f32 %v1747_v4, %v4112_v29  ;;  %v2120_v16 = vld [vmem:[%s4914_s0 + $0xa8] sm:$0xff] }
 0x1b5   :  { %1735 = vst [vmem:[%s4917_s3 + $0x20] sm:$0xf] %v1985_v3  ;;  %v1986_v53 = vpack.c.bf16 %v1720_v40, %v1720_v40  ;;  %v1759_v56 = vadd.f32 %v1756_v7, %v4112_v29  ;;  %v1765_v41 = vmul.f32 %v2110_v34, %v4082_v48  ;;  %v1739_v15 = vmul.f32 %v2111_v28, %v4082_v48  ;;  %v2121_v40 = vld [vmem:[%s4914_s0 + $0x160] sm:$0xff] }
 0x1b6   :  { %v1718_v18 = vmax.f32 %v1703_v61, %v1712_v2  ;;  %v1753_v55 = vmax.f32 %v1750_v51, 0.0  ;;  %v1748_v45 = vmul.f32 %v2112_v58, %v4082_v48  ;;  %v1757_v30 = vmul.f32 %v2113_v44, %v4082_v48  ;;  %v2123_v34 = vld [vmem:[%s4914_s0 + $0x220] sm:$0xff] }
 0x1b7   :  { %1736 = vst [vmem:[%s4917_s3 + $0x50] sm:$0xf] %v1986_v53  ;;  %v1762_v26 = vmax.f32 %v1759_v56, 0.0  ;;  %v1768_v37 = vadd.f32 %v1765_v41, %v4112_v29  ;;  %v1742_v20 = vadd.f32 %v1739_v15, %v4112_v29  ;;  %v1766_v12 = vmul.f32 %v2114_v43, %v4082_v48  ;;  %v2122_v53 = vld [vmem:[%s4914_s0 + $0x168] sm:$0xff]  ;;  %v2125_v58 = vld [vmem:[%s4914_s0 + $0x2e0] sm:$0xff] }
 0x1b8   :  { %v1721_v5 = vmax.f32 %v1715_v14, %v1718_v18  ;;  %v1774_v17 = vmax.f32 %v1744_v33, %v1753_v55  ;;  %v1751_v32 = vadd.f32 %v1748_v45, %v4112_v29  ;;  %v1760_v36 = vadd.f32 %v1757_v30, %v4112_v29  ;;  %v2124_v18 = vld [vmem:[%s4914_s0 + $0x228] sm:$0xff] }
 0x1b9   :  { %v1771_v52 = vmax.f32 %v1768_v37, 0.0  ;;  %v1745_v60 = vmax.f32 %v1742_v20, 0.0  ;;  %v1769_v13 = vadd.f32 %v1766_v12, %v4112_v29  ;;  %v1740_v35 = vmul.f32 %v2115_v47, %v4082_v48  ;;  %v2126_v37 = vld [vmem:[%s4914_s0 + $0x2e8] sm:$0xff] }
 0x1ba   :  { %v1987_v6 = vpack.c.bf16 %v1721_v5, %v1721_v5  ;;  %v1754_v38 = vmax.f32 %v1751_v32, 0.0  ;;  %v1763_v1 = vmax.f32 %v1760_v36, 0.0  ;;  %v1749_v62 = vmul.f32 %v2116_v22, %v4082_v48 }
 0x1bb   :  { %v1777_v42 = vmax.f32 %v1762_v26, %v1771_v52  ;;  %v1772_v8 = vmax.f32 %v1769_v13, 0.0  ;;  %v1743_v25 = vadd.f32 %v1740_v35, %v4112_v29  ;;  %v1758_v11 = vmul.f32 %v2117_v46, %v4082_v48 }
 0x1bc   :  { %1737 = vst [vmem:[%s4917_s3 + $0x80] sm:$0xf] %v1987_v6  ;;  %v1775_v59 = vmax.f32 %v1745_v60, %v1754_v38  ;;  %v1752_v19 = vadd.f32 %v1749_v62, %v4112_v29  ;;  %v1767_v54 = vmul.f32 %v2118_v57, %v4082_v48  ;;  %v1799_v49 = vmul.f32 %v2119_v24, %v4082_v48  ;;  %v2127_v60 = vld [vmem:[%s4914_s0 + $0x3a0] sm:$0xff]  ;;  %v2128_v38 = vld [vmem:[%s4914_s0 + $0x3a8] sm:$0xff]  ;;  %v2131_v57 = vld [vmem:[%s4914_s0 + $0xb0] sm:$0xff] }
 0x1bd   :  { %v1780_v31 = vmax.f32 %v1774_v17, %v1777_v42  ;;  %v1778_v50 = vmax.f32 %v1763_v1, %v1772_v8  ;;  %v1746_v39 = vmax.f32 %v1743_v25, 0.0  ;;  %v1761_v0 = vadd.f32 %v1758_v11, %v4112_v29  ;;  %v2129_v8 = vld [vmem:[%s4914_s0 + $0x460] sm:$0xff] }
 0x1be   :  { %v1755_v10 = vmax.f32 %v1752_v19, 0.0  ;;  %v1770_v9 = vadd.f32 %v1767_v54, %v4112_v29  ;;  %v1802_v27 = vadd.f32 %v1799_v49, %v4112_v29  ;;  %v1808_v21 = vmul.f32 %v2120_v16, %v4082_v48 }
 0x1bf   :  { %v1988_v23 = vpack.c.bf16 %v1780_v31, %v1780_v31  ;;  %v1781_v4 = vmax.f32 %v1775_v59, %v1778_v50  ;;  %v1764_v3 = vmax.f32 %v1761_v0, 0.0  ;;  %v1817_v61 = vmul.f32 %v2121_v40, %v4082_v48  ;;  %v2130_v59 = vld [vmem:[%s4914_s0 + $0x468] sm:$0xff] }
 0x1c0   :  { %v1773_v63 = vmax.f32 %v1770_v9, 0.0  ;;  %v1776_v7 = vmax.f32 %v1746_v39, %v1755_v10  ;;  %v1805_v2 = vmax.f32 %v1802_v27, 0.0  ;;  %v1811_v14 = vadd.f32 %v1808_v21, %v4112_v29  ;;  %v2132_v9 = vld [vmem:[%s4914_s0 + $0xb8] sm:$0xff] }
 0x1c1   :  { %1796 = vst [vmem:[%s4917_s3 + $0x24] sm:$0xf] %v1988_v23  ;;  %v1989_v33 = vpack.c.bf16 %v1781_v4, %v1781_v4  ;;  %v1820_v51 = vadd.f32 %v1817_v61, %v4112_v29  ;;  %v1826_v56 = vmul.f32 %v2122_v53, %v4082_v48  ;;  %v1800_v41 = vmul.f32 %v2123_v34, %v4082_v48  ;;  %v2133_v4 = vld [vmem:[%s4914_s0 + $0x170] sm:$0xff] }
 0x1c2   :  { %v1779_v28 = vmax.f32 %v1764_v3, %v1773_v63  ;;  %v1814_v15 = vmax.f32 %v1811_v14, 0.0  ;;  %v1809_v55 = vmul.f32 %v2124_v18, %v4082_v48  ;;  %v1818_v45 = vmul.f32 %v2125_v58, %v4082_v48  ;;  %v2135_v53 = vld [vmem:[%s4914_s0 + $0x230] sm:$0xff] }
 0x1c3   :  { %1797 = vst [vmem:[%s4917_s3 + $0x54] sm:$0xf] %v1989_v33  ;;  %v1823_v44 = vmax.f32 %v1820_v51, 0.0  ;;  %v1829_v30 = vadd.f32 %v1826_v56, %v4112_v29  ;;  %v1803_v26 = vadd.f32 %v1800_v41, %v4112_v29  ;;  %v1827_v20 = vmul.f32 %v2126_v37, %v4082_v48  ;;  %v2134_v33 = vld [vmem:[%s4914_s0 + $0x178] sm:$0xff]  ;;  %v2137_v18 = vld [vmem:[%s4914_s0 + $0x2f0] sm:$0xff] }
 0x1c4   :  { %v1782_v43 = vmax.f32 %v1776_v7, %v1779_v28  ;;  %v1835_v12 = vmax.f32 %v1805_v2, %v1814_v15  ;;  %v1812_v5 = vadd.f32 %v1809_v55, %v4112_v29  ;;  %v1821_v17 = vadd.f32 %v1818_v45, %v4112_v29  ;;  %v2136_v28 = vld [vmem:[%s4914_s0 + $0x238] sm:$0xff] }
 0x1c5   :  { %v1832_v32 = vmax.f32 %v1829_v30, 0.0  ;;  %v1806_v36 = vmax.f32 %v1803_v26, 0.0  ;;  %v1830_v52 = vadd.f32 %v1827_v20, %v4112_v29  ;;  %v1801_v13 = vmul.f32 %v2127_v60, %v4082_v48  ;;  %v2138_v30 = vld [vmem:[%s4914_s0 + $0x2f8] sm:$0xff] }
 0x1c6   :  { %v1990_v47 = vpack.c.bf16 %v1782_v43, %v1782_v43  ;;  %v1815_v35 = vmax.f32 %v1812_v5, 0.0  ;;  %v1824_v6 = vmax.f32 %v1821_v17, 0.0  ;;  %v1810_v1 = vmul.f32 %v2128_v38, %v4082_v48 }
 0x1c7   :  { %v1838_v22 = vmax.f32 %v1823_v44, %v1832_v32  ;;  %v1833_v62 = vmax.f32 %v1830_v52, 0.0  ;;  %v1804_v42 = vadd.f32 %v1801_v13, %v4112_v29  ;;  %v1819_v25 = vmul.f32 %v2129_v8, %v4082_v48 }
 0x1c8   :  { %1798 = vst [vmem:[%s4917_s3 + $0x84] sm:$0xf] %v1990_v47  ;;  %v1836_v46 = vmax.f32 %v1806_v36, %v1815_v35  ;;  %v1813_v11 = vadd.f32 %v1810_v1, %v4112_v29  ;;  %v1828_v19 = vmul.f32 %v2130_v59, %v4082_v48  ;;  %v1860_v54 = vmul.f32 %v2131_v57, %v4082_v48  ;;  %v2139_v36 = vld [vmem:[%s4914_s0 + $0x3b0] sm:$0xff]  ;;  %v2140_v35 = vld [vmem:[%s4914_s0 + $0x3b8] sm:$0xff] }
 0x1c9   :  { %v1841_v24 = vmax.f32 %v1835_v12, %v1838_v22  ;;  %v1839_v49 = vmax.f32 %v1824_v6, %v1833_v62  ;;  %v1807_v31 = vmax.f32 %v1804_v42, 0.0  ;;  %v1822_v50 = vadd.f32 %v1819_v25, %v4112_v29  ;;  %v2141_v62 = vld [vmem:[%s4914_s0 + $0x470] sm:$0xff] }
 0x1ca   :  { %v1816_v39 = vmax.f32 %v1813_v11, 0.0  ;;  %v1831_v0 = vadd.f32 %v1828_v19, %v4112_v29  ;;  %v1863_v10 = vadd.f32 %v1860_v54, %v4112_v29  ;;  %v1869_v27 = vmul.f32 %v2132_v9, %v4082_v48 }
 0x1cb   :  { %v1991_v16 = vpack.c.bf16 %v1841_v24, %v1841_v24  ;;  %v1842_v21 = vmax.f32 %v1836_v46, %v1839_v49  ;;  %v1825_v23 = vmax.f32 %v1822_v50, 0.0  ;;  %v1878_v3 = vmul.f32 %v2133_v4, %v4082_v48  ;;  %v2142_v46 = vld [vmem:[%s4914_s0 + $0x478] sm:$0xff] }
 0x1cc   :  { %v1834_v40 = vmax.f32 %v1831_v0, 0.0  ;;  %v1837_v61 = vmax.f32 %v1807_v31, %v1816_v39  ;;  %v1866_v63 = vmax.f32 %v1863_v10, 0.0  ;;  %v1872_v7 = vadd.f32 %v1869_v27, %v4112_v29 }
 0x1cd   :  { %1857 = vst [vmem:[%s4917_s3 + $0x28] sm:$0xf] %v1991_v16  ;;  %v1992_v2 = vpack.c.bf16 %v1842_v21, %v1842_v21  ;;  %v1881_v14 = vadd.f32 %v1878_v3, %v4112_v29  ;;  %v1887_v51 = vmul.f32 %v2134_v33, %v4082_v48  ;;  %v1861_v56 = vmul.f32 %v2135_v53, %v4082_v48 }
 0x1ce   :  { %v1840_v34 = vmax.f32 %v1825_v23, %v1834_v40  ;;  %v1875_v41 = vmax.f32 %v1872_v7, 0.0  ;;  %v1870_v15 = vmul.f32 %v2136_v28, %v4082_v48  ;;  %v1879_v55 = vmul.f32 %v2137_v18, %v4082_v48 }
 0x1cf   :  { %1858 = vst [vmem:[%s4917_s3 + $0x58] sm:$0xf] %v1992_v2  ;;  %v1884_v58 = vmax.f32 %v1881_v14, 0.0  ;;  %v1890_v45 = vadd.f32 %v1887_v51, %v4112_v29  ;;  %v1864_v44 = vadd.f32 %v1861_v56, %v4112_v29  ;;  %v1888_v26 = vmul.f32 %v2138_v30, %v4082_v48 }
 0x1d0   :  { %v1843_v37 = vmax.f32 %v1837_v61, %v1840_v34  ;;  %v1896_v20 = vmax.f32 %v1866_v63, %v1875_v41  ;;  %v1873_v43 = vadd.f32 %v1870_v15, %v4112_v29  ;;  %v1882_v12 = vadd.f32 %v1879_v55, %v4112_v29 }
 0x1d1   :  { %v1893_v5 = vmax.f32 %v1890_v45, 0.0  ;;  %v1867_v17 = vmax.f32 %v1864_v44, 0.0  ;;  %v1891_v32 = vadd.f32 %v1888_v26, %v4112_v29  ;;  %v1862_v52 = vmul.f32 %v2139_v36, %v4082_v48 }
 0x1d2   :  { %v1993_v60 = vpack.c.bf16 %v1843_v37, %v1843_v37  ;;  %v1876_v13 = vmax.f32 %v1873_v43, 0.0  ;;  %v1885_v47 = vmax.f32 %v1882_v12, 0.0  ;;  %v1871_v6 = vmul.f32 %v2140_v35, %v4082_v48 }
 0x1d3   :  { %v1899_v38 = vmax.f32 %v1884_v58, %v1893_v5  ;;  %v1894_v1 = vmax.f32 %v1891_v32, 0.0  ;;  %v1865_v22 = vadd.f32 %v1862_v52, %v4112_v29  ;;  %v1880_v42 = vmul.f32 %v2141_v62, %v4082_v48 }
 0x1d4   :  { %1859 = vst [vmem:[%s4917_s3 + $0x88] sm:$0xf] %v1993_v60  ;;  %v1897_v8 = vmax.f32 %v1867_v17, %v1876_v13  ;;  %v1874_v25 = vadd.f32 %v1871_v6, %v4112_v29  ;;  %v1889_v11 = vmul.f32 %v2142_v46, %v4082_v48 }
 0x1d5   :  { %v1902_v59 = vmax.f32 %v1896_v20, %v1899_v38  ;;  %v1900_v19 = vmax.f32 %v1885_v47, %v1894_v1  ;;  %v1868_v57 = vmax.f32 %v1865_v22, 0.0  ;;  %v1883_v54 = vadd.f32 %v1880_v42, %v4112_v29 }
 0x1d6   :  { %v1877_v24 = vmax.f32 %v1874_v25, 0.0  ;;  %v1892_v49 = vadd.f32 %v1889_v11, %v4112_v29 }
 0x1d7   :  { %v1994_v31 = vpack.c.bf16 %v1902_v59, %v1902_v59  ;;  %v1903_v50 = vmax.f32 %v1897_v8, %v1900_v19  ;;  %v1886_v39 = vmax.f32 %v1883_v54, 0.0 }
 0x1d8   :  { %v1895_v0 = vmax.f32 %v1892_v49, 0.0  ;;  %v1898_v10 = vmax.f32 %v1868_v57, %v1877_v24 }
 0x1d9   :  { %1918 = vst [vmem:[%s4917_s3 + $0x2c] sm:$0xf] %v1994_v31  ;;  %v1995_v9 = vpack.c.bf16 %v1903_v50, %v1903_v50 }
 0x1da   :  { %v1901_v27 = vmax.f32 %v1886_v39, %v1895_v0 }
 0x1db   :  { %1919 = vst [vmem:[%s4917_s3 + $0x5c] sm:$0xf] %v1995_v9 }
 0x1dc   :  { %v1904_v48 = vmax.f32 %v1898_v10, %v1901_v27 }
 0x1de   :  { %v1996_v16 = vpack.c.bf16 %v1904_v48, %v1904_v48 }
 0x1e0   :  { %1920 = vst [vmem:[%s4917_s3 + $0x8c] sm:$0xf] %v1996_v16 }

// kernel: network_forward.9
= control target key start
LH: loop header
LB: loop body
LE: loop exit
PB: predicated region body
PF: predicated region fallthrough
CT: control target
= control target key end

     0   :  { %s625_s0 = inlined_call_operand.vmem [shape: f32[8,2048], index: 0, kind: input, shape index: {}]   ;;  %s626_s1 = inlined_call_operand.vmem [shape: f32[1,128], index: 1, kind: input, shape index: {}]   ;;  %s627_s2 = inlined_call_operand.vmem [shape: f32[1,128], index: 2, kind: input, shape index: {}]   ;;  %s628_s3 = inlined_call_operand.vmem [shape: bf16[8,512], index: 3, kind: output, shape index: {}]  }
   0x1   :  { %v390_v0 = vld [vmem:[%s625_s0] sm:$0xff]  ;;  %v395_v1 = vld [vmem:[%s625_s0 + $0x8] sm:$0xff]  ;;  %v400_v2 = vld [vmem:[%s625_s0 + $0x10] sm:$0xff] }
   0x2   :  { %v405_v3 = vld [vmem:[%s625_s0 + $0x18] sm:$0xff]  ;;  %v410_v4 = vld [vmem:[%s625_s0 + $0x20] sm:$0xff]  ;;  %v30_v5 = vrot.slane %v390_v0, 4  ;;  %v36_v6 = vrot.slane %v395_v1, 4  ;;  %v417_v7 = vld [vmem:[%s625_s0 + $0x28] sm:$0xff]  ;;  %v42_v8 = vrot.slane %v400_v2, 4  ;;  %v126_v47 = vmul.f32 %v390_v0, %v390_v0 }
   0x3   :  { %637 = vst [vmem:[#allocation2_spill] sm:$0xff] %v410_v4  ;;  %638 = vst [vmem:[#allocation3_spill] sm:$0xff] %v417_v7  ;;  %v423_v9 = vld [vmem:[%s625_s0 + $0x30] sm:$0xff]  ;;  %v48_v10 = vrot.slane %v405_v3, 4  ;;  %v429_v11 = vld [vmem:[%s625_s0 + $0x38] sm:$0xff]  ;;  %v54_v12 = vrot.slane %v410_v4, 4  ;;  %v127_v48 = vmul.f32 %v395_v1, %v395_v1  ;;  %v128_v58 = vmul.f32 %v400_v2, %v400_v2 }
   0x4   :  { %639 = vst [vmem:[#allocation4_spill] sm:$0xff] %v423_v9  ;;  %640 = vst [vmem:[#allocation5_spill] sm:$0xff] %v429_v11  ;;  %v31_v13 = vadd.f32 %v30_v5, %v390_v0  ;;  %v37_v14 = vadd.f32 %v36_v6, %v395_v1  ;;  %v60_v15 = vrot.slane %v417_v7, 4  ;;  %v43_v16 = vadd.f32 %v42_v8, %v400_v2  ;;  %v446_v42 = vld [vmem:[%s625_s0 + $0x40] sm:$0xff]  ;;  %v451_v45 = vld [vmem:[%s625_s0 + $0x48] sm:$0xff] }
   0x5   :  { %v66_v17 = vrot.slane %v423_v9, 4  ;;  %v49_v18 = vadd.f32 %v48_v10, %v405_v3  ;;  %v72_v19 = vrot.slane %v429_v11, 4  ;;  %v55_v20 = vadd.f32 %v54_v12, %v410_v4  ;;  %v460_v49 = vld [vmem:[%s625_s0 + $0x50] sm:$0xff]  ;;  %v469_v53 = vld [vmem:[%s625_s0 + $0x58] sm:$0xff]  ;;  %v474_v54 = vld [vmem:[%s625_s0 + $0x60] sm:$0xff] }
   0x6   :  { %v32_v21 = vrot.slane %v31_v13, 2  ;;  %v38_v22 = vrot.slane %v37_v14, 2  ;;  %v61_v23 = vadd.f32 %v60_v15, %v417_v7  ;;  %v44_v24 = vrot.slane %v43_v16, 2  ;;  %641 = vst [vmem:[#allocation6_spill] sm:$0xff] %v469_v53  ;;  %642 = vst [vmem:[#allocation7_spill] sm:$0xff] %v474_v54  ;;  %v484_v59 = vld [vmem:[%s625_s0 + $0x68] sm:$0xff] }
   0x7   :  { %v67_v25 = vadd.f32 %v66_v17, %v423_v9  ;;  %v50_v26 = vrot.slane %v49_v18, 2  ;;  %v73_v27 = vadd.f32 %v72_v19, %v429_v11  ;;  %v56_v28 = vrot.slane %v55_v20, 2  ;;  %643 = vst [vmem:[#allocation8_spill] sm:$0xff] %v484_v59  ;;  %v497_v12 = vld [vmem:[%s625_s0 + $0x70] sm:$0xff] }
   0x8   :  { %v33_v29 = vadd.f32 %v32_v21, %v31_v13  ;;  %v39_v30 = vadd.f32 %v38_v22, %v37_v14  ;;  %v62_v31 = vrot.slane %v61_v23, 2  ;;  %v45_v32 = vadd.f32 %v44_v24, %v43_v16  ;;  %644 = vst [vmem:[#allocation9_spill] sm:$0xff] %v497_v12  ;;  %v512_v21 = vld [vmem:[%s625_s0 + $0x78] sm:$0xff] }
   0x9   :  { %v68_v33 = vrot.slane %v67_v25, 2  ;;  %v51_v34 = vadd.f32 %v50_v26, %v49_v18  ;;  %v74_v35 = vrot.slane %v73_v27, 2  ;;  %v57_v36 = vadd.f32 %v56_v28, %v55_v20 }
   0xa   :  { %v34_v37 = vrot.slane %v33_v29, 1  ;;  %v40_v38 = vrot.slane %v39_v30, 1  ;;  %v63_v39 = vadd.f32 %v62_v31, %v61_v23  ;;  %v46_v40 = vrot.slane %v45_v32, 1 }
   0xb   :  { %v69_v41 = vadd.f32 %v68_v33, %v67_v25  ;;  %v52_v43 = vrot.slane %v51_v34, 1  ;;  %v75_v44 = vadd.f32 %v74_v35, %v73_v27  ;;  %v58_v46 = vrot.slane %v57_v36, 1 }
   0xc   :  { %v462_v50 = vadd.f32 %v34_v37, %v33_v29  ;;  %v464_v51 = vadd.f32 %v40_v38, %v39_v30  ;;  %v64_v52 = vrot.slane %v63_v39, 1  ;;  %v476_v55 = vadd.f32 %v46_v40, %v45_v32 }
   0xd   :  { %v70_v56 = vrot.slane %v69_v41, 1  ;;  %v78_v57 = vrot.slane %v446_v42, 4  ;;  %v486_v60 = vadd.f32 %v52_v43, %v51_v34  ;;  %v76_v61 = vrot.slane %v75_v44, 1 }
   0xe   :  { %v84_v62 = vrot.slane %v451_v45, 4  ;;  %v129_v63 = vmul.f32 %v405_v3, %v405_v3  ;;  %v491_v5 = vadd.f32 %v58_v46, %v57_v36  ;;  %v90_v6 = vrot.slane %v460_v49, 4 }
   0xf   :  { %v142_v8 = vrot.slane %v126_v47, 4  ;;  %v148_v10 = vrot.slane %v127_v48, 4  ;;  %v499_v13 = vadd.f32 %v64_v52, %v63_v39  ;;  %v96_v14 = vrot.slane %v469_v53, 4 }
  0x10   :  { %v102_v15 = vrot.slane %v474_v54, 4  ;;  %v130_v16 = vmul.f32 %v410_v4, %v410_v4  ;;  %v505_v17 = vadd.f32 %v70_v56, %v69_v41  ;;  %v79_v18 = vadd.f32 %v78_v57, %v446_v42 }
  0x11   :  { %v108_v19 = vrot.slane %v484_v59, 4  ;;  %v154_v20 = vrot.slane %v128_v58, 4  ;;  %v514_v22 = vadd.f32 %v76_v61, %v75_v44  ;;  %v85_v23 = vadd.f32 %v84_v62, %v451_v45 }
  0x12   :  { %v131_v24 = vmul.f32 %v417_v7, %v417_v7  ;;  %v160_v25 = vrot.slane %v129_v63, 4  ;;  %v91_v26 = vadd.f32 %v90_v6, %v460_v49  ;;  %v114_v27 = vrot.slane %v497_v12, 4 }
  0x13   :  { %v143_v28 = vadd.f32 %v142_v8, %v126_v47  ;;  %v149_v29 = vadd.f32 %v148_v10, %v127_v48  ;;  %v97_v30 = vadd.f32 %v96_v14, %v469_v53  ;;  %v103_v31 = vadd.f32 %v102_v15, %v474_v54 }
  0x14   :  { %v132_v32 = vmul.f32 %v423_v9, %v423_v9  ;;  %v166_v33 = vrot.slane %v130_v16, 4  ;;  %v80_v34 = vrot.slane %v79_v18, 2  ;;  %v109_v35 = vadd.f32 %v108_v19, %v484_v59 }
  0x15   :  { %v120_v36 = vrot.slane %v512_v21, 4  ;;  %v155_v37 = vadd.f32 %v154_v20, %v128_v58  ;;  %v86_v38 = vrot.slane %v85_v23, 2  ;;  %v133_v39 = vmul.f32 %v429_v11, %v429_v11 }
  0x16   :  { %v161_v40 = vadd.f32 %v160_v25, %v129_v63  ;;  %v172_v41 = vrot.slane %v131_v24, 4  ;;  %v92_v43 = vrot.slane %v91_v26, 2  ;;  %v530_v44 = vadd.f32 %v114_v27, %v497_v12 }
  0x17   :  { %v144_v46 = vrot.slane %v143_v28, 2  ;;  %v150_v47 = vrot.slane %v149_v29, 2  ;;  %v98_v48 = vrot.slane %v97_v30, 2  ;;  %v104_v52 = vrot.slane %v103_v31, 2 }
  0x18   :  { %v167_v56 = vadd.f32 %v166_v33, %v130_v16  ;;  %v178_v57 = vrot.slane %v132_v32, 4  ;;  %v110_v61 = vrot.slane %v109_v35, 2  ;;  %v533_v62 = vadd.f32 %v120_v36, %v512_v21 }
  0x19   :  { %v134_v58 = vmul.f32 %v446_v42, %v446_v42  ;;  %v156_v6 = vrot.slane %v155_v37, 2  ;;  %v537_v63 = vadd.f32 %v80_v34, %v79_v18  ;;  %v162_v8 = vrot.slane %v161_v40, 2 }
  0x1a   :  { %v173_v10 = vadd.f32 %v172_v41, %v131_v24  ;;  %v184_v14 = vrot.slane %v133_v39, 4  ;;  %v539_v15 = vadd.f32 %v86_v38, %v85_v23  ;;  %v135_v19 = vmul.f32 %v451_v45, %v451_v45 }
  0x1b   :  { %v145_v16 = vadd.f32 %v144_v46, %v143_v28  ;;  %v151_v20 = vadd.f32 %v150_v47, %v149_v29  ;;  %v543_v25 = vadd.f32 %v92_v43, %v91_v26  ;;  %v168_v33 = vrot.slane %v167_v56, 2 }
  0x1c   :  { %v179_v36 = vadd.f32 %v178_v57, %v132_v32  ;;  %v546_v11 = vadd.f32 %v98_v48, %v97_v30  ;;  %v136_v18 = vmul.f32 %v460_v49, %v460_v49  ;;  %v157_v24 = vadd.f32 %v156_v6, %v155_v37 }
  0x1d   :  { %v190_v34 = vrot.slane %v134_v58, 4  ;;  %v550_v23 = vadd.f32 %v104_v52, %v103_v31  ;;  %v163_v38 = vadd.f32 %v162_v8, %v161_v40  ;;  %v174_v41 = vrot.slane %v173_v10, 2 }
  0x1e   :  { %v185_v9 = vadd.f32 %v184_v14, %v133_v39  ;;  %v137_v26 = vmul.f32 %v469_v53, %v469_v53  ;;  %v146_v28 = vrot.slane %v145_v16, 1  ;;  %v152_v29 = vrot.slane %v151_v20, 1 }
  0x1f   :  { %v196_v43 = vrot.slane %v135_v19, 4  ;;  %v554_v46 = vadd.f32 %v110_v61, %v109_v35  ;;  %v138_v30 = vmul.f32 %v474_v54, %v474_v54  ;;  %v169_v32 = vadd.f32 %v168_v33, %v167_v56 }
  0x20   :  { %v180_v47 = vrot.slane %v179_v36, 2  ;;  %v158_v31 = vrot.slane %v157_v24, 1  ;;  %v191_v48 = vadd.f32 %v190_v34, %v134_v58  ;;  %v202_v40 = vrot.slane %v136_v18, 4 }
  0x21   :  { %v139_v39 = vmul.f32 %v484_v59, %v484_v59  ;;  %v164_v52 = vrot.slane %v163_v38, 1  ;;  %v175_v57 = vadd.f32 %v174_v41, %v173_v10  ;;  %v186_v6 = vrot.slane %v185_v9, 2 }
  0x22   :  { %v147_v8 = vadd.f32 %v146_v28, %v145_v16  ;;  %v153_v14 = vadd.f32 %v152_v29, %v151_v20  ;;  %v197_v35 = vadd.f32 %v196_v43, %v135_v19  ;;  %v208_v61 = vrot.slane %v137_v26, 4 }
  0x23   :  { %v140_v27 = vmul.f32 %v497_v12, %v497_v12  ;;  %v170_v56 = vrot.slane %v169_v32, 1  ;;  %v181_v33 = vadd.f32 %v180_v47, %v179_v36  ;;  %v214_v54 = vrot.slane %v138_v30, 4 }
  0x24   :  { %v141_v58 = vmul.f32 %v512_v21, %v512_v21  ;;  %v159_v34 = vadd.f32 %v158_v31, %v157_v24  ;;  %v192_v37 = vrot.slane %v191_v48, 2  ;;  %v203_v7 = vadd.f32 %v202_v40, %v136_v18 }
  0x25   :  { %v165_v59 = vadd.f32 %v164_v52, %v163_v38  ;;  %v176_v4 = vrot.slane %v175_v57, 1  ;;  %v187_v10 = vadd.f32 %v186_v6, %v185_v9  ;;  %v220_v41 = vrot.slane %v139_v39, 4 }
  0x26   :  { %v198_v16 = vrot.slane %v197_v35, 2  ;;  %v209_v20 = vadd.f32 %v208_v61, %v137_v26  ;;  %v240_v19 = vadd.f32 %v464_v51, %v462_v50  ;;  %v241_v28 = vadd.f32 %v153_v14, %v147_v8 }
  0x27   :  { %v171_v29 = vadd.f32 %v170_v56, %v169_v32  ;;  %v182_v43 = vrot.slane %v181_v33, 1  ;;  %v215_v36 = vadd.f32 %v214_v54, %v138_v30  ;;  %v226_v47 = vrot.slane %v140_v27, 4 }
  0x28   :  { %v193_v12 = vadd.f32 %v192_v37, %v191_v48  ;;  %v204_v53 = vrot.slane %v203_v7, 2  ;;  %v242_v24 = vadd.f32 %v240_v19, %v476_v55  ;;  %v243_v31 = vadd.f32 %v241_v28, %v159_v34 }
  0x29   :  { %v177_v18 = vadd.f32 %v176_v4, %v175_v57  ;;  %v188_v38 = vrot.slane %v187_v10, 1  ;;  %v221_v40 = vadd.f32 %v220_v41, %v139_v39  ;;  %v232_v9 = vrot.slane %v141_v58, 4 }
  0x2a   :  { %v199_v52 = vadd.f32 %v198_v16, %v197_v35  ;;  %v210_v6 = vrot.slane %v209_v20, 2  ;;  %v244_v26 = vadd.f32 %v242_v24, %v486_v60  ;;  %v245_v61 = vadd.f32 %v243_v31, %v165_v59 }
  0x2b   :  { %v82_v50 = vrot.slane %v537_v63, 1  ;;  %v183_v51 = vadd.f32 %v182_v43, %v181_v33  ;;  %v216_v32 = vrot.slane %v215_v36, 2  ;;  %v227_v54 = vadd.f32 %v226_v47, %v140_v27 }
  0x2c   :  { %v194_v30 = vrot.slane %v193_v12, 1  ;;  %v205_v37 = vadd.f32 %v204_v53, %v203_v7  ;;  %v246_v48 = vadd.f32 %v244_v26, %v491_v5  ;;  %v247_v55 = vadd.f32 %v245_v61, %v171_v29 }
  0x2d   :  { %v88_v4 = vrot.slane %v539_v15, 1  ;;  %v189_v57 = vadd.f32 %v188_v38, %v187_v10  ;;  %v222_v39 = vrot.slane %v221_v40, 2  ;;  %v233_v8 = vadd.f32 %v232_v9, %v141_v58 }
  0x2e   :  { %v200_v14 = vrot.slane %v199_v52, 1  ;;  %v211_v35 = vadd.f32 %v210_v6, %v209_v20  ;;  %v248_v60 = vadd.f32 %v246_v48, %v499_v13  ;;  %v249_v59 = vadd.f32 %v247_v55, %v177_v18 }
  0x2f   :  { %v83_v56 = vadd.f32 %v82_v50, %v537_v63  ;;  %v94_v33 = vrot.slane %v543_v25, 1  ;;  %v217_v27 = vadd.f32 %v216_v32, %v215_v36  ;;  %v228_v34 = vrot.slane %v227_v54, 2 }
  0x30   :  { %v195_v7 = vadd.f32 %v194_v30, %v193_v12  ;;  %v206_v53 = vrot.slane %v205_v37, 1  ;;  %v250_v5 = vadd.f32 %v248_v60, %v505_v17  ;;  %v251_v41 = vadd.f32 %v249_v59, %v183_v51 }
  0x31   :  { %v89_v10 = vadd.f32 %v88_v4, %v539_v15  ;;  %v100_v58 = vrot.slane %v546_v11, 1  ;;  %v223_v16 = vadd.f32 %v222_v39, %v221_v40  ;;  %v234_v20 = vrot.slane %v233_v8, 2 }
  0x32   :  { %v201_v19 = vadd.f32 %v200_v14, %v199_v52  ;;  %v212_v13 = vrot.slane %v211_v35, 1  ;;  %v252_v28 = vadd.f32 %v250_v5, %v514_v22  ;;  %v253_v63 = vadd.f32 %v251_v41, %v189_v57 }
  0x33   :  { %v95_v29 = vadd.f32 %v94_v33, %v543_v25  ;;  %v106_v43 = vrot.slane %v550_v23, 1  ;;  %v645_v12 = vrot.slane %v530_v44, 2  ;;  %v229_v36 = vadd.f32 %v228_v34, %v227_v54 }
  0x34   :  { %v207_v47 = vadd.f32 %v206_v53, %v205_v37  ;;  %v218_v15 = vrot.slane %v217_v27, 1  ;;  %v254_v24 = vadd.f32 %v252_v28, %v83_v56  ;;  %v255_v31 = vadd.f32 %v253_v63, %v195_v7 }
  0x35   :  { %v117_v17 = vadd.f32 %v645_v12, %v530_v44  ;;  %v101_v18 = vadd.f32 %v100_v58, %v546_v11  ;;  %v112_v38 = vrot.slane %v554_v46, 1  ;;  %v646_v22 = vrot.slane %v533_v62, 2  ;;  %v274_v58 = vld [vmem:[%s626_s1] sm:$0x1] }
  0x36   :  { %v235_v25 = vadd.f32 %v234_v20, %v233_v8  ;;  %v213_v9 = vadd.f32 %v212_v13, %v211_v35  ;;  %v224_v52 = vrot.slane %v223_v16, 1  ;;  %v256_v6 = vadd.f32 %v254_v24, %v89_v10  ;;  %v278_v13 = vld [vmem:[%s627_s2] sm:$0x1] }
  0x37   :  { %v123_v40 = vadd.f32 %v646_v22, %v533_v62  ;;  %v257_v26 = vadd.f32 %v255_v31, %v201_v19  ;;  %v107_v44 = vadd.f32 %v106_v43, %v550_v23  ;;  %v118_v61 = vrot.slane %v117_v17, 1  ;;  %v648_v22 = vld [vmem:[#allocation2_spill] sm:$0xff] }
  0x38   :  { %v219_v50 = vadd.f32 %v218_v15, %v217_v27  ;;  %v230_v51 = vrot.slane %v229_v36, 1  ;;  %v258_v32 = vadd.f32 %v256_v6, %v95_v29  ;;  %v113_v11 = vadd.f32 %v112_v38, %v554_v46 }
  0x39   :  { %v259_v54 = vadd.f32 %v257_v26, %v207_v47  ;;  %v124_v30 = vrot.slane %v123_v40, 1  ;;  %v225_v37 = vadd.f32 %v224_v52, %v223_v16  ;;  %v236_v48 = vrot.slane %v235_v25, 1 }
  0x3a   :  { %v260_v55 = vadd.f32 %v258_v32, %v101_v18  ;;  %v119_v62 = vadd.f32 %v118_v61, %v117_v17  ;;  %v231_v57 = vadd.f32 %v230_v51, %v229_v36  ;;  %v282_v41 = vlaneseq  ;;  %v647_v18 = vld [vmem:[#allocation6_spill] sm:$0xff] }
  0x3b   :  { %v261_v4 = vadd.f32 %v259_v54, %v213_v9  ;;  %v125_v14 = vadd.f32 %v124_v30, %v123_v40  ;;  %v237_v35 = vadd.f32 %v236_v48, %v235_v25  ;;  %v649_v25 = vld [vmem:[#allocation3_spill] sm:$0xff] }
  0x3c   :  { %v262_v39 = vadd.f32 %v260_v55, %v107_v44  ;;  %v283_v10 = vshrl.u32 %v282_v41, 7 }
  0x3d   :  { %v263_v8 = vadd.f32 %v261_v4, %v219_v50 }
  0x3e   :  { %v264_v60 = vadd.f32 %v262_v39, %v113_v11  ;;  %v284_v16 = vsub.s32 0, %v283_v10 }
  0x3f   :  { %v265_v23 = vadd.f32 %v263_v8, %v225_v37 }
  0x40   :  { %v266_v59 = vadd.f32 %v264_v60, %v119_v62 }
  0x41   :  { %v267_v56 = vadd.f32 %v265_v23, %v231_v57 }
  0x42   :  { %v268_v33 = vadd.f32 %v266_v59, %v125_v14 }
  0x43   :  { %v269_v27 = vadd.f32 %v267_v56, %v237_v35 }
  0x44   :  { %v270_v34 = vmul.f32 0.0078125, %v268_v33 }
  0x45   :  { %v271_v7 = vmul.f32 0.0078125, %v269_v27 }
  0x46   :  { %v272_v46 = vmul.f32 %v270_v34, %v270_v34 }
  0x48   :  { %v273_v53 = vsub.f32 %v271_v7, %v272_v46 }
  0x4a   :  { %v275_v5 = vadd.f32 1e-05, %v273_v53 }
  0x4c   :  { %365 = vrsqrt.f32 %v275_v5 }
  0x59   :  { %v366_v20 = vpop.eup %365 }
  0x5a   :  { %v277_v19 = vmul.f32 %v366_v20, %v274_v58  ;;  %v654_v20 = vld [vmem:[#allocation9_spill] sm:$0xff] }
  0x5c   :  { %v279_v28 = vmul.f32 %v277_v19, %v270_v34  ;;  %v285_v63 = vrot.slane %v277_v19, %v284_v16 }
  0x5e   :  { %v280_v29 = vsub.f32 %v278_v13, %v279_v28  ;;  %v287_v43 = vmul.f32 %v285_v63, %v390_v0  ;;  %v296_v12 = vmul.f32 %v285_v63, %v395_v1  ;;  %v299_v17 = vmul.f32 %v285_v63, %v446_v42  ;;  %v650_v0 = vld [vmem:[#allocation7_spill] sm:$0xff]  ;;  %v651_v1 = vld [vmem:[#allocation8_spill] sm:$0xff] }
  0x5f   :  { %v302_v36 = vmul.f32 %v285_v63, %v451_v45  ;;  %v310_v47 = vmul.f32 %v285_v63, %v400_v2  ;;  %v313_v15 = vmul.f32 %v285_v63, %v405_v3  ;;  %v316_v24 = vmul.f32 %v285_v63, %v460_v49  ;;  %v652_v42 = vld [vmem:[#allocation4_spill] sm:$0xff]  ;;  %v653_v45 = vld [vmem:[#allocation5_spill] sm:$0xff] }
  0x60   :  { %v292_v31 = vrot.slane %v280_v29, %v284_v16  ;;  %v319_v38 = vmul.f32 %v285_v63, %v647_v18  ;;  %v327_v40 = vmul.f32 %v285_v63, %v648_v22  ;;  %v330_v9 = vmul.f32 %v285_v63, %v649_v25 }
  0x61   :  { %v333_v52 = vmul.f32 %v285_v63, %v650_v0  ;;  %v336_v6 = vmul.f32 %v285_v63, %v651_v1  ;;  %v344_v26 = vmul.f32 %v285_v63, %v652_v42  ;;  %v347_v44 = vmul.f32 %v285_v63, %v653_v45 }
  0x62   :  { %v294_v2 = vadd.f32 %v292_v31, %v287_v43  ;;  %v297_v61 = vadd.f32 %v296_v12, %v292_v31  ;;  %v300_v3 = vadd.f32 %v299_v17, %v292_v31  ;;  %v303_v50 = vadd.f32 %v302_v36, %v292_v31 }
  0x63   :  { %v311_v49 = vadd.f32 %v310_v47, %v292_v31  ;;  %v314_v51 = vadd.f32 %v313_v15, %v292_v31  ;;  %v317_v32 = vadd.f32 %v316_v24, %v292_v31  ;;  %v320_v54 = vadd.f32 %v319_v38, %v292_v31 }
  0x64   :  { %v295_v11 = vmax.f32 %v294_v2, 0.0  ;;  %v298_v30 = vmax.f32 %v297_v61, 0.0  ;;  %v301_v37 = vmax.f32 %v300_v3, 0.0  ;;  %v304_v48 = vmax.f32 %v303_v50, 0.0 }
  0x65   :  { %v312_v55 = vmax.f32 %v311_v49, 0.0  ;;  %v315_v4 = vmax.f32 %v314_v51, 0.0  ;;  %v318_v62 = vmax.f32 %v317_v32, 0.0  ;;  %v321_v57 = vmax.f32 %v320_v54, 0.0 }
  0x66   :  { %v305_v39 = vmax.f32 %v295_v11, %v298_v30  ;;  %v306_v8 = vmax.f32 %v301_v37, %v304_v48  ;;  %v328_v14 = vadd.f32 %v327_v40, %v292_v31  ;;  %v331_v35 = vadd.f32 %v330_v9, %v292_v31 }
  0x67   :  { %v322_v60 = vmax.f32 %v312_v55, %v315_v4  ;;  %v323_v23 = vmax.f32 %v318_v62, %v321_v57  ;;  %v334_v59 = vadd.f32 %v333_v52, %v292_v31  ;;  %v337_v56 = vadd.f32 %v336_v6, %v292_v31 }
  0x68   :  { %v307_v33 = vmax.f32 %v305_v39, %v306_v8  ;;  %v329_v27 = vmax.f32 %v328_v14, 0.0  ;;  %v332_v34 = vmax.f32 %v331_v35, 0.0  ;;  %v345_v7 = vadd.f32 %v344_v26, %v292_v31 }
  0x69   :  { %v324_v46 = vmax.f32 %v322_v60, %v323_v23  ;;  %v335_v53 = vmax.f32 %v334_v59, 0.0  ;;  %v338_v5 = vmax.f32 %v337_v56, 0.0  ;;  %v348_v41 = vadd.f32 %v347_v44, %v292_v31 }
  0x6a   :  { %v308_v10 = vpack.c.bf16 %v307_v33, %v307_v33  ;;  %v339_v58 = vmax.f32 %v329_v27, %v332_v34  ;;  %v346_v16 = vmax.f32 %v345_v7, 0.0  ;;  %v350_v19 = vmul.f32 %v285_v63, %v654_v20 }
  0x6b   :  { %v325_v13 = vpack.c.bf16 %v324_v46, %v324_v46  ;;  %v340_v28 = vmax.f32 %v335_v53, %v338_v5  ;;  %v349_v29 = vmax.f32 %v348_v41, 0.0  ;;  %v353_v43 = vmul.f32 %v285_v63, %v512_v21 }
  0x6c   :  { %309 = vst [vmem:[%s628_s3] sm:$0xf] %v308_v10  ;;  %v351_v12 = vadd.f32 %v350_v19, %v292_v31 }
  0x6d   :  { %326 = vst [vmem:[%s628_s3 + $0x4] sm:$0xf] %v325_v13  ;;  %v341_v17 = vmax.f32 %v339_v58, %v340_v28  ;;  %v354_v36 = vadd.f32 %v353_v43, %v292_v31  ;;  %v356_v18 = vmax.f32 %v346_v16, %v349_v29 }
  0x6e   :  { %v352_v47 = vmax.f32 %v351_v12, 0.0 }
  0x6f   :  { %v342_v15 = vpack.c.bf16 %v341_v17, %v341_v17  ;;  %v355_v24 = vmax.f32 %v354_v36, 0.0 }
  0x71   :  { %343 = vst [vmem:[%s628_s3 + $0x8] sm:$0xf] %v342_v15  ;;  %v357_v21 = vmax.f32 %v352_v47, %v355_v24 }
  0x73   :  { %v358_v63 = vmax.f32 %v356_v18, %v357_v21 }
  0x75   :  { %v359_v38 = vpack.c.bf16 %v358_v63, %v358_v63 }
  0x77   :  { %360 = vst [vmem:[%s628_s3 + $0xc] sm:$0xf] %v359_v38 }

// kernel: network_forward.11
= control target key start
LH: loop header
LB: loop body
LE: loop exit
PB: predicated region body
PF: predicated region fallthrough
CT: control target
= control target key end

     0   :  { %v343_v32 = vlaneseq  ;;  %s1095_s1 = inlined_call_operand.vmem [shape: bf16[256,128], index: 1, kind: input, shape index: {}]   ;;  %s1096_s0 = inlined_call_operand.vmem [shape: bf16[128,256], index: 0, kind: input, shape index: {}]   ;;  %s1097_s2 = inlined_call_operand.vmem [shape: f32[1,128], index: 2, kind: input, shape index: {}]   ;;  %s1098_s3 = inlined_call_operand.vmem [shape: f32[128,128], index: 3, kind: output, shape index: {}]  }
   0x1   :  { %v655_v0 = vld [vmem:[%s1095_s1 + $0x78] sm:$0xff]   ;;  %v657_v2 = vld [vmem:[%s1095_s1 + $0x70] sm:$0xff]   ;;  %v659_v4 = vld [vmem:[%s1095_s1 + $0x68] sm:$0xff]  }
   0x2   :  { %v656_v1 = vld [vmem:[%s1095_s1 + $0x38] sm:$0xff]   ;;  %575 = vmatprep.subr.bf16.mxu0 %v655_v0  ;;  %639 = vmatprep.subr.bf16.mxu1 %v655_v0  ;;  %v658_v3 = vld [vmem:[%s1095_s1 + $0x30] sm:$0xff]   ;;  %v660_v5 = vld [vmem:[%s1095_s1 + $0x28] sm:$0xff]   ;;  %v875_v35 = vand.u32 127, %v343_v32 }
   0x3   :  { %576 = vmatpush3.bf16.msra.mxu0 %v656_v1  ;;  %647 = vmatpush3.bf16.msra.mxu1 %v656_v1  ;;  %v661_v6 = vld [vmem:[%s1095_s1 + $0x60] sm:$0xff]   ;;  %v663_v8 = vld [vmem:[%s1095_s1 + $0x58] sm:$0xff]   ;;  %v665_v10 = vld [vmem:[%s1095_s1 + $0x50] sm:$0xff]  }
   0x4   :  { %577 = vmatprep.subr.bf16.mxu0 %v657_v2  ;;  %640 = vmatprep.subr.bf16.mxu1 %v657_v2  ;;  %v662_v7 = vld [vmem:[%s1095_s1 + $0x20] sm:$0xff]   ;;  %v664_v9 = vld [vmem:[%s1095_s1 + $0x18] sm:$0xff]   ;;  %v666_v13 = vld [vmem:[%s1095_s1 + $0x10] sm:$0xff]   ;;  %vm345_vm0 = vcmp.lt.s32.totalorder %v875_v35, 25 }
   0x5   :  { %v673_v11 = vld [vmem:[%s1096_s0 + $0x4] ss:$8 sps:$4 sm:$0xff]   ;;  %v671_v18 = vld [vmem:[%s1096_s0] ss:$8 sps:$4 sm:$0xff]   ;;  %v677_v20 = vld [vmem:[%s1096_s0 + $0x14] ss:$8 sps:$4 sm:$0xff]  }
   0x6   :  { %v676_v12 = vld [vmem:[%s1096_s0 + $0x44] ss:$8 sps:$4 sm:$0xff]   ;;  %278 = vmatprep.mubr.bf16.mxu0 %v673_v11  ;;  %v674_v19 = vld [vmem:[%s1096_s0 + $0x40] ss:$8 sps:$4 sm:$0xff]   ;;  %v680_v21 = vld [vmem:[%s1096_s0 + $0x54] ss:$8 sps:$4 sm:$0xff]  }
   0x7   :  { %578 = vmatpush3.bf16.msra.mxu0 %v658_v3  ;;  %648 = vmatpush3.bf16.msra.mxu1 %v658_v3  ;;  %v667_v14 = vld [vmem:[%s1095_s1 + $0x48] sm:$0xff]   ;;  %v669_v16 = vld [vmem:[%s1095_s1 + $0x40] sm:$0xff]   ;;  %v679_v22 = vld [vmem:[%s1096_s0 + $0x10] ss:$8 sps:$4 sm:$0xff]  }
   0x8   :  { %579 = vmatprep.subr.bf16.mxu0 %v659_v4  ;;  %641 = vmatprep.subr.bf16.mxu1 %v659_v4  ;;  %v668_v15 = vld [vmem:[%s1095_s1 + $0x8] sm:$0xff]   ;;  %v670_v17 = vld [vmem:[%s1095_s1] sm:$0xff]   ;;  %v682_v23 = vld [vmem:[%s1096_s0 + $0x50] ss:$8 sps:$4 sm:$0xff]  }
   0x9   :  { %310 = vmatprep.mubr.bf16.mxu1 %v676_v12  ;;  %v683_v24 = vld [vmem:[%s1096_s0 + $0x24] ss:$8 sps:$4 sm:$0xff]   ;;  %v685_v26 = vld [vmem:[%s1096_s0 + $0x20] ss:$8 sps:$4 sm:$0xff]   ;;  %v689_v28 = vld [vmem:[%s1096_s0 + $0x34] ss:$8 sps:$4 sm:$0xff]  }
   0xa   :  { %v686_v25 = vld [vmem:[%s1096_s0 + $0x64] ss:$8 sps:$4 sm:$0xff]   ;;  %v688_v27 = vld [vmem:[%s1096_s0 + $0x60] ss:$8 sps:$4 sm:$0xff]   ;;  %v692_v29 = vld [vmem:[%s1096_s0 + $0x74] ss:$8 sps:$4 sm:$0xff]  }
   0xb   :  { %580 = vmatpush3.bf16.msra.mxu0 %v660_v5  ;;  %649 = vmatpush3.bf16.msra.mxu1 %v660_v5  ;;  %v691_v30 = vld [vmem:[%s1096_s0 + $0x30] ss:$8 sps:$4 sm:$0xff]   ;;  %v880_v38 = vld [vmem:[%s1097_s2] ss:$0 sm:$0xff] }
   0xc   :  { %581 = vmatprep.subr.bf16.mxu0 %v661_v6  ;;  %642 = vmatprep.subr.bf16.mxu1 %v661_v6  ;;  %v694_v31 = vld [vmem:[%s1096_s0 + $0x70] ss:$8 sps:$4 sm:$0xff]  }
   0xf   :  { %582 = vmatpush3.bf16.msra.mxu0 %v662_v7  ;;  %650 = vmatpush3.bf16.msra.mxu1 %v662_v7 }
  0x10   :  { %583 = vmatprep.subr.bf16.mxu0 %v663_v8  ;;  %643 = vmatprep.subr.bf16.mxu1 %v663_v8 }
  0x13   :  { %584 = vmatpush3.bf16.msra.mxu0 %v664_v9  ;;  %651 = vmatpush3.bf16.msra.mxu1 %v664_v9 }
  0x14   :  { %585 = vmatprep.subr.bf16.mxu0 %v665_v10  ;;  %644 = vmatprep.subr.bf16.mxu1 %v665_v10 }
  0x17   :  { %586 = vmatpush3.bf16.msra.mxu0 %v666_v13  ;;  %652 = vmatpush3.bf16.msra.mxu1 %v666_v13 }
  0x18   :  { %587 = vmatprep.subr.bf16.mxu0 %v667_v14  ;;  %645 = vmatprep.subr.bf16.mxu1 %v667_v14 }
  0x1b   :  { %588 = vmatpush3.bf16.msra.mxu0 %v668_v15  ;;  %653 = vmatpush3.bf16.msra.mxu1 %v668_v15 }
  0x1c   :  { %589 = vmatprep.subr.bf16.mxu0 %v669_v16  ;;  %646 = vmatprep.subr.bf16.mxu1 %v669_v16 }
  0x1f   :  { %590 = vmatpush3.bf16.msra.mxu0 %v670_v17  ;;  %654 = vmatpush3.bf16.msra.mxu1 %v670_v17 }
  0x22   :  { %279 = vmatmul.mubr.bf16.vlgmr.msra.gmra.mxu0 %v671_v18  ;;  %311 = vmatmul.mubr.bf16.vlgmr.msra.gmra.mxu1 %v674_v19 }
  0x23   :  { %286 = vmatprep.mubr.bf16.mxu0 %v677_v20  ;;  %318 = vmatprep.mubr.bf16.mxu1 %v680_v21 }
  0x2a   :  { %287 = vmatmul.mubr.bf16.gmra.mxu0 %v679_v22  ;;  %319 = vmatmul.mubr.bf16.gmra.mxu1 %v682_v23 }
  0x2b   :  { %294 = vmatprep.mubr.bf16.mxu0 %v683_v24  ;;  %326 = vmatprep.mubr.bf16.mxu1 %v686_v25 }
  0x32   :  { %295 = vmatmul.mubr.bf16.gmra.mxu0 %v685_v26  ;;  %327 = vmatmul.mubr.bf16.gmra.mxu1 %v688_v27 }
  0x33   :  { %302 = vmatprep.mubr.bf16.mxu0 %v689_v28  ;;  %334 = vmatprep.mubr.bf16.mxu1 %v692_v29 }
  0x3a   :  { %303 = vmatmul.mubr.bf16.gmra.mxu0 %v691_v30  ;;  %335 = vmatmul.mubr.bf16.gmra.mxu1 %v694_v31 }
  0xe2   :  { %v591_v33 = vpop.f32.mrf.mxu0  ;;  %v615_v34 = vpop.f32.mrf.mxu1 }
  0xe4   :  { %v592_v36 = vpop.f32.mrf.mxu0  ;;  %v616_v37 = vpop.f32.mrf.mxu1 }
  0xe5   :  { %v593_v39 = vadd.f32 %v592_v36, %v591_v33  ;;  %v617_v40 = vadd.f32 %v616_v37, %v615_v34 }
  0xe6   :  { %v594_v41 = vpop.f32.mrf.mxu0  ;;  %v618_v42 = vpop.f32.mrf.mxu1 }
  0xe7   :  { %v281_v43 = vadd.f32 %v593_v39, %v880_v38  ;;  %v313_v46 = vadd.f32 %v617_v40, %v880_v38 }
  0xe8   :  { %v595_v44 = vpop.f32.mrf.mxu0  ;;  %v619_v45 = vpop.f32.mrf.mxu1 }
  0xe9   :  { %v596_v47 = vadd.f32 %v595_v44, %v594_v41  ;;  %v620_v48 = vadd.f32 %v619_v45, %v618_v42  ;;  %v887_v49 = vsel %vm345_vm0, %v281_v43, -1e+30  ;;  %v893_v55 = vsel %vm345_vm0, %v313_v46, -1e+30 }
  0xea   :  { %v597_v50 = vpop.f32.mrf.mxu0  ;;  %362 = vmax.xlane.f32.xlu0 %v887_v49  ;;  %v621_v51 = vpop.f32.mrf.mxu1 }
  0xeb   :  { %v316_v52 = vadd.f32 %v620_v48, %v880_v38  ;;  %v284_v59 = vadd.f32 %v596_v47, %v880_v38 }
  0xec   :  { %v598_v53 = vpop.f32.mrf.mxu0  ;;  %v622_v54 = vpop.f32.mrf.mxu1 }
  0xed   :  { %v599_v56 = vadd.f32 %v598_v53, %v597_v50  ;;  %v623_v57 = vadd.f32 %v622_v54, %v621_v51  ;;  %v897_v58 = vsel %vm345_vm0, %v316_v52, -1e+30  ;;  %v910_v5 = vsel %vm345_vm0, %v284_v59, -1e+30 }
  0xee   :  { %380 = vmax.xlane.f32.xlu1 %v897_v58  ;;  %v600_v60 = vpop.f32.mrf.mxu0  ;;  %378 = vmax.xlane.f32.xlu0 %v893_v55  ;;  %v624_v61 = vpop.f32.mrf.mxu1 }
  0xef   :  { %v289_v62 = vadd.f32 %v599_v56, %v880_v38  ;;  %v321_v63 = vadd.f32 %v623_v57, %v880_v38 }
  0xf0   :  { %v601_v0 = vpop.f32.mrf.mxu0  ;;  %v625_v1 = vpop.f32.mrf.mxu1 }
  0xf1   :  { %v602_v2 = vadd.f32 %v601_v0, %v600_v60  ;;  %v626_v3 = vadd.f32 %v625_v1, %v624_v61  ;;  %v906_v4 = vsel %vm345_vm0, %v289_v62, -1e+30  ;;  %v917_v9 = vsel %vm345_vm0, %v321_v63, -1e+30 }
  0xf2   :  { %v603_v6 = vpop.f32.mrf.mxu0  ;;  %366 = vmax.xlane.f32.xlu1 %v906_v4  ;;  %364 = vmax.xlane.f32.xlu0 %v910_v5  ;;  %v627_v7 = vpop.f32.mrf.mxu1 }
  0xf3   :  { %v292_v8 = vadd.f32 %v602_v2, %v880_v38  ;;  %v324_v15 = vadd.f32 %v626_v3, %v880_v38 }
  0xf4   :  { %v604_v10 = vpop.f32.mrf.mxu0  ;;  %v628_v11 = vpop.f32.mrf.mxu1 }
  0xf5   :  { %v605_v12 = vadd.f32 %v604_v10, %v603_v6  ;;  %v629_v13 = vadd.f32 %v628_v11, %v627_v7  ;;  %v921_v14 = vsel %vm345_vm0, %v292_v8, -1e+30  ;;  %v930_v24 = vsel %vm345_vm0, %v324_v15, -1e+30 }
  0xf6   :  { %v606_v16 = vpop.f32.mrf.mxu0  ;;  %368 = vmax.xlane.f32.xlu1 %v921_v14  ;;  %382 = vmax.xlane.f32.xlu0 %v917_v9  ;;  %v630_v17 = vpop.f32.mrf.mxu1 }
  0xf7   :  { %v297_v18 = vadd.f32 %v605_v12, %v880_v38  ;;  %v329_v19 = vadd.f32 %v629_v13, %v880_v38 }
  0xf8   :  { %v607_v20 = vpop.f32.mrf.mxu0  ;;  %v631_v21 = vpop.f32.mrf.mxu1 }
  0xf9   :  { %v608_v22 = vadd.f32 %v607_v20, %v606_v16  ;;  %v632_v23 = vadd.f32 %v631_v21, %v630_v17  ;;  %v934_v25 = vsel %vm345_vm0, %v297_v18, -1e+30  ;;  %v941_v29 = vsel %vm345_vm0, %v329_v19, -1e+30 }
  0xfa   :  { %v609_v26 = vpop.f32.mrf.mxu0  ;;  %384 = vmax.xlane.f32.xlu1 %v930_v24  ;;  %370 = vmax.xlane.f32.xlu0 %v934_v25  ;;  %v633_v27 = vpop.f32.mrf.mxu1 }
  0xfb   :  { %v300_v28 = vadd.f32 %v608_v22, %v880_v38  ;;  %v332_v36 = vadd.f32 %v632_v23, %v880_v38 }
  0xfc   :  { %v610_v30 = vpop.f32.mrf.mxu0  ;;  %v634_v31 = vpop.f32.mrf.mxu1 }
  0xfd   :  { %v611_v32 = vadd.f32 %v610_v30, %v609_v26  ;;  %v635_v33 = vadd.f32 %v634_v31, %v633_v27  ;;  %v351_v34 = vsel %vm345_vm0, %v300_v28, -1e+30  ;;  %v359_v46 = vsel %vm345_vm0, %v332_v36, -1e+30 }
  0xfe   :  { %v612_v37 = vpop.f32.mrf.mxu0  ;;  %372 = vmax.xlane.f32.xlu1 %v351_v34  ;;  %386 = vmax.xlane.f32.xlu0 %v941_v29  ;;  %v636_v39 = vpop.f32.mrf.mxu1 }
  0xff   :  { %v305_v40 = vadd.f32 %v611_v32, %v880_v38  ;;  %v337_v41 = vadd.f32 %v635_v33, %v880_v38 }
 0x100   :  { %v613_v42 = vpop.f32.mrf.mxu0  ;;  %v637_v43 = vpop.f32.mrf.mxu1 }
 0x101   :  { %v614_v44 = vadd.f32 %v613_v42, %v612_v37  ;;  %v638_v45 = vadd.f32 %v637_v43, %v636_v39  ;;  %v352_v47 = vsel %vm345_vm0, %v305_v40, -1e+30  ;;  %v956_v50 = vsel %vm345_vm0, %v337_v41, -1e+30 }
 0x102   :  { %388 = vmax.xlane.f32.xlu1 %v359_v46  ;;  %374 = vmax.xlane.f32.xlu0 %v352_v47 }
 0x103   :  { %v308_v48 = vadd.f32 %v614_v44, %v880_v38  ;;  %v340_v52 = vadd.f32 %v638_v45, %v880_v38 }
 0x105   :  { %v960_v51 = vsel %vm345_vm0, %v308_v48, -1e+30  ;;  %v967_v53 = vsel %vm345_vm0, %v340_v52, -1e+30 }
 0x106   :  { %376 = vmax.xlane.f32.xlu1 %v960_v51  ;;  %390 = vmax.xlane.f32.xlu0 %v956_v50 }
 0x10a   :  { %392 = vmax.xlane.f32.xlu1 %v967_v53 }
 0x173   :  { %v363_v54 = vpop.xlane.xlu0 %362 }
 0x174   :  { %v971_v56 = vsub.f32 %v887_v49, %v363_v54 }
 0x176   :  { %v410_v57 = vmul.f32 1.442695, %v971_v56 }
 0x177   :  { %v381_v59 = vpop.xlane.xlu1 %380  ;;  %v379_v60 = vpop.xlane.xlu0 %378 }
 0x178   :  { %695 = vpow2.f32 %v410_v57  ;;  %v975_v38 = vsub.f32 %v893_v55, %v379_v60  ;;  %v979_v63 = vsub.f32 %v897_v58, %v381_v59 }
 0x17a   :  { %v426_v61 = vmul.f32 1.442695, %v975_v38  ;;  %v428_v6 = vmul.f32 1.442695, %v979_v63 }
 0x17b   :  { %v367_v62 = vpop.xlane.xlu1 %366  ;;  %v365_v35 = vpop.xlane.xlu0 %364 }
 0x17c   :  { %v982_v0 = vsub.f32 %v906_v4, %v367_v62  ;;  %v985_v49 = vsub.f32 %v910_v5, %v365_v35  ;;  %697 = vpow2.f32 %v426_v61 }
 0x17e   :  { %v414_v1 = vmul.f32 1.442695, %v982_v0  ;;  %v412_v2 = vmul.f32 1.442695, %v985_v49 }
 0x17f   :  { %v369_v55 = vpop.xlane.xlu1 %368  ;;  %v383_v3 = vpop.xlane.xlu0 %382 }
 0x180   :  { %699 = vpow2.f32 %v414_v1  ;;  %v991_v7 = vsub.f32 %v921_v14, %v369_v55  ;;  %v994_v58 = vsub.f32 %v917_v9, %v383_v3 }
 0x181   :  { %701 = vpow2.f32 %v412_v2 }
 0x182   :  { %v430_v4 = vmul.f32 1.442695, %v994_v58  ;;  %703 = vpow2.f32 %v428_v6  ;;  %v416_v10 = vmul.f32 1.442695, %v991_v7 }
 0x183   :  { %v385_v5 = vpop.xlane.xlu1 %384  ;;  %v371_v8 = vpop.xlane.xlu0 %370 }
 0x184   :  { %v999_v11 = vsub.f32 %v930_v24, %v385_v5  ;;  %v1002_v12 = vsub.f32 %v934_v25, %v371_v8  ;;  %705 = vpow2.f32 %v430_v4 }
 0x185   :  { %v696_v13 = vpop.eup %695  ;;  %707 = vpow2.f32 %v416_v10 }
 0x186   :  { %v418_v14 = vmul.f32 1.442695, %v1002_v12  ;;  %442 = vadd.xlane.f32.xlu0 %v696_v13  ;;  %v432_v16 = vmul.f32 1.442695, %v999_v11 }
 0x187   :  { %v373_v9 = vpop.xlane.xlu1 %372  ;;  %v387_v15 = vpop.xlane.xlu0 %386 }
 0x188   :  { %v1006_v17 = vsub.f32 %v351_v34, %v373_v9  ;;  %v1009_v18 = vsub.f32 %v941_v29, %v387_v15  ;;  %709 = vpow2.f32 %v418_v14 }
 0x189   :  { %v698_v19 = vpop.eup %697  ;;  %711 = vpow2.f32 %v432_v16 }
 0x18a   :  { %v434_v20 = vmul.f32 1.442695, %v1009_v18  ;;  %458 = vadd.xlane.f32.xlu0 %v698_v19  ;;  %v420_v23 = vmul.f32 1.442695, %v1006_v17 }
 0x18b   :  { %v389_v21 = vpop.xlane.xlu1 %388  ;;  %v375_v22 = vpop.xlane.xlu0 %374 }
 0x18c   :  { %v1013_v24 = vsub.f32 %v359_v46, %v389_v21  ;;  %v1015_v25 = vsub.f32 %v352_v47, %v375_v22  ;;  %713 = vpow2.f32 %v434_v20 }
 0x18d   :  { %v700_v26 = vpop.eup %699  ;;  %715 = vpow2.f32 %v420_v23 }
 0x18e   :  { %v702_v27 = vpop.eup %701  ;;  %v422_v28 = vmul.f32 1.442695, %v1015_v25  ;;  %446 = vadd.xlane.f32.xlu0 %v700_v26  ;;  %v436_v31 = vmul.f32 1.442695, %v1013_v24 }
 0x18f   :  { %444 = vadd.xlane.f32.xlu1 %v702_v27  ;;  %v377_v29 = vpop.xlane.xlu1 %376  ;;  %v391_v30 = vpop.xlane.xlu0 %390 }
 0x190   :  { %v1020_v32 = vsub.f32 %v956_v50, %v391_v30  ;;  %v704_v33 = vpop.eup %703  ;;  %717 = vpow2.f32 %v422_v28  ;;  %v1023_v34 = vsub.f32 %v960_v51, %v377_v29 }
 0x191   :  { %v706_v36 = vpop.eup %705  ;;  %719 = vpow2.f32 %v436_v31 }
 0x192   :  { %v438_v37 = vmul.f32 1.442695, %v1020_v32  ;;  %462 = vadd.xlane.f32.xlu0 %v706_v36  ;;  %v708_v40 = vpop.eup %707  ;;  %v424_v41 = vmul.f32 1.442695, %v1023_v34 }
 0x193   :  { %460 = vadd.xlane.f32.xlu1 %v704_v33  ;;  %v393_v39 = vpop.xlane.xlu1 %392 }
 0x194   :  { %721 = vpow2.f32 %v438_v37  ;;  %v1028_v42 = vsub.f32 %v967_v53, %v393_v39 }
 0x195   :  { %v710_v43 = vpop.eup %709  ;;  %723 = vpow2.f32 %v424_v41 }
 0x196   :  { %450 = vadd.xlane.f32.xlu0 %v710_v43  ;;  %v712_v44 = vpop.eup %711  ;;  %v440_v45 = vmul.f32 1.442695, %v1028_v42 }
 0x197   :  { %448 = vadd.xlane.f32.xlu1 %v708_v40 }
 0x198   :  { %725 = vpow2.f32 %v440_v45 }
 0x199   :  { %v714_v46 = vpop.eup %713 }
 0x19a   :  { %466 = vadd.xlane.f32.xlu0 %v714_v46  ;;  %v716_v47 = vpop.eup %715 }
 0x19b   :  { %464 = vadd.xlane.f32.xlu1 %v712_v44 }
 0x19d   :  { %v718_v48 = vpop.eup %717 }
 0x19e   :  { %454 = vadd.xlane.f32.xlu0 %v718_v48  ;;  %v720_v50 = vpop.eup %719 }
 0x19f   :  { %452 = vadd.xlane.f32.xlu1 %v716_v47 }
 0x1a1   :  { %v722_v51 = vpop.eup %721 }
 0x1a2   :  { %470 = vadd.xlane.f32.xlu0 %v722_v51  ;;  %v724_v52 = vpop.eup %723 }
 0x1a3   :  { %468 = vadd.xlane.f32.xlu1 %v720_v50 }
 0x1a5   :  { %v726_v53 = vpop.eup %725 }
 0x1a7   :  { %456 = vadd.xlane.f32.xlu1 %v724_v52 }
 0x1ab   :  { %472 = vadd.xlane.f32.xlu1 %v726_v53 }
 0x20f   :  { %v443_v54 = vpop.xlane.xlu0 %442 }
 0x210   :  { %727 = vlog2.f32 %v443_v54 }
 0x213   :  { %v459_v57 = vpop.xlane.xlu0 %458 }
 0x214   :  { %729 = vlog2.f32 %v459_v57 }
 0x217   :  { %v447_v60 = vpop.xlane.xlu0 %446 }
 0x218   :  { %v445_v59 = vpop.xlane.xlu1 %444 }
 0x219   :  { %731 = vlog2.f32 %v445_v59 }
 0x21a   :  { %733 = vlog2.f32 %v447_v60 }
 0x21b   :  { %v463_v62 = vpop.xlane.xlu0 %462 }
 0x21c   :  { %v461_v61 = vpop.xlane.xlu1 %460 }
 0x21d   :  { %v728_v35 = vpop.eup %727  ;;  %735 = vlog2.f32 %v461_v61 }
 0x21e   :  { %v475_v1 = vmul.f32 0.6931472, %v728_v35  ;;  %737 = vlog2.f32 %v463_v62 }
 0x21f   :  { %v451_v3 = vpop.xlane.xlu0 %450 }
 0x220   :  { %v506_v2 = vsub.f32 %v971_v56, %v475_v1  ;;  %v449_v55 = vpop.xlane.xlu1 %448 }
 0x221   :  { %739 = vlog2.f32 %v449_v55  ;;  %v730_v6 = vpop.eup %729 }
 0x222   :  { %522 = vst [vmem:[%s1098_s3] sm:$0xff] %v506_v2  ;;  %741 = vlog2.f32 %v451_v3  ;;  %v491_v4 = vmul.f32 0.6931472, %v730_v6 }
 0x223   :  { %v467_v8 = vpop.xlane.xlu0 %466 }
 0x224   :  { %v465_v5 = vpop.xlane.xlu1 %464  ;;  %v514_v10 = vsub.f32 %v975_v38, %v491_v4 }
 0x225   :  { %743 = vlog2.f32 %v465_v5 }
 0x226   :  { %v732_v13 = vpop.eup %731  ;;  %745 = vlog2.f32 %v467_v8  ;;  %530 = vst [vmem:[%s1098_s3 + $0x40] sm:$0xff] %v514_v10 }
 0x227   :  { %v734_v14 = vpop.eup %733  ;;  %v477_v56 = vmul.f32 0.6931472, %v732_v13  ;;  %v455_v16 = vpop.xlane.xlu0 %454 }
 0x228   :  { %v479_v9 = vmul.f32 0.6931472, %v734_v14  ;;  %v453_v15 = vpop.xlane.xlu1 %452 }
 0x229   :  { %v507_v19 = vsub.f32 %v985_v49, %v477_v56  ;;  %747 = vlog2.f32 %v453_v15 }
 0x22a   :  { %v736_v20 = vpop.eup %735  ;;  %v508_v21 = vsub.f32 %v982_v0, %v479_v9  ;;  %749 = vlog2.f32 %v455_v16 }
 0x22b   :  { %v738_v38 = vpop.eup %737  ;;  %523 = vst [vmem:[%s1098_s3 + $0x8] sm:$0xff] %v507_v19  ;;  %v493_v22 = vmul.f32 0.6931472, %v736_v20  ;;  %v471_v27 = vpop.xlane.xlu0 %470 }
 0x22c   :  { %524 = vst [vmem:[%s1098_s3 + $0x10] sm:$0xff] %v508_v21  ;;  %v495_v23 = vmul.f32 0.6931472, %v738_v38  ;;  %v469_v26 = vpop.xlane.xlu1 %468 }
 0x22d   :  { %v515_v49 = vsub.f32 %v979_v63, %v493_v22  ;;  %751 = vlog2.f32 %v469_v26 }
 0x22e   :  { %v740_v28 = vpop.eup %739  ;;  %v516_v0 = vsub.f32 %v994_v58, %v495_v23  ;;  %753 = vlog2.f32 %v471_v27 }
 0x22f   :  { %v742_v29 = vpop.eup %741  ;;  %531 = vst [vmem:[%s1098_s3 + $0x48] sm:$0xff] %v515_v49  ;;  %v481_v30 = vmul.f32 0.6931472, %v740_v28 }
 0x230   :  { %532 = vst [vmem:[%s1098_s3 + $0x50] sm:$0xff] %v516_v0  ;;  %v483_v31 = vmul.f32 0.6931472, %v742_v29  ;;  %v457_v33 = vpop.xlane.xlu1 %456 }
 0x231   :  { %v509_v36 = vsub.f32 %v991_v7, %v481_v30  ;;  %755 = vlog2.f32 %v457_v33 }
 0x232   :  { %v744_v63 = vpop.eup %743  ;;  %v510_v37 = vsub.f32 %v1002_v12, %v483_v31 }
 0x233   :  { %v746_v58 = vpop.eup %745  ;;  %525 = vst [vmem:[%s1098_s3 + $0x18] sm:$0xff] %v509_v36  ;;  %v497_v39 = vmul.f32 0.6931472, %v744_v63 }
 0x234   :  { %526 = vst [vmem:[%s1098_s3 + $0x20] sm:$0xff] %v510_v37  ;;  %v499_v40 = vmul.f32 0.6931472, %v746_v58  ;;  %v473_v41 = vpop.xlane.xlu1 %472 }
 0x235   :  { %v517_v43 = vsub.f32 %v999_v11, %v497_v39  ;;  %757 = vlog2.f32 %v473_v41 }
 0x236   :  { %v748_v7 = vpop.eup %747  ;;  %v518_v44 = vsub.f32 %v1009_v18, %v499_v40 }
 0x237   :  { %v750_v45 = vpop.eup %749  ;;  %533 = vst [vmem:[%s1098_s3 + $0x58] sm:$0xff] %v517_v43  ;;  %v485_v12 = vmul.f32 0.6931472, %v748_v7 }
 0x238   :  { %534 = vst [vmem:[%s1098_s3 + $0x60] sm:$0xff] %v518_v44  ;;  %v487_v46 = vmul.f32 0.6931472, %v750_v45 }
 0x239   :  { %v511_v47 = vsub.f32 %v1006_v17, %v485_v12 }
 0x23a   :  { %v752_v48 = vpop.eup %751  ;;  %v512_v11 = vsub.f32 %v1015_v25, %v487_v46 }
 0x23b   :  { %v754_v50 = vpop.eup %753  ;;  %527 = vst [vmem:[%s1098_s3 + $0x28] sm:$0xff] %v511_v47  ;;  %v501_v18 = vmul.f32 0.6931472, %v752_v48 }
 0x23c   :  { %528 = vst [vmem:[%s1098_s3 + $0x30] sm:$0xff] %v512_v11  ;;  %v503_v51 = vmul.f32 0.6931472, %v754_v50 }
 0x23d   :  { %v519_v52 = vsub.f32 %v1013_v24, %v501_v18 }
 0x23e   :  { %v756_v53 = vpop.eup %755  ;;  %v520_v54 = vsub.f32 %v1020_v32, %v503_v51 }
 0x23f   :  { %535 = vst [vmem:[%s1098_s3 + $0x68] sm:$0xff] %v519_v52  ;;  %v489_v17 = vmul.f32 0.6931472, %v756_v53 }
 0x240   :  { %536 = vst [vmem:[%s1098_s3 + $0x70] sm:$0xff] %v520_v54 }
 0x241   :  { %v513_v25 = vsub.f32 %v1023_v34, %v489_v17 }
 0x242   :  { %v758_v57 = vpop.eup %757 }
 0x243   :  { %529 = vst [vmem:[%s1098_s3 + $0x38] sm:$0xff] %v513_v25  ;;  %v505_v24 = vmul.f32 0.6931472, %v758_v57 }
 0x245   :  { %v521_v59 = vsub.f32 %v1028_v42, %v505_v24 }
 0x247   :  { %537 = vst [vmem:[%s1098_s3 + $0x78] sm:$0xff] %v521_v59 }

// kernel: network_forward.8
= control target key start
LH: loop header
LB: loop body
LE: loop exit
PB: predicated region body
PF: predicated region fallthrough
CT: control target
= control target key end

     0   :  { %s7470_s1 = inlined_call_operand.vmem [shape: bf16[3200,128], index: 1, kind: input, shape index: {}]   ;;  %s7471_s0 = inlined_call_operand.vmem [shape: bf16[128,3200], index: 0, kind: input, shape index: {}]   ;;  %s7472_s2 = inlined_call_operand.vmem [shape: f32[1,128], index: 2, kind: input, shape index: {}]   ;;  %s7473_s3 = inlined_call_operand.vmem [shape: f32[128,128], index: 3, kind: output, shape index: {}]  }
   0x1   :  { %v5352_v0 = vld [vmem:[%s7470_s1 + $0x78] sm:$0xff]   ;;  %v5356_v4 = vld [vmem:[%s7470_s1 + $0x70] sm:$0xff]   ;;  %v5360_v8 = vld [vmem:[%s7470_s1 + $0x68] sm:$0xff]  }
   0x2   :  { %v5353_v1 = vld [vmem:[%s7470_s1 + $0xf8] sm:$0xff]   ;;  %4520 = vmatprep.subr.bf16.mxu0 %v5352_v0  ;;  %v5357_v5 = vld [vmem:[%s7470_s1 + $0xf0] sm:$0xff]   ;;  %v5361_v9 = vld [vmem:[%s7470_s1 + $0xe8] sm:$0xff]  }
   0x3   :  { %v5354_v2 = vld [vmem:[%s7470_s1 + $0x38] sm:$0xff]   ;;  %4584 = vmatprep.subr.bf16.mxu1 %v5353_v1  ;;  %v5358_v6 = vld [vmem:[%s7470_s1 + $0x30] sm:$0xff]   ;;  %v5362_v10 = vld [vmem:[%s7470_s1 + $0x28] sm:$0xff]  }
   0x4   :  { %v5355_v3 = vld [vmem:[%s7470_s1 + $0xb8] sm:$0xff]   ;;  %4521 = vmatpush3.bf16.msra.mxu0 %v5354_v2  ;;  %v5359_v7 = vld [vmem:[%s7470_s1 + $0xb0] sm:$0xff]   ;;  %v5363_v11 = vld [vmem:[%s7470_s1 + $0xa8] sm:$0xff]  }
   0x5   :  { %4585 = vmatpush3.bf16.msra.mxu1 %v5355_v3  ;;  %4522 = vmatprep.subr.bf16.mxu0 %v5356_v4  ;;  %v5364_v12 = vld [vmem:[%s7470_s1 + $0x60] sm:$0xff]   ;;  %v5368_v16 = vld [vmem:[%s7470_s1 + $0x58] sm:$0xff]   ;;  %v5372_v20 = vld [vmem:[%s7470_s1 + $0x50] sm:$0xff]  }
   0x6   :  { %4586 = vmatprep.subr.bf16.mxu1 %v5357_v5  ;;  %v5365_v13 = vld [vmem:[%s7470_s1 + $0xe0] sm:$0xff]   ;;  %v5369_v17 = vld [vmem:[%s7470_s1 + $0xd8] sm:$0xff]   ;;  %v5373_v21 = vld [vmem:[%s7470_s1 + $0xd0] sm:$0xff]  }
   0x7   :  { %v5366_v14 = vld [vmem:[%s7470_s1 + $0x20] sm:$0xff]   ;;  %v5370_v18 = vld [vmem:[%s7470_s1 + $0x18] sm:$0xff]   ;;  %v5374_v22 = vld [vmem:[%s7470_s1 + $0x10] sm:$0xff]  }
   0x8   :  { %4523 = vmatpush3.bf16.msra.mxu0 %v5358_v6  ;;  %v5367_v15 = vld [vmem:[%s7470_s1 + $0xa0] sm:$0xff]   ;;  %v5371_v19 = vld [vmem:[%s7470_s1 + $0x98] sm:$0xff]   ;;  %v5375_v23 = vld [vmem:[%s7470_s1 + $0x90] sm:$0xff]  }
   0x9   :  { %4587 = vmatpush3.bf16.msra.mxu1 %v5359_v7  ;;  %4524 = vmatprep.subr.bf16.mxu0 %v5360_v8  ;;  %v5376_v24 = vld [vmem:[%s7470_s1 + $0x48] sm:$0xff]   ;;  %v5380_v28 = vld [vmem:[%s7470_s1 + $0x40] sm:$0xff]   ;;  %v5390_v36 = vld [vmem:[%s7470_s1 + $0x178] sm:$0xff]  }
   0xa   :  { %4588 = vmatprep.subr.bf16.mxu1 %v5361_v9  ;;  %v5377_v25 = vld [vmem:[%s7470_s1 + $0xc8] sm:$0xff]   ;;  %v5381_v29 = vld [vmem:[%s7470_s1 + $0xc0] sm:$0xff]   ;;  %v5391_v37 = vld [vmem:[%s7470_s1 + $0x1f8] sm:$0xff]  }
   0xb   :  { %v5378_v26 = vld [vmem:[%s7470_s1 + $0x8] sm:$0xff]   ;;  %v5382_v30 = vld [vmem:[%s7470_s1] sm:$0xff]   ;;  %v5392_v38 = vld [vmem:[%s7470_s1 + $0x138] sm:$0xff]  }
   0xc   :  { %4525 = vmatpush3.bf16.msra.mxu0 %v5362_v10  ;;  %v5379_v27 = vld [vmem:[%s7470_s1 + $0x88] sm:$0xff]   ;;  %v5383_v31 = vld [vmem:[%s7470_s1 + $0x80] sm:$0xff]   ;;  %v5393_v39 = vld [vmem:[%s7470_s1 + $0x1b8] sm:$0xff]  }
   0xd   :  { %4589 = vmatpush3.bf16.msra.mxu1 %v5363_v11  ;;  %4526 = vmatprep.subr.bf16.mxu0 %v5364_v12  ;;  %v5384_v32 = vld [vmem:[%s7471_s0] ss:$100 sps:$4 sm:$0xff]   ;;  %v5387_v34 = vld [vmem:[%s7471_s0 + $0x8] ss:$100 sps:$4 sm:$0xff]   ;;  %v5396_v41 = vld [vmem:[%s7471_s0 + $0xd4] ss:$100 sps:$4 sm:$0xff]  }
   0xe   :  { %4590 = vmatprep.subr.bf16.mxu1 %v5365_v13  ;;  %v5386_v33 = vld [vmem:[%s7471_s0 + $0x4] ss:$100 sps:$4 sm:$0xff]   ;;  %v5389_v35 = vld [vmem:[%s7471_s0 + $0xc] ss:$100 sps:$4 sm:$0xff]   ;;  %v5404_v48 = vld [vmem:[%s7471_s0 + $0x194] ss:$100 sps:$4 sm:$0xff]  }
   0xf   :  { %2870 = vmatprep.mubr.bf16.mxu0 %v5386_v33  ;;  %2967 = vmatprep.mubr.bf16.mxu1 %v5389_v35  ;;  %v5394_v40 = vld [vmem:[%s7471_s0 + $0xcc] ss:$100 sps:$4 sm:$0xff]   ;;  %v5406_v49 = vld [vmem:[%s7471_s0 + $0x19c] ss:$100 sps:$4 sm:$0xff]   ;;  %v5416_v57 = vld [vmem:[%s7471_s0 + $0x264] ss:$100 sps:$4 sm:$0xff]  }
  0x10   :  { %4527 = vmatpush3.bf16.msra.mxu0 %v5366_v14  ;;  %v5398_v42 = vld [vmem:[%s7471_s0 + $0xc8] ss:$100 sps:$4 sm:$0xff]   ;;  %v5399_v43 = vld [vmem:[%s7471_s0 + $0xd0] ss:$100 sps:$4 sm:$0xff]   ;;  %v5409_v51 = vld [vmem:[%s7471_s0 + $0x198] ss:$100 sps:$4 sm:$0xff]  }
  0x11   :  { %4591 = vmatpush3.bf16.msra.mxu1 %v5367_v15  ;;  %4528 = vmatprep.subr.bf16.mxu0 %v5368_v16  ;;  %v5400_v44 = vld [vmem:[%s7470_s1 + $0x170] sm:$0xff]   ;;  %v5410_v52 = vld [vmem:[%s7470_s1 + $0x168] sm:$0xff]   ;;  %v5414_v56 = vld [vmem:[%s7471_s0 + $0x25c] ss:$100 sps:$4 sm:$0xff]  }
  0x12   :  { %4592 = vmatprep.subr.bf16.mxu1 %v5369_v17  ;;  %v5401_v45 = vld [vmem:[%s7470_s1 + $0x1f0] sm:$0xff]   ;;  %v5411_v53 = vld [vmem:[%s7470_s1 + $0x1e8] sm:$0xff]   ;;  %v5418_v58 = vld [vmem:[%s7471_s0 + $0x258] ss:$100 sps:$4 sm:$0xff]  }
  0x13   :  { %v5402_v46 = vld [vmem:[%s7470_s1 + $0x130] sm:$0xff]   ;;  %v5412_v54 = vld [vmem:[%s7470_s1 + $0x128] sm:$0xff]   ;;  %v5419_v59 = vld [vmem:[%s7471_s0 + $0x260] ss:$100 sps:$4 sm:$0xff]  }
  0x14   :  { %4529 = vmatpush3.bf16.msra.mxu0 %v5370_v18  ;;  %v5403_v47 = vld [vmem:[%s7470_s1 + $0x1b0] sm:$0xff]   ;;  %v5413_v55 = vld [vmem:[%s7470_s1 + $0x1a8] sm:$0xff]   ;;  %v5420_v60 = vld [vmem:[%s7470_s1 + $0x160] sm:$0xff]  }
  0x15   :  { %4593 = vmatpush3.bf16.msra.mxu1 %v5371_v19  ;;  %4530 = vmatprep.subr.bf16.mxu0 %v5372_v20  ;;  %v5408_v50 = vld [vmem:[%s7471_s0 + $0x190] ss:$100 sps:$4 sm:$0xff]   ;;  %v5421_v61 = vld [vmem:[%s7470_s1 + $0x1e0] sm:$0xff]   ;;  %v5430_v3 = vld [vmem:[%s7470_s1 + $0x158] sm:$0xff]  }
  0x16   :  { %4594 = vmatprep.subr.bf16.mxu1 %v5373_v21  ;;  %v5422_v62 = vld [vmem:[%s7470_s1 + $0x120] sm:$0xff]   ;;  %v5426_v1 = vld [vmem:[%s7471_s0 + $0x32c] ss:$100 sps:$4 sm:$0xff]   ;;  %v5431_v5 = vld [vmem:[%s7470_s1 + $0x1d8] sm:$0xff]  }
  0x17   :  { %v5423_v63 = vld [vmem:[%s7470_s1 + $0x1a0] sm:$0xff]   ;;  %v5429_v4 = vld [vmem:[%s7471_s0 + $0x328] ss:$100 sps:$4 sm:$0xff]   ;;  %v5432_v6 = vld [vmem:[%s7470_s1 + $0x118] sm:$0xff]  }
  0x18   :  { %4531 = vmatpush3.bf16.msra.mxu0 %v5374_v22  ;;  %v5424_v0 = vld [vmem:[%s7471_s0 + $0x324] ss:$100 sps:$4 sm:$0xff]   ;;  %v5433_v7 = vld [vmem:[%s7470_s1 + $0x198] sm:$0xff]   ;;  %v5434_v8 = vld [vmem:[%s7471_s0 + $0x3ec] ss:$100 sps:$4 sm:$0xff]  }
  0x19   :  { %4595 = vmatpush3.bf16.msra.mxu1 %v5375_v23  ;;  %4532 = vmatprep.subr.bf16.mxu0 %v5376_v24  ;;  %v5428_v2 = vld [vmem:[%s7471_s0 + $0x320] ss:$100 sps:$4 sm:$0xff]   ;;  %v5436_v9 = vld [vmem:[%s7471_s0 + $0x3f4] ss:$100 sps:$4 sm:$0xff]   ;;  %v5438_v12 = vld [vmem:[%s7471_s0 + $0x3e8] ss:$100 sps:$4 sm:$0xff]  }
  0x1a   :  { %4596 = vmatprep.subr.bf16.mxu1 %v5377_v25  ;;  %v5440_v10 = vld [vmem:[%s7470_s1 + $0x150] sm:$0xff]   ;;  %v5446_v17 = vld [vmem:[%s7471_s0 + $0x4bc] ss:$100 sps:$4 sm:$0xff]   ;;  %v5450_v18 = vld [vmem:[%s7470_s1 + $0x148] sm:$0xff]  }
  0x1b   :  { %v5441_v11 = vld [vmem:[%s7470_s1 + $0x1d0] sm:$0xff]   ;;  %v5451_v19 = vld [vmem:[%s7470_s1 + $0x1c8] sm:$0xff]   ;;  %v5449_v23 = vld [vmem:[%s7471_s0 + $0x4b8] ss:$100 sps:$4 sm:$0xff]  }
  0x1c   :  { %4533 = vmatpush3.bf16.msra.mxu0 %v5378_v26  ;;  %v5442_v13 = vld [vmem:[%s7470_s1 + $0x110] sm:$0xff]   ;;  %v5452_v20 = vld [vmem:[%s7470_s1 + $0x108] sm:$0xff]   ;;  %v5454_v24 = vld [vmem:[%s7471_s0 + $0x57c] ss:$100 sps:$4 sm:$0xff]  }
  0x1d   :  { %4597 = vmatpush3.bf16.msra.mxu1 %v5379_v27  ;;  %4534 = vmatprep.subr.bf16.mxu0 %v5380_v28  ;;  %v5443_v14 = vld [vmem:[%s7470_s1 + $0x190] sm:$0xff]   ;;  %v5453_v21 = vld [vmem:[%s7470_s1 + $0x188] sm:$0xff]   ;;  %v5460_v26 = vld [vmem:[%s7470_s1 + $0x140] sm:$0xff]  }
  0x1e   :  { %4598 = vmatprep.subr.bf16.mxu1 %v5381_v29  ;;  %v5439_v15 = vld [vmem:[%s7471_s0 + $0x3f0] ss:$100 sps:$4 sm:$0xff]   ;;  %v5456_v25 = vld [vmem:[%s7471_s0 + $0x584] ss:$100 sps:$4 sm:$0xff]   ;;  %v5470_v33 = vld [vmem:[%s7470_s1 + $0x278] sm:$0xff]  }
  0x1f   :  { %v5444_v16 = vld [vmem:[%s7471_s0 + $0x4b4] ss:$100 sps:$4 sm:$0xff]   ;;  %v5461_v27 = vld [vmem:[%s7470_s1 + $0x1c0] sm:$0xff]  }
  0x20   :  { %4535 = vmatpush3.bf16.msra.mxu0 %v5382_v30  ;;  %v5448_v22 = vld [vmem:[%s7471_s0 + $0x4b0] ss:$100 sps:$4 sm:$0xff]   ;;  %v5462_v28 = vld [vmem:[%s7470_s1 + $0x100] sm:$0xff]   ;;  %v5458_v30 = vld [vmem:[%s7471_s0 + $0x578] ss:$100 sps:$4 sm:$0xff]  }
  0x21   :  { %4599 = vmatpush3.bf16.msra.mxu1 %v5383_v31  ;;  %4648 = vmatprep.subr.bf16.mxu0 %v5390_v36  ;;  %v5463_v29 = vld [vmem:[%s7470_s1 + $0x180] sm:$0xff]   ;;  %v5464_v36 = vld [vmem:[%s7471_s0 + $0x10] ss:$100 sps:$4 sm:$0xff]  }
  0x22   :  { %4712 = vmatprep.subr.bf16.mxu1 %v5391_v37  ;;  %v5459_v31 = vld [vmem:[%s7471_s0 + $0x580] ss:$100 sps:$4 sm:$0xff]   ;;  %v5467_v37 = vld [vmem:[%s7471_s0 + $0x18] ss:$100 sps:$4 sm:$0xff]  }
  0x23   :  { %2871 = vmatmul.mubr.bf16.vlgmr.msra.gmra.mxu0 %v5384_v32  ;;  %v5466_v32 = vld [vmem:[%s7471_s0 + $0x14] ss:$100 sps:$4 sm:$0xff]   ;;  %v5469_v35 = vld [vmem:[%s7471_s0 + $0x1c] ss:$100 sps:$4 sm:$0xff]  }
  0x24   :  { %2968 = vmatmul.mubr.bf16.vlgmr.msra.gmra.mxu1 %v5387_v34  ;;  %4649 = vmatpush3.bf16.msra.mxu0 %v5392_v38  ;;  %v5471_v34 = vld [vmem:[%s7470_s1 + $0x2f8] sm:$0xff]  }
  0x25   :  { %4713 = vmatpush3.bf16.msra.mxu1 %v5393_v39  ;;  %2878 = vmatprep.mubr.bf16.mxu0 %v5394_v40  ;;  %v5472_v38 = vld [vmem:[%s7470_s1 + $0x238] sm:$0xff]  }
  0x26   :  { %2975 = vmatprep.mubr.bf16.mxu1 %v5396_v41  ;;  %4650 = vmatprep.subr.bf16.mxu0 %v5400_v44  ;;  %v5473_v39 = vld [vmem:[%s7470_s1 + $0x2b8] sm:$0xff]   ;;  %v5476_v41 = vld [vmem:[%s7471_s0 + $0xe4] ss:$100 sps:$4 sm:$0xff]   ;;  %v5482_v44 = vld [vmem:[%s7470_s1 + $0x230] sm:$0xff]  }
  0x27   :  { %4714 = vmatprep.subr.bf16.mxu1 %v5401_v45  ;;  %v5474_v40 = vld [vmem:[%s7471_s0 + $0xdc] ss:$100 sps:$4 sm:$0xff]   ;;  %v5483_v45 = vld [vmem:[%s7470_s1 + $0x2b0] sm:$0xff]  }
  0x28   :  { %4651 = vmatpush3.bf16.msra.mxu0 %v5402_v46  ;;  %v5478_v46 = vld [vmem:[%s7471_s0 + $0xd8] ss:$100 sps:$4 sm:$0xff]  }
  0x29   :  { %4715 = vmatpush3.bf16.msra.mxu1 %v5403_v47  ;;  %4652 = vmatprep.subr.bf16.mxu0 %v5410_v52  ;;  %v5490_v47 = vld [vmem:[%s7470_s1 + $0x268] sm:$0xff]  }
  0x2a   :  { %4716 = vmatprep.subr.bf16.mxu1 %v5411_v53  ;;  %v5492_v52 = vld [vmem:[%s7470_s1 + $0x228] sm:$0xff]  }
  0x2b   :  { %2879 = vmatmul.mubr.bf16.gmra.mxu0 %v5398_v42  ;;  %v5480_v42 = vld [vmem:[%s7470_s1 + $0x270] sm:$0xff]   ;;  %v5493_v53 = vld [vmem:[%s7470_s1 + $0x2a8] sm:$0xff]  }
  0x2c   :  { %2976 = vmatmul.mubr.bf16.gmra.mxu1 %v5399_v43  ;;  %2886 = vmatprep.mubr.bf16.mxu0 %v5404_v48  ;;  %v5481_v43 = vld [vmem:[%s7470_s1 + $0x2f0] sm:$0xff]   ;;  %v5479_v48 = vld [vmem:[%s7471_s0 + $0xe0] ss:$100 sps:$4 sm:$0xff]  }
  0x2d   :  { %2983 = vmatprep.mubr.bf16.mxu1 %v5406_v49  ;;  %4653 = vmatpush3.bf16.msra.mxu0 %v5412_v54  ;;  %v5491_v49 = vld [vmem:[%s7470_s1 + $0x2e8] sm:$0xff]   ;;  %v5500_v54 = vld [vmem:[%s7470_s1 + $0x260] sm:$0xff]  }
  0x2e   :  { %4717 = vmatpush3.bf16.msra.mxu1 %v5413_v55  ;;  %4654 = vmatprep.subr.bf16.mxu0 %v5420_v60  ;;  %v5501_v55 = vld [vmem:[%s7470_s1 + $0x2e0] sm:$0xff]   ;;  %v5494_v60 = vld [vmem:[%s7471_s0 + $0x26c] ss:$100 sps:$4 sm:$0xff]  }
  0x2f   :  { %4718 = vmatprep.subr.bf16.mxu1 %v5421_v61  ;;  %v5496_v61 = vld [vmem:[%s7471_s0 + $0x274] ss:$100 sps:$4 sm:$0xff]  }
  0x31   :  { %4655 = vmatpush3.bf16.msra.mxu0 %v5422_v62  ;;  %v5510_v62 = vld [vmem:[%s7470_s1 + $0x258] sm:$0xff]  }
  0x32   :  { %4719 = vmatpush3.bf16.msra.mxu1 %v5423_v63  ;;  %4656 = vmatprep.subr.bf16.mxu0 %v5430_v3  ;;  %v5511_v63 = vld [vmem:[%s7470_s1 + $0x2d8] sm:$0xff]   ;;  %v5499_v3 = vld [vmem:[%s7471_s0 + $0x270] ss:$100 sps:$4 sm:$0xff]  }
  0x33   :  { %2887 = vmatmul.mubr.bf16.gmra.mxu0 %v5408_v50  ;;  %4720 = vmatprep.subr.bf16.mxu1 %v5431_v5  ;;  %v5484_v50 = vld [vmem:[%s7471_s0 + $0x1a4] ss:$100 sps:$4 sm:$0xff]   ;;  %v5506_v5 = vld [vmem:[%s7471_s0 + $0x33c] ss:$100 sps:$4 sm:$0xff]  }
  0x34   :  { %2984 = vmatmul.mubr.bf16.gmra.mxu1 %v5409_v51  ;;  %2894 = vmatprep.mubr.bf16.mxu0 %v5414_v56  ;;  %v5486_v51 = vld [vmem:[%s7471_s0 + $0x1ac] ss:$100 sps:$4 sm:$0xff]   ;;  %v5488_v56 = vld [vmem:[%s7471_s0 + $0x1a0] ss:$100 sps:$4 sm:$0xff]  }
  0x35   :  { %2991 = vmatprep.mubr.bf16.mxu1 %v5416_v57  ;;  %4657 = vmatpush3.bf16.msra.mxu0 %v5432_v6  ;;  %v5502_v57 = vld [vmem:[%s7470_s1 + $0x220] sm:$0xff]   ;;  %v5520_v6 = vld [vmem:[%s7470_s1 + $0x250] sm:$0xff]  }
  0x36   :  { %4721 = vmatpush3.bf16.msra.mxu1 %v5433_v7  ;;  %4658 = vmatprep.subr.bf16.mxu0 %v5440_v10  ;;  %v5521_v7 = vld [vmem:[%s7470_s1 + $0x2d0] sm:$0xff]  }
  0x37   :  { %4722 = vmatprep.subr.bf16.mxu1 %v5441_v11  ;;  %v5508_v10 = vld [vmem:[%s7471_s0 + $0x330] ss:$100 sps:$4 sm:$0xff]   ;;  %v5509_v11 = vld [vmem:[%s7471_s0 + $0x338] ss:$100 sps:$4 sm:$0xff]  }
  0x39   :  { %4659 = vmatpush3.bf16.msra.mxu0 %v5442_v13  ;;  %v5516_v13 = vld [vmem:[%s7471_s0 + $0x404] ss:$100 sps:$4 sm:$0xff]  }
  0x3a   :  { %4723 = vmatpush3.bf16.msra.mxu1 %v5443_v14  ;;  %4660 = vmatprep.subr.bf16.mxu0 %v5450_v18  ;;  %v5530_v14 = vld [vmem:[%s7470_s1 + $0x248] sm:$0xff]   ;;  %v5518_v18 = vld [vmem:[%s7471_s0 + $0x3f8] ss:$100 sps:$4 sm:$0xff]  }
  0x3b   :  { %2895 = vmatmul.mubr.bf16.gmra.mxu0 %v5418_v58  ;;  %4724 = vmatprep.subr.bf16.mxu1 %v5451_v19  ;;  %v5503_v58 = vld [vmem:[%s7470_s1 + $0x2a0] sm:$0xff]  }
  0x3c   :  { %2992 = vmatmul.mubr.bf16.gmra.mxu1 %v5419_v59  ;;  %2902 = vmatprep.mubr.bf16.mxu0 %v5424_v0  ;;  %v5489_v59 = vld [vmem:[%s7471_s0 + $0x1a8] ss:$100 sps:$4 sm:$0xff]   ;;  %v5512_v0 = vld [vmem:[%s7470_s1 + $0x218] sm:$0xff]   ;;  %v5519_v19 = vld [vmem:[%s7471_s0 + $0x400] ss:$100 sps:$4 sm:$0xff]  }
  0x3d   :  { %2999 = vmatprep.mubr.bf16.mxu1 %v5426_v1  ;;  %4661 = vmatpush3.bf16.msra.mxu0 %v5452_v20  ;;  %v5513_v1 = vld [vmem:[%s7470_s1 + $0x298] sm:$0xff]   ;;  %v5524_v20 = vld [vmem:[%s7471_s0 + $0x4c4] ss:$100 sps:$4 sm:$0xff]  }
  0x3e   :  { %4725 = vmatpush3.bf16.msra.mxu1 %v5453_v21  ;;  %4662 = vmatprep.subr.bf16.mxu0 %v5460_v26  ;;  %v5540_v21 = vld [vmem:[%s7470_s1 + $0x240] sm:$0xff]  }
  0x3f   :  { %4726 = vmatprep.subr.bf16.mxu1 %v5461_v27  ;;  %v5528_v26 = vld [vmem:[%s7471_s0 + $0x4c0] ss:$100 sps:$4 sm:$0xff]   ;;  %v5550_v27 = vld [vmem:[%s7470_s1 + $0x378] sm:$0xff]  }
  0x41   :  { %4663 = vmatpush3.bf16.msra.mxu0 %v5462_v28  ;;  %v5551_v28 = vld [vmem:[%s7470_s1 + $0x3f8] sm:$0xff]  }
  0x42   :  { %4727 = vmatpush3.bf16.msra.mxu1 %v5463_v29  ;;  %4776 = vmatprep.subr.bf16.mxu0 %v5470_v33  ;;  %v5529_v29 = vld [vmem:[%s7471_s0 + $0x4c8] ss:$100 sps:$4 sm:$0xff]   ;;  %v5539_v33 = vld [vmem:[%s7471_s0 + $0x590] ss:$100 sps:$4 sm:$0xff]  }
  0x43   :  { %2903 = vmatmul.mubr.bf16.gmra.mxu0 %v5428_v2  ;;  %4840 = vmatprep.subr.bf16.mxu1 %v5471_v34  ;;  %v5498_v2 = vld [vmem:[%s7471_s0 + $0x268] ss:$100 sps:$4 sm:$0xff]  }
  0x44   :  { %3000 = vmatmul.mubr.bf16.gmra.mxu1 %v5429_v4  ;;  %2910 = vmatprep.mubr.bf16.mxu0 %v5434_v8  ;;  %v5504_v4 = vld [vmem:[%s7471_s0 + $0x334] ss:$100 sps:$4 sm:$0xff]   ;;  %v5546_v34 = vld [vmem:[%s7471_s0 + $0x24] ss:$100 sps:$4 sm:$0xff]  }
  0x45   :  { %3007 = vmatprep.mubr.bf16.mxu1 %v5436_v9  ;;  %v5522_v8 = vld [vmem:[%s7470_s1 + $0x210] sm:$0xff]  }
  0x46   :  { %v5523_v9 = vld [vmem:[%s7470_s1 + $0x290] sm:$0xff]  }
  0x4b   :  { %2911 = vmatmul.mubr.bf16.gmra.mxu0 %v5438_v12  ;;  %v5514_v12 = vld [vmem:[%s7471_s0 + $0x3fc] ss:$100 sps:$4 sm:$0xff]  }
  0x4c   :  { %3008 = vmatmul.mubr.bf16.gmra.mxu1 %v5439_v15  ;;  %2918 = vmatprep.mubr.bf16.mxu0 %v5444_v16  ;;  %v5531_v15 = vld [vmem:[%s7470_s1 + $0x2c8] sm:$0xff]  }
  0x4d   :  { %3015 = vmatprep.mubr.bf16.mxu1 %v5446_v17  ;;  %v5532_v16 = vld [vmem:[%s7470_s1 + $0x208] sm:$0xff]  }
  0x4e   :  { %v5533_v17 = vld [vmem:[%s7470_s1 + $0x288] sm:$0xff]  }
  0x53   :  { %2919 = vmatmul.mubr.bf16.gmra.mxu0 %v5448_v22  ;;  %v5526_v22 = vld [vmem:[%s7471_s0 + $0x4cc] ss:$100 sps:$4 sm:$0xff]  }
  0x54   :  { %3016 = vmatmul.mubr.bf16.gmra.mxu1 %v5449_v23  ;;  %2926 = vmatprep.mubr.bf16.mxu0 %v5454_v24  ;;  %v5541_v23 = vld [vmem:[%s7470_s1 + $0x2c0] sm:$0xff]  }
  0x55   :  { %3023 = vmatprep.mubr.bf16.mxu1 %v5456_v25  ;;  %v5542_v24 = vld [vmem:[%s7470_s1 + $0x200] sm:$0xff]  }
  0x56   :  { %v5543_v25 = vld [vmem:[%s7470_s1 + $0x280] sm:$0xff]  }
  0x5b   :  { %2927 = vmatmul.mubr.bf16.gmra.mxu0 %v5458_v30  ;;  %v5534_v30 = vld [vmem:[%s7471_s0 + $0x58c] ss:$100 sps:$4 sm:$0xff]  }
  0x5c   :  { %3024 = vmatmul.mubr.bf16.gmra.mxu1 %v5459_v31  ;;  %3064 = vmatprep.mubr.bf16.mxu0 %v5466_v32  ;;  %v5536_v31 = vld [vmem:[%s7471_s0 + $0x594] ss:$100 sps:$4 sm:$0xff]   ;;  %v5538_v32 = vld [vmem:[%s7471_s0 + $0x588] ss:$100 sps:$4 sm:$0xff]  }
  0x5d   :  { %3161 = vmatprep.mubr.bf16.mxu1 %v5469_v35  ;;  %v5549_v35 = vld [vmem:[%s7471_s0 + $0x2c] ss:$100 sps:$4 sm:$0xff]  }
  0x63   :  { %3065 = vmatmul.mubr.bf16.vlgmr.msra.gmra.mxu0 %v5464_v36  ;;  %v5544_v36 = vld [vmem:[%s7471_s0 + $0x20] ss:$100 sps:$4 sm:$0xff]  }
  0x64   :  { %3162 = vmatmul.mubr.bf16.vlgmr.msra.gmra.mxu1 %v5467_v37  ;;  %4777 = vmatpush3.bf16.msra.mxu0 %v5472_v38  ;;  %v5547_v37 = vld [vmem:[%s7471_s0 + $0x28] ss:$100 sps:$4 sm:$0xff]   ;;  %v5552_v38 = vld [vmem:[%s7470_s1 + $0x338] sm:$0xff]  }
  0x65   :  { %4841 = vmatpush3.bf16.msra.mxu1 %v5473_v39  ;;  %3072 = vmatprep.mubr.bf16.mxu0 %v5474_v40  ;;  %v5553_v39 = vld [vmem:[%s7470_s1 + $0x3b8] sm:$0xff]   ;;  %v5554_v40 = vld [vmem:[%s7471_s0 + $0xec] ss:$100 sps:$4 sm:$0xff]  }
  0x66   :  { %3169 = vmatprep.mubr.bf16.mxu1 %v5476_v41  ;;  %4778 = vmatprep.subr.bf16.mxu0 %v5480_v42  ;;  %v5556_v41 = vld [vmem:[%s7471_s0 + $0xf4] ss:$100 sps:$4 sm:$0xff]  }
  0x67   :  { %4842 = vmatprep.subr.bf16.mxu1 %v5481_v43  ;;  %v5560_v42 = vld [vmem:[%s7470_s1 + $0x370] sm:$0xff]  }
  0x68   :  { %4779 = vmatpush3.bf16.msra.mxu0 %v5482_v44  ;;  %v5561_v43 = vld [vmem:[%s7470_s1 + $0x3f0] sm:$0xff]  }
  0x69   :  { %4843 = vmatpush3.bf16.msra.mxu1 %v5483_v45  ;;  %4780 = vmatprep.subr.bf16.mxu0 %v5490_v47  ;;  %v5562_v44 = vld [vmem:[%s7470_s1 + $0x330] sm:$0xff]   ;;  %v5570_v47 = vld [vmem:[%s7470_s1 + $0x368] sm:$0xff]  }
  0x6a   :  { %4844 = vmatprep.subr.bf16.mxu1 %v5491_v49  ;;  %v5563_v45 = vld [vmem:[%s7470_s1 + $0x3b0] sm:$0xff]  }
  0x6b   :  { %3073 = vmatmul.mubr.bf16.gmra.mxu0 %v5478_v46  ;;  %v5558_v46 = vld [vmem:[%s7471_s0 + $0xe8] ss:$100 sps:$4 sm:$0xff]   ;;  %v5564_v49 = vld [vmem:[%s7471_s0 + $0x1b4] ss:$100 sps:$4 sm:$0xff]  }
  0x6c   :  { %3170 = vmatmul.mubr.bf16.gmra.mxu1 %v5479_v48  ;;  %3080 = vmatprep.mubr.bf16.mxu0 %v5484_v50  ;;  %v5559_v48 = vld [vmem:[%s7471_s0 + $0xf0] ss:$100 sps:$4 sm:$0xff]   ;;  %v5571_v50 = vld [vmem:[%s7470_s1 + $0x3e8] sm:$0xff]  }
  0x6d   :  { %3177 = vmatprep.mubr.bf16.mxu1 %v5486_v51  ;;  %4781 = vmatpush3.bf16.msra.mxu0 %v5492_v52  ;;  %v5566_v51 = vld [vmem:[%s7471_s0 + $0x1bc] ss:$100 sps:$4 sm:$0xff]   ;;  %v5572_v52 = vld [vmem:[%s7470_s1 + $0x328] sm:$0xff]  }
  0x6e   :  { %4845 = vmatpush3.bf16.msra.mxu1 %v5493_v53  ;;  %4782 = vmatprep.subr.bf16.mxu0 %v5500_v54  ;;  %v5573_v53 = vld [vmem:[%s7470_s1 + $0x3a8] sm:$0xff]   ;;  %v5580_v54 = vld [vmem:[%s7470_s1 + $0x360] sm:$0xff]  }
  0x6f   :  { %4846 = vmatprep.subr.bf16.mxu1 %v5501_v55  ;;  %v5581_v55 = vld [vmem:[%s7470_s1 + $0x3e0] sm:$0xff]  }
  0x71   :  { %4783 = vmatpush3.bf16.msra.mxu0 %v5502_v57  ;;  %v5582_v57 = vld [vmem:[%s7470_s1 + $0x320] sm:$0xff]  }
  0x72   :  { %4847 = vmatpush3.bf16.msra.mxu1 %v5503_v58  ;;  %4784 = vmatprep.subr.bf16.mxu0 %v5510_v62  ;;  %v5583_v58 = vld [vmem:[%s7470_s1 + $0x3a0] sm:$0xff]  }
  0x73   :  { %3081 = vmatmul.mubr.bf16.gmra.mxu0 %v5488_v56  ;;  %4848 = vmatprep.subr.bf16.mxu1 %v5511_v63  ;;  %v5568_v56 = vld [vmem:[%s7471_s0 + $0x1b0] ss:$100 sps:$4 sm:$0xff]   ;;  %v5576_v62 = vld [vmem:[%s7471_s0 + $0x284] ss:$100 sps:$4 sm:$0xff]   ;;  %v5591_v63 = vld [vmem:[%s7470_s1 + $0x3d8] sm:$0xff]  }
  0x74   :  { %3178 = vmatmul.mubr.bf16.gmra.mxu1 %v5489_v59  ;;  %3088 = vmatprep.mubr.bf16.mxu0 %v5494_v60  ;;  %v5569_v59 = vld [vmem:[%s7471_s0 + $0x1b8] ss:$100 sps:$4 sm:$0xff]  }
  0x75   :  { %3185 = vmatprep.mubr.bf16.mxu1 %v5496_v61  ;;  %4785 = vmatpush3.bf16.msra.mxu0 %v5512_v0  ;;  %v5574_v60 = vld [vmem:[%s7471_s0 + $0x27c] ss:$100 sps:$4 sm:$0xff]  }
  0x76   :  { %4849 = vmatpush3.bf16.msra.mxu1 %v5513_v1  ;;  %4786 = vmatprep.subr.bf16.mxu0 %v5520_v6  ;;  %v5590_v61 = vld [vmem:[%s7470_s1 + $0x358] sm:$0xff]   ;;  %v5603_v6 = vld [vmem:[%s7470_s1 + $0x390] sm:$0xff]  }
  0x77   :  { %4850 = vmatprep.subr.bf16.mxu1 %v5521_v7  ;;  %v5592_v0 = vld [vmem:[%s7470_s1 + $0x318] sm:$0xff]   ;;  %v5579_v7 = vld [vmem:[%s7471_s0 + $0x280] ss:$100 sps:$4 sm:$0xff]  }
  0x78   :  { %v5593_v1 = vld [vmem:[%s7470_s1 + $0x398] sm:$0xff]  }
  0x79   :  { %4787 = vmatpush3.bf16.msra.mxu0 %v5522_v8  ;;  %v5584_v8 = vld [vmem:[%s7471_s0 + $0x344] ss:$100 sps:$4 sm:$0xff]  }
  0x7a   :  { %4851 = vmatpush3.bf16.msra.mxu1 %v5523_v9  ;;  %4788 = vmatprep.subr.bf16.mxu0 %v5530_v14  ;;  %v5610_v9 = vld [vmem:[%s7470_s1 + $0x348] sm:$0xff]   ;;  %v5620_v14 = vld [vmem:[%s7470_s1 + $0x340] sm:$0xff]  }
  0x7b   :  { %3089 = vmatmul.mubr.bf16.gmra.mxu0 %v5498_v2  ;;  %4852 = vmatprep.subr.bf16.mxu1 %v5531_v15  ;;  %v5600_v2 = vld [vmem:[%s7470_s1 + $0x350] sm:$0xff]   ;;  %v5621_v15 = vld [vmem:[%s7470_s1 + $0x3c0] sm:$0xff]  }
  0x7c   :  { %3186 = vmatmul.mubr.bf16.gmra.mxu1 %v5499_v3  ;;  %3096 = vmatprep.mubr.bf16.mxu0 %v5504_v4  ;;  %v5601_v3 = vld [vmem:[%s7470_s1 + $0x3d0] sm:$0xff]  }
  0x7d   :  { %3193 = vmatprep.mubr.bf16.mxu1 %v5506_v5  ;;  %4789 = vmatpush3.bf16.msra.mxu0 %v5532_v16  ;;  %v5602_v4 = vld [vmem:[%s7470_s1 + $0x310] sm:$0xff]   ;;  %v5578_v5 = vld [vmem:[%s7471_s0 + $0x278] ss:$100 sps:$4 sm:$0xff]   ;;  %v5588_v16 = vld [vmem:[%s7471_s0 + $0x340] ss:$100 sps:$4 sm:$0xff]  }
  0x7e   :  { %4853 = vmatpush3.bf16.msra.mxu1 %v5533_v17  ;;  %4790 = vmatprep.subr.bf16.mxu0 %v5540_v21  ;;  %v5622_v17 = vld [vmem:[%s7470_s1 + $0x300] sm:$0xff]   ;;  %v5596_v21 = vld [vmem:[%s7471_s0 + $0x414] ss:$100 sps:$4 sm:$0xff]  }
  0x7f   :  { %4854 = vmatprep.subr.bf16.mxu1 %v5541_v23  ;;  %v5631_v23 = vld [vmem:[%s7470_s1 + $0x4f8] sm:$0xff]  }
  0x81   :  { %4791 = vmatpush3.bf16.msra.mxu0 %v5542_v24  ;;  %v5598_v24 = vld [vmem:[%s7471_s0 + $0x408] ss:$100 sps:$4 sm:$0xff]  }
  0x82   :  { %4855 = vmatpush3.bf16.msra.mxu1 %v5543_v25  ;;  %4904 = vmatprep.subr.bf16.mxu0 %v5550_v27  ;;  %v5599_v25 = vld [vmem:[%s7471_s0 + $0x410] ss:$100 sps:$4 sm:$0xff]   ;;  %v5606_v27 = vld [vmem:[%s7471_s0 + $0x4dc] ss:$100 sps:$4 sm:$0xff]  }
  0x83   :  { %3097 = vmatmul.mubr.bf16.gmra.mxu0 %v5508_v10  ;;  %4968 = vmatprep.subr.bf16.mxu1 %v5551_v28  ;;  %v5611_v10 = vld [vmem:[%s7470_s1 + $0x3c8] sm:$0xff]   ;;  %v5608_v28 = vld [vmem:[%s7471_s0 + $0x4d0] ss:$100 sps:$4 sm:$0xff]  }
  0x84   :  { %3194 = vmatmul.mubr.bf16.gmra.mxu1 %v5509_v11  ;;  %3104 = vmatprep.mubr.bf16.mxu0 %v5514_v12  ;;  %v5586_v11 = vld [vmem:[%s7471_s0 + $0x34c] ss:$100 sps:$4 sm:$0xff]  }
  0x85   :  { %3201 = vmatprep.mubr.bf16.mxu1 %v5516_v13  ;;  %v5612_v12 = vld [vmem:[%s7470_s1 + $0x308] sm:$0xff]  }
  0x86   :  { %v5613_v13 = vld [vmem:[%s7470_s1 + $0x388] sm:$0xff]  }
  0x8b   :  { %3105 = vmatmul.mubr.bf16.gmra.mxu0 %v5518_v18  ;;  %v5623_v18 = vld [vmem:[%s7470_s1 + $0x380] sm:$0xff]  }
  0x8c   :  { %3202 = vmatmul.mubr.bf16.gmra.mxu1 %v5519_v19  ;;  %3112 = vmatprep.mubr.bf16.mxu0 %v5524_v20  ;;  %v5589_v19 = vld [vmem:[%s7471_s0 + $0x348] ss:$100 sps:$4 sm:$0xff]  }
  0x8d   :  { %3209 = vmatprep.mubr.bf16.mxu1 %v5526_v22  ;;  %v5594_v20 = vld [vmem:[%s7471_s0 + $0x40c] ss:$100 sps:$4 sm:$0xff]   ;;  %v5630_v22 = vld [vmem:[%s7470_s1 + $0x478] sm:$0xff]  }
  0x93   :  { %3113 = vmatmul.mubr.bf16.gmra.mxu0 %v5528_v26  ;;  %v5604_v26 = vld [vmem:[%s7471_s0 + $0x4d4] ss:$100 sps:$4 sm:$0xff]  }
  0x94   :  { %3210 = vmatmul.mubr.bf16.gmra.mxu1 %v5529_v29  ;;  %3120 = vmatprep.mubr.bf16.mxu0 %v5534_v30  ;;  %v5609_v29 = vld [vmem:[%s7471_s0 + $0x4d8] ss:$100 sps:$4 sm:$0xff]  }
  0x95   :  { %3217 = vmatprep.mubr.bf16.mxu1 %v5536_v31  ;;  %v5614_v30 = vld [vmem:[%s7471_s0 + $0x59c] ss:$100 sps:$4 sm:$0xff]   ;;  %v5616_v31 = vld [vmem:[%s7471_s0 + $0x5a4] ss:$100 sps:$4 sm:$0xff]  }
  0x9b   :  { %3121 = vmatmul.mubr.bf16.gmra.mxu0 %v5538_v32  ;;  %v5618_v32 = vld [vmem:[%s7471_s0 + $0x598] ss:$100 sps:$4 sm:$0xff]  }
  0x9c   :  { %3218 = vmatmul.mubr.bf16.gmra.mxu1 %v5539_v33  ;;  %3258 = vmatprep.mubr.bf16.mxu0 %v5546_v34  ;;  %v5619_v33 = vld [vmem:[%s7471_s0 + $0x5a0] ss:$100 sps:$4 sm:$0xff]   ;;  %v5626_v34 = vld [vmem:[%s7471_s0 + $0x34] ss:$100 sps:$4 sm:$0xff]  }
  0x9d   :  { %3355 = vmatprep.mubr.bf16.mxu1 %v5549_v35  ;;  %v5629_v35 = vld [vmem:[%s7471_s0 + $0x3c] ss:$100 sps:$4 sm:$0xff]  }
  0xa3   :  { %3259 = vmatmul.mubr.bf16.vlgmr.msra.gmra.mxu0 %v5544_v36  ;;  %v5624_v36 = vld [vmem:[%s7471_s0 + $0x30] ss:$100 sps:$4 sm:$0xff]  }
  0xa4   :  { %3356 = vmatmul.mubr.bf16.vlgmr.msra.gmra.mxu1 %v5547_v37  ;;  %4905 = vmatpush3.bf16.msra.mxu0 %v5552_v38  ;;  %v5627_v37 = vld [vmem:[%s7471_s0 + $0x38] ss:$100 sps:$4 sm:$0xff]  }
  0xa5   :  { %4969 = vmatpush3.bf16.msra.mxu1 %v5553_v39  ;;  %3266 = vmatprep.mubr.bf16.mxu0 %v5554_v40  ;;  %v5632_v38 = vld [vmem:[%s7470_s1 + $0x438] sm:$0xff]  }
  0xa6   :  { %3363 = vmatprep.mubr.bf16.mxu1 %v5556_v41  ;;  %4906 = vmatprep.subr.bf16.mxu0 %v5560_v42  ;;  %v5633_v39 = vld [vmem:[%s7470_s1 + $0x4b8] sm:$0xff]   ;;  %v5636_v41 = vld [vmem:[%s7471_s0 + $0x104] ss:$100 sps:$4 sm:$0xff]   ;;  %v5640_v42 = vld [vmem:[%s7470_s1 + $0x470] sm:$0xff]  }
  0xa7   :  { %4970 = vmatprep.subr.bf16.mxu1 %v5561_v43  ;;  %v5634_v40 = vld [vmem:[%s7471_s0 + $0xfc] ss:$100 sps:$4 sm:$0xff]   ;;  %v5641_v43 = vld [vmem:[%s7470_s1 + $0x4f0] sm:$0xff]  }
  0xa8   :  { %4907 = vmatpush3.bf16.msra.mxu0 %v5562_v44 }
  0xa9   :  { %4971 = vmatpush3.bf16.msra.mxu1 %v5563_v45  ;;  %4908 = vmatprep.subr.bf16.mxu0 %v5570_v47  ;;  %v6579_v45 = vld [vmem:[%s7472_s2] ss:$0 sm:$0xff] }
  0xaa   :  { %4972 = vmatprep.subr.bf16.mxu1 %v5571_v50  ;;  %v5638_v50 = vld [vmem:[%s7471_s0 + $0xf8] ss:$100 sps:$4 sm:$0xff]  }
  0xab   :  { %3267 = vmatmul.mubr.bf16.gmra.mxu0 %v5558_v46  ;;  %v5642_v46 = vld [vmem:[%s7470_s1 + $0x430] sm:$0xff]  }
  0xac   :  { %3364 = vmatmul.mubr.bf16.gmra.mxu1 %v5559_v48  ;;  %3274 = vmatprep.mubr.bf16.mxu0 %v5564_v49  ;;  %v5643_v48 = vld [vmem:[%s7470_s1 + $0x4b0] sm:$0xff]  }
  0xad   :  { %3371 = vmatprep.mubr.bf16.mxu1 %v5566_v51  ;;  %4909 = vmatpush3.bf16.msra.mxu0 %v5572_v52  ;;  %v5650_v51 = vld [vmem:[%s7470_s1 + $0x468] sm:$0xff]  }
  0xae   :  { %4973 = vmatpush3.bf16.msra.mxu1 %v5573_v53  ;;  %4910 = vmatprep.subr.bf16.mxu0 %v5580_v54  ;;  %v5651_v54 = vld [vmem:[%s7470_s1 + $0x4e8] sm:$0xff]  }
  0xaf   :  { %4974 = vmatprep.subr.bf16.mxu1 %v5581_v55 }
  0xb1   :  { %4911 = vmatpush3.bf16.msra.mxu0 %v5582_v57  ;;  %v5639_v57 = vld [vmem:[%s7471_s0 + $0x100] ss:$100 sps:$4 sm:$0xff]  }
  0xb2   :  { %4975 = vmatpush3.bf16.msra.mxu1 %v5583_v58  ;;  %4912 = vmatprep.subr.bf16.mxu0 %v5590_v61  ;;  %v5646_v61 = vld [vmem:[%s7471_s0 + $0x1cc] ss:$100 sps:$4 sm:$0xff]  }
  0xb3   :  { %3275 = vmatmul.mubr.bf16.gmra.mxu0 %v5568_v56  ;;  %4976 = vmatprep.subr.bf16.mxu1 %v5591_v63  ;;  %v5652_v63 = vld [vmem:[%s7470_s1 + $0x428] sm:$0xff]  }
  0xb4   :  { %3372 = vmatmul.mubr.bf16.gmra.mxu1 %v5569_v59  ;;  %3282 = vmatprep.mubr.bf16.mxu0 %v5574_v60  ;;  %v5644_v60 = vld [vmem:[%s7471_s0 + $0x1c4] ss:$100 sps:$4 sm:$0xff]  }
  0xb5   :  { %3379 = vmatprep.mubr.bf16.mxu1 %v5576_v62  ;;  %4913 = vmatpush3.bf16.msra.mxu0 %v5592_v0  ;;  %v5653_v0 = vld [vmem:[%s7470_s1 + $0x4a8] sm:$0xff]  }
  0xb6   :  { %4977 = vmatpush3.bf16.msra.mxu1 %v5593_v1  ;;  %4914 = vmatprep.subr.bf16.mxu0 %v5600_v2 }
  0xb7   :  { %4978 = vmatprep.subr.bf16.mxu1 %v5601_v3 }
  0xb9   :  { %4915 = vmatpush3.bf16.msra.mxu0 %v5602_v4  ;;  %v5660_v4 = vld [vmem:[%s7470_s1 + $0x460] sm:$0xff]  }
  0xba   :  { %4979 = vmatpush3.bf16.msra.mxu1 %v5603_v6  ;;  %4916 = vmatprep.subr.bf16.mxu0 %v5610_v9 }
  0xbb   :  { %3283 = vmatmul.mubr.bf16.gmra.mxu0 %v5578_v5  ;;  %4980 = vmatprep.subr.bf16.mxu1 %v5611_v10  ;;  %v5662_v10 = vld [vmem:[%s7470_s1 + $0x420] sm:$0xff]  }
  0xbc   :  { %3380 = vmatmul.mubr.bf16.gmra.mxu1 %v5579_v7  ;;  %3290 = vmatprep.mubr.bf16.mxu0 %v5584_v8  ;;  %v5661_v7 = vld [vmem:[%s7470_s1 + $0x4e0] sm:$0xff]  }
  0xbd   :  { %3387 = vmatprep.mubr.bf16.mxu1 %v5586_v11  ;;  %4917 = vmatpush3.bf16.msra.mxu0 %v5612_v12  ;;  %v5648_v12 = vld [vmem:[%s7471_s0 + $0x1c0] ss:$100 sps:$4 sm:$0xff]  }
  0xbe   :  { %4981 = vmatpush3.bf16.msra.mxu1 %v5613_v13  ;;  %4918 = vmatprep.subr.bf16.mxu0 %v5620_v14  ;;  %v5663_v13 = vld [vmem:[%s7470_s1 + $0x4a0] sm:$0xff]  }
  0xbf   :  { %4982 = vmatprep.subr.bf16.mxu1 %v5621_v15 }
  0xc1   :  { %4919 = vmatpush3.bf16.msra.mxu0 %v5622_v17  ;;  %v5649_v17 = vld [vmem:[%s7471_s0 + $0x1c8] ss:$100 sps:$4 sm:$0xff]  }
  0xc2   :  { %4983 = vmatpush3.bf16.msra.mxu1 %v5623_v18  ;;  %5032 = vmatprep.subr.bf16.mxu0 %v5630_v22  ;;  %v5654_v18 = vld [vmem:[%s7471_s0 + $0x28c] ss:$100 sps:$4 sm:$0xff]   ;;  %v5671_v22 = vld [vmem:[%s7470_s1 + $0x4d8] sm:$0xff]  }
  0xc3   :  { %3291 = vmatmul.mubr.bf16.gmra.mxu0 %v5588_v16  ;;  %5096 = vmatprep.subr.bf16.mxu1 %v5631_v23 }
  0xc4   :  { %3388 = vmatmul.mubr.bf16.gmra.mxu1 %v5589_v19  ;;  %3298 = vmatprep.mubr.bf16.mxu0 %v5594_v20  ;;  %v5670_v19 = vld [vmem:[%s7470_s1 + $0x458] sm:$0xff]  }
  0xc5   :  { %3395 = vmatprep.mubr.bf16.mxu1 %v5596_v21 }
  0xcb   :  { %3299 = vmatmul.mubr.bf16.gmra.mxu0 %v5598_v24 }
  0xcc   :  { %3396 = vmatmul.mubr.bf16.gmra.mxu1 %v5599_v25  ;;  %3306 = vmatprep.mubr.bf16.mxu0 %v5604_v26  ;;  %v5656_v25 = vld [vmem:[%s7471_s0 + $0x294] ss:$100 sps:$4 sm:$0xff]  }
  0xcd   :  { %3403 = vmatprep.mubr.bf16.mxu1 %v5606_v27  ;;  %v5672_v26 = vld [vmem:[%s7470_s1 + $0x418] sm:$0xff]  }
  0xd3   :  { %3307 = vmatmul.mubr.bf16.gmra.mxu0 %v5608_v28  ;;  %v5673_v28 = vld [vmem:[%s7470_s1 + $0x498] sm:$0xff]  }
  0xd4   :  { %3404 = vmatmul.mubr.bf16.gmra.mxu1 %v5609_v29  ;;  %3314 = vmatprep.mubr.bf16.mxu0 %v5614_v30 }
  0xd5   :  { %3411 = vmatprep.mubr.bf16.mxu1 %v5616_v31 }
  0xdb   :  { %3315 = vmatmul.mubr.bf16.gmra.mxu0 %v5618_v32  ;;  %v5680_v32 = vld [vmem:[%s7470_s1 + $0x450] sm:$0xff]  }
  0xdc   :  { %3412 = vmatmul.mubr.bf16.gmra.mxu1 %v5619_v33  ;;  %3452 = vmatprep.mubr.bf16.mxu0 %v5626_v34 }
  0xdd   :  { %3549 = vmatprep.mubr.bf16.mxu1 %v5629_v35  ;;  %v5681_v35 = vld [vmem:[%s7470_s1 + $0x4d0] sm:$0xff]  }
  0xe3   :  { %v4536_v44 = vpop.f32.mrf.mxu0  ;;  %3453 = vmatmul.mubr.bf16.vlgmr.msra.gmra.mxu0 %v5624_v36 }
  0xe4   :  { %v4600_v47 = vpop.f32.mrf.mxu1  ;;  %3550 = vmatmul.mubr.bf16.vlgmr.msra.gmra.mxu1 %v5627_v37  ;;  %5033 = vmatpush3.bf16.msra.mxu0 %v5632_v38 }
  0xe5   :  { %5097 = vmatpush3.bf16.msra.mxu1 %v5633_v39  ;;  %v4537_v49 = vpop.f32.mrf.mxu0  ;;  %3460 = vmatprep.mubr.bf16.mxu0 %v5634_v40  ;;  %v5658_v39 = vld [vmem:[%s7471_s0 + $0x288] ss:$100 sps:$4 sm:$0xff]   ;;  %v5682_v40 = vld [vmem:[%s7470_s1 + $0x410] sm:$0xff]  }
  0xe6   :  { %v4538_v52 = vadd.f32 %v4537_v49, %v4536_v44  ;;  %v4601_v53 = vpop.f32.mrf.mxu1  ;;  %3557 = vmatprep.mubr.bf16.mxu1 %v5636_v41  ;;  %5034 = vmatprep.subr.bf16.mxu0 %v5640_v42  ;;  %v5683_v41 = vld [vmem:[%s7470_s1 + $0x490] sm:$0xff]  }
  0xe7   :  { %v4602_v55 = vadd.f32 %v4601_v53, %v4600_v47  ;;  %v4539_v56 = vpop.f32.mrf.mxu0  ;;  %5098 = vmatprep.subr.bf16.mxu1 %v5641_v43  ;;  %v5666_v47 = vld [vmem:[%s7471_s0 + $0x354] ss:$100 sps:$4 sm:$0xff]  }
  0xe8   :  { %v2873_v58 = vadd.f32 %v4538_v52, %v6579_v45  ;;  %v4603_v59 = vpop.f32.mrf.mxu1  ;;  %5035 = vmatpush3.bf16.msra.mxu0 %v5642_v46  ;;  %v5659_v46 = vld [vmem:[%s7471_s0 + $0x290] ss:$100 sps:$4 sm:$0xff]   ;;  %v5691_v52 = vld [vmem:[%s7470_s1 + $0x4c8] sm:$0xff]  }
  0xe9   :  { %v4540_v62 = vpop.f32.mrf.mxu0  ;;  %5099 = vmatpush3.bf16.msra.mxu1 %v5643_v48  ;;  %5036 = vmatprep.subr.bf16.mxu0 %v5650_v51  ;;  %v5690_v48 = vld [vmem:[%s7470_s1 + $0x448] sm:$0xff]   ;;  %v5669_v51 = vld [vmem:[%s7471_s0 + $0x35c] ss:$100 sps:$4 sm:$0xff]  }
  0xea   :  { %v6612_v1 = vadd.f32 %v4602_v55, %v2873_v58  ;;  %v4541_v2 = vadd.f32 %v4540_v62, %v4539_v56  ;;  %v4604_v3 = vpop.f32.mrf.mxu1  ;;  %5100 = vmatprep.subr.bf16.mxu1 %v5651_v54  ;;  %v5692_v55 = vld [vmem:[%s7470_s1 + $0x408] sm:$0xff]  }
  0xeb   :  { %v4605_v5 = vadd.f32 %v4604_v3, %v4603_v59  ;;  %v4542_v6 = vpop.f32.mrf.mxu0  ;;  %3461 = vmatmul.mubr.bf16.gmra.mxu0 %v5638_v50 }
  0xec   :  { %v2876_v8 = vadd.f32 %v4541_v2, %v6579_v45  ;;  %v4606_v9 = vpop.f32.mrf.mxu1  ;;  %3558 = vmatmul.mubr.bf16.gmra.mxu1 %v5639_v57  ;;  %3468 = vmatprep.mubr.bf16.mxu0 %v5644_v60  ;;  %v5693_v57 = vld [vmem:[%s7470_s1 + $0x488] sm:$0xff]  }
  0xed   :  { %v4543_v11 = vpop.f32.mrf.mxu0  ;;  %3565 = vmatprep.mubr.bf16.mxu1 %v5646_v61  ;;  %5037 = vmatpush3.bf16.msra.mxu0 %v5652_v63  ;;  %v5700_v61 = vld [vmem:[%s7470_s1 + $0x440] sm:$0xff]  }
  0xee   :  { %v6630_v14 = vadd.f32 %v4605_v5, %v2876_v8  ;;  %v4544_v15 = vadd.f32 %v4543_v11, %v4542_v6  ;;  %v4607_v16 = vpop.f32.mrf.mxu1  ;;  %5101 = vmatpush3.bf16.msra.mxu1 %v5653_v0  ;;  %5038 = vmatprep.subr.bf16.mxu0 %v5660_v4  ;;  %v5701_v0 = vld [vmem:[%s7470_s1 + $0x4c0] sm:$0xff]   ;;  %v5664_v5 = vld [vmem:[%s7471_s0 + $0x350] ss:$100 sps:$4 sm:$0xff]   ;;  %v5667_v11 = vld [vmem:[%s7471_s0 + $0x358] ss:$100 sps:$4 sm:$0xff]  }
  0xef   :  { %v4608_v20 = vadd.f32 %v4607_v16, %v4606_v9  ;;  %v4545_v21 = vpop.f32.mrf.mxu0  ;;  %5102 = vmatprep.subr.bf16.mxu1 %v5661_v7  ;;  %v5702_v6 = vld [vmem:[%s7470_s1 + $0x400] sm:$0xff]   ;;  %v5711_v16 = vld [vmem:[%s7470_s1 + $0x5f8] sm:$0xff]  }
  0xf0   :  { %v2881_v23 = vadd.f32 %v4544_v15, %v6579_v45  ;;  %v4609_v24 = vpop.f32.mrf.mxu1  ;;  %v5703_v7 = vld [vmem:[%s7470_s1 + $0x480] sm:$0xff]  }
  0xf1   :  { %v4546_v27 = vpop.f32.mrf.mxu0  ;;  %5039 = vmatpush3.bf16.msra.mxu0 %v5662_v10 }
  0xf2   :  { %v6654_v29 = vadd.f32 %v4608_v20, %v2881_v23  ;;  %v4547_v30 = vadd.f32 %v4546_v27, %v4545_v21  ;;  %v4610_v31 = vpop.f32.mrf.mxu1  ;;  %5103 = vmatpush3.bf16.msra.mxu1 %v5663_v13  ;;  %5040 = vmatprep.subr.bf16.mxu0 %v5670_v19  ;;  %v5676_v19 = vld [vmem:[%s7471_s0 + $0x41c] ss:$100 sps:$4 sm:$0xff]   ;;  %v5679_v21 = vld [vmem:[%s7471_s0 + $0x424] ss:$100 sps:$4 sm:$0xff]  }
  0xf3   :  { %v4611_v33 = vadd.f32 %v4610_v31, %v4609_v24  ;;  %v4548_v34 = vpop.f32.mrf.mxu0  ;;  %3469 = vmatmul.mubr.bf16.gmra.mxu0 %v5648_v12  ;;  %5104 = vmatprep.subr.bf16.mxu1 %v5671_v22  ;;  %v5710_v12 = vld [vmem:[%s7470_s1 + $0x578] sm:$0xff]  }
  0xf4   :  { %v2884_v36 = vadd.f32 %v4547_v30, %v6579_v45  ;;  %v4612_v37 = vpop.f32.mrf.mxu1  ;;  %3566 = vmatmul.mubr.bf16.gmra.mxu1 %v5649_v17  ;;  %3476 = vmatprep.mubr.bf16.mxu0 %v5654_v18 }
  0xf5   :  { %v4549_v38 = vpop.f32.mrf.mxu0  ;;  %3573 = vmatprep.mubr.bf16.mxu1 %v5656_v25  ;;  %5041 = vmatpush3.bf16.msra.mxu0 %v5672_v26 }
  0xf6   :  { %v6672_v42 = vadd.f32 %v4611_v33, %v2884_v36  ;;  %v4550_v43 = vadd.f32 %v4549_v38, %v4548_v34  ;;  %v4613_v44 = vpop.f32.mrf.mxu1  ;;  %5105 = vmatpush3.bf16.msra.mxu1 %v5673_v28  ;;  %5042 = vmatprep.subr.bf16.mxu0 %v5680_v32  ;;  %v5674_v34 = vld [vmem:[%s7471_s0 + $0x418] ss:$100 sps:$4 sm:$0xff]  }
  0xf7   :  { %v4614_v49 = vadd.f32 %v4613_v44, %v4612_v37  ;;  %v4551_v50 = vpop.f32.mrf.mxu0  ;;  %5106 = vmatprep.subr.bf16.mxu1 %v5681_v35  ;;  %v5677_v37 = vld [vmem:[%s7471_s0 + $0x420] ss:$100 sps:$4 sm:$0xff]  }
  0xf8   :  { %v2889_v53 = vadd.f32 %v4550_v43, %v6579_v45  ;;  %v4615_v54 = vpop.f32.mrf.mxu1  ;;  %v5689_v43 = vld [vmem:[%s7471_s0 + $0x4ec] ss:$100 sps:$4 sm:$0xff]  }
  0xf9   :  { %v4552_v56 = vpop.f32.mrf.mxu0  ;;  %5043 = vmatpush3.bf16.msra.mxu0 %v5682_v40  ;;  %v5686_v40 = vld [vmem:[%s7471_s0 + $0x4e4] ss:$100 sps:$4 sm:$0xff]  }
  0xfa   :  { %v6696_v58 = vadd.f32 %v4614_v49, %v2889_v53  ;;  %v4553_v59 = vadd.f32 %v4552_v56, %v4551_v50  ;;  %v4616_v60 = vpop.f32.mrf.mxu1  ;;  %5107 = vmatpush3.bf16.msra.mxu1 %v5683_v41  ;;  %5044 = vmatprep.subr.bf16.mxu0 %v5690_v48 }
  0xfb   :  { %v4617_v62 = vadd.f32 %v4616_v60, %v4615_v54  ;;  %v4554_v63 = vpop.f32.mrf.mxu0  ;;  %3477 = vmatmul.mubr.bf16.gmra.mxu0 %v5658_v39  ;;  %5108 = vmatprep.subr.bf16.mxu1 %v5691_v52 }
  0xfc   :  { %v2892_v2 = vadd.f32 %v4553_v59, %v6579_v45  ;;  %v4618_v3 = vpop.f32.mrf.mxu1  ;;  %3574 = vmatmul.mubr.bf16.gmra.mxu1 %v5659_v46  ;;  %3484 = vmatprep.mubr.bf16.mxu0 %v5666_v47  ;;  %v5684_v59 = vld [vmem:[%s7471_s0 + $0x4e0] ss:$100 sps:$4 sm:$0xff]  }
  0xfd   :  { %v4555_v4 = vpop.f32.mrf.mxu0  ;;  %3581 = vmatprep.mubr.bf16.mxu1 %v5669_v51  ;;  %5045 = vmatpush3.bf16.msra.mxu0 %v5692_v55 }
  0xfe   :  { %v6714_v8 = vadd.f32 %v4617_v62, %v2892_v2  ;;  %v4556_v9 = vadd.f32 %v4555_v4, %v4554_v63  ;;  %v4619_v10 = vpop.f32.mrf.mxu1  ;;  %5109 = vmatpush3.bf16.msra.mxu1 %v5693_v57  ;;  %5046 = vmatprep.subr.bf16.mxu0 %v5700_v61  ;;  %v5687_v62 = vld [vmem:[%s7471_s0 + $0x4e8] ss:$100 sps:$4 sm:$0xff]   ;;  %v5699_v2 = vld [vmem:[%s7471_s0 + $0x5b4] ss:$100 sps:$4 sm:$0xff]  }
  0xff   :  { %v4620_v13 = vadd.f32 %v4619_v10, %v4618_v3  ;;  %v4557_v15 = vpop.f32.mrf.mxu0  ;;  %5110 = vmatprep.subr.bf16.mxu1 %v5701_v0  ;;  %v5696_v63 = vld [vmem:[%s7471_s0 + $0x5ac] ss:$100 sps:$4 sm:$0xff]  }
 0x100   :  { %v2897_v17 = vadd.f32 %v4556_v9, %v6579_v45  ;;  %v4621_v18 = vpop.f32.mrf.mxu1 }
 0x101   :  { %v4558_v20 = vpop.f32.mrf.mxu0  ;;  %5047 = vmatpush3.bf16.msra.mxu0 %v5702_v6 }
 0x102   :  { %v6732_v22 = vadd.f32 %v4620_v13, %v2897_v17  ;;  %v4559_v23 = vadd.f32 %v4558_v20, %v4557_v15  ;;  %v4622_v24 = vpop.f32.mrf.mxu1  ;;  %5111 = vmatpush3.bf16.msra.mxu1 %v5703_v7  ;;  %5160 = vmatprep.subr.bf16.mxu0 %v5710_v12 }
 0x103   :  { %v4623_v25 = vadd.f32 %v4622_v24, %v4621_v18  ;;  %v4560_v26 = vpop.f32.mrf.mxu0  ;;  %3485 = vmatmul.mubr.bf16.gmra.mxu0 %v5664_v5  ;;  %5224 = vmatprep.subr.bf16.mxu1 %v5711_v16  ;;  %v5694_v18 = vld [vmem:[%s7471_s0 + $0x5a8] ss:$100 sps:$4 sm:$0xff]  }
 0x104   :  { %v2900_v27 = vadd.f32 %v4559_v23, %v6579_v45  ;;  %v4624_v28 = vpop.f32.mrf.mxu1  ;;  %3582 = vmatmul.mubr.bf16.gmra.mxu1 %v5667_v11  ;;  %3492 = vmatprep.mubr.bf16.mxu0 %v5676_v19  ;;  %v5706_v23 = vld [vmem:[%s7471_s0 + $0x44] ss:$100 sps:$4 sm:$0xff]  }
 0x105   :  { %v4561_v30 = vpop.f32.mrf.mxu0  ;;  %3589 = vmatprep.mubr.bf16.mxu1 %v5679_v21  ;;  %v5697_v21 = vld [vmem:[%s7471_s0 + $0x5b0] ss:$100 sps:$4 sm:$0xff]  }
 0x106   :  { %v6735_v31 = vadd.f32 %v4623_v25, %v2900_v27  ;;  %v4562_v32 = vadd.f32 %v4561_v30, %v4560_v26  ;;  %v4625_v33 = vpop.f32.mrf.mxu1  ;;  %v5709_v25 = vld [vmem:[%s7471_s0 + $0x4c] ss:$100 sps:$4 sm:$0xff]  }
 0x107   :  { %v4626_v35 = vadd.f32 %v4625_v33, %v4624_v28  ;;  %v4563_v36 = vpop.f32.mrf.mxu0 }
 0x108   :  { %v2905_v38 = vadd.f32 %v4562_v32, %v6579_v45  ;;  %v4627_v39 = vpop.f32.mrf.mxu1 }
 0x109   :  { %v4564_v41 = vpop.f32.mrf.mxu0 }
 0x10a   :  { %v6750_v44 = vadd.f32 %v4626_v35, %v2905_v38  ;;  %v4565_v46 = vadd.f32 %v4564_v41, %v4563_v36  ;;  %v4628_v47 = vpop.f32.mrf.mxu1  ;;  %v5704_v36 = vld [vmem:[%s7471_s0 + $0x40] ss:$100 sps:$4 sm:$0xff]   ;;  %v5712_v41 = vld [vmem:[%s7470_s1 + $0x538] sm:$0xff]  }
 0x10b   :  { %v4629_v48 = vadd.f32 %v4628_v47, %v4627_v39  ;;  %v4566_v49 = vpop.f32.mrf.mxu0  ;;  %3493 = vmatmul.mubr.bf16.gmra.mxu0 %v5674_v34  ;;  %v5713_v47 = vld [vmem:[%s7470_s1 + $0x5b8] sm:$0xff]  }
 0x10c   :  { %v2908_v50 = vadd.f32 %v4565_v46, %v6579_v45  ;;  %v4630_v51 = vpop.f32.mrf.mxu1  ;;  %3590 = vmatmul.mubr.bf16.gmra.mxu1 %v5677_v37  ;;  %3500 = vmatprep.mubr.bf16.mxu0 %v5686_v40  ;;  %v5707_v40 = vld [vmem:[%s7471_s0 + $0x48] ss:$100 sps:$4 sm:$0xff]  }
 0x10d   :  { %v4567_v52 = vpop.f32.mrf.mxu0  ;;  %3597 = vmatprep.mubr.bf16.mxu1 %v5689_v43 }
 0x10e   :  { %v6753_v53 = vadd.f32 %v4629_v48, %v2908_v50  ;;  %v4568_v54 = vadd.f32 %v4567_v52, %v4566_v49  ;;  %v4631_v55 = vpop.f32.mrf.mxu1  ;;  %v5716_v50 = vld [vmem:[%s7471_s0 + $0x10c] ss:$100 sps:$4 sm:$0xff]   ;;  %v5719_v52 = vld [vmem:[%s7471_s0 + $0x114] ss:$100 sps:$4 sm:$0xff]  }
 0x10f   :  { %v4632_v56 = vadd.f32 %v4631_v55, %v4630_v51  ;;  %v4569_v57 = vpop.f32.mrf.mxu0 }
 0x110   :  { %v2913_v60 = vadd.f32 %v4568_v54, %v6579_v45  ;;  %v4633_v61 = vpop.f32.mrf.mxu1 }
 0x111   :  { %v4570_v0 = vpop.f32.mrf.mxu0 }
 0x112   :  { %v6768_v3 = vadd.f32 %v4632_v56, %v2913_v60  ;;  %v4571_v4 = vadd.f32 %v4570_v0, %v4569_v57  ;;  %v4634_v5 = vpop.f32.mrf.mxu1  ;;  %v5720_v57 = vld [vmem:[%s7470_s1 + $0x570] sm:$0xff]  }
 0x113   :  { %v4635_v6 = vadd.f32 %v4634_v5, %v4633_v61  ;;  %v4572_v7 = vpop.f32.mrf.mxu0  ;;  %3501 = vmatmul.mubr.bf16.gmra.mxu0 %v5684_v59  ;;  %v5721_v61 = vld [vmem:[%s7470_s1 + $0x5f0] sm:$0xff]  }
 0x114   :  { %v2916_v9 = vadd.f32 %v4571_v4, %v6579_v45  ;;  %v4636_v10 = vpop.f32.mrf.mxu1  ;;  %3598 = vmatmul.mubr.bf16.gmra.mxu1 %v5687_v62  ;;  %3508 = vmatprep.mubr.bf16.mxu0 %v5696_v63  ;;  %v5722_v0 = vld [vmem:[%s7470_s1 + $0x530] sm:$0xff]   ;;  %v5714_v4 = vld [vmem:[%s7471_s0 + $0x108] ss:$100 sps:$4 sm:$0xff]  }
 0x115   :  { %v4573_v11 = vpop.f32.mrf.mxu0  ;;  %3605 = vmatprep.mubr.bf16.mxu1 %v5699_v2  ;;  %v5723_v5 = vld [vmem:[%s7470_s1 + $0x5b0] sm:$0xff]  }
 0x116   :  { %v6771_v12 = vadd.f32 %v4635_v6, %v2916_v9  ;;  %v4574_v13 = vadd.f32 %v4573_v11, %v4572_v7  ;;  %v4637_v15 = vpop.f32.mrf.mxu1  ;;  %v5726_v11 = vld [vmem:[%s7471_s0 + $0x1d4] ss:$100 sps:$4 sm:$0xff]  }
 0x117   :  { %v4638_v16 = vadd.f32 %v4637_v15, %v4636_v10  ;;  %v4575_v17 = vpop.f32.mrf.mxu0  ;;  %v5717_v10 = vld [vmem:[%s7471_s0 + $0x110] ss:$100 sps:$4 sm:$0xff]  }
 0x118   :  { %v2921_v19 = vadd.f32 %v4574_v13, %v6579_v45  ;;  %v4639_v20 = vpop.f32.mrf.mxu1  ;;  %v5731_v13 = vld [vmem:[%s7470_s1 + $0x5e8] sm:$0xff]  }
 0x119   :  { %v4576_v24 = vpop.f32.mrf.mxu0 }
 0x11a   :  { %v6786_v26 = vadd.f32 %v4638_v16, %v2921_v19  ;;  %v4577_v27 = vadd.f32 %v4576_v24, %v4575_v17  ;;  %v4640_v28 = vpop.f32.mrf.mxu1  ;;  %v5729_v17 = vld [vmem:[%s7471_s0 + $0x1dc] ss:$100 sps:$4 sm:$0xff]  }
 0x11b   :  { %v4641_v30 = vadd.f32 %v4640_v28, %v4639_v20  ;;  %v4578_v32 = vpop.f32.mrf.mxu0  ;;  %3509 = vmatmul.mubr.bf16.gmra.mxu0 %v5694_v18  ;;  %v5732_v20 = vld [vmem:[%s7470_s1 + $0x528] sm:$0xff]  }
 0x11c   :  { %v2924_v33 = vadd.f32 %v4577_v27, %v6579_v45  ;;  %v4642_v34 = vpop.f32.mrf.mxu1  ;;  %3606 = vmatmul.mubr.bf16.gmra.mxu1 %v5697_v21  ;;  %3646 = vmatprep.mubr.bf16.mxu0 %v5706_v23  ;;  %v5733_v23 = vld [vmem:[%s7470_s1 + $0x5a8] sm:$0xff]  }
 0x11d   :  { %v4579_v35 = vpop.f32.mrf.mxu0  ;;  %3743 = vmatprep.mubr.bf16.mxu1 %v5709_v25 }
 0x11e   :  { %v6792_v37 = vadd.f32 %v4641_v30, %v2924_v33  ;;  %v4580_v38 = vadd.f32 %v4579_v35, %v4578_v32  ;;  %v4643_v39 = vpop.f32.mrf.mxu1  ;;  %v5741_v32 = vld [vmem:[%s7470_s1 + $0x5e0] sm:$0xff]  }
 0x11f   :  { %v4644_v43 = vadd.f32 %v4643_v39, %v4642_v34  ;;  %v4581_v46 = vpop.f32.mrf.mxu0 }
 0x120   :  { %v2929_v48 = vadd.f32 %v4580_v38, %v6579_v45  ;;  %v4645_v49 = vpop.f32.mrf.mxu1  ;;  %v5742_v38 = vld [vmem:[%s7470_s1 + $0x520] sm:$0xff]  }
 0x121   :  { %v4582_v51 = vpop.f32.mrf.mxu0 }
 0x122   :  { %v6810_v54 = vadd.f32 %v4644_v43, %v2929_v48  ;;  %v4583_v55 = vadd.f32 %v4582_v51, %v4581_v46  ;;  %v4646_v56 = vpop.f32.mrf.mxu1  ;;  %v5736_v43 = vld [vmem:[%s7471_s0 + $0x29c] ss:$100 sps:$4 sm:$0xff]  }
 0x123   :  { %v4647_v59 = vadd.f32 %v4646_v56, %v4645_v49  ;;  %v4664_v60 = vpop.f32.mrf.mxu0  ;;  %3647 = vmatmul.mubr.bf16.vlgmr.msra.gmra.mxu0 %v5704_v36  ;;  %v5724_v36 = vld [vmem:[%s7471_s0 + $0x1d0] ss:$100 sps:$4 sm:$0xff]   ;;  %v5743_v46 = vld [vmem:[%s7470_s1 + $0x5a0] sm:$0xff]  }
 0x124   :  { %v2932_v62 = vadd.f32 %v4583_v55, %v6579_v45  ;;  %v4728_v63 = vpop.f32.mrf.mxu1  ;;  %3744 = vmatmul.mubr.bf16.vlgmr.msra.gmra.mxu1 %v5707_v40  ;;  %5161 = vmatpush3.bf16.msra.mxu0 %v5712_v41  ;;  %v5730_v45 = vld [vmem:[%s7470_s1 + $0x568] sm:$0xff]  }
 0x125   :  { %5225 = vmatpush3.bf16.msra.mxu1 %v5713_v47  ;;  %v4665_v2 = vpop.f32.mrf.mxu0  ;;  %3654 = vmatprep.mubr.bf16.mxu0 %v5716_v50  ;;  %v5750_v47 = vld [vmem:[%s7470_s1 + $0x558] sm:$0xff]   ;;  %v5739_v55 = vld [vmem:[%s7471_s0 + $0x2a4] ss:$100 sps:$4 sm:$0xff]  }
 0x126   :  { %v6831_v6 = vadd.f32 %v4647_v59, %v2932_v62  ;;  %v4666_v7 = vadd.f32 %v4665_v2, %v4664_v60  ;;  %v4729_v9 = vpop.f32.mrf.mxu1  ;;  %3751 = vmatprep.mubr.bf16.mxu1 %v5719_v52  ;;  %5162 = vmatprep.subr.bf16.mxu0 %v5720_v57  ;;  %v5751_v50 = vld [vmem:[%s7470_s1 + $0x5d8] sm:$0xff]   ;;  %v5760_v62 = vld [vmem:[%s7470_s1 + $0x550] sm:$0xff]  }
 0x127   :  { %v4730_v15 = vadd.f32 %v4729_v9, %v4728_v63  ;;  %v4667_v16 = vpop.f32.mrf.mxu0  ;;  %5226 = vmatprep.subr.bf16.mxu1 %v5721_v61  ;;  %v5752_v57 = vld [vmem:[%s7470_s1 + $0x518] sm:$0xff]   ;;  %v5761_v2 = vld [vmem:[%s7470_s1 + $0x5d0] sm:$0xff]  }
 0x128   :  { %v3067_v18 = vadd.f32 %v4666_v7, %v6612_v1  ;;  %v4731_v19 = vpop.f32.mrf.mxu1  ;;  %5163 = vmatpush3.bf16.msra.mxu0 %v5722_v0  ;;  %v5740_v1 = vld [vmem:[%s7470_s1 + $0x560] sm:$0xff]   ;;  %v5734_v9 = vld [vmem:[%s7471_s0 + $0x298] ss:$100 sps:$4 sm:$0xff]  }
 0x129   :  { %v4668_v21 = vpop.f32.mrf.mxu0  ;;  %5227 = vmatpush3.bf16.msra.mxu1 %v5723_v5  ;;  %5164 = vmatprep.subr.bf16.mxu0 %v5730_v45  ;;  %v5762_v45 = vld [vmem:[%s7470_s1 + $0x510] sm:$0xff]  }
 0x12a   :  { %v6852_v24 = vadd.f32 %v4730_v15, %v3067_v18  ;;  %v4669_v25 = vadd.f32 %v4668_v21, %v4667_v16  ;;  %v4732_v27 = vpop.f32.mrf.mxu1  ;;  %5228 = vmatprep.subr.bf16.mxu1 %v5731_v13  ;;  %v5737_v15 = vld [vmem:[%s7471_s0 + $0x2a0] ss:$100 sps:$4 sm:$0xff]   ;;  %v5770_v16 = vld [vmem:[%s7470_s1 + $0x548] sm:$0xff]  }
 0x12b   :  { %v4733_v28 = vadd.f32 %v4732_v27, %v4731_v19  ;;  %v4670_v30 = vpop.f32.mrf.mxu0  ;;  %3655 = vmatmul.mubr.bf16.gmra.mxu0 %v5714_v4  ;;  %v5746_v19 = vld [vmem:[%s7471_s0 + $0x364] ss:$100 sps:$4 sm:$0xff]  }
 0x12c   :  { %v3070_v33 = vadd.f32 %v4669_v25, %v6630_v14  ;;  %v4734_v34 = vpop.f32.mrf.mxu1  ;;  %3752 = vmatmul.mubr.bf16.gmra.mxu1 %v5717_v10  ;;  %3662 = vmatprep.mubr.bf16.mxu0 %v5726_v11  ;;  %v5727_v14 = vld [vmem:[%s7471_s0 + $0x1d8] ss:$100 sps:$4 sm:$0xff]   ;;  %v5763_v10 = vld [vmem:[%s7470_s1 + $0x590] sm:$0xff]  }
 0x12d   :  { %v4671_v35 = vpop.f32.mrf.mxu0  ;;  %3759 = vmatprep.mubr.bf16.mxu1 %v5729_v17  ;;  %5165 = vmatpush3.bf16.msra.mxu0 %v5732_v20  ;;  %v5771_v20 = vld [vmem:[%s7470_s1 + $0x5c8] sm:$0xff]  }
 0x12e   :  { %v6867_v39 = vadd.f32 %v4733_v28, %v3070_v33  ;;  %v4672_v40 = vadd.f32 %v4671_v35, %v4670_v30  ;;  %v4735_v41 = vpop.f32.mrf.mxu1  ;;  %5229 = vmatpush3.bf16.msra.mxu1 %v5733_v23  ;;  %5166 = vmatprep.subr.bf16.mxu0 %v5740_v1  ;;  %v5749_v25 = vld [vmem:[%s7471_s0 + $0x36c] ss:$100 sps:$4 sm:$0xff]  }
 0x12f   :  { %v4736_v48 = vadd.f32 %v4735_v41, %v4734_v34  ;;  %v4673_v49 = vpop.f32.mrf.mxu0  ;;  %5230 = vmatprep.subr.bf16.mxu1 %v5741_v32  ;;  %v5772_v1 = vld [vmem:[%s7470_s1 + $0x508] sm:$0xff]  }
 0x130   :  { %v3075_v51 = vadd.f32 %v4672_v40, %v6654_v29  ;;  %v4737_v52 = vpop.f32.mrf.mxu1  ;;  %v5753_v29 = vld [vmem:[%s7470_s1 + $0x598] sm:$0xff]   ;;  %v5773_v28 = vld [vmem:[%s7470_s1 + $0x588] sm:$0xff]  }
 0x131   :  { %v4674_v56 = vpop.f32.mrf.mxu0  ;;  %5167 = vmatpush3.bf16.msra.mxu0 %v5742_v38 }
 0x132   :  { %v6891_v59 = vadd.f32 %v4736_v48, %v3075_v51  ;;  %v4675_v60 = vadd.f32 %v4674_v56, %v4673_v49  ;;  %v4738_v61 = vpop.f32.mrf.mxu1  ;;  %5231 = vmatpush3.bf16.msra.mxu1 %v5743_v46  ;;  %5168 = vmatprep.subr.bf16.mxu0 %v5750_v47  ;;  %v6959_v49 = vld [vmem:[%s7470_s1 + $0x638] sm:$0xff]  }
 0x133   :  { %v4739_v63 = vadd.f32 %v4738_v61, %v4737_v52  ;;  %v4676_v0 = vpop.f32.mrf.mxu0  ;;  %3663 = vmatmul.mubr.bf16.gmra.mxu0 %v5724_v36  ;;  %5232 = vmatprep.subr.bf16.mxu1 %v5751_v50  ;;  %v5781_v36 = vld [vmem:[%s7470_s1 + $0x5c0] sm:$0xff]   ;;  %v5747_v52 = vld [vmem:[%s7471_s0 + $0x368] ss:$100 sps:$4 sm:$0xff]   ;;  %v5759_v61 = vld [vmem:[%s7471_s0 + $0x434] ss:$100 sps:$4 sm:$0xff]  }
 0x134   :  { %v3078_v4 = vadd.f32 %v4675_v60, %v6672_v42  ;;  %v4740_v5 = vpop.f32.mrf.mxu1  ;;  %3760 = vmatmul.mubr.bf16.gmra.mxu1 %v5727_v14  ;;  %3670 = vmatprep.mubr.bf16.mxu0 %v5736_v43  ;;  %v5744_v14 = vld [vmem:[%s7471_s0 + $0x360] ss:$100 sps:$4 sm:$0xff]  }
 0x135   :  { %v4677_v7 = vpop.f32.mrf.mxu0  ;;  %3767 = vmatprep.mubr.bf16.mxu1 %v5739_v55  ;;  %5169 = vmatpush3.bf16.msra.mxu0 %v5752_v57  ;;  %v5782_v43 = vld [vmem:[%s7470_s1 + $0x500] sm:$0xff]   ;;  %v5756_v57 = vld [vmem:[%s7471_s0 + $0x42c] ss:$100 sps:$4 sm:$0xff]  }
 0x136   :  { %v6912_v11 = vadd.f32 %v4739_v63, %v3078_v4  ;;  %v4678_v42 = vadd.f32 %v4677_v7, %v4676_v0  ;;  %v4741_v13 = vpop.f32.mrf.mxu1  ;;  %5233 = vmatpush3.bf16.msra.mxu1 %v5753_v29  ;;  %5170 = vmatprep.subr.bf16.mxu0 %v5760_v62 }
 0x137   :  { %v4742_v17 = vadd.f32 %v4741_v13, %v4740_v5  ;;  %v4679_v18 = vpop.f32.mrf.mxu0  ;;  %5234 = vmatprep.subr.bf16.mxu1 %v5761_v2 }
 0x138   :  { %v3083_v21 = vadd.f32 %v4678_v42, %v6696_v58  ;;  %v4743_v23 = vpop.f32.mrf.mxu1  ;;  %v5780_v58 = vld [vmem:[%s7470_s1 + $0x540] sm:$0xff]  }
 0x139   :  { %v4680_v27 = vpop.f32.mrf.mxu0  ;;  %5171 = vmatpush3.bf16.msra.mxu0 %v5762_v45 }
 0x13a   :  { %v6936_v30 = vadd.f32 %v4742_v17, %v3083_v21  ;;  %v4681_v32 = vadd.f32 %v4680_v27, %v4679_v18  ;;  %v4744_v33 = vpop.f32.mrf.mxu1  ;;  %5235 = vmatpush3.bf16.msra.mxu1 %v5763_v10  ;;  %5172 = vmatprep.subr.bf16.mxu0 %v5770_v16  ;;  %v5754_v10 = vld [vmem:[%s7471_s0 + $0x428] ss:$100 sps:$4 sm:$0xff]   ;;  %v5766_v17 = vld [vmem:[%s7471_s0 + $0x4f4] ss:$100 sps:$4 sm:$0xff]  }
 0x13b   :  { %v4745_v34 = vadd.f32 %v4744_v33, %v4743_v23  ;;  %v4682_v35 = vpop.f32.mrf.mxu0  ;;  %3671 = vmatmul.mubr.bf16.gmra.mxu0 %v5734_v9  ;;  %5236 = vmatprep.subr.bf16.mxu1 %v5771_v20 }
 0x13c   :  { %v3086_v38 = vadd.f32 %v4681_v32, %v6714_v8  ;;  %v4746_v40 = vpop.f32.mrf.mxu1  ;;  %3768 = vmatmul.mubr.bf16.gmra.mxu1 %v5737_v15  ;;  %3678 = vmatprep.mubr.bf16.mxu0 %v5746_v19  ;;  %v5783_v8 = vld [vmem:[%s7470_s1 + $0x580] sm:$0xff]   ;;  %v5757_v15 = vld [vmem:[%s7471_s0 + $0x430] ss:$100 sps:$4 sm:$0xff]  }
 0x13d   :  { %v4683_v41 = vpop.f32.mrf.mxu0  ;;  %3775 = vmatprep.mubr.bf16.mxu1 %v5749_v25  ;;  %5173 = vmatpush3.bf16.msra.mxu0 %v5772_v1  ;;  %v5769_v19 = vld [vmem:[%s7471_s0 + $0x4fc] ss:$100 sps:$4 sm:$0xff]  }
 0x13e   :  { %v6951_v46 = vadd.f32 %v4745_v34, %v3086_v38  ;;  %v4684_v47 = vadd.f32 %v4683_v41, %v4682_v35  ;;  %v4747_v48 = vpop.f32.mrf.mxu1  ;;  %5237 = vmatpush3.bf16.msra.mxu1 %v5773_v28  ;;  %5174 = vmatprep.subr.bf16.mxu0 %v5780_v58  ;;  %v5776_v41 = vld [vmem:[%s7471_s0 + $0x5bc] ss:$100 sps:$4 sm:$0xff]  }
 0x13f   :  { %v4748_v50 = vadd.f32 %v4747_v48, %v4746_v40  ;;  %v4685_v51 = vpop.f32.mrf.mxu0  ;;  %5238 = vmatprep.subr.bf16.mxu1 %v5781_v36  ;;  %v5764_v36 = vld [vmem:[%s7471_s0 + $0x4f0] ss:$100 sps:$4 sm:$0xff]  }
 0x140   :  { %v3091_v55 = vadd.f32 %v4684_v47, %v6732_v22  ;;  %v4749_v56 = vpop.f32.mrf.mxu1 }
 0x141   :  { %v4686_v60 = vpop.f32.mrf.mxu0  ;;  %5175 = vmatpush3.bf16.msra.mxu0 %v5782_v43  ;;  %v5779_v43 = vld [vmem:[%s7471_s0 + $0x5c4] ss:$100 sps:$4 sm:$0xff]  }
 0x142   :  { %v6971_v29 = vadd.f32 %v4748_v50, %v3091_v55  ;;  %v4687_v62 = vadd.f32 %v4686_v60, %v4685_v51  ;;  %v4750_v63 = vpop.f32.mrf.mxu1  ;;  %5239 = vmatpush3.bf16.msra.mxu1 %v5783_v8  ;;  %5304 = vmatprep.subr.bf16.mxu0 %v6959_v49 }
 0x143   :  { %v4751_v0 = vadd.f32 %v4750_v63, %v4749_v56  ;;  %v4688_v22 = vpop.f32.mrf.mxu0  ;;  %3679 = vmatmul.mubr.bf16.gmra.mxu0 %v5744_v14  ;;  %5336 = vmatprep.subr.bf16.mxu1 %v6959_v49  ;;  %v5774_v63 = vld [vmem:[%s7471_s0 + $0x5b8] ss:$100 sps:$4 sm:$0xff]  }
 0x144   :  { %v3094_v2 = vadd.f32 %v4687_v62, %v6735_v31  ;;  %v4752_v4 = vpop.f32.mrf.mxu1  ;;  %3776 = vmatmul.mubr.bf16.gmra.mxu1 %v5747_v52  ;;  %3686 = vmatprep.mubr.bf16.mxu0 %v5756_v57 }
 0x145   :  { %v4689_v5 = vpop.f32.mrf.mxu0  ;;  %3783 = vmatprep.mubr.bf16.mxu1 %v5759_v61 }
 0x146   :  { %v6976_v45 = vadd.f32 %v4751_v0, %v3094_v2  ;;  %v4690_v7 = vadd.f32 %v4689_v5, %v4688_v22  ;;  %v4753_v9 = vpop.f32.mrf.mxu1  ;;  %v5786_v2 = vld [vmem:[%s7471_s0 + $0x54] ss:$100 sps:$4 sm:$0xff]   ;;  %v5789_v5 = vld [vmem:[%s7471_s0 + $0x5c] ss:$100 sps:$4 sm:$0xff]  }
 0x147   :  { %v4754_v42 = vadd.f32 %v4753_v9, %v4752_v4  ;;  %v4691_v13 = vpop.f32.mrf.mxu0 }
 0x148   :  { %v3099_v31 = vadd.f32 %v4690_v7, %v6750_v44  ;;  %v4755_v16 = vpop.f32.mrf.mxu1 }
 0x149   :  { %v4692_v18 = vpop.f32.mrf.mxu0 }
 0x14a   :  { %v6991_v20 = vadd.f32 %v4754_v42, %v3099_v31  ;;  %v4693_v21 = vadd.f32 %v4692_v18, %v4691_v13  ;;  %v4756_v23 = vpop.f32.mrf.mxu1 }
 0x14b   :  { %v4757_v25 = vadd.f32 %v4756_v23, %v4755_v16  ;;  %v4694_v27 = vpop.f32.mrf.mxu0  ;;  %3687 = vmatmul.mubr.bf16.gmra.mxu0 %v5754_v10  ;;  %v5784_v23 = vld [vmem:[%s7471_s0 + $0x50] ss:$100 sps:$4 sm:$0xff]  }
 0x14c   :  { %v3102_v1 = vadd.f32 %v4693_v21, %v6753_v53  ;;  %v4758_v44 = vpop.f32.mrf.mxu1  ;;  %3784 = vmatmul.mubr.bf16.gmra.mxu1 %v5757_v15  ;;  %3694 = vmatprep.mubr.bf16.mxu0 %v5766_v17  ;;  %v5767_v53 = vld [vmem:[%s7471_s0 + $0x4f8] ss:$100 sps:$4 sm:$0xff]  }
 0x14d   :  { %v4695_v28 = vpop.f32.mrf.mxu0  ;;  %3791 = vmatprep.mubr.bf16.mxu1 %v5769_v19 }
 0x14e   :  { %v6994_v32 = vadd.f32 %v4757_v25, %v3102_v1  ;;  %v4696_v33 = vadd.f32 %v4695_v28, %v4694_v27  ;;  %v4759_v58 = vpop.f32.mrf.mxu1 }
 0x14f   :  { %v4760_v34 = vadd.f32 %v4759_v58, %v4758_v44  ;;  %v4697_v35 = vpop.f32.mrf.mxu0  ;;  %v5793_v44 = vld [vmem:[%s7471_s0 + $0x11c] ss:$100 sps:$4 sm:$0xff]  }
 0x150   :  { %v3107_v38 = vadd.f32 %v4696_v33, %v6768_v3  ;;  %v4761_v40 = vpop.f32.mrf.mxu1 }
 0x151   :  { %v4698_v14 = vpop.f32.mrf.mxu0 }
 0x152   :  { %v7009_v47 = vadd.f32 %v4760_v34, %v3107_v38  ;;  %v4699_v48 = vadd.f32 %v4698_v14, %v4697_v35  ;;  %v4762_v8 = vpop.f32.mrf.mxu1  ;;  %v5796_v34 = vld [vmem:[%s7471_s0 + $0x124] ss:$100 sps:$4 sm:$0xff]  }
 0x153   :  { %v4763_v50 = vadd.f32 %v4762_v8, %v4761_v40  ;;  %v4700_v3 = vpop.f32.mrf.mxu0  ;;  %3695 = vmatmul.mubr.bf16.gmra.mxu0 %v5764_v36 }
 0x154   :  { %v3110_v51 = vadd.f32 %v4699_v48, %v6771_v12  ;;  %v4764_v52 = vpop.f32.mrf.mxu1  ;;  %3792 = vmatmul.mubr.bf16.gmra.mxu1 %v5767_v53  ;;  %3702 = vmatprep.mubr.bf16.mxu0 %v5776_v41  ;;  %v5777_v12 = vld [vmem:[%s7471_s0 + $0x5c0] ss:$100 sps:$4 sm:$0xff]   ;;  %v5804_v41 = vld [vmem:[%s7470_s1 + $0x628] sm:$0xff]  }
 0x155   :  { %v4701_v55 = vpop.f32.mrf.mxu0  ;;  %3799 = vmatprep.mubr.bf16.mxu1 %v5779_v43 }
 0x156   :  { %v7012_v56 = vadd.f32 %v4763_v50, %v3110_v51  ;;  %v4702_v57 = vadd.f32 %v4701_v55, %v4700_v3  ;;  %v4765_v60 = vpop.f32.mrf.mxu1  ;;  %v5791_v50 = vld [vmem:[%s7471_s0 + $0x118] ss:$100 sps:$4 sm:$0xff]   ;;  %v5794_v51 = vld [vmem:[%s7471_s0 + $0x120] ss:$100 sps:$4 sm:$0xff]  }
 0x157   :  { %v4766_v61 = vadd.f32 %v4765_v60, %v4764_v52  ;;  %v4703_v62 = vpop.f32.mrf.mxu0  ;;  %v5800_v52 = vld [vmem:[%s7471_s0 + $0x1e4] ss:$100 sps:$4 sm:$0xff]  }
 0x158   :  { %v3115_v0 = vadd.f32 %v4702_v57, %v6786_v26  ;;  %v4767_v22 = vpop.f32.mrf.mxu1  ;;  %v5803_v57 = vld [vmem:[%s7471_s0 + $0x1ec] ss:$100 sps:$4 sm:$0xff]  }
 0x159   :  { %v4704_v4 = vpop.f32.mrf.mxu0 }
 0x15a   :  { %v7027_v7 = vadd.f32 %v4766_v61, %v3115_v0  ;;  %v4705_v9 = vadd.f32 %v4704_v4, %v4703_v62  ;;  %v4768_v10 = vpop.f32.mrf.mxu1  ;;  %v5811_v62 = vld [vmem:[%s7470_s1 + $0x620] sm:$0xff]  }
 0x15b   :  { %v4769_v42 = vadd.f32 %v4768_v10, %v4767_v22  ;;  %v4706_v26 = vpop.f32.mrf.mxu0  ;;  %3703 = vmatmul.mubr.bf16.gmra.mxu0 %v5774_v63  ;;  %v5818_v10 = vld [vmem:[%s7470_s1 + $0x618] sm:$0xff]  }
 0x15c   :  { %v3118_v13 = vadd.f32 %v4705_v9, %v6792_v37  ;;  %v4770_v15 = vpop.f32.mrf.mxu1  ;;  %3800 = vmatmul.mubr.bf16.gmra.mxu1 %v5777_v12  ;;  %3840 = vmatprep.mubr.bf16.mxu0 %v5786_v2  ;;  %v5787_v37 = vld [vmem:[%s7471_s0 + $0x58] ss:$100 sps:$4 sm:$0xff]  }
 0x15d   :  { %v4707_v31 = vpop.f32.mrf.mxu0  ;;  %3937 = vmatprep.mubr.bf16.mxu1 %v5789_v5 }
 0x15e   :  { %v7030_v16 = vadd.f32 %v4769_v42, %v3118_v13  ;;  %v4708_v17 = vadd.f32 %v4707_v31, %v4706_v26  ;;  %v4771_v18 = vpop.f32.mrf.mxu1  ;;  %v5801_v31 = vld [vmem:[%s7471_s0 + $0x1e8] ss:$100 sps:$4 sm:$0xff]  }
 0x15f   :  { %v4772_v19 = vadd.f32 %v4771_v18, %v4770_v15  ;;  %v4709_v21 = vpop.f32.mrf.mxu0 }
 0x160   :  { %v3123_v25 = vadd.f32 %v4708_v17, %v6810_v54  ;;  %v4773_v27 = vpop.f32.mrf.mxu1  ;;  %v5797_v54 = vld [vmem:[%s7470_s1 + $0x630] sm:$0xff]  }
 0x161   :  { %v4710_v1 = vpop.f32.mrf.mxu0  ;;  %v5807_v17 = vld [vmem:[%s7471_s0 + $0x2ac] ss:$100 sps:$4 sm:$0xff]  }
 0x162   :  { %v7042_v28 = vadd.f32 %v4772_v19, %v3123_v25  ;;  %v4711_v33 = vadd.f32 %v4710_v1, %v4709_v21  ;;  %v4774_v58 = vpop.f32.mrf.mxu1  ;;  %v5810_v19 = vld [vmem:[%s7471_s0 + $0x2b4] ss:$100 sps:$4 sm:$0xff]  }
 0x163   :  { %v4775_v35 = vadd.f32 %v4774_v58, %v4773_v27  ;;  %v4792_v36 = vpop.f32.mrf.mxu0  ;;  %3841 = vmatmul.mubr.bf16.vlgmr.msra.gmra.mxu0 %v5784_v23 }
 0x164   :  { %v3126_v38 = vadd.f32 %v4711_v33, %v6831_v6  ;;  %v4856_v40 = vpop.f32.mrf.mxu1  ;;  %3938 = vmatmul.mubr.bf16.vlgmr.msra.gmra.mxu1 %v5787_v37  ;;  %5305 = vmatpush3.bf16.msra.mxu0 %v6959_v49 }
 0x165   :  { %5344 = vmatpush3.bf16.msra.mxu1 %v6959_v49  ;;  %v4793_v53 = vpop.f32.mrf.mxu0  ;;  %3848 = vmatprep.mubr.bf16.mxu0 %v5793_v44 }
 0x166   :  { %v7056_v14 = vadd.f32 %v4775_v35, %v3126_v38  ;;  %v4794_v43 = vadd.f32 %v4793_v53, %v4792_v36  ;;  %v4857_v48 = vpop.f32.mrf.mxu1  ;;  %3945 = vmatprep.mubr.bf16.mxu1 %v5796_v34  ;;  %5306 = vmatprep.subr.bf16.mxu0 %v5797_v54  ;;  %v5832_v35 = vld [vmem:[%s7470_s1 + $0x608] sm:$0xff]  }
 0x167   :  { %v4858_v8 = vadd.f32 %v4857_v48, %v4856_v40  ;;  %v4795_v6 = vpop.f32.mrf.mxu0  ;;  %5337 = vmatprep.subr.bf16.mxu1 %v5797_v54 }
 0x168   :  { %v3261_v49 = vadd.f32 %v4794_v43, %v6852_v24  ;;  %v4859_v3 = vpop.f32.mrf.mxu1  ;;  %5307 = vmatpush3.bf16.msra.mxu0 %v5797_v54  ;;  %v5814_v43 = vld [vmem:[%s7471_s0 + $0x374] ss:$100 sps:$4 sm:$0xff]  }
 0x169   :  { %v4796_v55 = vpop.f32.mrf.mxu0  ;;  %5345 = vmatpush3.bf16.msra.mxu1 %v5797_v54  ;;  %5308 = vmatprep.subr.bf16.mxu0 %v5804_v41 }
 0x16a   :  { %v7071_v60 = vadd.f32 %v4858_v8, %v3261_v49  ;;  %v4797_v24 = vadd.f32 %v4796_v55, %v4795_v6  ;;  %v4860_v61 = vpop.f32.mrf.mxu1  ;;  %5338 = vmatprep.subr.bf16.mxu1 %v5804_v41  ;;  %v5817_v8 = vld [vmem:[%s7471_s0 + $0x37c] ss:$100 sps:$4 sm:$0xff]  }
 0x16b   :  { %v4861_v63 = vadd.f32 %v4860_v61, %v4859_v3  ;;  %v4798_v0 = vpop.f32.mrf.mxu0  ;;  %3849 = vmatmul.mubr.bf16.gmra.mxu0 %v5791_v50 }
 0x16c   :  { %v3264_v22 = vadd.f32 %v4797_v24, %v6867_v39  ;;  %v4862_v12 = vpop.f32.mrf.mxu1  ;;  %3946 = vmatmul.mubr.bf16.gmra.mxu1 %v5794_v51  ;;  %3856 = vmatprep.mubr.bf16.mxu0 %v5800_v52  ;;  %v5798_v39 = vld [vmem:[%s7471_s0 + $0x1e0] ss:$100 sps:$4 sm:$0xff]  }
 0x16d   :  { %v4799_v2 = vpop.f32.mrf.mxu0  ;;  %3953 = vmatprep.mubr.bf16.mxu1 %v5803_v57  ;;  %5309 = vmatpush3.bf16.msra.mxu0 %v5804_v41 }
 0x16e   :  { %v7077_v4 = vadd.f32 %v4861_v63, %v3264_v22  ;;  %v4800_v5 = vadd.f32 %v4799_v2, %v4798_v0  ;;  %v4863_v9 = vpop.f32.mrf.mxu1  ;;  %5346 = vmatpush3.bf16.msra.mxu1 %v5804_v41  ;;  %5310 = vmatprep.subr.bf16.mxu0 %v5811_v62  ;;  %v5808_v41 = vld [vmem:[%s7471_s0 + $0x2b0] ss:$100 sps:$4 sm:$0xff]   ;;  %v5815_v2 = vld [vmem:[%s7471_s0 + $0x378] ss:$100 sps:$4 sm:$0xff]  }
 0x16f   :  { %v4864_v42 = vadd.f32 %v4863_v9, %v4862_v12  ;;  %v4801_v26 = vpop.f32.mrf.mxu0  ;;  %5339 = vmatprep.subr.bf16.mxu1 %v5811_v62  ;;  %v5812_v22 = vld [vmem:[%s7471_s0 + $0x370] ss:$100 sps:$4 sm:$0xff]  }
 0x170   :  { %v3269_v13 = vadd.f32 %v4800_v5, %v6891_v59  ;;  %v4865_v15 = vpop.f32.mrf.mxu1  ;;  %v5825_v59 = vld [vmem:[%s7470_s1 + $0x610] sm:$0xff]   ;;  %v5821_v5 = vld [vmem:[%s7471_s0 + $0x43c] ss:$100 sps:$4 sm:$0xff]  }
 0x171   :  { %v4802_v18 = vpop.f32.mrf.mxu0  ;;  %5311 = vmatpush3.bf16.msra.mxu0 %v5811_v62 }
 0x172   :  { %v7095_v21 = vadd.f32 %v4864_v42, %v3269_v13  ;;  %v4803_v23 = vadd.f32 %v4802_v18, %v4801_v26  ;;  %v4866_v25 = vpop.f32.mrf.mxu1  ;;  %5347 = vmatpush3.bf16.msra.mxu1 %v5811_v62  ;;  %5312 = vmatprep.subr.bf16.mxu0 %v5818_v10 }
 0x173   :  { %v4867_v27 = vadd.f32 %v4866_v25, %v4865_v15  ;;  %v4804_v37 = vpop.f32.mrf.mxu0  ;;  %3857 = vmatmul.mubr.bf16.gmra.mxu0 %v5798_v39  ;;  %5340 = vmatprep.subr.bf16.mxu1 %v5818_v10 }
 0x174   :  { %v3272_v1 = vadd.f32 %v4803_v23, %v6912_v11  ;;  %v4868_v44 = vpop.f32.mrf.mxu1  ;;  %3954 = vmatmul.mubr.bf16.gmra.mxu1 %v5801_v31  ;;  %3864 = vmatprep.mubr.bf16.mxu0 %v5807_v17  ;;  %v5805_v11 = vld [vmem:[%s7471_s0 + $0x2a8] ss:$100 sps:$4 sm:$0xff]  }
 0x175   :  { %v4805_v33 = vpop.f32.mrf.mxu0  ;;  %3961 = vmatprep.mubr.bf16.mxu1 %v5810_v19  ;;  %5313 = vmatpush3.bf16.msra.mxu0 %v5818_v10 }
 0x176   :  { %v7101_v58 = vadd.f32 %v4867_v27, %v3272_v1  ;;  %v4806_v34 = vadd.f32 %v4805_v33, %v4804_v37  ;;  %v4869_v54 = vpop.f32.mrf.mxu1  ;;  %5348 = vmatpush3.bf16.msra.mxu1 %v5818_v10  ;;  %5314 = vmatprep.subr.bf16.mxu0 %v5825_v59  ;;  %v5824_v10 = vld [vmem:[%s7471_s0 + $0x444] ss:$100 sps:$4 sm:$0xff]   ;;  %v5819_v27 = vld [vmem:[%s7471_s0 + $0x438] ss:$100 sps:$4 sm:$0xff]  }
 0x177   :  { %v4870_v36 = vadd.f32 %v4869_v54, %v4868_v44  ;;  %v4807_v38 = vpop.f32.mrf.mxu0  ;;  %5341 = vmatprep.subr.bf16.mxu1 %v5825_v59  ;;  %v5828_v44 = vld [vmem:[%s7471_s0 + $0x504] ss:$100 sps:$4 sm:$0xff]  }
 0x178   :  { %v3277_v40 = vadd.f32 %v4806_v34, %v6936_v30  ;;  %v4871_v53 = vpop.f32.mrf.mxu1  ;;  %v5839_v30 = vld [vmem:[%s7470_s1 + $0x600] sm:$0xff]   ;;  %v5831_v34 = vld [vmem:[%s7471_s0 + $0x50c] ss:$100 sps:$4 sm:$0xff]  }
 0x179   :  { %v4808_v48 = vpop.f32.mrf.mxu0  ;;  %5315 = vmatpush3.bf16.msra.mxu0 %v5825_v59 }
 0x17a   :  { %v7119_v6 = vadd.f32 %v4870_v36, %v3277_v40  ;;  %v4809_v50 = vadd.f32 %v4808_v48, %v4807_v38  ;;  %v4872_v49 = vpop.f32.mrf.mxu1  ;;  %5349 = vmatpush3.bf16.msra.mxu1 %v5825_v59  ;;  %5316 = vmatprep.subr.bf16.mxu0 %v5832_v35 }
 0x17b   :  { %v4873_v3 = vadd.f32 %v4872_v49, %v4871_v53  ;;  %v4810_v51 = vpop.f32.mrf.mxu0  ;;  %3865 = vmatmul.mubr.bf16.gmra.mxu0 %v5805_v11  ;;  %5342 = vmatprep.subr.bf16.mxu1 %v5832_v35  ;;  %v5826_v49 = vld [vmem:[%s7471_s0 + $0x500] ss:$100 sps:$4 sm:$0xff]  }
 0x17c   :  { %v3280_v52 = vadd.f32 %v4809_v50, %v6951_v46  ;;  %v4874_v55 = vpop.f32.mrf.mxu1  ;;  %3962 = vmatmul.mubr.bf16.gmra.mxu1 %v5808_v41  ;;  %3872 = vmatprep.mubr.bf16.mxu0 %v5814_v43 }
 0x17d   :  { %v4811_v57 = vpop.f32.mrf.mxu0  ;;  %3969 = vmatprep.mubr.bf16.mxu1 %v5817_v8  ;;  %5317 = vmatpush3.bf16.msra.mxu0 %v5832_v35 }
 0x17e   :  { %v7125_v24 = vadd.f32 %v4873_v3, %v3280_v52  ;;  %v4812_v61 = vadd.f32 %v4811_v57, %v4810_v51  ;;  %v4875_v62 = vpop.f32.mrf.mxu1  ;;  %5350 = vmatpush3.bf16.msra.mxu1 %v5832_v35  ;;  %5318 = vmatprep.subr.bf16.mxu0 %v5839_v30  ;;  %v5835_v51 = vld [vmem:[%s7471_s0 + $0x5cc] ss:$100 sps:$4 sm:$0xff]  }
 0x17f   :  { %v4876_v63 = vadd.f32 %v4875_v62, %v4874_v55  ;;  %v4813_v0 = vpop.f32.mrf.mxu0  ;;  %5343 = vmatprep.subr.bf16.mxu1 %v5839_v30  ;;  %v5838_v55 = vld [vmem:[%s7471_s0 + $0x5d4] ss:$100 sps:$4 sm:$0xff]  }
 0x180   :  { %v3285_v46 = vadd.f32 %v4812_v61, %v6971_v29  ;;  %v4877_v12 = vpop.f32.mrf.mxu1 }
 0x181   :  { %v4814_v9 = vpop.f32.mrf.mxu0  ;;  %5319 = vmatpush3.bf16.msra.mxu0 %v5839_v30 }
 0x182   :  { %v7140_v42 = vadd.f32 %v4876_v63, %v3285_v46  ;;  %v4815_v26 = vadd.f32 %v4814_v9, %v4813_v0  ;;  %v4878_v39 = vpop.f32.mrf.mxu1  ;;  %5351 = vmatpush3.bf16.msra.mxu1 %v5839_v30 }
 0x183   :  { %v4879_v29 = vadd.f32 %v4878_v39, %v4877_v12  ;;  %v4816_v13 = vpop.f32.mrf.mxu0  ;;  %3873 = vmatmul.mubr.bf16.gmra.mxu0 %v5812_v22 }
 0x184   :  { %v3288_v15 = vadd.f32 %v4815_v26, %v6976_v45  ;;  %v4880_v31 = vpop.f32.mrf.mxu1  ;;  %3970 = vmatmul.mubr.bf16.gmra.mxu1 %v5815_v2  ;;  %3880 = vmatprep.mubr.bf16.mxu0 %v5821_v5  ;;  %v5822_v45 = vld [vmem:[%s7471_s0 + $0x440] ss:$100 sps:$4 sm:$0xff]   ;;  %v5833_v26 = vld [vmem:[%s7471_s0 + $0x5c8] ss:$100 sps:$4 sm:$0xff]  }
 0x185   :  { %v4817_v17 = vpop.f32.mrf.mxu0  ;;  %3977 = vmatprep.mubr.bf16.mxu1 %v5824_v10 }
 0x186   :  { %v7143_v18 = vadd.f32 %v4879_v29, %v3288_v15  ;;  %v4818_v19 = vadd.f32 %v4817_v17, %v4816_v13  ;;  %v4881_v23 = vpop.f32.mrf.mxu1  ;;  %v5840_v13 = vld [vmem:[%s7471_s0 + $0x60] ss:$100 sps:$4 sm:$0xff]  }
 0x187   :  { %v4882_v25 = vadd.f32 %v4881_v23, %v4880_v31  ;;  %v4819_v59 = vpop.f32.mrf.mxu0  ;;  %v5841_v31 = vld [vmem:[%s7471_s0 + $0x380] ss:$100 sps:$4 sm:$0xff]  }
 0x188   :  { %v3293_v37 = vadd.f32 %v4818_v19, %v6991_v20  ;;  %v4883_v1 = vpop.f32.mrf.mxu1 }
 0x189   :  { %v4820_v33 = vpop.f32.mrf.mxu0 }
 0x18a   :  { %v7158_v54 = vadd.f32 %v4882_v25, %v3293_v37  ;;  %v4821_v35 = vadd.f32 %v4820_v33, %v4819_v59  ;;  %v4884_v36 = vpop.f32.mrf.mxu1 }
 0x18b   :  { %v4885_v38 = vadd.f32 %v4884_v36, %v4883_v1  ;;  %v4822_v20 = vpop.f32.mrf.mxu0  ;;  %3881 = vmatmul.mubr.bf16.gmra.mxu0 %v5819_v27 }
 0x18c   :  { %v3296_v11 = vadd.f32 %v4821_v35, %v6994_v32  ;;  %v4886_v40 = vpop.f32.mrf.mxu1  ;;  %3978 = vmatmul.mubr.bf16.gmra.mxu1 %v5822_v45  ;;  %3888 = vmatprep.mubr.bf16.mxu0 %v5828_v44  ;;  %v5829_v32 = vld [vmem:[%s7471_s0 + $0x508] ss:$100 sps:$4 sm:$0xff]  }
 0x18d   :  { %v4823_v53 = vpop.f32.mrf.mxu0  ;;  %3985 = vmatprep.mubr.bf16.mxu1 %v5831_v34  ;;  %v5842_v35 = vld [vmem:[%s7471_s0 + $0x128] ss:$100 sps:$4 sm:$0xff]  }
 0x18e   :  { %v7161_v41 = vadd.f32 %v4885_v38, %v3296_v11  ;;  %v4824_v43 = vadd.f32 %v4823_v53, %v4822_v20  ;;  %v4887_v48 = vpop.f32.mrf.mxu1  ;;  %v5844_v20 = vld [vmem:[%s7471_s0 + $0x1f0] ss:$100 sps:$4 sm:$0xff]  }
 0x18f   :  { %v4888_v8 = vadd.f32 %v4887_v48, %v4886_v40  ;;  %v4825_v50 = vpop.f32.mrf.mxu0  ;;  %v5845_v40 = vld [vmem:[%s7471_s0 + $0x510] ss:$100 sps:$4 sm:$0xff]  }
 0x190   :  { %v3301_v30 = vadd.f32 %v4824_v43, %v7009_v47  ;;  %v4889_v3 = vpop.f32.mrf.mxu1 }
 0x191   :  { %v4826_v52 = vpop.f32.mrf.mxu0 }
 0x192   :  { %v7176_v57 = vadd.f32 %v4888_v8, %v3301_v30  ;;  %v4827_v61 = vadd.f32 %v4826_v52, %v4825_v50  ;;  %v4890_v62 = vpop.f32.mrf.mxu1 }
 0x193   :  { %v4891_v63 = vadd.f32 %v4890_v62, %v4889_v3  ;;  %v4828_v47 = vpop.f32.mrf.mxu0  ;;  %3889 = vmatmul.mubr.bf16.gmra.mxu0 %v5826_v49 }
 0x194   :  { %v3304_v0 = vadd.f32 %v4827_v61, %v7012_v56  ;;  %v4892_v22 = vpop.f32.mrf.mxu1  ;;  %3986 = vmatmul.mubr.bf16.gmra.mxu1 %v5829_v32  ;;  %3896 = vmatprep.mubr.bf16.mxu0 %v5835_v51  ;;  %v5836_v56 = vld [vmem:[%s7471_s0 + $0x5d0] ss:$100 sps:$4 sm:$0xff]   ;;  %v5846_v61 = vld [vmem:[%s7471_s0 + $0x2b8] ss:$100 sps:$4 sm:$0xff]  }
 0x195   :  { %v4829_v46 = vpop.f32.mrf.mxu0  ;;  %3993 = vmatprep.mubr.bf16.mxu1 %v5838_v55 }
 0x196   :  { %v7179_v12 = vadd.f32 %v4891_v63, %v3304_v0  ;;  %v4830_v2 = vadd.f32 %v4829_v46, %v4828_v47  ;;  %v4893_v5 = vpop.f32.mrf.mxu1 }
 0x197   :  { %v4894_v9 = vadd.f32 %v4893_v5, %v4892_v22  ;;  %v4831_v10 = vpop.f32.mrf.mxu0 }
 0x198   :  { %v3309_v39 = vadd.f32 %v4830_v2, %v7027_v7  ;;  %v4895_v29 = vpop.f32.mrf.mxu1 }
 0x199   :  { %v4832_v15 = vpop.f32.mrf.mxu0 }
 0x19a   :  { %v7194_v17 = vadd.f32 %v4894_v9, %v3309_v39  ;;  %v4833_v19 = vadd.f32 %v4832_v15, %v4831_v10  ;;  %v4896_v23 = vpop.f32.mrf.mxu1 }
 0x19b   :  { %v4897_v25 = vadd.f32 %v4896_v23, %v4895_v29  ;;  %v4834_v7 = vpop.f32.mrf.mxu0  ;;  %3897 = vmatmul.mubr.bf16.gmra.mxu0 %v5833_v26 }
 0x19c   :  { %v3312_v59 = vadd.f32 %v4833_v19, %v7030_v16  ;;  %v4898_v27 = vpop.f32.mrf.mxu1  ;;  %3994 = vmatmul.mubr.bf16.gmra.mxu1 %v5836_v56  ;;  %5320 = vmatprep.mubr.bf16.mxu0 %v5840_v13  ;;  %v5843_v16 = vld [vmem:[%s7471_s0 + $0x448] ss:$100 sps:$4 sm:$0xff]  }
 0x19d   :  { %v4835_v37 = vpop.f32.mrf.mxu0  ;;  %5328 = vmatprep.mubr.bf16.mxu1 %v5841_v31 }
 0x19e   :  { %v7197_v1 = vadd.f32 %v4897_v25, %v3312_v59  ;;  %v4836_v45 = vadd.f32 %v4835_v37, %v4834_v7  ;;  %v4899_v44 = vpop.f32.mrf.mxu1 }
 0x19f   :  { %v4900_v33 = vadd.f32 %v4899_v44, %v4898_v27  ;;  %v4837_v34 = vpop.f32.mrf.mxu0 }
 0x1a0   :  { %v3317_v36 = vadd.f32 %v4836_v45, %v7042_v28  ;;  %v4901_v38 = vpop.f32.mrf.mxu1 }
 0x1a1   :  { %v4838_v11 = vpop.f32.mrf.mxu0 }
 0x1a2   :  { %v7212_v53 = vadd.f32 %v4900_v33, %v3317_v36  ;;  %v4839_v43 = vadd.f32 %v4838_v11, %v4837_v34  ;;  %v4902_v48 = vpop.f32.mrf.mxu1 }
 0x1a3   :  { %v4903_v8 = vadd.f32 %v4902_v48, %v4901_v38  ;;  %v4920_v28 = vpop.f32.mrf.mxu0  ;;  %5321 = vmatmul.mubr.bf16.vlgmr.msra.gmra.mxu0 %v5842_v35 }
 0x1a4   :  { %v3320_v50 = vadd.f32 %v4839_v43, %v7056_v14  ;;  %v4984_v49 = vpop.f32.mrf.mxu1  ;;  %5329 = vmatmul.mubr.bf16.vlgmr.msra.gmra.mxu1 %v5843_v16  ;;  %5324 = vmatprep.mubr.bf16.mxu0 %v5844_v20  ;;  %v5847_v14 = vld [vmem:[%s7471_s0 + $0x5d8] ss:$100 sps:$4 sm:$0xff]  }
 0x1a5   :  { %v4921_v30 = vpop.f32.mrf.mxu0  ;;  %5332 = vmatprep.mubr.bf16.mxu1 %v5845_v40 }
 0x1a6   :  { %v7215_v3 = vadd.f32 %v4903_v8, %v3320_v50  ;;  %v4922_v32 = vadd.f32 %v4921_v30, %v4920_v28  ;;  %v4985_v51 = vpop.f32.mrf.mxu1 }
 0x1a7   :  { %v4986_v52 = vadd.f32 %v4985_v51, %v4984_v49  ;;  %v4923_v55 = vpop.f32.mrf.mxu0 }
 0x1a8   :  { %v3455_v62 = vadd.f32 %v4922_v32, %v7071_v60  ;;  %v4987_v63 = vpop.f32.mrf.mxu1 }
 0x1a9   :  { %v4924_v47 = vpop.f32.mrf.mxu0 }
 0x1aa   :  { %v7224_v0 = vadd.f32 %v4986_v52, %v3455_v62  ;;  %v4925_v22 = vadd.f32 %v4924_v47, %v4923_v55  ;;  %v4988_v46 = vpop.f32.mrf.mxu1 }
 0x1ab   :  { %v4989_v2 = vadd.f32 %v4988_v46, %v4987_v63  ;;  %v4926_v5 = vpop.f32.mrf.mxu0  ;;  %5325 = vmatmul.mubr.bf16.gmra.mxu0 %v5846_v61 }
 0x1ac   :  { %v3458_v9 = vadd.f32 %v4925_v22, %v7077_v4  ;;  %v4990_v10 = vpop.f32.mrf.mxu1  ;;  %5333 = vmatmul.mubr.bf16.gmra.mxu1 %v5847_v14 }
 0x1ad   :  { %v4927_v26 = vpop.f32.mrf.mxu0 }
 0x1ae   :  { %v7227_v39 = vadd.f32 %v4989_v2, %v3458_v9  ;;  %v4928_v60 = vadd.f32 %v4927_v26, %v4926_v5  ;;  %v4991_v29 = vpop.f32.mrf.mxu1 }
 0x1af   :  { %v4992_v56 = vadd.f32 %v4991_v29, %v4990_v10  ;;  %v4929_v13 = vpop.f32.mrf.mxu0 }
 0x1b0   :  { %v3463_v15 = vadd.f32 %v4928_v60, %v7095_v21  ;;  %v4993_v31 = vpop.f32.mrf.mxu1 }
 0x1b1   :  { %v4930_v19 = vpop.f32.mrf.mxu0 }
 0x1b2   :  { %v7230_v23 = vadd.f32 %v4992_v56, %v3463_v15  ;;  %v4931_v25 = vadd.f32 %v4930_v19, %v4929_v13  ;;  %v4994_v7 = vpop.f32.mrf.mxu1 }
 0x1b3   :  { %v4995_v59 = vadd.f32 %v4994_v7, %v4993_v31  ;;  %v4932_v27 = vpop.f32.mrf.mxu0 }
 0x1b4   :  { %v3466_v4 = vadd.f32 %v4931_v25, %v7101_v58  ;;  %v4996_v37 = vpop.f32.mrf.mxu1 }
 0x1b5   :  { %v4933_v45 = vpop.f32.mrf.mxu0 }
 0x1b6   :  { %v7233_v44 = vadd.f32 %v4995_v59, %v3466_v4  ;;  %v4934_v33 = vadd.f32 %v4933_v45, %v4932_v27  ;;  %v4997_v34 = vpop.f32.mrf.mxu1 }
 0x1b7   :  { %v4998_v35 = vadd.f32 %v4997_v34, %v4996_v37  ;;  %v4935_v36 = vpop.f32.mrf.mxu0 }
 0x1b8   :  { %v3471_v21 = vadd.f32 %v4934_v33, %v7119_v6  ;;  %v4999_v38 = vpop.f32.mrf.mxu1 }
 0x1b9   :  { %v4936_v16 = vpop.f32.mrf.mxu0 }
 0x1ba   :  { %v7236_v20 = vadd.f32 %v4998_v35, %v3471_v21  ;;  %v4937_v11 = vadd.f32 %v4936_v16, %v4935_v36  ;;  %v5000_v40 = vpop.f32.mrf.mxu1 }
 0x1bb   :  { %v5001_v43 = vadd.f32 %v5000_v40, %v4999_v38  ;;  %v4938_v48 = vpop.f32.mrf.mxu0 }
 0x1bc   :  { %v3474_v58 = vadd.f32 %v4937_v11, %v7125_v24  ;;  %v5002_v8 = vpop.f32.mrf.mxu1 }
 0x1bd   :  { %v4939_v28 = vpop.f32.mrf.mxu0 }
 0x1be   :  { %v7239_v50 = vadd.f32 %v5001_v43, %v3474_v58  ;;  %v4940_v49 = vadd.f32 %v4939_v28, %v4938_v48  ;;  %v5003_v30 = vpop.f32.mrf.mxu1 }
 0x1bf   :  { %v5004_v32 = vadd.f32 %v5003_v30, %v5002_v8  ;;  %v4941_v51 = vpop.f32.mrf.mxu0 }
 0x1c0   :  { %v3479_v6 = vadd.f32 %v4940_v49, %v7140_v42  ;;  %v5005_v52 = vpop.f32.mrf.mxu1 }
 0x1c1   :  { %v4942_v55 = vpop.f32.mrf.mxu0 }
 0x1c2   :  { %v7242_v61 = vadd.f32 %v5004_v32, %v3479_v6  ;;  %v4943_v62 = vadd.f32 %v4942_v55, %v4941_v51  ;;  %v5006_v63 = vpop.f32.mrf.mxu1 }
 0x1c3   :  { %v5007_v14 = vadd.f32 %v5006_v63, %v5005_v52  ;;  %v4944_v47 = vpop.f32.mrf.mxu0 }
 0x1c4   :  { %v3482_v24 = vadd.f32 %v4943_v62, %v7143_v18  ;;  %v5008_v22 = vpop.f32.mrf.mxu1 }
 0x1c5   :  { %v4945_v46 = vpop.f32.mrf.mxu0 }
 0x1c6   :  { %v7245_v2 = vadd.f32 %v5007_v14, %v3482_v24  ;;  %v4946_v5 = vadd.f32 %v4945_v46, %v4944_v47  ;;  %v5009_v9 = vpop.f32.mrf.mxu1 }
 0x1c7   :  { %v5010_v10 = vadd.f32 %v5009_v9, %v5008_v22  ;;  %v4947_v26 = vpop.f32.mrf.mxu0 }
 0x1c8   :  { %v3487_v42 = vadd.f32 %v4946_v5, %v7158_v54  ;;  %v5011_v60 = vpop.f32.mrf.mxu1 }
 0x1c9   :  { %v4948_v29 = vpop.f32.mrf.mxu0 }
 0x1ca   :  { %v7248_v56 = vadd.f32 %v5010_v10, %v3487_v42  ;;  %v4949_v13 = vadd.f32 %v4948_v29, %v4947_v26  ;;  %v5012_v15 = vpop.f32.mrf.mxu1 }
 0x1cb   :  { %v5013_v31 = vadd.f32 %v5012_v15, %v5011_v60  ;;  %v4950_v19 = vpop.f32.mrf.mxu0 }
 0x1cc   :  { %v3490_v18 = vadd.f32 %v4949_v13, %v7161_v41  ;;  %v5014_v25 = vpop.f32.mrf.mxu1 }
 0x1cd   :  { %v4951_v7 = vpop.f32.mrf.mxu0 }
 0x1ce   :  { %v7251_v59 = vadd.f32 %v5013_v31, %v3490_v18  ;;  %v4952_v27 = vadd.f32 %v4951_v7, %v4950_v19  ;;  %v5015_v4 = vpop.f32.mrf.mxu1 }
 0x1cf   :  { %v5016_v37 = vadd.f32 %v5015_v4, %v5014_v25  ;;  %v4953_v45 = vpop.f32.mrf.mxu0 }
 0x1d0   :  { %v3495_v54 = vadd.f32 %v4952_v27, %v7176_v57  ;;  %v5017_v33 = vpop.f32.mrf.mxu1 }
 0x1d1   :  { %v4954_v34 = vpop.f32.mrf.mxu0 }
 0x1d2   :  { %v7254_v35 = vadd.f32 %v5016_v37, %v3495_v54  ;;  %v4955_v36 = vadd.f32 %v4954_v34, %v4953_v45  ;;  %v5018_v21 = vpop.f32.mrf.mxu1 }
 0x1d3   :  { %v5019_v38 = vadd.f32 %v5018_v21, %v5017_v33  ;;  %v4956_v16 = vpop.f32.mrf.mxu0 }
 0x1d4   :  { %v3498_v41 = vadd.f32 %v4955_v36, %v7179_v12  ;;  %v5020_v11 = vpop.f32.mrf.mxu1 }
 0x1d5   :  { %v4957_v40 = vpop.f32.mrf.mxu0 }
 0x1d6   :  { %v7257_v43 = vadd.f32 %v5019_v38, %v3498_v41  ;;  %v4958_v48 = vadd.f32 %v4957_v40, %v4956_v16  ;;  %v5021_v58 = vpop.f32.mrf.mxu1 }
 0x1d7   :  { %v5022_v8 = vadd.f32 %v5021_v58, %v5020_v11  ;;  %v4959_v28 = vpop.f32.mrf.mxu0 }
 0x1d8   :  { %v3503_v57 = vadd.f32 %v4958_v48, %v7194_v17  ;;  %v5023_v49 = vpop.f32.mrf.mxu1 }
 0x1d9   :  { %v4960_v30 = vpop.f32.mrf.mxu0 }
 0x1da   :  { %v7260_v32 = vadd.f32 %v5022_v8, %v3503_v57  ;;  %v4961_v51 = vadd.f32 %v4960_v30, %v4959_v28  ;;  %v5024_v6 = vpop.f32.mrf.mxu1 }
 0x1db   :  { %v5025_v52 = vadd.f32 %v5024_v6, %v5023_v49  ;;  %v4962_v55 = vpop.f32.mrf.mxu0 }
 0x1dc   :  { %v3506_v12 = vadd.f32 %v4961_v51, %v7197_v1  ;;  %v5026_v62 = vpop.f32.mrf.mxu1 }
 0x1dd   :  { %v4963_v63 = vpop.f32.mrf.mxu0 }
 0x1de   :  { %v7263_v14 = vadd.f32 %v5025_v52, %v3506_v12  ;;  %v4964_v47 = vadd.f32 %v4963_v63, %v4962_v55  ;;  %v5027_v24 = vpop.f32.mrf.mxu1 }
 0x1df   :  { %v5028_v22 = vadd.f32 %v5027_v24, %v5026_v62  ;;  %v4965_v46 = vpop.f32.mrf.mxu0 }
 0x1e0   :  { %v3511_v17 = vadd.f32 %v4964_v47, %v7212_v53  ;;  %v5029_v5 = vpop.f32.mrf.mxu1 }
 0x1e1   :  { %v4966_v9 = vpop.f32.mrf.mxu0 }
 0x1e2   :  { %v7266_v10 = vadd.f32 %v5028_v22, %v3511_v17  ;;  %v4967_v26 = vadd.f32 %v4966_v9, %v4965_v46  ;;  %v5030_v42 = vpop.f32.mrf.mxu1 }
 0x1e3   :  { %v5031_v60 = vadd.f32 %v5030_v42, %v5029_v5  ;;  %v5048_v29 = vpop.f32.mrf.mxu0 }
 0x1e4   :  { %v3514_v1 = vadd.f32 %v4967_v26, %v7215_v3  ;;  %v5112_v13 = vpop.f32.mrf.mxu1 }
 0x1e5   :  { %v5049_v15 = vpop.f32.mrf.mxu0 }
 0x1e6   :  { %v7269_v31 = vadd.f32 %v5031_v60, %v3514_v1  ;;  %v5050_v19 = vadd.f32 %v5049_v15, %v5048_v29  ;;  %v5113_v18 = vpop.f32.mrf.mxu1 }
 0x1e7   :  { %v5114_v25 = vadd.f32 %v5113_v18, %v5112_v13  ;;  %v5051_v7 = vpop.f32.mrf.mxu0 }
 0x1e8   :  { %v3649_v53 = vadd.f32 %v5050_v19, %v7224_v0  ;;  %v5115_v27 = vpop.f32.mrf.mxu1 }
 0x1e9   :  { %v5052_v4 = vpop.f32.mrf.mxu0 }
 0x1ea   :  { %v7272_v37 = vadd.f32 %v5114_v25, %v3649_v53  ;;  %v5053_v45 = vadd.f32 %v5052_v4, %v5051_v7  ;;  %v5116_v54 = vpop.f32.mrf.mxu1 }
 0x1eb   :  { %v5117_v33 = vadd.f32 %v5116_v54, %v5115_v27  ;;  %v5054_v34 = vpop.f32.mrf.mxu0 }
 0x1ec   :  { %v3652_v3 = vadd.f32 %v5053_v45, %v7227_v39  ;;  %v5118_v36 = vpop.f32.mrf.mxu1 }
 0x1ed   :  { %v5055_v21 = vpop.f32.mrf.mxu0 }
 0x1ee   :  { %v7275_v38 = vadd.f32 %v5117_v33, %v3652_v3  ;;  %v5056_v16 = vadd.f32 %v5055_v21, %v5054_v34  ;;  %v5119_v41 = vpop.f32.mrf.mxu1 }
 0x1ef   :  { %v5120_v11 = vadd.f32 %v5119_v41, %v5118_v36  ;;  %v5057_v40 = vpop.f32.mrf.mxu0 }
 0x1f0   :  { %v3657_v0 = vadd.f32 %v5056_v16, %v7230_v23  ;;  %v5121_v48 = vpop.f32.mrf.mxu1 }
 0x1f1   :  { %v5058_v58 = vpop.f32.mrf.mxu0 }
 0x1f2   :  { %v7278_v8 = vadd.f32 %v5120_v11, %v3657_v0  ;;  %v5059_v28 = vadd.f32 %v5058_v58, %v5057_v40  ;;  %v5122_v57 = vpop.f32.mrf.mxu1 }
 0x1f3   :  { %v5123_v49 = vadd.f32 %v5122_v57, %v5121_v48  ;;  %v5060_v30 = vpop.f32.mrf.mxu0 }
 0x1f4   :  { %v3660_v39 = vadd.f32 %v5059_v28, %v7233_v44  ;;  %v5124_v51 = vpop.f32.mrf.mxu1 }
 0x1f5   :  { %v5061_v6 = vpop.f32.mrf.mxu0 }
 0x1f6   :  { %v7281_v52 = vadd.f32 %v5123_v49, %v3660_v39  ;;  %v5062_v55 = vadd.f32 %v5061_v6, %v5060_v30  ;;  %v5125_v12 = vpop.f32.mrf.mxu1 }
 0x1f7   :  { %v5126_v62 = vadd.f32 %v5125_v12, %v5124_v51  ;;  %v5063_v63 = vpop.f32.mrf.mxu0 }
 0x1f8   :  { %v3665_v23 = vadd.f32 %v5062_v55, %v7236_v20  ;;  %v5127_v47 = vpop.f32.mrf.mxu1 }
 0x1f9   :  { %v5064_v24 = vpop.f32.mrf.mxu0 }
 0x1fa   :  { %v7284_v22 = vadd.f32 %v5126_v62, %v3665_v23  ;;  %v5065_v46 = vadd.f32 %v5064_v24, %v5063_v63  ;;  %v5128_v17 = vpop.f32.mrf.mxu1 }
 0x1fb   :  { %v5129_v5 = vadd.f32 %v5128_v17, %v5127_v47  ;;  %v5066_v9 = vpop.f32.mrf.mxu0 }
 0x1fc   :  { %v3668_v44 = vadd.f32 %v5065_v46, %v7239_v50  ;;  %v5130_v26 = vpop.f32.mrf.mxu1 }
 0x1fd   :  { %v5067_v42 = vpop.f32.mrf.mxu0 }
 0x1fe   :  { %v7287_v60 = vadd.f32 %v5129_v5, %v3668_v44  ;;  %v5068_v29 = vadd.f32 %v5067_v42, %v5066_v9  ;;  %v5131_v1 = vpop.f32.mrf.mxu1 }
 0x1ff   :  { %v5132_v13 = vadd.f32 %v5131_v1, %v5130_v26  ;;  %v5069_v15 = vpop.f32.mrf.mxu0 }
 0x200   :  { %7474 = vst [vmem:[#allocation2_spill] sm:$0xff] %v7287_v60  ;;  %v3673_v20 = vadd.f32 %v5068_v29, %v7242_v61  ;;  %v5133_v19 = vpop.f32.mrf.mxu1 }
 0x201   :  { %v5070_v18 = vpop.f32.mrf.mxu0 }
 0x202   :  { %v7290_v25 = vadd.f32 %v5132_v13, %v3673_v20  ;;  %v5071_v7 = vadd.f32 %v5070_v18, %v5069_v15  ;;  %v5134_v53 = vpop.f32.mrf.mxu1 }
 0x203   :  { %v5135_v27 = vadd.f32 %v5134_v53, %v5133_v19  ;;  %v5072_v4 = vpop.f32.mrf.mxu0 }
 0x204   :  { %v3676_v50 = vadd.f32 %v5071_v7, %v7245_v2  ;;  %v5136_v45 = vpop.f32.mrf.mxu1 }
 0x205   :  { %v5073_v54 = vpop.f32.mrf.mxu0 }
 0x206   :  { %v7293_v33 = vadd.f32 %v5135_v27, %v3676_v50  ;;  %v5074_v34 = vadd.f32 %v5073_v54, %v5072_v4  ;;  %v5137_v3 = vpop.f32.mrf.mxu1 }
 0x207   :  { %v5138_v36 = vadd.f32 %v5137_v3, %v5136_v45  ;;  %v5075_v21 = vpop.f32.mrf.mxu0 }
 0x208   :  { %7475 = vst [vmem:[#allocation3_spill] sm:$0xff] %v7293_v33  ;;  %v3681_v61 = vadd.f32 %v5074_v34, %v7248_v56  ;;  %v5139_v16 = vpop.f32.mrf.mxu1 }
 0x209   :  { %v5076_v41 = vpop.f32.mrf.mxu0 }
 0x20a   :  { %v7296_v11 = vadd.f32 %v5138_v36, %v3681_v61  ;;  %v5077_v40 = vadd.f32 %v5076_v41, %v5075_v21  ;;  %v5140_v0 = vpop.f32.mrf.mxu1 }
 0x20b   :  { %v5141_v48 = vadd.f32 %v5140_v0, %v5139_v16  ;;  %v5078_v58 = vpop.f32.mrf.mxu0 }
 0x20c   :  { %v3684_v2 = vadd.f32 %v5077_v40, %v7251_v59  ;;  %v5142_v28 = vpop.f32.mrf.mxu1 }
 0x20d   :  { %v5079_v57 = vpop.f32.mrf.mxu0 }
 0x20e   :  { %v7299_v49 = vadd.f32 %v5141_v48, %v3684_v2  ;;  %v5080_v30 = vadd.f32 %v5079_v57, %v5078_v58  ;;  %v5143_v39 = vpop.f32.mrf.mxu1 }
 0x20f   :  { %v5144_v51 = vadd.f32 %v5143_v39, %v5142_v28  ;;  %v5081_v6 = vpop.f32.mrf.mxu0 }
 0x210   :  { %v3689_v56 = vadd.f32 %v5080_v30, %v7254_v35  ;;  %v5145_v55 = vpop.f32.mrf.mxu1 }
 0x211   :  { %v5082_v12 = vpop.f32.mrf.mxu0 }
 0x212   :  { %v7302_v62 = vadd.f32 %v5144_v51, %v3689_v56  ;;  %v5083_v63 = vadd.f32 %v5082_v12, %v5081_v6  ;;  %v5146_v23 = vpop.f32.mrf.mxu1 }
 0x213   :  { %v5147_v47 = vadd.f32 %v5146_v23, %v5145_v55  ;;  %v5084_v24 = vpop.f32.mrf.mxu0 }
 0x214   :  { %v3692_v59 = vadd.f32 %v5083_v63, %v7257_v43  ;;  %v5148_v46 = vpop.f32.mrf.mxu1 }
 0x215   :  { %v5085_v17 = vpop.f32.mrf.mxu0 }
 0x216   :  { %v7305_v5 = vadd.f32 %v5147_v47, %v3692_v59  ;;  %v5086_v9 = vadd.f32 %v5085_v17, %v5084_v24  ;;  %v5149_v44 = vpop.f32.mrf.mxu1 }
 0x217   :  { %v5150_v26 = vadd.f32 %v5149_v44, %v5148_v46  ;;  %v5087_v42 = vpop.f32.mrf.mxu0 }
 0x218   :  { %v3697_v35 = vadd.f32 %v5086_v9, %v7260_v32  ;;  %v5151_v29 = vpop.f32.mrf.mxu1 }
 0x219   :  { %v5088_v1 = vpop.f32.mrf.mxu0 }
 0x21a   :  { %v7308_v13 = vadd.f32 %v5150_v26, %v3697_v35  ;;  %v5089_v15 = vadd.f32 %v5088_v1, %v5087_v42  ;;  %v5152_v20 = vpop.f32.mrf.mxu1 }
 0x21b   :  { %v5153_v19 = vadd.f32 %v5152_v20, %v5151_v29  ;;  %v5090_v18 = vpop.f32.mrf.mxu0 }
 0x21c   :  { %7476 = vst [vmem:[#allocation4_spill] sm:$0xff] %v7308_v13  ;;  %v3700_v43 = vadd.f32 %v5089_v15, %v7263_v14  ;;  %v5154_v7 = vpop.f32.mrf.mxu1 }
 0x21d   :  { %v5091_v53 = vpop.f32.mrf.mxu0 }
 0x21e   :  { %v7311_v27 = vadd.f32 %v5153_v19, %v3700_v43  ;;  %v5092_v4 = vadd.f32 %v5091_v53, %v5090_v18  ;;  %v5155_v50 = vpop.f32.mrf.mxu1 }
 0x21f   :  { %v5156_v45 = vadd.f32 %v5155_v50, %v5154_v7  ;;  %v5093_v54 = vpop.f32.mrf.mxu0 }
 0x220   :  { %7477 = vst [vmem:[#allocation5_spill] sm:$0xff] %v7311_v27  ;;  %v3705_v32 = vadd.f32 %v5092_v4, %v7266_v10  ;;  %v5157_v34 = vpop.f32.mrf.mxu1 }
 0x221   :  { %v5094_v3 = vpop.f32.mrf.mxu0 }
 0x222   :  { %v7314_v36 = vadd.f32 %v5156_v45, %v3705_v32  ;;  %v5095_v21 = vadd.f32 %v5094_v3, %v5093_v54  ;;  %v5158_v61 = vpop.f32.mrf.mxu1 }
 0x223   :  { %v5159_v16 = vadd.f32 %v5158_v61, %v5157_v34  ;;  %v5176_v41 = vpop.f32.mrf.mxu0 }
 0x224   :  { %7478 = vst [vmem:[#allocation6_spill] sm:$0xff] %v7314_v36  ;;  %v3708_v14 = vadd.f32 %v5095_v21, %v7269_v31  ;;  %v7317_v40 = vpop.f32.mrf.mxu1 }
 0x225   :  { %v5177_v0 = vpop.f32.mrf.mxu0 }
 0x226   :  { %v7319_v48 = vadd.f32 %v5159_v16, %v3708_v14  ;;  %v7321_v58 = vpop.f32.mrf.mxu1 }
 0x227   :  { %v5179_v2 = vpop.f32.mrf.mxu0 }
 0x228   :  { %7479 = vst [vmem:[#allocation7_spill] sm:$0xff] %v7319_v48  ;;  %v7323_v28 = vpop.f32.mrf.mxu1  ;;  %v5178_v48 = vadd.f32 %v5177_v0, %v5176_v41  ;;  %v5242_v41 = vadd.f32 %v7321_v58, %v7317_v40 }
 0x229   :  { %v5180_v10 = vpop.f32.mrf.mxu0 }
 0x22a   :  { %v7325_v57 = vpop.f32.mrf.mxu1 }
 0x22b   :  { %v5182_v30 = vpop.f32.mrf.mxu0  ;;  %v5245_v0 = vadd.f32 %v7325_v57, %v7323_v28 }
 0x22c   :  { %v7327_v39 = vpop.f32.mrf.mxu1 }
 0x22d   :  { %v5183_v51 = vpop.f32.mrf.mxu0 }
 0x22e   :  { %v7329_v6 = vpop.f32.mrf.mxu1 }
 0x22f   :  { %v5185_v31 = vpop.f32.mrf.mxu0 }
 0x230   :  { %v7331_v56 = vpop.f32.mrf.mxu1 }
 0x231   :  { %v5186_v55 = vpop.f32.mrf.mxu0 }
 0x232   :  { %v7333_v12 = vpop.f32.mrf.mxu1 }
 0x233   :  { %v5188_v63 = vpop.f32.mrf.mxu0  ;;  %v5251_v28 = vadd.f32 %v7333_v12, %v7331_v56 }
 0x234   :  { %v7335_v23 = vpop.f32.mrf.mxu1 }
 0x235   :  { %7480 = vst [vmem:[#allocation8_spill] sm:$0xff] %v7335_v23  ;;  %v5189_v47 = vpop.f32.mrf.mxu0  ;;  %v5184_v23 = vadd.f32 %v5183_v51, %v5182_v30 }
 0x236   :  { %v7337_v24 = vpop.f32.mrf.mxu1  ;;  %v5190_v51 = vadd.f32 %v5189_v47, %v5188_v63 }
 0x237   :  { %7481 = vst [vmem:[#allocation9_spill] sm:$0xff] %v7337_v24  ;;  %v7339_v59 = vpop.f32.mrf.mxu0  ;;  %v5181_v24 = vadd.f32 %v5180_v10, %v5179_v2 }
 0x238   :  { %7482 = vst [vmem:[#allocation10_spill] sm:$0xff] %v7339_v59  ;;  %v7341_v46 = vpop.f32.mrf.mxu1  ;;  %v3859_v47 = vadd.f32 %v5190_v51, %v7284_v22 }
 0x239   :  { %7483 = vst [vmem:[#allocation11_spill] sm:$0xff] %v7341_v46  ;;  %v7343_v17 = vpop.f32.mrf.mxu0 }
 0x23a   :  { %7484 = vst [vmem:[#allocation12_spill] sm:$0xff] %v7343_v17  ;;  %v7345_v9 = vpop.f32.mrf.mxu1  ;;  %v5187_v17 = vadd.f32 %v5186_v55, %v5185_v31 }
 0x23b   :  { %7485 = vst [vmem:[#allocation13_spill] sm:$0xff] %v7345_v9  ;;  %v5194_v44 = vpop.f32.mrf.mxu0 }
 0x23c   :  { %v7347_v26 = vpop.f32.mrf.mxu1 }
 0x23d   :  { %7486 = vst [vmem:[#allocation14_spill] sm:$0xff] %v7347_v26  ;;  %v5195_v42 = vpop.f32.mrf.mxu0 }
 0x23e   :  { %v7349_v35 = vpop.f32.mrf.mxu1 }
 0x23f   :  { %7487 = vst [vmem:[#allocation15_spill] sm:$0xff] %v7349_v35  ;;  %v7351_v29 = vpop.f32.mrf.mxu0 }
 0x240   :  { %v7353_v1 = vpop.f32.mrf.mxu1 }
 0x241   :  { %7488 = vst [vmem:[#allocation16_spill] sm:$0xff] %v7353_v1  ;;  %v7355_v15 = vpop.f32.mrf.mxu0 }
 0x242   :  { %v7357_v20 = vpop.f32.mrf.mxu1 }
 0x243   :  { %7489 = vst [vmem:[#allocation17_spill] sm:$0xff] %v7357_v20  ;;  %v5200_v19 = vpop.f32.mrf.mxu0 }
 0x244   :  { %v5264_v18 = vpop.f32.mrf.mxu1 }
 0x245   :  { %v5201_v43 = vpop.f32.mrf.mxu0 }
 0x246   :  { %v5265_v7 = vpop.f32.mrf.mxu1  ;;  %v5202_v36 = vadd.f32 %v5201_v43, %v5200_v19 }
 0x247   :  { %v5203_v53 = vpop.f32.mrf.mxu0 }
 0x248   :  { %v7359_v4 = vpop.f32.mrf.mxu1 }
 0x249   :  { %v5204_v50 = vpop.f32.mrf.mxu0 }
 0x24a   :  { %v7361_v45 = vpop.f32.mrf.mxu1 }
 0x24b   :  { %7490 = vst [vmem:[#allocation18_spill] sm:$0xff] %v7361_v45  ;;  %v5206_v54 = vpop.f32.mrf.mxu0 }
 0x24c   :  { %v5270_v32 = vpop.f32.mrf.mxu1 }
 0x24d   :  { %v5207_v34 = vpop.f32.mrf.mxu0 }
 0x24e   :  { %v5271_v3 = vpop.f32.mrf.mxu1  ;;  %v5208_v35 = vadd.f32 %v5207_v34, %v5206_v54 }
 0x24f   :  { %v5209_v21 = vpop.f32.mrf.mxu0  ;;  %v5272_v55 = vadd.f32 %v5271_v3, %v5270_v32  ;;  %v7501_v3 = vld [vmem:[#allocation4_spill] sm:$0xff] }
 0x250   :  { %v5273_v61 = vpop.f32.mrf.mxu1  ;;  %v3883_v2 = vadd.f32 %v5208_v35, %v7302_v62  ;;  %v5196_v62 = vadd.f32 %v5195_v42, %v5194_v44  ;;  %v5266_v35 = vadd.f32 %v5265_v7, %v5264_v18 }
 0x251   :  { %v5210_v16 = vpop.f32.mrf.mxu0 }
 0x252   :  { %v5274_v14 = vpop.f32.mrf.mxu1  ;;  %v5211_v10 = vadd.f32 %v5210_v16, %v5209_v21  ;;  %v3980_v63 = vadd.f32 %v5272_v55, %v3883_v2  ;;  %v3867_v42 = vadd.f32 %v5196_v62, %v7290_v25  ;;  %v7503_v2 = vld [vmem:[#allocation8_spill] sm:$0xff]  ;;  %v7508_v55 = vld [vmem:[#allocation7_spill] sm:$0xff] }
 0x253   :  { %v5212_v9 = vpop.f32.mrf.mxu0  ;;  %v5275_v19 = vadd.f32 %v5274_v14, %v5273_v61 }
 0x254   :  { %v7363_v46 = vpop.f32.mrf.mxu1 }
 0x255   :  { %7491 = vst [vmem:[#allocation19_spill] sm:$0xff] %v7363_v46  ;;  %v5213_v27 = vpop.f32.mrf.mxu0  ;;  %v3843_v46 = vadd.f32 %v5178_v48, %v7272_v37  ;;  %v5248_v37 = vadd.f32 %v7329_v6, %v7327_v39  ;;  %v3854_v48 = vadd.f32 %v5187_v17, %v7281_v52  ;;  %v3886_v39 = vadd.f32 %v5211_v10, %v7305_v5  ;;  %v7504_v10 = vld [vmem:[#allocation9_spill] sm:$0xff] }
 0x256   :  { %v7365_v20 = vpop.f32.mrf.mxu1  ;;  %v5214_v43 = vadd.f32 %v5213_v27, %v5212_v9  ;;  %v5199_v5 = vadd.f32 %v7355_v15, %v7351_v29  ;;  %v7497_v29 = vld [vmem:[#allocation10_spill] sm:$0xff]  ;;  %v7498_v15 = vld [vmem:[#allocation12_spill] sm:$0xff] }
 0x257   :  { %7492 = vst [vmem:[#allocation20_spill] sm:$0xff] %v7365_v20  ;;  %v7367_v1 = vpop.f32.mrf.mxu0  ;;  %v3846_v20 = vadd.f32 %v5181_v24, %v7275_v38  ;;  %v5205_v38 = vadd.f32 %v5204_v50, %v5203_v53  ;;  %v3940_v58 = vadd.f32 %v5242_v41, %v3843_v46  ;;  %v3951_v46 = vadd.f32 %v5251_v28, %v3854_v48  ;;  %v7500_v50 = vld [vmem:[#allocation15_spill] sm:$0xff] }
 0x258   :  { %7493 = vst [vmem:[#allocation21_spill] sm:$0xff] %v7367_v1  ;;  %v7369_v60 = vpop.f32.mrf.mxu1  ;;  %v3851_v1 = vadd.f32 %v5184_v23, %v7278_v8  ;;  %v3875_v8 = vadd.f32 %v5202_v36, %v7296_v11  ;;  %v3983_v7 = vadd.f32 %v5275_v19, %v3886_v39  ;;  %v5193_v53 = vadd.f32 %v7498_v15, %v7497_v29  ;;  %v7510_v39 = vld [vmem:[#allocation16_spill] sm:$0xff] }
 0x259   :  { %7494 = vst [vmem:[#allocation22_spill] sm:$0xff] %v7369_v60  ;;  %v7371_v33 = vpop.f32.mrf.mxu0  ;;  %v3943_v24 = vadd.f32 %v5245_v0, %v3846_v20  ;;  %v3878_v11 = vadd.f32 %v5205_v38, %v7299_v49  ;;  %v7496_v20 = vld [vmem:[#allocation6_spill] sm:$0xff]  ;;  %v3891_v21 = vadd.f32 %v5214_v43, %v7501_v3 }
 0x25a   :  { %v7373_v13 = vpop.f32.mrf.mxu1  ;;  %v3948_v23 = vadd.f32 %v5248_v37, %v3851_v1  ;;  %v3972_v44 = vadd.f32 %v5266_v35, %v3875_v8  ;;  %v7505_v37 = vld [vmem:[#allocation3_spill] sm:$0xff] }
 0x25b   :  { %v5218_v26 = vpop.f32.mrf.mxu0  ;;  %v3870_v48 = vadd.f32 %v5199_v5, %v7505_v37 }
 0x25c   :  { %v5282_v59 = vpop.f32.mrf.mxu1 }
 0x25d   :  { %v5219_v45 = vpop.f32.mrf.mxu0 }
 0x25e   :  { %v5283_v60 = vpop.f32.mrf.mxu1  ;;  %v5220_v52 = vadd.f32 %v5219_v45, %v5218_v26  ;;  %v7495_v26 = vld [vmem:[#allocation18_spill] sm:$0xff] }
 0x25f   :  { %v5221_v30 = vpop.f32.mrf.mxu0  ;;  %v5269_v1 = vadd.f32 %v7495_v26, %v7359_v4  ;;  %v7499_v4 = vld [vmem:[#allocation14_spill] sm:$0xff]  ;;  %v7502_v61 = vld [vmem:[#allocation21_spill] sm:$0xff]  ;;  %v5284_v14 = vadd.f32 %v5283_v60, %v5282_v59  ;;  %v7507_v60 = vld [vmem:[#allocation20_spill] sm:$0xff] }
 0x260   :  { %v7386_v31 = vpop.f32.mrf.mxu1  ;;  %v3899_v18 = vadd.f32 %v5220_v52, %v7496_v20  ;;  %v5260_v45 = vadd.f32 %v7500_v50, %v7499_v4  ;;  %v5217_v16 = vadd.f32 %v7371_v33, %v7502_v61  ;;  %v7506_v33 = vld [vmem:[#allocation19_spill] sm:$0xff]  ;;  %v7511_v52 = vld [vmem:[#allocation17_spill] sm:$0xff] }
 0x261   :  { %v5222_v40 = vpop.f32.mrf.mxu0  ;;  %v3975_v34 = vadd.f32 %v5269_v1, %v3878_v11  ;;  %v5278_v59 = vadd.f32 %v7507_v60, %v7506_v33  ;;  %v7515_v1 = vld [vmem:[#allocation22_spill] sm:$0xff] }
 0x262   :  { %v5286_v57 = vpop.f32.mrf.mxu1  ;;  %v5223_v27 = vadd.f32 %v5222_v40, %v5221_v30  ;;  %v5254_v30 = vadd.f32 %v7504_v10, %v7503_v2  ;;  %v3964_v8 = vadd.f32 %v5260_v45, %v3867_v42  ;;  %v3996_v62 = vadd.f32 %v5284_v14, %v3899_v18 }
 0x263   :  { %v5322_v6 = vpop.f32.mrf.mxu0 }
 0x264   :  { %v4045_v36 = vadd.f32 %v5322_v6, %v3948_v23  ;;  %v5330_v17 = vpop.f32.mrf.mxu1  ;;  %v3902_v40 = vadd.f32 %v5223_v27, %v7508_v55  ;;  %v7509_v23 = vld [vmem:[#allocation2_spill] sm:$0xff]  ;;  %v5263_v6 = vadd.f32 %v7511_v52, %v7510_v39  ;;  %v3956_v11 = vadd.f32 %v5254_v30, %v3859_v47 }
 0x265   :  { %v4077_v56 = vadd.f32 %v5330_v17, %v3980_v63  ;;  %v4036_v12 = vpop.f32.mrf.mxu0  ;;  %v3862_v35 = vadd.f32 %v5193_v53, %v7509_v23 }
 0x266   :  { %4101 = vst [vmem:[%s7473_s3 + $0x10] sm:$0xff] %v4045_v36  ;;  %v4037_v22 = vadd.f32 %v4036_v12, %v3940_v58  ;;  %v4068_v49 = vpop.f32.mrf.mxu1  ;;  %v7512_v36 = vld [vmem:[#allocation5_spill] sm:$0xff]  ;;  %v7513_v12 = vld [vmem:[#allocation11_spill] sm:$0xff]  ;;  %v3967_v26 = vadd.f32 %v5263_v6, %v3870_v48 }
 0x267   :  { %4109 = vst [vmem:[%s7473_s3 + $0x50] sm:$0xff] %v4077_v56  ;;  %v4069_v25 = vadd.f32 %v4068_v49, %v3972_v44  ;;  %v5323_v9 = vpop.f32.mrf.mxu0  ;;  %v3894_v17 = vadd.f32 %v5217_v16, %v7512_v36  ;;  %v3988_v56 = vadd.f32 %v5278_v59, %v3891_v21  ;;  %v7514_v44 = vld [vmem:[#allocation13_spill] sm:$0xff] }
 0x268   :  { %4099 = vst [vmem:[%s7473_s3] sm:$0xff] %v4037_v22  ;;  %v4048_v54 = vadd.f32 %v5323_v9, %v3951_v46  ;;  %v5331_v32 = vpop.f32.mrf.mxu1  ;;  %v5287_v46 = vadd.f32 %v5286_v57, %v7386_v31  ;;  %v5257_v42 = vadd.f32 %v7514_v44, %v7513_v12  ;;  %v5281_v31 = vadd.f32 %v7373_v13, %v7515_v1 }
 0x269   :  { %4107 = vst [vmem:[%s7473_s3 + $0x40] sm:$0xff] %v4069_v25  ;;  %v4080_v41 = vadd.f32 %v5331_v32, %v3983_v7  ;;  %v4039_v0 = vpop.f32.mrf.mxu0 }
 0x26a   :  { %4102 = vst [vmem:[%s7473_s3 + $0x18] sm:$0xff] %v4048_v54  ;;  %v4040_v51 = vadd.f32 %v4039_v0, %v3943_v24  ;;  %v4071_v38 = vpop.f32.mrf.mxu1  ;;  %v3999_v49 = vadd.f32 %v5287_v46, %v3902_v40  ;;  %v3959_v27 = vadd.f32 %v5257_v42, %v3862_v35  ;;  %v3991_v9 = vadd.f32 %v5281_v31, %v3894_v17 }
 0x26b   :  { %4110 = vst [vmem:[%s7473_s3 + $0x58] sm:$0xff] %v4080_v41  ;;  %v4072_v58 = vadd.f32 %v4071_v38, %v3975_v34  ;;  %v5326_v28 = vpop.f32.mrf.mxu0 }
 0x26c   :  { %4100 = vst [vmem:[%s7473_s3 + $0x8] sm:$0xff] %v4040_v51  ;;  %v4061_v24 = vadd.f32 %v5326_v28, %v3964_v8  ;;  %v5334_v63 = vpop.f32.mrf.mxu1 }
 0x26d   :  { %4108 = vst [vmem:[%s7473_s3 + $0x48] sm:$0xff] %v4072_v58  ;;  %v4093_v19 = vadd.f32 %v5334_v63, %v3996_v62  ;;  %v4052_v43 = vpop.f32.mrf.mxu0 }
 0x26e   :  { %4105 = vst [vmem:[%s7473_s3 + $0x30] sm:$0xff] %v4061_v24  ;;  %v4053_v5 = vadd.f32 %v4052_v43, %v3956_v11  ;;  %v4084_v47 = vpop.f32.mrf.mxu1 }
 0x26f   :  { %4113 = vst [vmem:[%s7473_s3 + $0x70] sm:$0xff] %v4093_v19  ;;  %v4085_v57 = vadd.f32 %v4084_v47, %v3988_v56  ;;  %v5327_v22 = vpop.f32.mrf.mxu0 }
 0x270   :  { %4103 = vst [vmem:[%s7473_s3 + $0x20] sm:$0xff] %v4053_v5  ;;  %v4064_v20 = vadd.f32 %v5327_v22, %v3967_v26  ;;  %v5335_v18 = vpop.f32.mrf.mxu1 }
 0x271   :  { %4111 = vst [vmem:[%s7473_s3 + $0x60] sm:$0xff] %v4085_v57  ;;  %v4096_v25 = vadd.f32 %v5335_v18, %v3999_v49  ;;  %v4055_v13 = vpop.f32.mrf.mxu0 }
 0x272   :  { %4106 = vst [vmem:[%s7473_s3 + $0x38] sm:$0xff] %v4064_v20  ;;  %v4056_v7 = vadd.f32 %v4055_v13, %v3959_v27  ;;  %v4087_v29 = vpop.f32.mrf.mxu1 }
 0x273   :  { %4114 = vst [vmem:[%s7473_s3 + $0x78] sm:$0xff] %v4096_v25  ;;  %v4088_v15 = vadd.f32 %v4087_v29, %v3991_v9 }
 0x274   :  { %4104 = vst [vmem:[%s7473_s3 + $0x28] sm:$0xff] %v4056_v7 }
 0x275   :  { %4112 = vst [vmem:[%s7473_s3 + $0x68] sm:$0xff] %v4088_v15 }

// kernel: network_forward.10
= control target key start
LH: loop header
LB: loop body
LE: loop exit
PB: predicated region body
PF: predicated region fallthrough
CT: control target
= control target key end

     0   :  { %s5755_s1 = inlined_call_operand.vmem [shape: bf16[2048,256], index: 1, kind: input, shape index: {}]   ;;  %s5756_s0 = inlined_call_operand.vmem [shape: bf16[128,2048], index: 0, kind: input, shape index: {}]   ;;  %s5757_s2 = inlined_call_operand.vmem [shape: f32[1,256], index: 2, kind: input, shape index: {}]   ;;  %s5758_s3 = inlined_call_operand.vmem [shape: f32[128,256], index: 3, kind: output, shape index: {}]  }
   0x1   :  { %v3686_v0 = vld [vmem:[%s5755_s1 + $0x74] ss:$8 sps:$4 sm:$0xff]   ;;  %v3690_v2 = vld [vmem:[%s5755_s1 + $0x70] ss:$8 sps:$4 sm:$0xff]   ;;  %v3692_v4 = vld [vmem:[%s5755_s1 + $0x64] ss:$8 sps:$4 sm:$0xff]  }
   0x2   :  { %v3688_v1 = vld [vmem:[%s5755_s1 + $0x174] ss:$8 sps:$4 sm:$0xff]   ;;  %2330 = vmatprep.subr.bf16.mxu0 %v3686_v0  ;;  %v3691_v3 = vld [vmem:[%s5755_s1 + $0x170] ss:$8 sps:$4 sm:$0xff]   ;;  %v3694_v5 = vld [vmem:[%s5755_s1 + $0x164] ss:$8 sps:$4 sm:$0xff]  }
   0x3   :  { %2443 = vmatprep.subr.bf16.mxu1 %v3688_v1  ;;  %2331 = vmatpush1.bf16.msra.mxu0 %v3690_v2  ;;  %v3696_v6 = vld [vmem:[%s5755_s1 + $0x60] ss:$8 sps:$4 sm:$0xff]   ;;  %v3698_v8 = vld [vmem:[%s5755_s1 + $0x54] ss:$8 sps:$4 sm:$0xff]   ;;  %v3702_v10 = vld [vmem:[%s5755_s1 + $0x50] ss:$8 sps:$4 sm:$0xff]  }
   0x4   :  { %2444 = vmatpush1.bf16.msra.mxu1 %v3691_v3  ;;  %2332 = vmatprep.subr.bf16.mxu0 %v3692_v4  ;;  %v3697_v7 = vld [vmem:[%s5755_s1 + $0x160] ss:$8 sps:$4 sm:$0xff]   ;;  %v3700_v9 = vld [vmem:[%s5755_s1 + $0x154] ss:$8 sps:$4 sm:$0xff]   ;;  %v3703_v11 = vld [vmem:[%s5755_s1 + $0x150] ss:$8 sps:$4 sm:$0xff]  }
   0x5   :  { %2445 = vmatprep.subr.bf16.mxu1 %v3694_v5  ;;  %v3704_v12 = vld [vmem:[%s5755_s1 + $0x44] ss:$8 sps:$4 sm:$0xff]   ;;  %v3708_v14 = vld [vmem:[%s5755_s1 + $0x40] ss:$8 sps:$4 sm:$0xff]   ;;  %v3710_v16 = vld [vmem:[%s5755_s1 + $0x34] ss:$8 sps:$4 sm:$0xff]  }
   0x6   :  { %v3706_v13 = vld [vmem:[%s5755_s1 + $0x144] ss:$8 sps:$4 sm:$0xff]   ;;  %v3709_v15 = vld [vmem:[%s5755_s1 + $0x140] ss:$8 sps:$4 sm:$0xff]   ;;  %v3712_v17 = vld [vmem:[%s5755_s1 + $0x134] ss:$8 sps:$4 sm:$0xff]  }
   0x7   :  { %2333 = vmatpush1.bf16.msra.mxu0 %v3696_v6  ;;  %v3714_v18 = vld [vmem:[%s5755_s1 + $0x30] ss:$8 sps:$4 sm:$0xff]   ;;  %v3716_v20 = vld [vmem:[%s5755_s1 + $0x24] ss:$8 sps:$4 sm:$0xff]   ;;  %v3720_v22 = vld [vmem:[%s5755_s1 + $0x20] ss:$8 sps:$4 sm:$0xff]  }
   0x8   :  { %2446 = vmatpush1.bf16.msra.mxu1 %v3697_v7  ;;  %2334 = vmatprep.subr.bf16.mxu0 %v3698_v8  ;;  %v3715_v19 = vld [vmem:[%s5755_s1 + $0x130] ss:$8 sps:$4 sm:$0xff]   ;;  %v3718_v21 = vld [vmem:[%s5755_s1 + $0x124] ss:$8 sps:$4 sm:$0xff]   ;;  %v3721_v23 = vld [vmem:[%s5755_s1 + $0x120] ss:$8 sps:$4 sm:$0xff]  }
   0x9   :  { %2447 = vmatprep.subr.bf16.mxu1 %v3700_v9  ;;  %v3722_v24 = vld [vmem:[%s5755_s1 + $0x14] ss:$8 sps:$4 sm:$0xff]   ;;  %v3726_v26 = vld [vmem:[%s5755_s1 + $0x10] ss:$8 sps:$4 sm:$0xff]   ;;  %v3728_v28 = vld [vmem:[%s5755_s1 + $0x4] ss:$8 sps:$4 sm:$0xff]  }
   0xa   :  { %v3724_v25 = vld [vmem:[%s5755_s1 + $0x114] ss:$8 sps:$4 sm:$0xff]   ;;  %v3727_v27 = vld [vmem:[%s5755_s1 + $0x110] ss:$8 sps:$4 sm:$0xff]   ;;  %v3730_v29 = vld [vmem:[%s5755_s1 + $0x104] ss:$8 sps:$4 sm:$0xff]  }
   0xb   :  { %2335 = vmatpush1.bf16.msra.mxu0 %v3702_v10  ;;  %v3732_v30 = vld [vmem:[%s5755_s1] ss:$8 sps:$4 sm:$0xff]   ;;  %v3734_v32 = vld [vmem:[%s5755_s1 + $0xf4] ss:$8 sps:$4 sm:$0xff]   ;;  %v3738_v34 = vld [vmem:[%s5755_s1 + $0xf0] ss:$8 sps:$4 sm:$0xff]  }
   0xc   :  { %2448 = vmatpush1.bf16.msra.mxu1 %v3703_v11  ;;  %2336 = vmatprep.subr.bf16.mxu0 %v3704_v12  ;;  %v3733_v31 = vld [vmem:[%s5755_s1 + $0x100] ss:$8 sps:$4 sm:$0xff]   ;;  %v3736_v33 = vld [vmem:[%s5755_s1 + $0x1f4] ss:$8 sps:$4 sm:$0xff]   ;;  %v3739_v35 = vld [vmem:[%s5755_s1 + $0x1f0] ss:$8 sps:$4 sm:$0xff]  }
   0xd   :  { %2449 = vmatprep.subr.bf16.mxu1 %v3706_v13  ;;  %v3740_v36 = vld [vmem:[%s5755_s1 + $0xe4] ss:$8 sps:$4 sm:$0xff]   ;;  %v3744_v38 = vld [vmem:[%s5755_s1 + $0xe0] ss:$8 sps:$4 sm:$0xff]   ;;  %v3746_v40 = vld [vmem:[%s5755_s1 + $0xd4] ss:$8 sps:$4 sm:$0xff]  }
   0xe   :  { %v3742_v37 = vld [vmem:[%s5755_s1 + $0x1e4] ss:$8 sps:$4 sm:$0xff]   ;;  %v3745_v39 = vld [vmem:[%s5755_s1 + $0x1e0] ss:$8 sps:$4 sm:$0xff]   ;;  %v3748_v41 = vld [vmem:[%s5755_s1 + $0x1d4] ss:$8 sps:$4 sm:$0xff]  }
   0xf   :  { %2337 = vmatpush1.bf16.msra.mxu0 %v3708_v14  ;;  %v3750_v42 = vld [vmem:[%s5755_s1 + $0xd0] ss:$8 sps:$4 sm:$0xff]   ;;  %v3752_v44 = vld [vmem:[%s5755_s1 + $0xc4] ss:$8 sps:$4 sm:$0xff]   ;;  %v3756_v46 = vld [vmem:[%s5755_s1 + $0xc0] ss:$8 sps:$4 sm:$0xff]  }
  0x10   :  { %2450 = vmatpush1.bf16.msra.mxu1 %v3709_v15  ;;  %2338 = vmatprep.subr.bf16.mxu0 %v3710_v16  ;;  %v3751_v43 = vld [vmem:[%s5755_s1 + $0x1d0] ss:$8 sps:$4 sm:$0xff]   ;;  %v3754_v45 = vld [vmem:[%s5755_s1 + $0x1c4] ss:$8 sps:$4 sm:$0xff]   ;;  %v3757_v47 = vld [vmem:[%s5755_s1 + $0x1c0] ss:$8 sps:$4 sm:$0xff]  }
  0x11   :  { %2451 = vmatprep.subr.bf16.mxu1 %v3712_v17  ;;  %v14_v48 = vld [vmem:[%s5756_s0] sm:$0xff]  ;;  %v15_v50 = vld [vmem:[%s5756_s0 + $0x8] sm:$0xff]  ;;  %v3758_v52 = vld [vmem:[%s5755_s1 + $0xb4] ss:$8 sps:$4 sm:$0xff]  }
  0x12   :  { %v22_v49 = vld [vmem:[%s5756_s0 + $0x40] sm:$0xff]  ;;  %v23_v51 = vld [vmem:[%s5756_s0 + $0x48] sm:$0xff]  ;;  %v3760_v54 = vld [vmem:[%s5755_s1 + $0x1b4] ss:$8 sps:$4 sm:$0xff]  }
  0x13   :  { %2339 = vmatpush1.bf16.msra.mxu0 %v3714_v18  ;;  %v3303_v53 = vcombine.high %v14_v48, %v22_v49  ;;  %v3305_v55 = vcombine.high %v15_v50, %v23_v51  ;;  %v3762_v56 = vld [vmem:[%s5755_s1 + $0xb0] ss:$8 sps:$4 sm:$0xff]   ;;  %v3764_v58 = vld [vmem:[%s5755_s1 + $0xa4] ss:$8 sps:$4 sm:$0xff]   ;;  %v3768_v60 = vld [vmem:[%s5755_s1 + $0xa0] ss:$8 sps:$4 sm:$0xff]   ;;  %v3302_v11 = vcombine.low %v14_v48, %v22_v49  ;;  %v3304_v12 = vcombine.low %v15_v50, %v23_v51 }
  0x14   :  { %2452 = vmatpush1.bf16.msra.mxu1 %v3715_v19  ;;  %2340 = vmatprep.subr.bf16.mxu0 %v3716_v20  ;;  %v3763_v57 = vld [vmem:[%s5755_s1 + $0x1b0] ss:$8 sps:$4 sm:$0xff]   ;;  %v3766_v59 = vld [vmem:[%s5755_s1 + $0x1a4] ss:$8 sps:$4 sm:$0xff]   ;;  %v3769_v61 = vld [vmem:[%s5755_s1 + $0x1a0] ss:$8 sps:$4 sm:$0xff]  }
  0x15   :  { %2453 = vmatprep.subr.bf16.mxu1 %v3718_v21  ;;  %2362 = vmatprep.mubr.bf16.mxu0 %v3303_v53  ;;  %v3770_v62 = vld [vmem:[%s5755_s1 + $0x94] ss:$8 sps:$4 sm:$0xff]   ;;  %v3774_v0 = vld [vmem:[%s5755_s1 + $0x90] ss:$8 sps:$4 sm:$0xff]   ;;  %v3776_v2 = vld [vmem:[%s5755_s1 + $0x84] ss:$8 sps:$4 sm:$0xff]  }
  0x16   :  { %2475 = vmatprep.mubr.bf16.mxu1 %v3305_v55  ;;  %v3772_v63 = vld [vmem:[%s5755_s1 + $0x194] ss:$8 sps:$4 sm:$0xff]   ;;  %v3775_v1 = vld [vmem:[%s5755_s1 + $0x190] ss:$8 sps:$4 sm:$0xff]   ;;  %v3778_v3 = vld [vmem:[%s5755_s1 + $0x184] ss:$8 sps:$4 sm:$0xff]  }
  0x17   :  { %2341 = vmatpush1.bf16.msra.mxu0 %v3720_v22  ;;  %v3780_v4 = vld [vmem:[%s5755_s1 + $0x80] ss:$8 sps:$4 sm:$0xff]   ;;  %v3784_v6 = vld [vmem:[%s5755_s1 + $0x274] ss:$8 sps:$4 sm:$0xff]   ;;  %v3782_v8 = vld [vmem:[%s5755_s1 + $0x270] ss:$8 sps:$4 sm:$0xff]  }
  0x18   :  { %2454 = vmatpush1.bf16.msra.mxu1 %v3721_v23  ;;  %2342 = vmatprep.subr.bf16.mxu0 %v3722_v24  ;;  %v3781_v5 = vld [vmem:[%s5755_s1 + $0x180] ss:$8 sps:$4 sm:$0xff]   ;;  %v3787_v7 = vld [vmem:[%s5755_s1 + $0x374] ss:$8 sps:$4 sm:$0xff]   ;;  %v3785_v9 = vld [vmem:[%s5755_s1 + $0x370] ss:$8 sps:$4 sm:$0xff]  }
  0x19   :  { %2455 = vmatprep.subr.bf16.mxu1 %v3724_v25  ;;  %v30_v10 = vld [vmem:[%s5756_s0 + $0x80] sm:$0xff]  ;;  %v31_v14 = vld [vmem:[%s5756_s0 + $0x88] sm:$0xff]  ;;  %v3796_v22 = vld [vmem:[%s5755_s1 + $0x254] ss:$8 sps:$4 sm:$0xff]  }
  0x1a   :  { %v38_v13 = vld [vmem:[%s5756_s0 + $0xc0] sm:$0xff]  ;;  %v39_v15 = vld [vmem:[%s5756_s0 + $0xc8] sm:$0xff]  ;;  %v3799_v23 = vld [vmem:[%s5755_s1 + $0x354] ss:$8 sps:$4 sm:$0xff]  }
  0x1b   :  { %2343 = vmatpush1.bf16.msra.mxu0 %v3726_v26  ;;  %v3790_v16 = vld [vmem:[%s5755_s1 + $0x264] ss:$8 sps:$4 sm:$0xff]   ;;  %v3319_v18 = vcombine.high %v30_v10, %v38_v13  ;;  %v3321_v19 = vcombine.high %v31_v14, %v39_v15  ;;  %v3788_v20 = vld [vmem:[%s5755_s1 + $0x260] ss:$8 sps:$4 sm:$0xff]   ;;  %v3794_v24 = vld [vmem:[%s5755_s1 + $0x250] ss:$8 sps:$4 sm:$0xff]  }
  0x1c   :  { %2456 = vmatpush1.bf16.msra.mxu1 %v3727_v27  ;;  %2344 = vmatprep.subr.bf16.mxu0 %v3728_v28  ;;  %v3793_v17 = vld [vmem:[%s5755_s1 + $0x364] ss:$8 sps:$4 sm:$0xff]   ;;  %v3791_v21 = vld [vmem:[%s5755_s1 + $0x360] ss:$8 sps:$4 sm:$0xff]   ;;  %v3797_v25 = vld [vmem:[%s5755_s1 + $0x350] ss:$8 sps:$4 sm:$0xff]   ;;  %v3318_v28 = vcombine.low %v30_v10, %v38_v13 }
  0x1d   :  { %2457 = vmatprep.subr.bf16.mxu1 %v3730_v29  ;;  %v46_v26 = vld [vmem:[%s5756_s0 + $0x100] sm:$0xff]  ;;  %v3320_v29 = vcombine.low %v31_v14, %v39_v15  ;;  %v3823_v55 = vld [vmem:[%s5755_s1 + $0x314] ss:$8 sps:$4 sm:$0xff]   ;;  %v103_v13 = vld [vmem:[%s5756_s0 + $0x2c8] sm:$0xff] }
  0x1e   :  { %v54_v27 = vld [vmem:[%s5756_s0 + $0x140] sm:$0xff]  ;;  %v3830_v14 = vld [vmem:[%s5755_s1 + $0x2f0] ss:$8 sps:$4 sm:$0xff]  }
  0x1f   :  { %2345 = vmatpush1.bf16.msra.mxu0 %v3732_v30  ;;  %v47_v30 = vld [vmem:[%s5756_s0 + $0x108] sm:$0xff]  ;;  %v3833_v15 = vld [vmem:[%s5755_s1 + $0x3f0] ss:$8 sps:$4 sm:$0xff]  }
  0x20   :  { %2458 = vmatpush1.bf16.msra.mxu1 %v3733_v31  ;;  %2346 = vmatprep.subr.bf16.mxu0 %v3734_v32  ;;  %v55_v31 = vld [vmem:[%s5756_s0 + $0x148] sm:$0xff] }
  0x21   :  { %2459 = vmatprep.subr.bf16.mxu1 %v3736_v33  ;;  %v3802_v32 = vld [vmem:[%s5755_s1 + $0x244] ss:$8 sps:$4 sm:$0xff]   ;;  %v3815_v53 = vld [vmem:[%s5755_s1 + $0x320] ss:$8 sps:$4 sm:$0xff]  }
  0x22   :  { %v3805_v33 = vld [vmem:[%s5755_s1 + $0x344] ss:$8 sps:$4 sm:$0xff]  }
  0x23   :  { %2347 = vmatpush2.bf16.msra.mxu0 %v3738_v34  ;;  %v3335_v34 = vcombine.high %v46_v26, %v54_v27  ;;  %v3814_v48 = vld [vmem:[%s5755_s1 + $0x224] ss:$8 sps:$4 sm:$0xff]  }
  0x24   :  { %2460 = vmatpush2.bf16.msra.mxu1 %v3739_v35  ;;  %2348 = vmatprep.subr.bf16.mxu0 %v3740_v36  ;;  %v3337_v35 = vcombine.high %v47_v30, %v55_v31  ;;  %v3800_v36 = vld [vmem:[%s5755_s1 + $0x240] ss:$8 sps:$4 sm:$0xff]   ;;  %v3817_v49 = vld [vmem:[%s5755_s1 + $0x324] ss:$8 sps:$4 sm:$0xff]  }
  0x25   :  { %2461 = vmatprep.subr.bf16.mxu1 %v3742_v37  ;;  %v3803_v37 = vld [vmem:[%s5755_s1 + $0x340] ss:$8 sps:$4 sm:$0xff]  }
  0x27   :  { %2349 = vmatpush2.bf16.msra.mxu0 %v3744_v38  ;;  %v3808_v38 = vld [vmem:[%s5755_s1 + $0x234] ss:$8 sps:$4 sm:$0xff]  }
  0x28   :  { %2462 = vmatpush2.bf16.msra.mxu1 %v3745_v39  ;;  %2350 = vmatprep.subr.bf16.mxu0 %v3746_v40  ;;  %v3811_v39 = vld [vmem:[%s5755_s1 + $0x334] ss:$8 sps:$4 sm:$0xff]   ;;  %v3806_v40 = vld [vmem:[%s5755_s1 + $0x230] ss:$8 sps:$4 sm:$0xff]  }
  0x29   :  { %2463 = vmatprep.subr.bf16.mxu1 %v3748_v41  ;;  %v3809_v41 = vld [vmem:[%s5755_s1 + $0x330] ss:$8 sps:$4 sm:$0xff]  }
  0x2b   :  { %2351 = vmatpush2.bf16.msra.mxu0 %v3750_v42  ;;  %v62_v42 = vld [vmem:[%s5756_s0 + $0x180] sm:$0xff] }
  0x2c   :  { %2464 = vmatpush2.bf16.msra.mxu1 %v3751_v43  ;;  %2352 = vmatprep.subr.bf16.mxu0 %v3752_v44  ;;  %v70_v43 = vld [vmem:[%s5756_s0 + $0x1c0] sm:$0xff]  ;;  %v3334_v44 = vcombine.low %v46_v26, %v54_v27 }
  0x2d   :  { %2465 = vmatprep.subr.bf16.mxu1 %v3754_v45  ;;  %v3336_v45 = vcombine.low %v47_v30, %v55_v31  ;;  %v3351_v50 = vcombine.high %v62_v42, %v70_v43  ;;  %v110_v26 = vld [vmem:[%s5756_s0 + $0x300] sm:$0xff]  ;;  %v111_v30 = vld [vmem:[%s5756_s0 + $0x308] sm:$0xff] }
  0x2e   :  { %v119_v31 = vld [vmem:[%s5756_s0 + $0x348] sm:$0xff] }
  0x2f   :  { %2353 = vmatpush2.bf16.msra.mxu0 %v3756_v46  ;;  %v63_v46 = vld [vmem:[%s5756_s0 + $0x188] sm:$0xff] }
  0x30   :  { %2466 = vmatpush2.bf16.msra.mxu1 %v3757_v47  ;;  %2354 = vmatprep.subr.bf16.mxu0 %v3758_v52  ;;  %v71_v47 = vld [vmem:[%s5756_s0 + $0x1c8] sm:$0xff] }
  0x31   :  { %2467 = vmatprep.subr.bf16.mxu1 %v3760_v54  ;;  %v3353_v51 = vcombine.high %v63_v46, %v71_v47  ;;  %v3812_v52 = vld [vmem:[%s5755_s1 + $0x220] ss:$8 sps:$4 sm:$0xff]   ;;  %v3820_v54 = vld [vmem:[%s5755_s1 + $0x214] ss:$8 sps:$4 sm:$0xff]  }
  0x33   :  { %2355 = vmatpush2.bf16.msra.mxu0 %v3762_v56  ;;  %v3818_v56 = vld [vmem:[%s5755_s1 + $0x210] ss:$8 sps:$4 sm:$0xff]  }
  0x34   :  { %2468 = vmatpush2.bf16.msra.mxu1 %v3763_v57  ;;  %2356 = vmatprep.subr.bf16.mxu0 %v3764_v58  ;;  %v78_v57 = vld [vmem:[%s5756_s0 + $0x200] sm:$0xff] }
  0x35   :  { %2469 = vmatprep.subr.bf16.mxu1 %v3766_v59  ;;  %v86_v58 = vld [vmem:[%s5756_s0 + $0x240] sm:$0xff]  ;;  %v3350_v59 = vcombine.low %v62_v42, %v70_v43 }
  0x36   :  { %v3366_v10 = vcombine.low %v78_v57, %v86_v58  ;;  %v126_v42 = vld [vmem:[%s5756_s0 + $0x380] sm:$0xff] }
  0x37   :  { %2357 = vmatpush2.bf16.msra.mxu0 %v3768_v60  ;;  %v3352_v60 = vcombine.low %v63_v46, %v71_v47  ;;  %v134_v43 = vld [vmem:[%s5756_s0 + $0x3c0] sm:$0xff]  ;;  %v127_v46 = vld [vmem:[%s5756_s0 + $0x388] sm:$0xff] }
  0x38   :  { %2470 = vmatpush2.bf16.msra.mxu1 %v3769_v61  ;;  %2358 = vmatprep.subr.bf16.mxu0 %v3770_v62  ;;  %v79_v61 = vld [vmem:[%s5756_s0 + $0x208] sm:$0xff] }
  0x39   :  { %2471 = vmatprep.subr.bf16.mxu1 %v3772_v63  ;;  %v87_v62 = vld [vmem:[%s5756_s0 + $0x248] sm:$0xff]  ;;  %v3821_v63 = vld [vmem:[%s5755_s1 + $0x310] ss:$8 sps:$4 sm:$0xff]  }
  0x3a   :  { %v135_v47 = vld [vmem:[%s5756_s0 + $0x3c8] sm:$0xff] }
  0x3b   :  { %2359 = vmatpush2.bf16.msra.mxu0 %v3774_v0  ;;  %v3826_v0 = vld [vmem:[%s5755_s1 + $0x204] ss:$8 sps:$4 sm:$0xff]  }
  0x3c   :  { %2472 = vmatpush2.bf16.msra.mxu1 %v3775_v1  ;;  %2360 = vmatprep.subr.bf16.mxu0 %v3776_v2  ;;  %v3829_v1 = vld [vmem:[%s5755_s1 + $0x304] ss:$8 sps:$4 sm:$0xff]   ;;  %v3367_v2 = vcombine.high %v78_v57, %v86_v58  ;;  %v3869_v57 = vld [vmem:[%s5755_s1 + $0x390] ss:$8 sps:$4 sm:$0xff]  }
  0x3d   :  { %2473 = vmatprep.subr.bf16.mxu1 %v3778_v3  ;;  %v3369_v3 = vcombine.high %v79_v61, %v87_v62  ;;  %v16_v58 = vld [vmem:[%s5756_s0 + $0x10] sm:$0xff] }
  0x3f   :  { %2361 = vmatpush2.bf16.msra.mxu0 %v3780_v4  ;;  %v3824_v4 = vld [vmem:[%s5755_s1 + $0x200] ss:$8 sps:$4 sm:$0xff]  }
  0x40   :  { %2474 = vmatpush2.bf16.msra.mxu1 %v3781_v5  ;;  %2556 = vmatprep.subr.bf16.mxu0 %v3784_v6  ;;  %v3827_v5 = vld [vmem:[%s5755_s1 + $0x300] ss:$8 sps:$4 sm:$0xff]   ;;  %v3832_v6 = vld [vmem:[%s5755_s1 + $0x2f4] ss:$8 sps:$4 sm:$0xff]  }
  0x41   :  { %2669 = vmatprep.subr.bf16.mxu1 %v3787_v7  ;;  %v3835_v7 = vld [vmem:[%s5755_s1 + $0x3f4] ss:$8 sps:$4 sm:$0xff]  }
  0x42   :  { %2363 = vmatmul.mubr.bf16.vlgmr.msra.gmra.mxu0 %v3302_v11  ;;  %v3368_v11 = vcombine.low %v79_v61, %v87_v62  ;;  %v3416_v61 = vcombine.low %v127_v46, %v135_v47  ;;  %v17_v62 = vld [vmem:[%s5756_s0 + $0x18] sm:$0xff] }
  0x43   :  { %2476 = vmatmul.mubr.bf16.vlgmr.msra.gmra.mxu1 %v3304_v12  ;;  %2557 = vmatpush1.bf16.msra.mxu0 %v3782_v8  ;;  %v94_v8 = vld [vmem:[%s5756_s0 + $0x280] sm:$0xff]  ;;  %v95_v12 = vld [vmem:[%s5756_s0 + $0x288] sm:$0xff] }
  0x44   :  { %2670 = vmatpush1.bf16.msra.mxu1 %v3785_v9  ;;  %2558 = vmatprep.subr.bf16.mxu0 %v3790_v16  ;;  %v102_v9 = vld [vmem:[%s5756_s0 + $0x2c0] sm:$0xff] }
  0x45   :  { %2671 = vmatprep.subr.bf16.mxu1 %v3793_v17  ;;  %2372 = vmatprep.mubr.bf16.mxu0 %v3319_v18  ;;  %v3838_v16 = vld [vmem:[%s5755_s1 + $0x2e4] ss:$8 sps:$4 sm:$0xff]   ;;  %v3383_v18 = vcombine.high %v94_v8, %v102_v9  ;;  %v3382_v27 = vcombine.low %v94_v8, %v102_v9  ;;  %v3878_v8 = vld [vmem:[%s5755_s1 + $0x470] ss:$8 sps:$4 sm:$0xff]  }
  0x46   :  { %2485 = vmatprep.mubr.bf16.mxu1 %v3321_v19  ;;  %v3841_v17 = vld [vmem:[%s5755_s1 + $0x3e4] ss:$8 sps:$4 sm:$0xff]   ;;  %v3385_v19 = vcombine.high %v95_v12, %v103_v13  ;;  %v32_v9 = vld [vmem:[%s5756_s0 + $0x90] sm:$0xff] }
  0x47   :  { %2559 = vmatpush1.bf16.msra.mxu0 %v3788_v20  ;;  %v3836_v20 = vld [vmem:[%s5755_s1 + $0x2e0] ss:$8 sps:$4 sm:$0xff]  }
  0x48   :  { %2672 = vmatpush1.bf16.msra.mxu1 %v3791_v21  ;;  %2560 = vmatprep.subr.bf16.mxu0 %v3796_v22  ;;  %v3839_v21 = vld [vmem:[%s5755_s1 + $0x3e0] ss:$8 sps:$4 sm:$0xff]   ;;  %v3844_v22 = vld [vmem:[%s5755_s1 + $0x2d4] ss:$8 sps:$4 sm:$0xff]  }
  0x49   :  { %2673 = vmatprep.subr.bf16.mxu1 %v3799_v23  ;;  %v3847_v23 = vld [vmem:[%s5755_s1 + $0x3d4] ss:$8 sps:$4 sm:$0xff]  }
  0x4a   :  { %2373 = vmatmul.mubr.bf16.gmra.mxu0 %v3318_v28  ;;  %v3384_v28 = vcombine.low %v95_v12, %v103_v13  ;;  %v33_v13 = vld [vmem:[%s5756_s0 + $0x98] sm:$0xff] }
  0x4b   :  { %2486 = vmatmul.mubr.bf16.gmra.mxu1 %v3320_v29  ;;  %2561 = vmatpush1.bf16.msra.mxu0 %v3794_v24  ;;  %v3842_v24 = vld [vmem:[%s5755_s1 + $0x2d0] ss:$8 sps:$4 sm:$0xff]   ;;  %v118_v29 = vld [vmem:[%s5756_s0 + $0x340] sm:$0xff] }
  0x4c   :  { %2674 = vmatpush1.bf16.msra.mxu1 %v3797_v25  ;;  %2562 = vmatprep.subr.bf16.mxu0 %v3802_v32  ;;  %v3845_v25 = vld [vmem:[%s5755_s1 + $0x3d0] ss:$8 sps:$4 sm:$0xff]   ;;  %v3850_v32 = vld [vmem:[%s5755_s1 + $0x2c4] ss:$8 sps:$4 sm:$0xff]  }
  0x4d   :  { %2675 = vmatprep.subr.bf16.mxu1 %v3805_v33  ;;  %2382 = vmatprep.mubr.bf16.mxu0 %v3335_v34  ;;  %v3853_v33 = vld [vmem:[%s5755_s1 + $0x3c4] ss:$8 sps:$4 sm:$0xff]   ;;  %v3399_v34 = vcombine.high %v110_v26, %v118_v29 }
  0x4e   :  { %2495 = vmatprep.mubr.bf16.mxu1 %v3337_v35  ;;  %v3401_v35 = vcombine.high %v111_v30, %v119_v31 }
  0x4f   :  { %2563 = vmatpush1.bf16.msra.mxu0 %v3800_v36  ;;  %v3848_v36 = vld [vmem:[%s5755_s1 + $0x2c0] ss:$8 sps:$4 sm:$0xff]  }
  0x50   :  { %2676 = vmatpush1.bf16.msra.mxu1 %v3803_v37  ;;  %2564 = vmatprep.subr.bf16.mxu0 %v3808_v38  ;;  %v3851_v37 = vld [vmem:[%s5755_s1 + $0x3c0] ss:$8 sps:$4 sm:$0xff]   ;;  %v3856_v38 = vld [vmem:[%s5755_s1 + $0x2b4] ss:$8 sps:$4 sm:$0xff]  }
  0x51   :  { %2677 = vmatprep.subr.bf16.mxu1 %v3811_v39  ;;  %v3859_v39 = vld [vmem:[%s5755_s1 + $0x3b4] ss:$8 sps:$4 sm:$0xff]  }
  0x52   :  { %2383 = vmatmul.mubr.bf16.gmra.mxu0 %v3334_v44  ;;  %v3398_v44 = vcombine.low %v110_v26, %v118_v29  ;;  %v57_v29 = vld [vmem:[%s5756_s0 + $0x158] sm:$0xff] }
  0x53   :  { %2496 = vmatmul.mubr.bf16.gmra.mxu1 %v3336_v45  ;;  %2565 = vmatpush1.bf16.msra.mxu0 %v3806_v40  ;;  %v3854_v40 = vld [vmem:[%s5755_s1 + $0x2b0] ss:$8 sps:$4 sm:$0xff]   ;;  %v3400_v45 = vcombine.low %v111_v30, %v119_v31 }
  0x54   :  { %2678 = vmatpush1.bf16.msra.mxu1 %v3809_v41  ;;  %2566 = vmatprep.subr.bf16.mxu0 %v3814_v48  ;;  %v3857_v41 = vld [vmem:[%s5755_s1 + $0x3b0] ss:$8 sps:$4 sm:$0xff]   ;;  %v3862_v48 = vld [vmem:[%s5755_s1 + $0x2a4] ss:$8 sps:$4 sm:$0xff]  }
  0x55   :  { %2679 = vmatprep.subr.bf16.mxu1 %v3817_v49  ;;  %2392 = vmatprep.mubr.bf16.mxu0 %v3351_v50  ;;  %v3865_v49 = vld [vmem:[%s5755_s1 + $0x3a4] ss:$8 sps:$4 sm:$0xff]   ;;  %v3415_v50 = vcombine.high %v126_v42, %v134_v43  ;;  %v3890_v30 = vld [vmem:[%s5755_s1 + $0x450] ss:$8 sps:$4 sm:$0xff]  }
  0x56   :  { %2505 = vmatprep.mubr.bf16.mxu1 %v3353_v51  ;;  %v3417_v51 = vcombine.high %v127_v46, %v135_v47  ;;  %v3893_v31 = vld [vmem:[%s5755_s1 + $0x550] ss:$8 sps:$4 sm:$0xff]  }
  0x57   :  { %2567 = vmatpush1.bf16.msra.mxu0 %v3812_v52  ;;  %v3860_v52 = vld [vmem:[%s5755_s1 + $0x2a0] ss:$8 sps:$4 sm:$0xff]   ;;  %v65_v46 = vld [vmem:[%s5756_s0 + $0x198] sm:$0xff] }
  0x58   :  { %2680 = vmatpush1.bf16.msra.mxu1 %v3815_v53  ;;  %2568 = vmatprep.subr.bf16.mxu0 %v3820_v54  ;;  %v3863_v53 = vld [vmem:[%s5755_s1 + $0x3a0] ss:$8 sps:$4 sm:$0xff]   ;;  %v3868_v54 = vld [vmem:[%s5755_s1 + $0x294] ss:$8 sps:$4 sm:$0xff]  }
  0x59   :  { %2681 = vmatprep.subr.bf16.mxu1 %v3823_v55  ;;  %v3871_v55 = vld [vmem:[%s5755_s1 + $0x394] ss:$8 sps:$4 sm:$0xff]  }
  0x5a   :  { %2393 = vmatmul.mubr.bf16.gmra.mxu0 %v3350_v59  ;;  %v24_v59 = vld [vmem:[%s5756_s0 + $0x50] sm:$0xff]  ;;  %v73_v47 = vld [vmem:[%s5756_s0 + $0x1d8] sm:$0xff] }
  0x5b   :  { %2506 = vmatmul.mubr.bf16.gmra.mxu1 %v3352_v60  ;;  %2569 = vmatpush1.bf16.msra.mxu0 %v3818_v56  ;;  %v3866_v56 = vld [vmem:[%s5755_s1 + $0x290] ss:$8 sps:$4 sm:$0xff]   ;;  %v3414_v60 = vcombine.low %v126_v42, %v134_v43 }
  0x5c   :  { %2682 = vmatpush1.bf16.msra.mxu1 %v3821_v63  ;;  %2570 = vmatprep.subr.bf16.mxu0 %v3826_v0  ;;  %v25_v63 = vld [vmem:[%s5756_s0 + $0x58] sm:$0xff]  ;;  %v3874_v0 = vld [vmem:[%s5755_s1 + $0x284] ss:$8 sps:$4 sm:$0xff]   ;;  %v64_v42 = vld [vmem:[%s5756_s0 + $0x190] sm:$0xff] }
  0x5d   :  { %2683 = vmatprep.subr.bf16.mxu1 %v3829_v1  ;;  %2402 = vmatprep.mubr.bf16.mxu0 %v3367_v2  ;;  %v3877_v1 = vld [vmem:[%s5755_s1 + $0x384] ss:$8 sps:$4 sm:$0xff]   ;;  %v3307_v2 = vcombine.high %v16_v58, %v24_v59  ;;  %v3308_v12 = vcombine.low %v17_v62, %v25_v63 }
  0x5e   :  { %2515 = vmatprep.mubr.bf16.mxu1 %v3369_v3  ;;  %v3309_v3 = vcombine.high %v17_v62, %v25_v63  ;;  %v81_v62 = vld [vmem:[%s5756_s0 + $0x218] sm:$0xff] }
  0x5f   :  { %2571 = vmatpush1.bf16.msra.mxu0 %v3824_v4  ;;  %v3872_v4 = vld [vmem:[%s5755_s1 + $0x280] ss:$8 sps:$4 sm:$0xff]   ;;  %v89_v63 = vld [vmem:[%s5756_s0 + $0x258] sm:$0xff] }
  0x60   :  { %2684 = vmatpush1.bf16.msra.mxu1 %v3827_v5  ;;  %2572 = vmatprep.subr.bf16.mxu0 %v3832_v6  ;;  %v3875_v5 = vld [vmem:[%s5755_s1 + $0x380] ss:$8 sps:$4 sm:$0xff]   ;;  %v3880_v6 = vld [vmem:[%s5755_s1 + $0x474] ss:$8 sps:$4 sm:$0xff]  }
  0x61   :  { %2685 = vmatprep.subr.bf16.mxu1 %v3835_v7  ;;  %v3883_v7 = vld [vmem:[%s5755_s1 + $0x574] ss:$8 sps:$4 sm:$0xff]  }
  0x62   :  { %2403 = vmatmul.mubr.bf16.gmra.mxu0 %v3366_v10  ;;  %v40_v10 = vld [vmem:[%s5756_s0 + $0xd0] sm:$0xff] }
  0x63   :  { %2516 = vmatmul.mubr.bf16.gmra.mxu1 %v3368_v11  ;;  %2573 = vmatpush2.bf16.msra.mxu0 %v3830_v14  ;;  %v3306_v11 = vcombine.low %v16_v58, %v24_v59  ;;  %v41_v14 = vld [vmem:[%s5756_s0 + $0xd8] sm:$0xff]  ;;  %v3322_v26 = vcombine.low %v32_v9, %v40_v10  ;;  %v80_v58 = vld [vmem:[%s5756_s0 + $0x210] sm:$0xff] }
  0x64   :  { %2686 = vmatpush2.bf16.msra.mxu1 %v3833_v15  ;;  %2574 = vmatprep.subr.bf16.mxu0 %v3838_v16  ;;  %v3881_v15 = vld [vmem:[%s5755_s1 + $0x570] ss:$8 sps:$4 sm:$0xff]   ;;  %v3886_v16 = vld [vmem:[%s5755_s1 + $0x464] ss:$8 sps:$4 sm:$0xff]  }
  0x65   :  { %2687 = vmatprep.subr.bf16.mxu1 %v3841_v17  ;;  %2412 = vmatprep.mubr.bf16.mxu0 %v3383_v18  ;;  %v3889_v17 = vld [vmem:[%s5755_s1 + $0x564] ss:$8 sps:$4 sm:$0xff]   ;;  %v3323_v18 = vcombine.high %v32_v9, %v40_v10  ;;  %v88_v59 = vld [vmem:[%s5756_s0 + $0x250] sm:$0xff] }
  0x66   :  { %2525 = vmatprep.mubr.bf16.mxu1 %v3385_v19  ;;  %v3325_v19 = vcombine.high %v33_v13, %v41_v14  ;;  %v3929_v9 = vld [vmem:[%s5755_s1 + $0x5f0] ss:$8 sps:$4 sm:$0xff]  }
  0x67   :  { %2575 = vmatpush2.bf16.msra.mxu0 %v3836_v20  ;;  %v3884_v20 = vld [vmem:[%s5755_s1 + $0x460] ss:$8 sps:$4 sm:$0xff]   ;;  %v96_v10 = vld [vmem:[%s5756_s0 + $0x290] sm:$0xff] }
  0x68   :  { %2688 = vmatpush2.bf16.msra.mxu1 %v3839_v21  ;;  %2576 = vmatprep.subr.bf16.mxu0 %v3844_v22  ;;  %v3887_v21 = vld [vmem:[%s5755_s1 + $0x560] ss:$8 sps:$4 sm:$0xff]   ;;  %v3892_v22 = vld [vmem:[%s5755_s1 + $0x454] ss:$8 sps:$4 sm:$0xff]  }
  0x69   :  { %2689 = vmatprep.subr.bf16.mxu1 %v3847_v23  ;;  %v3895_v23 = vld [vmem:[%s5755_s1 + $0x554] ss:$8 sps:$4 sm:$0xff]  }
  0x6a   :  { %2413 = vmatmul.mubr.bf16.gmra.mxu0 %v3382_v27  ;;  %v3324_v27 = vcombine.low %v33_v13, %v41_v14  ;;  %v3372_v13 = vcombine.low %v81_v62, %v89_v63  ;;  %v97_v14 = vld [vmem:[%s5756_s0 + $0x298] sm:$0xff] }
  0x6b   :  { %2526 = vmatmul.mubr.bf16.gmra.mxu1 %v3384_v28  ;;  %2577 = vmatpush2.bf16.msra.mxu0 %v3842_v24  ;;  %v48_v24 = vld [vmem:[%s5756_s0 + $0x110] sm:$0xff]  ;;  %v49_v28 = vld [vmem:[%s5756_s0 + $0x118] sm:$0xff] }
  0x6c   :  { %2690 = vmatpush2.bf16.msra.mxu1 %v3845_v25  ;;  %2578 = vmatprep.subr.bf16.mxu0 %v3850_v32  ;;  %v56_v25 = vld [vmem:[%s5756_s0 + $0x150] sm:$0xff]  ;;  %v3898_v32 = vld [vmem:[%s5755_s1 + $0x444] ss:$8 sps:$4 sm:$0xff]  }
  0x6d   :  { %2691 = vmatprep.subr.bf16.mxu1 %v3853_v33  ;;  %2422 = vmatprep.mubr.bf16.mxu0 %v3399_v34  ;;  %v3901_v33 = vld [vmem:[%s5755_s1 + $0x544] ss:$8 sps:$4 sm:$0xff]   ;;  %v3339_v34 = vcombine.high %v48_v24, %v56_v25  ;;  %v3338_v43 = vcombine.low %v48_v24, %v56_v25  ;;  %v3938_v24 = vld [vmem:[%s5755_s1 + $0x4d0] ss:$8 sps:$4 sm:$0xff]  }
  0x6e   :  { %2535 = vmatprep.mubr.bf16.mxu1 %v3401_v35  ;;  %v3341_v35 = vcombine.high %v49_v28, %v57_v29  ;;  %v112_v25 = vld [vmem:[%s5756_s0 + $0x310] sm:$0xff] }
  0x6f   :  { %2579 = vmatpush2.bf16.msra.mxu0 %v3848_v36  ;;  %v3896_v36 = vld [vmem:[%s5755_s1 + $0x440] ss:$8 sps:$4 sm:$0xff]  }
  0x70   :  { %2692 = vmatpush2.bf16.msra.mxu1 %v3851_v37  ;;  %2580 = vmatprep.subr.bf16.mxu0 %v3856_v38  ;;  %v3899_v37 = vld [vmem:[%s5755_s1 + $0x540] ss:$8 sps:$4 sm:$0xff]   ;;  %v3904_v38 = vld [vmem:[%s5755_s1 + $0x434] ss:$8 sps:$4 sm:$0xff]  }
  0x71   :  { %2693 = vmatprep.subr.bf16.mxu1 %v3859_v39  ;;  %v3907_v39 = vld [vmem:[%s5755_s1 + $0x534] ss:$8 sps:$4 sm:$0xff]  }
  0x72   :  { %2423 = vmatmul.mubr.bf16.gmra.mxu0 %v3398_v44  ;;  %v3340_v44 = vcombine.low %v49_v28, %v57_v29  ;;  %v113_v29 = vld [vmem:[%s5756_s0 + $0x318] sm:$0xff] }
  0x73   :  { %2536 = vmatmul.mubr.bf16.gmra.mxu1 %v3400_v45  ;;  %2581 = vmatpush2.bf16.msra.mxu0 %v3854_v40  ;;  %v3902_v40 = vld [vmem:[%s5755_s1 + $0x430] ss:$8 sps:$4 sm:$0xff]  }
  0x74   :  { %2694 = vmatpush2.bf16.msra.mxu1 %v3857_v41  ;;  %2582 = vmatprep.subr.bf16.mxu0 %v3862_v48  ;;  %v3905_v41 = vld [vmem:[%s5755_s1 + $0x530] ss:$8 sps:$4 sm:$0xff]   ;;  %v3910_v48 = vld [vmem:[%s5755_s1 + $0x424] ss:$8 sps:$4 sm:$0xff]  }
  0x75   :  { %2695 = vmatprep.subr.bf16.mxu1 %v3865_v49  ;;  %2432 = vmatprep.mubr.bf16.mxu0 %v3415_v50  ;;  %v72_v45 = vld [vmem:[%s5756_s0 + $0x1d0] sm:$0xff]  ;;  %v3913_v49 = vld [vmem:[%s5755_s1 + $0x524] ss:$8 sps:$4 sm:$0xff]  }
  0x76   :  { %2545 = vmatprep.mubr.bf16.mxu1 %v3417_v51  ;;  %v3355_v50 = vcombine.high %v64_v42, %v72_v45  ;;  %v3357_v51 = vcombine.high %v65_v46, %v73_v47 }
  0x77   :  { %2583 = vmatpush2.bf16.msra.mxu0 %v3860_v52  ;;  %v3908_v52 = vld [vmem:[%s5755_s1 + $0x420] ss:$8 sps:$4 sm:$0xff]  }
  0x78   :  { %2696 = vmatpush2.bf16.msra.mxu1 %v3863_v53  ;;  %2584 = vmatprep.subr.bf16.mxu0 %v3868_v54  ;;  %v3911_v53 = vld [vmem:[%s5755_s1 + $0x520] ss:$8 sps:$4 sm:$0xff]   ;;  %v3916_v54 = vld [vmem:[%s5755_s1 + $0x414] ss:$8 sps:$4 sm:$0xff]  }
  0x79   :  { %2697 = vmatprep.subr.bf16.mxu1 %v3871_v55  ;;  %v3919_v55 = vld [vmem:[%s5755_s1 + $0x514] ss:$8 sps:$4 sm:$0xff]  }
  0x7a   :  { %2433 = vmatmul.mubr.bf16.gmra.mxu0 %v3414_v60  ;;  %v3354_v60 = vcombine.low %v64_v42, %v72_v45  ;;  %v137_v45 = vld [vmem:[%s5756_s0 + $0x3d8] sm:$0xff] }
  0x7b   :  { %2546 = vmatmul.mubr.bf16.gmra.mxu1 %v3416_v61  ;;  %2585 = vmatpush2.bf16.msra.mxu0 %v3866_v56  ;;  %v3914_v56 = vld [vmem:[%s5755_s1 + $0x410] ss:$8 sps:$4 sm:$0xff]   ;;  %v3356_v61 = vcombine.low %v65_v46, %v73_v47 }
  0x7c   :  { %2698 = vmatpush2.bf16.msra.mxu1 %v3869_v57  ;;  %2586 = vmatprep.subr.bf16.mxu0 %v3874_v0  ;;  %v3917_v57 = vld [vmem:[%s5755_s1 + $0x510] ss:$8 sps:$4 sm:$0xff]   ;;  %v3922_v0 = vld [vmem:[%s5755_s1 + $0x404] ss:$8 sps:$4 sm:$0xff]  }
  0x7d   :  { %2699 = vmatprep.subr.bf16.mxu1 %v3877_v1  ;;  %2588 = vmatprep.mubr.bf16.mxu0 %v3307_v2  ;;  %v3925_v1 = vld [vmem:[%s5755_s1 + $0x504] ss:$8 sps:$4 sm:$0xff]   ;;  %v3371_v2 = vcombine.high %v80_v58, %v88_v59  ;;  %v3950_v46 = vld [vmem:[%s5755_s1 + $0x4b0] ss:$8 sps:$4 sm:$0xff]  }
  0x7e   :  { %2701 = vmatprep.mubr.bf16.mxu1 %v3309_v3  ;;  %v3373_v3 = vcombine.high %v81_v62, %v89_v63  ;;  %v3953_v47 = vld [vmem:[%s5755_s1 + $0x5b0] ss:$8 sps:$4 sm:$0xff]   ;;  %v19_v62 = vld [vmem:[%s5756_s0 + $0x28] sm:$0xff] }
  0x7f   :  { %2587 = vmatpush2.bf16.msra.mxu0 %v3872_v4  ;;  %v3920_v4 = vld [vmem:[%s5755_s1 + $0x400] ss:$8 sps:$4 sm:$0xff]  }
  0x80   :  { %2700 = vmatpush2.bf16.msra.mxu1 %v3875_v5  ;;  %2782 = vmatprep.subr.bf16.mxu0 %v3880_v6  ;;  %v3923_v5 = vld [vmem:[%s5755_s1 + $0x500] ss:$8 sps:$4 sm:$0xff]   ;;  %v3928_v6 = vld [vmem:[%s5755_s1 + $0x4f4] ss:$8 sps:$4 sm:$0xff]  }
  0x81   :  { %2895 = vmatprep.subr.bf16.mxu1 %v3883_v7  ;;  %v3931_v7 = vld [vmem:[%s5755_s1 + $0x5f4] ss:$8 sps:$4 sm:$0xff]   ;;  %v27_v63 = vld [vmem:[%s5756_s0 + $0x68] sm:$0xff] }
  0x82   :  { %2589 = vmatmul.mubr.bf16.vlgmr.msra.gmra.mxu0 %v3306_v11  ;;  %v104_v11 = vld [vmem:[%s5756_s0 + $0x2d0] sm:$0xff] }
  0x83   :  { %2702 = vmatmul.mubr.bf16.vlgmr.msra.gmra.mxu1 %v3308_v12  ;;  %2783 = vmatpush1.bf16.msra.mxu0 %v3878_v8  ;;  %v3926_v8 = vld [vmem:[%s5755_s1 + $0x4f0] ss:$8 sps:$4 sm:$0xff]   ;;  %v3370_v12 = vcombine.low %v80_v58, %v88_v59  ;;  %v18_v58 = vld [vmem:[%s5756_s0 + $0x20] sm:$0xff] }
  0x84   :  { %2896 = vmatpush1.bf16.msra.mxu1 %v3881_v15  ;;  %2784 = vmatprep.subr.bf16.mxu0 %v3886_v16  ;;  %v105_v15 = vld [vmem:[%s5756_s0 + $0x2d8] sm:$0xff]  ;;  %v3934_v16 = vld [vmem:[%s5755_s1 + $0x4e4] ss:$8 sps:$4 sm:$0xff]  }
  0x85   :  { %2897 = vmatprep.subr.bf16.mxu1 %v3889_v17  ;;  %2598 = vmatprep.mubr.bf16.mxu0 %v3323_v18  ;;  %v3937_v17 = vld [vmem:[%s5755_s1 + $0x5e4] ss:$8 sps:$4 sm:$0xff]   ;;  %v3387_v18 = vcombine.high %v96_v10, %v104_v11  ;;  %v3388_v28 = vcombine.low %v97_v14, %v105_v15 }
  0x86   :  { %2711 = vmatprep.mubr.bf16.mxu1 %v3325_v19  ;;  %v3389_v19 = vcombine.high %v97_v14, %v105_v15  ;;  %v35_v14 = vld [vmem:[%s5756_s0 + $0xa8] sm:$0xff] }
  0x87   :  { %2785 = vmatpush1.bf16.msra.mxu0 %v3884_v20  ;;  %v3932_v20 = vld [vmem:[%s5755_s1 + $0x4e0] ss:$8 sps:$4 sm:$0xff]  }
  0x88   :  { %2898 = vmatpush1.bf16.msra.mxu1 %v3887_v21  ;;  %2786 = vmatprep.subr.bf16.mxu0 %v3892_v22  ;;  %v3935_v21 = vld [vmem:[%s5755_s1 + $0x5e0] ss:$8 sps:$4 sm:$0xff]   ;;  %v3940_v22 = vld [vmem:[%s5755_s1 + $0x4d4] ss:$8 sps:$4 sm:$0xff]  }
  0x89   :  { %2899 = vmatprep.subr.bf16.mxu1 %v3895_v23  ;;  %v3943_v23 = vld [vmem:[%s5755_s1 + $0x5d4] ss:$8 sps:$4 sm:$0xff]   ;;  %v43_v15 = vld [vmem:[%s5756_s0 + $0xe8] sm:$0xff] }
  0x8a   :  { %2599 = vmatmul.mubr.bf16.gmra.mxu0 %v3322_v26  ;;  %v120_v26 = vld [vmem:[%s5756_s0 + $0x350] sm:$0xff] }
  0x8b   :  { %2712 = vmatmul.mubr.bf16.gmra.mxu1 %v3324_v27  ;;  %2787 = vmatpush1.bf16.msra.mxu0 %v3890_v30  ;;  %v3386_v27 = vcombine.low %v96_v10, %v104_v11  ;;  %v121_v30 = vld [vmem:[%s5756_s0 + $0x358] sm:$0xff]  ;;  %v3402_v42 = vcombine.low %v112_v25, %v120_v26  ;;  %v34_v10 = vld [vmem:[%s5756_s0 + $0xa0] sm:$0xff] }
  0x8c   :  { %2900 = vmatpush1.bf16.msra.mxu1 %v3893_v31  ;;  %2788 = vmatprep.subr.bf16.mxu0 %v3898_v32  ;;  %v3941_v31 = vld [vmem:[%s5755_s1 + $0x5d0] ss:$8 sps:$4 sm:$0xff]   ;;  %v3946_v32 = vld [vmem:[%s5755_s1 + $0x4c4] ss:$8 sps:$4 sm:$0xff]  }
  0x8d   :  { %2901 = vmatprep.subr.bf16.mxu1 %v3901_v33  ;;  %2608 = vmatprep.mubr.bf16.mxu0 %v3339_v34  ;;  %v3949_v33 = vld [vmem:[%s5755_s1 + $0x5c4] ss:$8 sps:$4 sm:$0xff]   ;;  %v3403_v34 = vcombine.high %v112_v25, %v120_v26  ;;  %v3989_v25 = vld [vmem:[%s5755_s1 + $0x750] ss:$8 sps:$4 sm:$0xff]  }
  0x8e   :  { %2721 = vmatprep.mubr.bf16.mxu1 %v3341_v35  ;;  %v3405_v35 = vcombine.high %v113_v29, %v121_v30  ;;  %v42_v11 = vld [vmem:[%s5756_s0 + $0xe0] sm:$0xff] }
  0x8f   :  { %2789 = vmatpush1.bf16.msra.mxu0 %v3896_v36  ;;  %v3944_v36 = vld [vmem:[%s5755_s1 + $0x4c0] ss:$8 sps:$4 sm:$0xff]  }
  0x90   :  { %2902 = vmatpush1.bf16.msra.mxu1 %v3899_v37  ;;  %2790 = vmatprep.subr.bf16.mxu0 %v3904_v38  ;;  %v3947_v37 = vld [vmem:[%s5755_s1 + $0x5c0] ss:$8 sps:$4 sm:$0xff]   ;;  %v3952_v38 = vld [vmem:[%s5755_s1 + $0x4b4] ss:$8 sps:$4 sm:$0xff]  }
  0x91   :  { %2903 = vmatprep.subr.bf16.mxu1 %v3907_v39  ;;  %v3955_v39 = vld [vmem:[%s5755_s1 + $0x5b4] ss:$8 sps:$4 sm:$0xff]   ;;  %v50_v26 = vld [vmem:[%s5756_s0 + $0x120] sm:$0xff] }
  0x92   :  { %2609 = vmatmul.mubr.bf16.gmra.mxu0 %v3338_v43  ;;  %v3404_v43 = vcombine.low %v113_v29, %v121_v30  ;;  %v3328_v29 = vcombine.low %v35_v14, %v43_v15  ;;  %v51_v30 = vld [vmem:[%s5756_s0 + $0x128] sm:$0xff] }
  0x93   :  { %2722 = vmatmul.mubr.bf16.gmra.mxu1 %v3340_v44  ;;  %2791 = vmatpush1.bf16.msra.mxu0 %v3902_v40  ;;  %v128_v40 = vld [vmem:[%s5756_s0 + $0x390] sm:$0xff]  ;;  %v129_v44 = vld [vmem:[%s5756_s0 + $0x398] sm:$0xff] }
  0x94   :  { %2904 = vmatpush1.bf16.msra.mxu1 %v3905_v41  ;;  %2792 = vmatprep.subr.bf16.mxu0 %v3910_v48  ;;  %v136_v41 = vld [vmem:[%s5756_s0 + $0x3d0] sm:$0xff]  ;;  %v3958_v48 = vld [vmem:[%s5755_s1 + $0x4a4] ss:$8 sps:$4 sm:$0xff]  }
  0x95   :  { %2905 = vmatprep.subr.bf16.mxu1 %v3913_v49  ;;  %2618 = vmatprep.mubr.bf16.mxu0 %v3355_v50  ;;  %v3961_v49 = vld [vmem:[%s5755_s1 + $0x5a4] ss:$8 sps:$4 sm:$0xff]   ;;  %v3419_v50 = vcombine.high %v128_v40, %v136_v41  ;;  %v3418_v59 = vcombine.low %v128_v40, %v136_v41 }
  0x96   :  { %2731 = vmatprep.mubr.bf16.mxu1 %v3357_v51  ;;  %v3421_v51 = vcombine.high %v129_v44, %v137_v45  ;;  %v66_v40 = vld [vmem:[%s5756_s0 + $0x1a0] sm:$0xff] }
  0x97   :  { %2793 = vmatpush1.bf16.msra.mxu0 %v3908_v52  ;;  %v3956_v52 = vld [vmem:[%s5755_s1 + $0x4a0] ss:$8 sps:$4 sm:$0xff]  }
  0x98   :  { %2906 = vmatpush1.bf16.msra.mxu1 %v3911_v53  ;;  %2794 = vmatprep.subr.bf16.mxu0 %v3916_v54  ;;  %v3959_v53 = vld [vmem:[%s5755_s1 + $0x5a0] ss:$8 sps:$4 sm:$0xff]   ;;  %v3964_v54 = vld [vmem:[%s5755_s1 + $0x494] ss:$8 sps:$4 sm:$0xff]  }
  0x99   :  { %2907 = vmatprep.subr.bf16.mxu1 %v3919_v55  ;;  %v3967_v55 = vld [vmem:[%s5755_s1 + $0x594] ss:$8 sps:$4 sm:$0xff]  }
  0x9a   :  { %2619 = vmatmul.mubr.bf16.gmra.mxu0 %v3354_v60  ;;  %v3420_v60 = vcombine.low %v129_v44, %v137_v45  ;;  %v67_v44 = vld [vmem:[%s5756_s0 + $0x1a8] sm:$0xff] }
  0x9b   :  { %2732 = vmatmul.mubr.bf16.gmra.mxu1 %v3356_v61  ;;  %2795 = vmatpush1.bf16.msra.mxu0 %v3914_v56  ;;  %v3962_v56 = vld [vmem:[%s5755_s1 + $0x490] ss:$8 sps:$4 sm:$0xff]   ;;  %v26_v61 = vld [vmem:[%s5756_s0 + $0x60] sm:$0xff]  ;;  %v75_v45 = vld [vmem:[%s5756_s0 + $0x1e8] sm:$0xff] }
  0x9c   :  { %2908 = vmatpush1.bf16.msra.mxu1 %v3917_v57  ;;  %2796 = vmatprep.subr.bf16.mxu0 %v3922_v0  ;;  %v3965_v57 = vld [vmem:[%s5755_s1 + $0x590] ss:$8 sps:$4 sm:$0xff]   ;;  %v3970_v0 = vld [vmem:[%s5755_s1 + $0x484] ss:$8 sps:$4 sm:$0xff]  }
  0x9d   :  { %2909 = vmatprep.subr.bf16.mxu1 %v3925_v1  ;;  %2628 = vmatprep.mubr.bf16.mxu0 %v3371_v2  ;;  %v3973_v1 = vld [vmem:[%s5755_s1 + $0x584] ss:$8 sps:$4 sm:$0xff]   ;;  %v3311_v2 = vcombine.high %v18_v58, %v26_v61 }
  0x9e   :  { %2741 = vmatprep.mubr.bf16.mxu1 %v3373_v3  ;;  %v3313_v3 = vcombine.high %v19_v62, %v27_v63 }
  0x9f   :  { %2797 = vmatpush1.bf16.msra.mxu0 %v3920_v4  ;;  %v3968_v4 = vld [vmem:[%s5755_s1 + $0x480] ss:$8 sps:$4 sm:$0xff]  }
  0xa0   :  { %2910 = vmatpush1.bf16.msra.mxu1 %v3923_v5  ;;  %2798 = vmatprep.subr.bf16.mxu0 %v3928_v6  ;;  %v3971_v5 = vld [vmem:[%s5755_s1 + $0x580] ss:$8 sps:$4 sm:$0xff]   ;;  %v3976_v6 = vld [vmem:[%s5755_s1 + $0x674] ss:$8 sps:$4 sm:$0xff]  }
  0xa1   :  { %2911 = vmatprep.subr.bf16.mxu1 %v3931_v7  ;;  %v3979_v7 = vld [vmem:[%s5755_s1 + $0x774] ss:$8 sps:$4 sm:$0xff]  }
  0xa2   :  { %2629 = vmatmul.mubr.bf16.gmra.mxu0 %v3370_v12  ;;  %v3310_v12 = vcombine.low %v18_v58, %v26_v61  ;;  %v3360_v58 = vcombine.low %v67_v44, %v75_v45  ;;  %v91_v61 = vld [vmem:[%s5756_s0 + $0x268] sm:$0xff] }
  0xa3   :  { %2742 = vmatmul.mubr.bf16.gmra.mxu1 %v3372_v13  ;;  %2799 = vmatpush2.bf16.msra.mxu0 %v3926_v8  ;;  %v3974_v8 = vld [vmem:[%s5755_s1 + $0x670] ss:$8 sps:$4 sm:$0xff]   ;;  %v3312_v13 = vcombine.low %v19_v62, %v27_v63 }
  0xa4   :  { %2912 = vmatpush2.bf16.msra.mxu1 %v3929_v9  ;;  %2800 = vmatprep.subr.bf16.mxu0 %v3934_v16  ;;  %v3977_v9 = vld [vmem:[%s5755_s1 + $0x770] ss:$8 sps:$4 sm:$0xff]   ;;  %v3982_v16 = vld [vmem:[%s5755_s1 + $0x664] ss:$8 sps:$4 sm:$0xff]  }
  0xa5   :  { %2913 = vmatprep.subr.bf16.mxu1 %v3937_v17  ;;  %2638 = vmatprep.mubr.bf16.mxu0 %v3387_v18  ;;  %v3985_v17 = vld [vmem:[%s5755_s1 + $0x764] ss:$8 sps:$4 sm:$0xff]   ;;  %v3327_v18 = vcombine.high %v34_v10, %v42_v11  ;;  %v4010_v62 = vld [vmem:[%s5755_s1 + $0x610] ss:$8 sps:$4 sm:$0xff]  }
  0xa6   :  { %2751 = vmatprep.mubr.bf16.mxu1 %v3389_v19  ;;  %v3329_v19 = vcombine.high %v35_v14, %v43_v15  ;;  %v4013_v63 = vld [vmem:[%s5755_s1 + $0x710] ss:$8 sps:$4 sm:$0xff]  }
  0xa7   :  { %2801 = vmatpush2.bf16.msra.mxu0 %v3932_v20  ;;  %v3980_v20 = vld [vmem:[%s5755_s1 + $0x660] ss:$8 sps:$4 sm:$0xff]   ;;  %v4022_v14 = vld [vmem:[%s5755_s1 + $0x6f0] ss:$8 sps:$4 sm:$0xff]  }
  0xa8   :  { %2914 = vmatpush2.bf16.msra.mxu1 %v3935_v21  ;;  %2802 = vmatprep.subr.bf16.mxu0 %v3940_v22  ;;  %v3983_v21 = vld [vmem:[%s5755_s1 + $0x760] ss:$8 sps:$4 sm:$0xff]   ;;  %v3988_v22 = vld [vmem:[%s5755_s1 + $0x654] ss:$8 sps:$4 sm:$0xff]   ;;  %v4025_v15 = vld [vmem:[%s5755_s1 + $0x7f0] ss:$8 sps:$4 sm:$0xff]  }
  0xa9   :  { %2915 = vmatprep.subr.bf16.mxu1 %v3943_v23  ;;  %v3991_v23 = vld [vmem:[%s5755_s1 + $0x754] ss:$8 sps:$4 sm:$0xff]  }
  0xaa   :  { %2639 = vmatmul.mubr.bf16.gmra.mxu0 %v3386_v27  ;;  %v58_v27 = vld [vmem:[%s5756_s0 + $0x160] sm:$0xff] }
  0xab   :  { %2752 = vmatmul.mubr.bf16.gmra.mxu1 %v3388_v28  ;;  %2803 = vmatpush2.bf16.msra.mxu0 %v3938_v24  ;;  %v3986_v24 = vld [vmem:[%s5755_s1 + $0x650] ss:$8 sps:$4 sm:$0xff]   ;;  %v3326_v28 = vcombine.low %v34_v10, %v42_v11  ;;  %v3342_v41 = vcombine.low %v50_v26, %v58_v27  ;;  %v106_v11 = vld [vmem:[%s5756_s0 + $0x2e0] sm:$0xff] }
  0xac   :  { %2916 = vmatpush2.bf16.msra.mxu1 %v3941_v31  ;;  %2804 = vmatprep.subr.bf16.mxu0 %v3946_v32  ;;  %v59_v31 = vld [vmem:[%s5756_s0 + $0x168] sm:$0xff] }
  0xad   :  { %2917 = vmatprep.subr.bf16.mxu1 %v3949_v33  ;;  %2648 = vmatprep.mubr.bf16.mxu0 %v3403_v34  ;;  %v3994_v32 = vld [vmem:[%s5755_s1 + $0x644] ss:$8 sps:$4 sm:$0xff]   ;;  %v3343_v34 = vcombine.high %v50_v26, %v58_v27 }
  0xae   :  { %2761 = vmatprep.mubr.bf16.mxu1 %v3405_v35  ;;  %v3997_v33 = vld [vmem:[%s5755_s1 + $0x744] ss:$8 sps:$4 sm:$0xff]   ;;  %v3345_v35 = vcombine.high %v51_v30, %v59_v31 }
  0xaf   :  { %2805 = vmatpush2.bf16.msra.mxu0 %v3944_v36  ;;  %v3992_v36 = vld [vmem:[%s5755_s1 + $0x640] ss:$8 sps:$4 sm:$0xff]  }
  0xb0   :  { %2918 = vmatpush2.bf16.msra.mxu1 %v3947_v37  ;;  %2806 = vmatprep.subr.bf16.mxu0 %v3952_v38  ;;  %v3995_v37 = vld [vmem:[%s5755_s1 + $0x740] ss:$8 sps:$4 sm:$0xff]   ;;  %v4000_v38 = vld [vmem:[%s5755_s1 + $0x634] ss:$8 sps:$4 sm:$0xff]  }
  0xb1   :  { %2919 = vmatprep.subr.bf16.mxu1 %v3955_v39  ;;  %v4003_v39 = vld [vmem:[%s5755_s1 + $0x734] ss:$8 sps:$4 sm:$0xff]   ;;  %v122_v27 = vld [vmem:[%s5756_s0 + $0x360] sm:$0xff] }
  0xb2   :  { %2649 = vmatmul.mubr.bf16.gmra.mxu0 %v3402_v42  ;;  %v3344_v42 = vcombine.low %v51_v30, %v59_v31  ;;  %v4034_v30 = vld [vmem:[%s5755_s1 + $0x6d0] ss:$8 sps:$4 sm:$0xff]  }
  0xb3   :  { %2762 = vmatmul.mubr.bf16.gmra.mxu1 %v3404_v43  ;;  %2807 = vmatpush2.bf16.msra.mxu0 %v3950_v46  ;;  %v74_v43 = vld [vmem:[%s5756_s0 + $0x1e0] sm:$0xff]  ;;  %v3998_v46 = vld [vmem:[%s5755_s1 + $0x630] ss:$8 sps:$4 sm:$0xff]  }
  0xb4   :  { %2920 = vmatpush2.bf16.msra.mxu1 %v3953_v47  ;;  %2808 = vmatprep.subr.bf16.mxu0 %v3958_v48  ;;  %v4001_v47 = vld [vmem:[%s5755_s1 + $0x730] ss:$8 sps:$4 sm:$0xff]   ;;  %v4006_v48 = vld [vmem:[%s5755_s1 + $0x624] ss:$8 sps:$4 sm:$0xff]  }
  0xb5   :  { %2921 = vmatprep.subr.bf16.mxu1 %v3961_v49  ;;  %2658 = vmatprep.mubr.bf16.mxu0 %v3419_v50  ;;  %v4009_v49 = vld [vmem:[%s5755_s1 + $0x724] ss:$8 sps:$4 sm:$0xff]   ;;  %v3359_v50 = vcombine.high %v66_v40, %v74_v43  ;;  %v4037_v31 = vld [vmem:[%s5755_s1 + $0x7d0] ss:$8 sps:$4 sm:$0xff]  }
  0xb6   :  { %2771 = vmatprep.mubr.bf16.mxu1 %v3421_v51  ;;  %v3361_v51 = vcombine.high %v67_v44, %v75_v45  ;;  %v131_v44 = vld [vmem:[%s5756_s0 + $0x3a8] sm:$0xff] }
  0xb7   :  { %2809 = vmatpush2.bf16.msra.mxu0 %v3956_v52  ;;  %v4004_v52 = vld [vmem:[%s5755_s1 + $0x620] ss:$8 sps:$4 sm:$0xff]  }
  0xb8   :  { %2922 = vmatpush2.bf16.msra.mxu1 %v3959_v53  ;;  %2810 = vmatprep.subr.bf16.mxu0 %v3964_v54  ;;  %v4007_v53 = vld [vmem:[%s5755_s1 + $0x720] ss:$8 sps:$4 sm:$0xff]   ;;  %v4012_v54 = vld [vmem:[%s5755_s1 + $0x614] ss:$8 sps:$4 sm:$0xff]  }
  0xb9   :  { %2923 = vmatprep.subr.bf16.mxu1 %v3967_v55  ;;  %v4015_v55 = vld [vmem:[%s5755_s1 + $0x714] ss:$8 sps:$4 sm:$0xff]   ;;  %v139_v45 = vld [vmem:[%s5756_s0 + $0x3e8] sm:$0xff] }
  0xba   :  { %2659 = vmatmul.mubr.bf16.gmra.mxu0 %v3418_v59  ;;  %v90_v59 = vld [vmem:[%s5756_s0 + $0x260] sm:$0xff] }
  0xbb   :  { %2772 = vmatmul.mubr.bf16.gmra.mxu1 %v3420_v60  ;;  %2811 = vmatpush2.bf16.msra.mxu0 %v3962_v56  ;;  %v82_v56 = vld [vmem:[%s5756_s0 + $0x220] sm:$0xff]  ;;  %v83_v60 = vld [vmem:[%s5756_s0 + $0x228] sm:$0xff] }
  0xbc   :  { %2924 = vmatpush2.bf16.msra.mxu1 %v3965_v57  ;;  %2812 = vmatprep.subr.bf16.mxu0 %v3970_v0  ;;  %v3358_v57 = vcombine.low %v66_v40, %v74_v43  ;;  %v4018_v0 = vld [vmem:[%s5755_s1 + $0x604] ss:$8 sps:$4 sm:$0xff]   ;;  %v3376_v10 = vcombine.low %v83_v60, %v91_v61 }
  0xbd   :  { %2925 = vmatprep.subr.bf16.mxu1 %v3973_v1  ;;  %2814 = vmatprep.mubr.bf16.mxu0 %v3311_v2  ;;  %v4021_v1 = vld [vmem:[%s5755_s1 + $0x704] ss:$8 sps:$4 sm:$0xff]   ;;  %v3375_v2 = vcombine.high %v82_v56, %v90_v59 }
  0xbe   :  { %2927 = vmatprep.mubr.bf16.mxu1 %v3313_v3  ;;  %v3377_v3 = vcombine.high %v83_v60, %v91_v61  ;;  %v130_v40 = vld [vmem:[%s5756_s0 + $0x3a0] sm:$0xff]  ;;  %v28_v60 = vld [vmem:[%s5756_s0 + $0x70] sm:$0xff]  ;;  %v21_v61 = vld [vmem:[%s5756_s0 + $0x38] sm:$0xff] }
  0xbf   :  { %2813 = vmatpush2.bf16.msra.mxu0 %v3968_v4  ;;  %v4016_v4 = vld [vmem:[%s5755_s1 + $0x600] ss:$8 sps:$4 sm:$0xff]  }
  0xc0   :  { %2926 = vmatpush2.bf16.msra.mxu1 %v3971_v5  ;;  %3008 = vmatprep.subr.bf16.mxu0 %v3976_v6  ;;  %v4019_v5 = vld [vmem:[%s5755_s1 + $0x700] ss:$8 sps:$4 sm:$0xff]   ;;  %v4024_v6 = vld [vmem:[%s5755_s1 + $0x6f4] ss:$8 sps:$4 sm:$0xff]  }
  0xc1   :  { %3121 = vmatprep.subr.bf16.mxu1 %v3979_v7  ;;  %v4027_v7 = vld [vmem:[%s5755_s1 + $0x7f4] ss:$8 sps:$4 sm:$0xff]   ;;  %v138_v43 = vld [vmem:[%s5756_s0 + $0x3e0] sm:$0xff] }
  0xc2   :  { %2815 = vmatmul.mubr.bf16.vlgmr.msra.gmra.mxu0 %v3310_v12  ;;  %v99_v12 = vld [vmem:[%s5756_s0 + $0x2a8] sm:$0xff] }
  0xc3   :  { %2928 = vmatmul.mubr.bf16.vlgmr.msra.gmra.mxu1 %v3312_v13  ;;  %3009 = vmatpush1.bf16.msra.mxu0 %v3974_v8  ;;  %v98_v8 = vld [vmem:[%s5756_s0 + $0x2a0] sm:$0xff]  ;;  %v107_v13 = vld [vmem:[%s5756_s0 + $0x2e8] sm:$0xff] }
  0xc4   :  { %3122 = vmatpush1.bf16.msra.mxu1 %v3977_v9  ;;  %3010 = vmatprep.subr.bf16.mxu0 %v3982_v16  ;;  %v3374_v9 = vcombine.low %v82_v56, %v90_v59  ;;  %v4030_v16 = vld [vmem:[%s5755_s1 + $0x6e4] ss:$8 sps:$4 sm:$0xff]   ;;  %v3392_v26 = vcombine.low %v99_v12, %v107_v13  ;;  %v4063_v56 = vld [vmem:[%s5755_s1 + $0x794] ss:$8 sps:$4 sm:$0xff]   ;;  %v3424_v59 = vcombine.low %v131_v44, %v139_v45 }
  0xc5   :  { %3123 = vmatprep.subr.bf16.mxu1 %v3985_v17  ;;  %2824 = vmatprep.mubr.bf16.mxu0 %v3327_v18  ;;  %v4033_v17 = vld [vmem:[%s5755_s1 + $0x7e4] ss:$8 sps:$4 sm:$0xff]   ;;  %v3391_v18 = vcombine.high %v98_v8, %v106_v11 }
  0xc6   :  { %2937 = vmatprep.mubr.bf16.mxu1 %v3329_v19  ;;  %v3393_v19 = vcombine.high %v99_v12, %v107_v13  ;;  %v37_v12 = vld [vmem:[%s5756_s0 + $0xb8] sm:$0xff] }
  0xc7   :  { %3011 = vmatpush1.bf16.msra.mxu0 %v3980_v20  ;;  %v4028_v20 = vld [vmem:[%s5755_s1 + $0x6e0] ss:$8 sps:$4 sm:$0xff]   ;;  %v45_v13 = vld [vmem:[%s5756_s0 + $0xf8] sm:$0xff] }
  0xc8   :  { %3124 = vmatpush1.bf16.msra.mxu1 %v3983_v21  ;;  %3012 = vmatprep.subr.bf16.mxu0 %v3988_v22  ;;  %v4031_v21 = vld [vmem:[%s5755_s1 + $0x7e0] ss:$8 sps:$4 sm:$0xff]   ;;  %v4036_v22 = vld [vmem:[%s5755_s1 + $0x6d4] ss:$8 sps:$4 sm:$0xff]  }
  0xc9   :  { %3125 = vmatprep.subr.bf16.mxu1 %v3991_v23  ;;  %v4039_v23 = vld [vmem:[%s5755_s1 + $0x7d4] ss:$8 sps:$4 sm:$0xff]  }
  0xca   :  { %2825 = vmatmul.mubr.bf16.gmra.mxu0 %v3326_v28  ;;  %v115_v28 = vld [vmem:[%s5756_s0 + $0x328] sm:$0xff] }
  0xcb   :  { %2938 = vmatmul.mubr.bf16.gmra.mxu1 %v3328_v29  ;;  %3013 = vmatpush1.bf16.msra.mxu0 %v3986_v24  ;;  %v114_v24 = vld [vmem:[%s5756_s0 + $0x320] sm:$0xff]  ;;  %v123_v29 = vld [vmem:[%s5756_s0 + $0x368] sm:$0xff] }
  0xcc   :  { %3126 = vmatpush1.bf16.msra.mxu1 %v3989_v25  ;;  %3014 = vmatprep.subr.bf16.mxu0 %v3994_v32  ;;  %v3390_v25 = vcombine.low %v98_v8, %v106_v11  ;;  %v4042_v32 = vld [vmem:[%s5755_s1 + $0x6c4] ss:$8 sps:$4 sm:$0xff]   ;;  %v398_v8 = vld [vmem:[%s5757_s2] sm:$0x3]  ;;  %v44_v11 = vld [vmem:[%s5756_s0 + $0xf0] sm:$0xff] }
  0xcd   :  { %3127 = vmatprep.subr.bf16.mxu1 %v3997_v33  ;;  %2834 = vmatprep.mubr.bf16.mxu0 %v3343_v34  ;;  %v4045_v33 = vld [vmem:[%s5755_s1 + $0x7c4] ss:$8 sps:$4 sm:$0xff]   ;;  %v3407_v34 = vcombine.high %v114_v24, %v122_v27 }
  0xce   :  { %2947 = vmatprep.mubr.bf16.mxu1 %v3345_v35  ;;  %v3409_v35 = vcombine.high %v115_v28, %v123_v29 }
  0xcf   :  { %3015 = vmatpush1.bf16.msra.mxu0 %v3992_v36  ;;  %v4040_v36 = vld [vmem:[%s5755_s1 + $0x6c0] ss:$8 sps:$4 sm:$0xff]  }
  0xd0   :  { %3128 = vmatpush1.bf16.msra.mxu1 %v3995_v37  ;;  %3016 = vmatprep.subr.bf16.mxu0 %v4000_v38  ;;  %v4043_v37 = vld [vmem:[%s5755_s1 + $0x7c0] ss:$8 sps:$4 sm:$0xff]   ;;  %v4048_v38 = vld [vmem:[%s5755_s1 + $0x6b4] ss:$8 sps:$4 sm:$0xff]  }
  0xd1   :  { %3129 = vmatprep.subr.bf16.mxu1 %v4003_v39  ;;  %v4051_v39 = vld [vmem:[%s5755_s1 + $0x7b4] ss:$8 sps:$4 sm:$0xff]  }
  0xd2   :  { %2835 = vmatmul.mubr.bf16.gmra.mxu0 %v3342_v41  ;;  %v3406_v41 = vcombine.low %v114_v24, %v122_v27  ;;  %v52_v24 = vld [vmem:[%s5756_s0 + $0x130] sm:$0xff] }
  0xd3   :  { %2948 = vmatmul.mubr.bf16.gmra.mxu1 %v3344_v42  ;;  %3017 = vmatpush1.bf16.msra.mxu0 %v3998_v46  ;;  %v3408_v42 = vcombine.low %v115_v28, %v123_v29  ;;  %v4046_v46 = vld [vmem:[%s5755_s1 + $0x6b0] ss:$8 sps:$4 sm:$0xff]  }
  0xd4   :  { %3130 = vmatpush1.bf16.msra.mxu1 %v4001_v47  ;;  %3018 = vmatprep.subr.bf16.mxu0 %v4006_v48  ;;  %v4049_v47 = vld [vmem:[%s5755_s1 + $0x7b0] ss:$8 sps:$4 sm:$0xff]   ;;  %v4054_v48 = vld [vmem:[%s5755_s1 + $0x6a4] ss:$8 sps:$4 sm:$0xff]  }
  0xd5   :  { %3131 = vmatprep.subr.bf16.mxu1 %v4009_v49  ;;  %2844 = vmatprep.mubr.bf16.mxu0 %v3359_v50  ;;  %v4057_v49 = vld [vmem:[%s5755_s1 + $0x7a4] ss:$8 sps:$4 sm:$0xff]   ;;  %v3423_v50 = vcombine.high %v130_v40, %v138_v43  ;;  %v60_v27 = vld [vmem:[%s5756_s0 + $0x170] sm:$0xff]  ;;  %v53_v28 = vld [vmem:[%s5756_s0 + $0x138] sm:$0xff] }
  0xd6   :  { %2957 = vmatprep.mubr.bf16.mxu1 %v3361_v51  ;;  %v3425_v51 = vcombine.high %v131_v44, %v139_v45  ;;  %v61_v29 = vld [vmem:[%s5756_s0 + $0x178] sm:$0xff] }
  0xd7   :  { %3019 = vmatpush1.bf16.msra.mxu0 %v4004_v52  ;;  %v4052_v52 = vld [vmem:[%s5755_s1 + $0x6a0] ss:$8 sps:$4 sm:$0xff]  }
  0xd8   :  { %3132 = vmatpush1.bf16.msra.mxu1 %v4007_v53  ;;  %3020 = vmatprep.subr.bf16.mxu0 %v4012_v54  ;;  %v4055_v53 = vld [vmem:[%s5755_s1 + $0x7a0] ss:$8 sps:$4 sm:$0xff]   ;;  %v400_v54 = vlaneseq }
  0xd9   :  { %3133 = vmatprep.subr.bf16.mxu1 %v4015_v55  ;;  %v4060_v55 = vld [vmem:[%s5755_s1 + $0x694] ss:$8 sps:$4 sm:$0xff]  }
  0xda   :  { %2845 = vmatmul.mubr.bf16.gmra.mxu0 %v3358_v57  ;;  %v20_v57 = vld [vmem:[%s5756_s0 + $0x30] sm:$0xff] }
  0xdb   :  { %2958 = vmatmul.mubr.bf16.gmra.mxu1 %v3360_v58  ;;  %3021 = vmatpush1.bf16.msra.mxu0 %v4010_v62  ;;  %v3422_v58 = vcombine.low %v130_v40, %v138_v43  ;;  %v29_v62 = vld [vmem:[%s5756_s0 + $0x78] sm:$0xff] }
  0xdc   :  { %3134 = vmatpush1.bf16.msra.mxu1 %v4013_v63  ;;  %3022 = vmatprep.subr.bf16.mxu0 %v4018_v0  ;;  %v4058_v63 = vld [vmem:[%s5755_s1 + $0x690] ss:$8 sps:$4 sm:$0xff]  }
  0xdd   :  { %3135 = vmatprep.subr.bf16.mxu1 %v4021_v1  ;;  %2854 = vmatprep.mubr.bf16.mxu0 %v3375_v2  ;;  %v4061_v0 = vld [vmem:[%s5755_s1 + $0x790] ss:$8 sps:$4 sm:$0xff]   ;;  %v401_v1 = vshrl.u32 %v400_v54, 7  ;;  %v4066_v2 = vld [vmem:[%s5755_s1 + $0x684] ss:$8 sps:$4 sm:$0xff]  }
  0xde   :  { %2967 = vmatprep.mubr.bf16.mxu1 %v3377_v3  ;;  %v4069_v3 = vld [vmem:[%s5755_s1 + $0x784] ss:$8 sps:$4 sm:$0xff]  }
  0xdf   :  { %3023 = vmatpush1.bf16.msra.mxu0 %v4016_v4  ;;  %v3315_v4 = vcombine.high %v20_v57, %v28_v60 }
  0xe0   :  { %3136 = vmatpush1.bf16.msra.mxu1 %v4019_v5  ;;  %3024 = vmatprep.subr.bf16.mxu0 %v4024_v6  ;;  %v3317_v5 = vcombine.high %v21_v61, %v29_v62  ;;  %v4064_v6 = vld [vmem:[%s5755_s1 + $0x680] ss:$8 sps:$4 sm:$0xff]  }
  0xe1   :  { %3137 = vmatprep.subr.bf16.mxu1 %v4027_v7  ;;  %v4067_v7 = vld [vmem:[%s5755_s1 + $0x780] ss:$8 sps:$4 sm:$0xff]  }
  0xe2   :  { %2855 = vmatmul.mubr.bf16.gmra.mxu0 %v3374_v9  ;;  %v402_v9 = vsub.s32 0, %v401_v1 }
  0xe3   :  { %2968 = vmatmul.mubr.bf16.gmra.mxu1 %v3376_v10  ;;  %3025 = vmatpush2.bf16.msra.mxu0 %v4022_v14  ;;  %v36_v10 = vld [vmem:[%s5756_s0 + $0xb0] sm:$0xff]  ;;  %v406_v14 = vsub.s32 1, %v401_v1 }
  0xe4   :  { %3138 = vmatpush2.bf16.msra.mxu1 %v4025_v15  ;;  %3026 = vmatprep.subr.bf16.mxu0 %v4030_v16  ;;  %v3314_v15 = vcombine.low %v20_v57, %v28_v60  ;;  %v3316_v16 = vcombine.low %v21_v61, %v29_v62 }
  0xe5   :  { %3139 = vmatprep.subr.bf16.mxu1 %v4033_v17  ;;  %2864 = vmatprep.mubr.bf16.mxu0 %v3391_v18  ;;  %v5173_v17 = vrot.slane %v398_v8, %v402_v9  ;;  %v3331_v18 = vcombine.high %v36_v10, %v44_v11 }
  0xe6   :  { %2977 = vmatprep.mubr.bf16.mxu1 %v3393_v19  ;;  %v3333_v19 = vcombine.high %v37_v12, %v45_v13 }
  0xe7   :  { %3027 = vmatpush2.bf16.msra.mxu0 %v4028_v20  ;;  %v5175_v20 = vrot.slane %v398_v8, %v406_v14  ;;  %v84_v8 = vld [vmem:[%s5756_s0 + $0x230] sm:$0xff] }
  0xe8   :  { %3140 = vmatpush2.bf16.msra.mxu1 %v4031_v21  ;;  %3028 = vmatprep.subr.bf16.mxu0 %v4036_v22 }
  0xe9   :  { %3141 = vmatprep.subr.bf16.mxu1 %v4039_v23 }
  0xea   :  { %2865 = vmatmul.mubr.bf16.gmra.mxu0 %v3390_v25 }
  0xeb   :  { %2978 = vmatmul.mubr.bf16.gmra.mxu1 %v3392_v26  ;;  %3029 = vmatpush2.bf16.msra.mxu0 %v4034_v30 }
  0xec   :  { %3142 = vmatpush2.bf16.msra.mxu1 %v4037_v31  ;;  %3030 = vmatprep.subr.bf16.mxu0 %v4042_v32 }
  0xed   :  { %3143 = vmatprep.subr.bf16.mxu1 %v4045_v33  ;;  %2874 = vmatprep.mubr.bf16.mxu0 %v3407_v34  ;;  %v3330_v34 = vcombine.low %v36_v10, %v44_v11  ;;  %v92_v11 = vld [vmem:[%s5756_s0 + $0x270] sm:$0xff] }
  0xee   :  { %2987 = vmatprep.mubr.bf16.mxu1 %v3409_v35  ;;  %v3332_v35 = vcombine.low %v37_v12, %v45_v13  ;;  %v85_v12 = vld [vmem:[%s5756_s0 + $0x238] sm:$0xff] }
  0xef   :  { %3031 = vmatpush2.bf16.msra.mxu0 %v4040_v36  ;;  %v93_v13 = vld [vmem:[%s5756_s0 + $0x278] sm:$0xff] }
  0xf0   :  { %3144 = vmatpush2.bf16.msra.mxu1 %v4043_v37  ;;  %3032 = vmatprep.subr.bf16.mxu0 %v4048_v38  ;;  %v3347_v38 = vcombine.high %v52_v24, %v60_v27 }
  0xf1   :  { %3145 = vmatprep.subr.bf16.mxu1 %v4051_v39  ;;  %v3349_v39 = vcombine.high %v53_v28, %v61_v29 }
  0xf2   :  { %2875 = vmatmul.mubr.bf16.gmra.mxu0 %v3406_v41 }
  0xf3   :  { %2988 = vmatmul.mubr.bf16.gmra.mxu1 %v3408_v42  ;;  %3033 = vmatpush2.bf16.msra.mxu0 %v4046_v46 }
  0xf4   :  { %3146 = vmatpush2.bf16.msra.mxu1 %v4049_v47  ;;  %3034 = vmatprep.subr.bf16.mxu0 %v4054_v48  ;;  %v68_v48 = vld [vmem:[%s5756_s0 + $0x1b0] sm:$0xff] }
  0xf5   :  { %3147 = vmatprep.subr.bf16.mxu1 %v4057_v49  ;;  %2884 = vmatprep.mubr.bf16.mxu0 %v3423_v50 }
  0xf6   :  { %2997 = vmatprep.mubr.bf16.mxu1 %v3425_v51  ;;  %v76_v51 = vld [vmem:[%s5756_s0 + $0x1f0] sm:$0xff] }
  0xf7   :  { %3035 = vmatpush2.bf16.msra.mxu0 %v4052_v52  ;;  %v69_v52 = vld [vmem:[%s5756_s0 + $0x1b8] sm:$0xff]  ;;  %v3363_v62 = vcombine.high %v68_v48, %v76_v51 }
  0xf8   :  { %3148 = vmatpush2.bf16.msra.mxu1 %v4055_v53  ;;  %3036 = vmatprep.subr.bf16.mxu0 %v4060_v55  ;;  %v77_v53 = vld [vmem:[%s5756_s0 + $0x1f8] sm:$0xff] }
  0xf9   :  { %3149 = vmatprep.subr.bf16.mxu1 %v4063_v56 }
  0xfa   :  { %2885 = vmatmul.mubr.bf16.gmra.mxu0 %v3422_v58  ;;  %v3346_v58 = vcombine.low %v52_v24, %v60_v27  ;;  %v3379_v24 = vcombine.high %v84_v8, %v92_v11 }
  0xfb   :  { %2998 = vmatmul.mubr.bf16.gmra.mxu1 %v3424_v59  ;;  %3037 = vmatpush2.bf16.msra.mxu0 %v4058_v63  ;;  %v3348_v59 = vcombine.low %v53_v28, %v61_v29  ;;  %v3365_v63 = vcombine.high %v69_v52, %v77_v53 }
  0xfc   :  { %3150 = vmatpush2.bf16.msra.mxu1 %v4061_v0  ;;  %3038 = vmatprep.subr.bf16.mxu0 %v4066_v2 }
  0xfd   :  { %3151 = vmatprep.subr.bf16.mxu1 %v4069_v3  ;;  %3040 = vmatprep.mubr.bf16.mxu0 %v3315_v4 }
  0xfe   :  { %3153 = vmatprep.mubr.bf16.mxu1 %v3317_v5 }
  0xff   :  { %3039 = vmatpush2.bf16.msra.mxu0 %v4064_v6 }
 0x100   :  { %3152 = vmatpush2.bf16.msra.mxu1 %v4067_v7 }
 0x102   :  { %v2364_v21 = vpop.f32.mrf.mxu0  ;;  %3041 = vmatmul.mubr.bf16.vlgmr.msra.gmra.mxu0 %v3314_v15 }
 0x103   :  { %v2477_v22 = vpop.f32.mrf.mxu1  ;;  %3154 = vmatmul.mubr.bf16.vlgmr.msra.gmra.mxu1 %v3316_v16  ;;  %v2365_v23 = vadd.f32 %v2364_v21, %v5173_v17  ;;  %3050 = vmatprep.mubr.bf16.mxu0 %v3331_v18  ;;  %v3364_v21 = vcombine.low %v69_v52, %v77_v53 }
 0x104   :  { %3163 = vmatprep.mubr.bf16.mxu1 %v3333_v19  ;;  %v2366_v25 = vpop.f32.mrf.mxu0  ;;  %v3362_v19 = vcombine.low %v68_v48, %v76_v51  ;;  %v3378_v48 = vcombine.low %v84_v8, %v92_v11 }
 0x105   :  { %v2479_v26 = vpop.f32.mrf.mxu1  ;;  %v5190_v30 = vadd.f32 %v2477_v22, %v2365_v23  ;;  %v2367_v31 = vadd.f32 %v2366_v25, %v5175_v20  ;;  %v3381_v25 = vcombine.high %v85_v12, %v93_v13 }
 0x106   :  { %v2368_v32 = vpop.f32.mrf.mxu0 }
 0x107   :  { %v2481_v33 = vpop.f32.mrf.mxu1  ;;  %v5193_v36 = vadd.f32 %v2479_v26, %v2367_v31  ;;  %v2369_v37 = vadd.f32 %v2368_v32, %v5173_v17 }
 0x108   :  { %v2370_v40 = vpop.f32.mrf.mxu0 }
 0x109   :  { %v2483_v41 = vpop.f32.mrf.mxu1  ;;  %v5196_v42 = vadd.f32 %v2481_v33, %v2369_v37  ;;  %v2371_v43 = vadd.f32 %v2370_v40, %v5175_v20  ;;  %v101_v40 = vld [vmem:[%s5756_s0 + $0x2b8] sm:$0xff] }
 0x10a   :  { %v2374_v44 = vpop.f32.mrf.mxu0  ;;  %3051 = vmatmul.mubr.bf16.gmra.mxu0 %v3330_v34 }
 0x10b   :  { %v2487_v45 = vpop.f32.mrf.mxu1  ;;  %3164 = vmatmul.mubr.bf16.gmra.mxu1 %v3332_v35  ;;  %v5199_v46 = vadd.f32 %v2483_v41, %v2371_v43  ;;  %v2375_v47 = vadd.f32 %v2374_v44, %v5173_v17  ;;  %3060 = vmatprep.mubr.bf16.mxu0 %v3347_v38  ;;  %v100_v35 = vld [vmem:[%s5756_s0 + $0x2b0] sm:$0xff]  ;;  %v109_v41 = vld [vmem:[%s5756_s0 + $0x2f8] sm:$0xff] }
 0x10c   :  { %3173 = vmatprep.mubr.bf16.mxu1 %v3349_v39  ;;  %v2376_v49 = vpop.f32.mrf.mxu0  ;;  %v108_v39 = vld [vmem:[%s5756_s0 + $0x2f0] sm:$0xff]  ;;  %v3397_v53 = vcombine.high %v101_v40, %v109_v41 }
 0x10d   :  { %v2489_v50 = vpop.f32.mrf.mxu1  ;;  %v5214_v54 = vadd.f32 %v2487_v45, %v2375_v47  ;;  %v2377_v55 = vadd.f32 %v2376_v49, %v5175_v20  ;;  %v3380_v49 = vcombine.low %v85_v12, %v93_v13  ;;  %v3395_v52 = vcombine.high %v100_v35, %v108_v39 }
 0x10e   :  { %v2378_v56 = vpop.f32.mrf.mxu0  ;;  %v3394_v12 = vcombine.low %v100_v35, %v108_v39  ;;  %v3396_v13 = vcombine.low %v101_v40, %v109_v41  ;;  %v141_v39 = vld [vmem:[%s5756_s0 + $0x3f8] sm:$0xff] }
 0x10f   :  { %v2491_v57 = vpop.f32.mrf.mxu1  ;;  %v5217_v60 = vadd.f32 %v2489_v50, %v2377_v55  ;;  %v2379_v61 = vadd.f32 %v2378_v56, %v5173_v17 }
 0x110   :  { %v2380_v0 = vpop.f32.mrf.mxu0 }
 0x111   :  { %v2493_v1 = vpop.f32.mrf.mxu1  ;;  %v5220_v2 = vadd.f32 %v2491_v57, %v2379_v61  ;;  %v2381_v3 = vadd.f32 %v2380_v0, %v5175_v20  ;;  %v116_v0 = vld [vmem:[%s5756_s0 + $0x330] sm:$0xff] }
 0x112   :  { %v2384_v4 = vpop.f32.mrf.mxu0  ;;  %3061 = vmatmul.mubr.bf16.gmra.mxu0 %v3346_v58 }
 0x113   :  { %v2497_v5 = vpop.f32.mrf.mxu1  ;;  %3174 = vmatmul.mubr.bf16.gmra.mxu1 %v3348_v59  ;;  %v5223_v6 = vadd.f32 %v2493_v1, %v2381_v3  ;;  %v2385_v7 = vadd.f32 %v2384_v4, %v5173_v17  ;;  %3070 = vmatprep.mubr.bf16.mxu0 %v3363_v62  ;;  %v124_v4 = vld [vmem:[%s5756_s0 + $0x370] sm:$0xff] }
 0x114   :  { %3183 = vmatprep.mubr.bf16.mxu1 %v3365_v63  ;;  %v2386_v9 = vpop.f32.mrf.mxu0 }
 0x115   :  { %v2499_v10 = vpop.f32.mrf.mxu1  ;;  %v5238_v14 = vadd.f32 %v2497_v5, %v2385_v7  ;;  %v2387_v15 = vadd.f32 %v2386_v9, %v5175_v20  ;;  %v117_v5 = vld [vmem:[%s5756_s0 + $0x338] sm:$0xff] }
 0x116   :  { %v2388_v16 = vpop.f32.mrf.mxu0  ;;  %v125_v7 = vld [vmem:[%s5756_s0 + $0x378] sm:$0xff] }
 0x117   :  { %v2501_v18 = vpop.f32.mrf.mxu1  ;;  %v5241_v22 = vadd.f32 %v2499_v10, %v2387_v15  ;;  %v2389_v23 = vadd.f32 %v2388_v16, %v5173_v17 }
 0x118   :  { %v2390_v26 = vpop.f32.mrf.mxu0 }
 0x119   :  { %v2503_v27 = vpop.f32.mrf.mxu1  ;;  %v5244_v28 = vadd.f32 %v2501_v18, %v2389_v23  ;;  %v2391_v29 = vadd.f32 %v2390_v26, %v5175_v20  ;;  %v3411_v18 = vcombine.high %v116_v0, %v124_v4 }
 0x11a   :  { %v2394_v31 = vpop.f32.mrf.mxu0  ;;  %3071 = vmatmul.mubr.bf16.gmra.mxu0 %v3362_v19  ;;  %v3413_v19 = vcombine.high %v117_v5, %v125_v7 }
 0x11b   :  { %v2507_v32 = vpop.f32.mrf.mxu1  ;;  %3184 = vmatmul.mubr.bf16.gmra.mxu1 %v3364_v21  ;;  %v5247_v33 = vadd.f32 %v2503_v27, %v2391_v29  ;;  %v2395_v34 = vadd.f32 %v2394_v31, %v5173_v17  ;;  %3080 = vmatprep.mubr.bf16.mxu0 %v3379_v24 }
 0x11c   :  { %3193 = vmatprep.mubr.bf16.mxu1 %v3381_v25  ;;  %v2396_v37 = vpop.f32.mrf.mxu0 }
 0x11d   :  { %v2509_v38 = vpop.f32.mrf.mxu1  ;;  %v5262_v43 = vadd.f32 %v2507_v32, %v2395_v34  ;;  %v2397_v44 = vadd.f32 %v2396_v37, %v5175_v20  ;;  %v132_v32 = vld [vmem:[%s5756_s0 + $0x3b0] sm:$0xff] }
 0x11e   :  { %v2398_v45 = vpop.f32.mrf.mxu0  ;;  %v140_v37 = vld [vmem:[%s5756_s0 + $0x3f0] sm:$0xff] }
 0x11f   :  { %v2511_v47 = vpop.f32.mrf.mxu1  ;;  %v5265_v50 = vadd.f32 %v2509_v38, %v2397_v44  ;;  %v2399_v51 = vadd.f32 %v2398_v45, %v5173_v17  ;;  %v133_v38 = vld [vmem:[%s5756_s0 + $0x3b8] sm:$0xff] }
 0x120   :  { %v2400_v55 = vpop.f32.mrf.mxu0 }
 0x121   :  { %v2513_v56 = vpop.f32.mrf.mxu1  ;;  %v5268_v57 = vadd.f32 %v2511_v47, %v2399_v51  ;;  %v2401_v58 = vadd.f32 %v2400_v55, %v5175_v20  ;;  %v3410_v47 = vcombine.low %v116_v0, %v124_v4 }
 0x122   :  { %v2404_v59 = vpop.f32.mrf.mxu0  ;;  %3081 = vmatmul.mubr.bf16.gmra.mxu0 %v3378_v48  ;;  %v3412_v48 = vcombine.low %v117_v5, %v125_v7 }
 0x123   :  { %v2517_v61 = vpop.f32.mrf.mxu1  ;;  %3194 = vmatmul.mubr.bf16.gmra.mxu1 %v3380_v49  ;;  %v5271_v62 = vadd.f32 %v2513_v56, %v2401_v58  ;;  %v2405_v63 = vadd.f32 %v2404_v59, %v5173_v17  ;;  %3090 = vmatprep.mubr.bf16.mxu0 %v3395_v52  ;;  %v3427_v52 = vcombine.high %v132_v32, %v140_v37 }
 0x124   :  { %3203 = vmatprep.mubr.bf16.mxu1 %v3397_v53  ;;  %v2406_v1 = vpop.f32.mrf.mxu0  ;;  %v3429_v53 = vcombine.high %v133_v38, %v141_v39 }
 0x125   :  { %v2519_v3 = vpop.f32.mrf.mxu1  ;;  %v5286_v8 = vadd.f32 %v2517_v61, %v2405_v63  ;;  %v2407_v9 = vadd.f32 %v2406_v1, %v5175_v20 }
 0x126   :  { %v2408_v10 = vpop.f32.mrf.mxu0 }
 0x127   :  { %v2521_v11 = vpop.f32.mrf.mxu1  ;;  %v5289_v15 = vadd.f32 %v2519_v3, %v2407_v9  ;;  %v2409_v16 = vadd.f32 %v2408_v10, %v5173_v17 }
 0x128   :  { %v2410_v21 = vpop.f32.mrf.mxu0 }
 0x129   :  { %v2523_v23 = vpop.f32.mrf.mxu1  ;;  %v5292_v24 = vadd.f32 %v2521_v11, %v2409_v16  ;;  %v2411_v25 = vadd.f32 %v2410_v21, %v5175_v20  ;;  %v3426_v11 = vcombine.low %v132_v32, %v140_v37 }
 0x12a   :  { %v2414_v26 = vpop.f32.mrf.mxu0  ;;  %3091 = vmatmul.mubr.bf16.gmra.mxu0 %v3394_v12  ;;  %v3428_v12 = vcombine.low %v133_v38, %v141_v39 }
 0x12b   :  { %v2527_v27 = vpop.f32.mrf.mxu1  ;;  %3204 = vmatmul.mubr.bf16.gmra.mxu1 %v3396_v13  ;;  %v5295_v29 = vadd.f32 %v2523_v23, %v2411_v25  ;;  %v2415_v31 = vadd.f32 %v2414_v26, %v5173_v17  ;;  %3100 = vmatprep.mubr.bf16.mxu0 %v3411_v18 }
 0x12c   :  { %3213 = vmatprep.mubr.bf16.mxu1 %v3413_v19  ;;  %v2416_v34 = vpop.f32.mrf.mxu0 }
 0x12d   :  { %v2529_v35 = vpop.f32.mrf.mxu1  ;;  %v5310_v40 = vadd.f32 %v2527_v27, %v2415_v31  ;;  %v2417_v41 = vadd.f32 %v2416_v34, %v5175_v20 }
 0x12e   :  { %v2418_v44 = vpop.f32.mrf.mxu0 }
 0x12f   :  { %v2531_v45 = vpop.f32.mrf.mxu1  ;;  %v5313_v49 = vadd.f32 %v2529_v35, %v2417_v41  ;;  %v2419_v51 = vadd.f32 %v2418_v44, %v5173_v17 }
 0x130   :  { %v2420_v55 = vpop.f32.mrf.mxu0 }
 0x131   :  { %v2533_v56 = vpop.f32.mrf.mxu1  ;;  %v5316_v58 = vadd.f32 %v2531_v45, %v2419_v51  ;;  %v2421_v59 = vadd.f32 %v2420_v55, %v5175_v20 }
 0x132   :  { %v2424_v61 = vpop.f32.mrf.mxu0  ;;  %3101 = vmatmul.mubr.bf16.gmra.mxu0 %v3410_v47 }
 0x133   :  { %v2537_v63 = vpop.f32.mrf.mxu1  ;;  %3214 = vmatmul.mubr.bf16.gmra.mxu1 %v3412_v48  ;;  %v5319_v1 = vadd.f32 %v2533_v56, %v2421_v59  ;;  %v2425_v0 = vadd.f32 %v2424_v61, %v5173_v17  ;;  %3110 = vmatprep.mubr.bf16.mxu0 %v3427_v52 }
 0x134   :  { %3223 = vmatprep.mubr.bf16.mxu1 %v3429_v53  ;;  %v2426_v3 = vpop.f32.mrf.mxu0 }
 0x135   :  { %v2539_v4 = vpop.f32.mrf.mxu1  ;;  %v5322_v5 = vadd.f32 %v2537_v63, %v2425_v0  ;;  %v2427_v7 = vadd.f32 %v2426_v3, %v5175_v20 }
 0x136   :  { %v2428_v9 = vpop.f32.mrf.mxu0 }
 0x137   :  { %v2541_v10 = vpop.f32.mrf.mxu1  ;;  %v5325_v13 = vadd.f32 %v2539_v4, %v2427_v7  ;;  %v2429_v16 = vadd.f32 %v2428_v9, %v5173_v17 }
 0x138   :  { %v2430_v18 = vpop.f32.mrf.mxu0 }
 0x139   :  { %v2543_v19 = vpop.f32.mrf.mxu1  ;;  %v5328_v21 = vadd.f32 %v2541_v10, %v2429_v16  ;;  %v2431_v23 = vadd.f32 %v2430_v18, %v5175_v20 }
 0x13a   :  { %v2434_v25 = vpop.f32.mrf.mxu0  ;;  %3111 = vmatmul.mubr.bf16.gmra.mxu0 %v3426_v11 }
 0x13b   :  { %v2547_v26 = vpop.f32.mrf.mxu1  ;;  %3224 = vmatmul.mubr.bf16.gmra.mxu1 %v3428_v12  ;;  %v5331_v27 = vadd.f32 %v2543_v19, %v2431_v23  ;;  %v2435_v31 = vadd.f32 %v2434_v25, %v5173_v17 }
 0x13c   :  { %v2436_v32 = vpop.f32.mrf.mxu0 }
 0x13d   :  { %v2549_v34 = vpop.f32.mrf.mxu1  ;;  %v5334_v35 = vadd.f32 %v2547_v26, %v2435_v31  ;;  %v2437_v37 = vadd.f32 %v2436_v32, %v5175_v20 }
 0x13e   :  { %v2438_v38 = vpop.f32.mrf.mxu0 }
 0x13f   :  { %v2551_v39 = vpop.f32.mrf.mxu1  ;;  %v5337_v41 = vadd.f32 %v2549_v34, %v2437_v37  ;;  %v2439_v44 = vadd.f32 %v2438_v38, %v5173_v17 }
 0x140   :  { %v2440_v45 = vpop.f32.mrf.mxu0 }
 0x141   :  { %v2553_v47 = vpop.f32.mrf.mxu1  ;;  %v5340_v48 = vadd.f32 %v2551_v39, %v2439_v44  ;;  %v2441_v51 = vadd.f32 %v2440_v45, %v5175_v20 }
 0x142   :  { %v2590_v52 = vpop.f32.mrf.mxu0 }
 0x143   :  { %v2703_v53 = vpop.f32.mrf.mxu1  ;;  %v5343_v55 = vadd.f32 %v2553_v47, %v2441_v51  ;;  %v2591_v56 = vadd.f32 %v2590_v52, %v5190_v30 }
 0x144   :  { %v2592_v59 = vpop.f32.mrf.mxu0 }
 0x145   :  { %v2705_v61 = vpop.f32.mrf.mxu1  ;;  %v5346_v63 = vadd.f32 %v2703_v53, %v2591_v56  ;;  %v2593_v0 = vadd.f32 %v2592_v59, %v5193_v36 }
 0x146   :  { %v2594_v3 = vpop.f32.mrf.mxu0 }
 0x147   :  { %v2707_v17 = vpop.f32.mrf.mxu1  ;;  %v5349_v4 = vadd.f32 %v2705_v61, %v2593_v0  ;;  %v2595_v7 = vadd.f32 %v2594_v3, %v5196_v42 }
 0x148   :  { %v2596_v9 = vpop.f32.mrf.mxu0 }
 0x149   :  { %v2709_v20 = vpop.f32.mrf.mxu1  ;;  %v5352_v10 = vadd.f32 %v2707_v17, %v2595_v7  ;;  %v2597_v11 = vadd.f32 %v2596_v9, %v5199_v46 }
 0x14a   :  { %v2600_v12 = vpop.f32.mrf.mxu0 }
 0x14b   :  { %v2713_v30 = vpop.f32.mrf.mxu1  ;;  %v5355_v16 = vadd.f32 %v2709_v20, %v2597_v11  ;;  %v2601_v18 = vadd.f32 %v2600_v12, %v5214_v54 }
 0x14c   :  { %v2602_v19 = vpop.f32.mrf.mxu0 }
 0x14d   :  { %v2715_v36 = vpop.f32.mrf.mxu1  ;;  %v5358_v23 = vadd.f32 %v2713_v30, %v2601_v18  ;;  %v2603_v25 = vadd.f32 %v2602_v19, %v5217_v60 }
 0x14e   :  { %v2604_v26 = vpop.f32.mrf.mxu0 }
 0x14f   :  { %v2717_v42 = vpop.f32.mrf.mxu1  ;;  %v5361_v31 = vadd.f32 %v2715_v36, %v2603_v25  ;;  %v2605_v32 = vadd.f32 %v2604_v26, %v5220_v2 }
 0x150   :  { %v2606_v34 = vpop.f32.mrf.mxu0 }
 0x151   :  { %v2719_v46 = vpop.f32.mrf.mxu1  ;;  %v5364_v37 = vadd.f32 %v2717_v42, %v2605_v32  ;;  %v2607_v38 = vadd.f32 %v2606_v34, %v5223_v6 }
 0x152   :  { %v2610_v39 = vpop.f32.mrf.mxu0 }
 0x153   :  { %v2723_v54 = vpop.f32.mrf.mxu1  ;;  %v5367_v44 = vadd.f32 %v2719_v46, %v2607_v38  ;;  %v2611_v45 = vadd.f32 %v2610_v39, %v5238_v14 }
 0x154   :  { %v2612_v47 = vpop.f32.mrf.mxu0 }
 0x155   :  { %v2725_v60 = vpop.f32.mrf.mxu1  ;;  %v5370_v51 = vadd.f32 %v2723_v54, %v2611_v45  ;;  %v2613_v52 = vadd.f32 %v2612_v47, %v5241_v22 }
 0x156   :  { %v2614_v53 = vpop.f32.mrf.mxu0 }
 0x157   :  { %v2727_v2 = vpop.f32.mrf.mxu1  ;;  %v5373_v56 = vadd.f32 %v2725_v60, %v2613_v52  ;;  %v2615_v59 = vadd.f32 %v2614_v53, %v5244_v28 }
 0x158   :  { %v2616_v61 = vpop.f32.mrf.mxu0 }
 0x159   :  { %v2729_v6 = vpop.f32.mrf.mxu1  ;;  %v5376_v0 = vadd.f32 %v2727_v2, %v2615_v59  ;;  %v2617_v3 = vadd.f32 %v2616_v61, %v5247_v33 }
 0x15a   :  { %v2620_v17 = vpop.f32.mrf.mxu0 }
 0x15b   :  { %v2733_v14 = vpop.f32.mrf.mxu1  ;;  %v5379_v7 = vadd.f32 %v2729_v6, %v2617_v3  ;;  %v2621_v9 = vadd.f32 %v2620_v17, %v5262_v43 }
 0x15c   :  { %v2622_v20 = vpop.f32.mrf.mxu0 }
 0x15d   :  { %v2735_v22 = vpop.f32.mrf.mxu1  ;;  %v5382_v11 = vadd.f32 %v2733_v14, %v2621_v9  ;;  %v2623_v12 = vadd.f32 %v2622_v20, %v5265_v50 }
 0x15e   :  { %v2624_v30 = vpop.f32.mrf.mxu0 }
 0x15f   :  { %v2737_v28 = vpop.f32.mrf.mxu1  ;;  %v5385_v18 = vadd.f32 %v2735_v22, %v2623_v12  ;;  %v2625_v19 = vadd.f32 %v2624_v30, %v5268_v57 }
 0x160   :  { %v2626_v36 = vpop.f32.mrf.mxu0 }
 0x161   :  { %v2739_v33 = vpop.f32.mrf.mxu1  ;;  %v5388_v25 = vadd.f32 %v2737_v28, %v2625_v19  ;;  %v2627_v26 = vadd.f32 %v2626_v36, %v5271_v62 }
 0x162   :  { %v2630_v42 = vpop.f32.mrf.mxu0 }
 0x163   :  { %v2743_v43 = vpop.f32.mrf.mxu1  ;;  %v5391_v32 = vadd.f32 %v2739_v33, %v2627_v26  ;;  %v2631_v34 = vadd.f32 %v2630_v42, %v5286_v8 }
 0x164   :  { %v2632_v46 = vpop.f32.mrf.mxu0 }
 0x165   :  { %v2745_v50 = vpop.f32.mrf.mxu1  ;;  %v5394_v38 = vadd.f32 %v2743_v43, %v2631_v34  ;;  %v2633_v39 = vadd.f32 %v2632_v46, %v5289_v15 }
 0x166   :  { %v2634_v54 = vpop.f32.mrf.mxu0 }
 0x167   :  { %v2747_v57 = vpop.f32.mrf.mxu1  ;;  %v5397_v45 = vadd.f32 %v2745_v50, %v2633_v39  ;;  %v2635_v47 = vadd.f32 %v2634_v54, %v5292_v24 }
 0x168   :  { %v2636_v60 = vpop.f32.mrf.mxu0 }
 0x169   :  { %v2749_v62 = vpop.f32.mrf.mxu1  ;;  %v5400_v52 = vadd.f32 %v2747_v57, %v2635_v47  ;;  %v2637_v53 = vadd.f32 %v2636_v60, %v5295_v29 }
 0x16a   :  { %v2640_v2 = vpop.f32.mrf.mxu0 }
 0x16b   :  { %5759 = vst [vmem:[#allocation2_spill] sm:$0xff] %v5400_v52  ;;  %v2753_v8 = vpop.f32.mrf.mxu1  ;;  %v5403_v59 = vadd.f32 %v2749_v62, %v2637_v53  ;;  %v2641_v61 = vadd.f32 %v2640_v2, %v5310_v40 }
 0x16c   :  { %v2642_v6 = vpop.f32.mrf.mxu0 }
 0x16d   :  { %5760 = vst [vmem:[#allocation3_spill] sm:$0xff] %v5403_v59  ;;  %v2755_v15 = vpop.f32.mrf.mxu1  ;;  %v5406_v3 = vadd.f32 %v2753_v8, %v2641_v61  ;;  %v2643_v17 = vadd.f32 %v2642_v6, %v5313_v49 }
 0x16e   :  { %v2644_v14 = vpop.f32.mrf.mxu0 }
 0x16f   :  { %5761 = vst [vmem:[#allocation4_spill] sm:$0xff] %v5406_v3  ;;  %v2757_v24 = vpop.f32.mrf.mxu1  ;;  %v5409_v9 = vadd.f32 %v2755_v15, %v2643_v17  ;;  %v2645_v20 = vadd.f32 %v2644_v14, %v5316_v58 }
 0x170   :  { %v2646_v22 = vpop.f32.mrf.mxu0 }
 0x171   :  { %5762 = vst [vmem:[#allocation5_spill] sm:$0xff] %v5409_v9  ;;  %v2759_v29 = vpop.f32.mrf.mxu1  ;;  %v5412_v12 = vadd.f32 %v2757_v24, %v2645_v20  ;;  %v2647_v30 = vadd.f32 %v2646_v22, %v5319_v1 }
 0x172   :  { %v2650_v28 = vpop.f32.mrf.mxu0 }
 0x173   :  { %5763 = vst [vmem:[#allocation6_spill] sm:$0xff] %v5412_v12  ;;  %v2763_v40 = vpop.f32.mrf.mxu1  ;;  %v5415_v19 = vadd.f32 %v2759_v29, %v2647_v30  ;;  %v2651_v36 = vadd.f32 %v2650_v28, %v5322_v5 }
 0x174   :  { %v2652_v33 = vpop.f32.mrf.mxu0 }
 0x175   :  { %5764 = vst [vmem:[#allocation7_spill] sm:$0xff] %v5415_v19  ;;  %v2765_v49 = vpop.f32.mrf.mxu1  ;;  %v5418_v26 = vadd.f32 %v2763_v40, %v2651_v36  ;;  %v2653_v42 = vadd.f32 %v2652_v33, %v5325_v13 }
 0x176   :  { %v2654_v43 = vpop.f32.mrf.mxu0 }
 0x177   :  { %5765 = vst [vmem:[#allocation8_spill] sm:$0xff] %v5418_v26  ;;  %v2767_v58 = vpop.f32.mrf.mxu1  ;;  %v5421_v34 = vadd.f32 %v2765_v49, %v2653_v42  ;;  %v2655_v46 = vadd.f32 %v2654_v43, %v5328_v21 }
 0x178   :  { %v2656_v50 = vpop.f32.mrf.mxu0 }
 0x179   :  { %5766 = vst [vmem:[#allocation9_spill] sm:$0xff] %v5421_v34  ;;  %v2769_v1 = vpop.f32.mrf.mxu1  ;;  %v5424_v39 = vadd.f32 %v2767_v58, %v2655_v46  ;;  %v2657_v54 = vadd.f32 %v2656_v50, %v5331_v27 }
 0x17a   :  { %v2660_v57 = vpop.f32.mrf.mxu0 }
 0x17b   :  { %5767 = vst [vmem:[#allocation10_spill] sm:$0xff] %v5424_v39  ;;  %v2773_v5 = vpop.f32.mrf.mxu1  ;;  %v5427_v47 = vadd.f32 %v2769_v1, %v2657_v54  ;;  %v2661_v60 = vadd.f32 %v2660_v57, %v5334_v35 }
 0x17c   :  { %v2662_v62 = vpop.f32.mrf.mxu0 }
 0x17d   :  { %5768 = vst [vmem:[#allocation11_spill] sm:$0xff] %v5427_v47  ;;  %v2775_v13 = vpop.f32.mrf.mxu1  ;;  %v5430_v53 = vadd.f32 %v2773_v5, %v2661_v60  ;;  %v2663_v2 = vadd.f32 %v2662_v62, %v5337_v41 }
 0x17e   :  { %v2664_v8 = vpop.f32.mrf.mxu0 }
 0x17f   :  { %5769 = vst [vmem:[#allocation12_spill] sm:$0xff] %v5430_v53  ;;  %v2777_v21 = vpop.f32.mrf.mxu1  ;;  %v5433_v61 = vadd.f32 %v2775_v13, %v2663_v2  ;;  %v2665_v6 = vadd.f32 %v2664_v8, %v5340_v48 }
 0x180   :  { %v2666_v15 = vpop.f32.mrf.mxu0 }
 0x181   :  { %5770 = vst [vmem:[#allocation13_spill] sm:$0xff] %v5433_v61  ;;  %v2779_v27 = vpop.f32.mrf.mxu1  ;;  %v5436_v17 = vadd.f32 %v2777_v21, %v2665_v6  ;;  %v2667_v14 = vadd.f32 %v2666_v15, %v5343_v55 }
 0x182   :  { %v2816_v24 = vpop.f32.mrf.mxu0 }
 0x183   :  { %5771 = vst [vmem:[#allocation14_spill] sm:$0xff] %v5436_v17  ;;  %v5439_v35 = vpop.f32.mrf.mxu1  ;;  %v5441_v20 = vadd.f32 %v2779_v27, %v2667_v14 }
 0x184   :  { %v2818_v22 = vpop.f32.mrf.mxu0 }
 0x185   :  { %5772 = vst [vmem:[#allocation15_spill] sm:$0xff] %v5441_v20  ;;  %v5443_v29 = vpop.f32.mrf.mxu1 }
 0x186   :  { %v5445_v41 = vpop.f32.mrf.mxu0 }
 0x187   :  { %v5447_v30 = vpop.f32.mrf.mxu1 }
 0x188   :  { %v5449_v28 = vpop.f32.mrf.mxu0 }
 0x189   :  { %v5451_v48 = vpop.f32.mrf.mxu1 }
 0x18a   :  { %v5453_v40 = vpop.f32.mrf.mxu0 }
 0x18b   :  { %v5455_v36 = vpop.f32.mrf.mxu1 }
 0x18c   :  { %v5457_v55 = vpop.f32.mrf.mxu0 }
 0x18d   :  { %v5459_v33 = vpop.f32.mrf.mxu1 }
 0x18e   :  { %v5461_v49 = vpop.f32.mrf.mxu0 }
 0x18f   :  { %v5463_v42 = vpop.f32.mrf.mxu1 }
 0x190   :  { %v5465_v43 = vpop.f32.mrf.mxu0 }
 0x191   :  { %v5467_v58 = vpop.f32.mrf.mxu1 }
 0x192   :  { %v5469_v46 = vpop.f32.mrf.mxu0 }
 0x193   :  { %v5471_v50 = vpop.f32.mrf.mxu1 }
 0x194   :  { %v5473_v1 = vpop.f32.mrf.mxu0 }
 0x195   :  { %v5475_v54 = vpop.f32.mrf.mxu1 }
 0x196   :  { %v5477_v57 = vpop.f32.mrf.mxu0 }
 0x197   :  { %v5479_v5 = vpop.f32.mrf.mxu1 }
 0x198   :  { %v5481_v60 = vpop.f32.mrf.mxu0 }
 0x199   :  { %v5483_v62 = vpop.f32.mrf.mxu1 }
 0x19a   :  { %v5485_v13 = vpop.f32.mrf.mxu0 }
 0x19b   :  { %v5487_v2 = vpop.f32.mrf.mxu1 }
 0x19c   :  { %v5489_v8 = vpop.f32.mrf.mxu0 }
 0x19d   :  { %v5491_v21 = vpop.f32.mrf.mxu1 }
 0x19e   :  { %v5493_v6 = vpop.f32.mrf.mxu0 }
 0x19f   :  { %v5495_v15 = vpop.f32.mrf.mxu1 }
 0x1a0   :  { %v5497_v27 = vpop.f32.mrf.mxu0 }
 0x1a1   :  { %v5499_v14 = vpop.f32.mrf.mxu1 }
 0x1a2   :  { %v5501_v20 = vpop.f32.mrf.mxu0 }
 0x1a3   :  { %v5503_v17 = vpop.f32.mrf.mxu1 }
 0x1a4   :  { %v5505_v61 = vpop.f32.mrf.mxu0 }
 0x1a5   :  { %v5507_v53 = vpop.f32.mrf.mxu1 }
 0x1a6   :  { %5773 = vst [vmem:[#allocation16_spill] sm:$0xff] %v5507_v53  ;;  %v5509_v47 = vpop.f32.mrf.mxu0 }
 0x1a7   :  { %5774 = vst [vmem:[#allocation17_spill] sm:$0xff] %v5509_v47  ;;  %v5511_v39 = vpop.f32.mrf.mxu1 }
 0x1a8   :  { %5775 = vst [vmem:[#allocation18_spill] sm:$0xff] %v5511_v39  ;;  %v5513_v34 = vpop.f32.mrf.mxu0 }
 0x1a9   :  { %5776 = vst [vmem:[#allocation19_spill] sm:$0xff] %v5513_v34  ;;  %v5515_v26 = vpop.f32.mrf.mxu1 }
 0x1aa   :  { %5777 = vst [vmem:[#allocation20_spill] sm:$0xff] %v5515_v26  ;;  %v5517_v19 = vpop.f32.mrf.mxu0 }
 0x1ab   :  { %5778 = vst [vmem:[#allocation21_spill] sm:$0xff] %v5517_v19  ;;  %v5519_v12 = vpop.f32.mrf.mxu1 }
 0x1ac   :  { %5779 = vst [vmem:[#allocation22_spill] sm:$0xff] %v5519_v12  ;;  %v5521_v9 = vpop.f32.mrf.mxu0 }
 0x1ad   :  { %5780 = vst [vmem:[#allocation23_spill] sm:$0xff] %v5521_v9  ;;  %v5523_v3 = vpop.f32.mrf.mxu1 }
 0x1ae   :  { %5781 = vst [vmem:[#allocation24_spill] sm:$0xff] %v5523_v3  ;;  %v5525_v59 = vpop.f32.mrf.mxu0 }
 0x1af   :  { %5782 = vst [vmem:[#allocation25_spill] sm:$0xff] %v5525_v59  ;;  %v5527_v52 = vpop.f32.mrf.mxu1 }
 0x1b0   :  { %5783 = vst [vmem:[#allocation26_spill] sm:$0xff] %v5527_v52  ;;  %v5529_v53 = vpop.f32.mrf.mxu0 }
 0x1b1   :  { %5784 = vst [vmem:[#allocation27_spill] sm:$0xff] %v5529_v53  ;;  %v5531_v47 = vpop.f32.mrf.mxu1 }
 0x1b2   :  { %5785 = vst [vmem:[#allocation28_spill] sm:$0xff] %v5531_v47  ;;  %v5533_v39 = vpop.f32.mrf.mxu0 }
 0x1b3   :  { %5786 = vst [vmem:[#allocation29_spill] sm:$0xff] %v5533_v39  ;;  %v5535_v34 = vpop.f32.mrf.mxu1 }
 0x1b4   :  { %5787 = vst [vmem:[#allocation30_spill] sm:$0xff] %v5535_v34  ;;  %v5537_v26 = vpop.f32.mrf.mxu0  ;;  %v2817_v34 = vadd.f32 %v2816_v24, %v5346_v63  ;;  %v2823_v63 = vadd.f32 %v5449_v28, %v5355_v16  ;;  %v2831_v28 = vadd.f32 %v5461_v49, %v5364_v37 }
 0x1b5   :  { %5788 = vst [vmem:[#allocation31_spill] sm:$0xff] %v5537_v26  ;;  %v5539_v19 = vpop.f32.mrf.mxu1 }
 0x1b6   :  { %5789 = vst [vmem:[#allocation32_spill] sm:$0xff] %v5539_v19  ;;  %v5541_v12 = vpop.f32.mrf.mxu0 }
 0x1b7   :  { %5790 = vst [vmem:[#allocation33_spill] sm:$0xff] %v5541_v12  ;;  %v5543_v9 = vpop.f32.mrf.mxu1 }
 0x1b8   :  { %5791 = vst [vmem:[#allocation34_spill] sm:$0xff] %v5543_v9  ;;  %v5545_v3 = vpop.f32.mrf.mxu0  ;;  %v2819_v9 = vadd.f32 %v2818_v22, %v5349_v4  ;;  %v2827_v4 = vadd.f32 %v5453_v40, %v5358_v23  ;;  %v2837_v40 = vadd.f32 %v5469_v46, %v5370_v51 }
 0x1b9   :  { %5792 = vst [vmem:[#allocation35_spill] sm:$0xff] %v5545_v3  ;;  %v5547_v59 = vpop.f32.mrf.mxu1 }
 0x1ba   :  { %5793 = vst [vmem:[#allocation36_spill] sm:$0xff] %v5547_v59  ;;  %v5549_v52 = vpop.f32.mrf.mxu0  ;;  %v2930_v59 = vadd.f32 %v5439_v35, %v2817_v34 }
 0x1bb   :  { %5794 = vst [vmem:[#allocation37_spill] sm:$0xff] %v5549_v52  ;;  %v5551_v53 = vpop.f32.mrf.mxu1 }
 0x1bc   :  { %5795 = vst [vmem:[#allocation38_spill] sm:$0xff] %v5551_v53  ;;  %v5553_v47 = vpop.f32.mrf.mxu0  ;;  %v2821_v53 = vadd.f32 %v5445_v41, %v5352_v10  ;;  %v2829_v10 = vadd.f32 %v5457_v55, %v5361_v31  ;;  %v2944_v55 = vadd.f32 %v5463_v42, %v2831_v28 }
 0x1bd   :  { %5796 = vst [vmem:[#allocation39_spill] sm:$0xff] %v5553_v47  ;;  %v5555_v39 = vpop.f32.mrf.mxu1 }
 0x1be   :  { %5797 = vst [vmem:[#allocation40_spill] sm:$0xff] %v5555_v39  ;;  %v5558_v26 = vpop.f32.mrf.mxu0  ;;  %v2932_v39 = vadd.f32 %v5443_v29, %v2819_v9  ;;  %v2936_v9 = vadd.f32 %v5451_v48, %v2823_v63 }
 0x1bf   :  { %5798 = vst [vmem:[#allocation41_spill] sm:$0xff] %v5558_v26  ;;  %v5560_v19 = vpop.f32.mrf.mxu1 }
 0x1c0   :  { %5799 = vst [vmem:[#allocation42_spill] sm:$0xff] %v5560_v19  ;;  %v5563_v12 = vpop.f32.mrf.mxu0 }
 0x1c1   :  { %5800 = vst [vmem:[#allocation43_spill] sm:$0xff] %v5563_v12  ;;  %v5565_v3 = vpop.f32.mrf.mxu1 }
 0x1c2   :  { %5801 = vst [vmem:[#allocation44_spill] sm:$0xff] %v5565_v3  ;;  %v3042_v47 = vpop.f32.mrf.mxu0  ;;  %v2934_v3 = vadd.f32 %v5447_v30, %v2821_v53  ;;  %v2942_v53 = vadd.f32 %v5459_v33, %v2829_v10 }
 0x1c3   :  { %v3155_v52 = vpop.f32.mrf.mxu1  ;;  %v3043_v24 = vadd.f32 %v3042_v47, %v2930_v59  ;;  %v2940_v59 = vadd.f32 %v5455_v36, %v2827_v4 }
 0x1c4   :  { %v3044_v22 = vpop.f32.mrf.mxu0 }
 0x1c5   :  { %v3157_v19 = vpop.f32.mrf.mxu1  ;;  %v3156_v12 = vadd.f32 %v3155_v52, %v3043_v24  ;;  %v3045_v34 = vadd.f32 %v3044_v22, %v2932_v39  ;;  %v2950_v22 = vadd.f32 %v5471_v50, %v2837_v40 }
 0x1c6   :  { %v3046_v35 = vpop.f32.mrf.mxu0 }
 0x1c7   :  { %v3159_v41 = vpop.f32.mrf.mxu1  ;;  %v3234_v29 = vmax.f32 %v3156_v12, 0.0  ;;  %v3158_v26 = vadd.f32 %v3157_v19, %v3045_v34  ;;  %v3047_v16 = vadd.f32 %v3046_v35, %v2934_v3  ;;  %v2833_v3 = vadd.f32 %v5465_v43, %v5367_v44 }
 0x1c8   :  { %v3048_v47 = vpop.f32.mrf.mxu0  ;;  %v2839_v43 = vadd.f32 %v5473_v1, %v5373_v56  ;;  %v2841_v35 = vadd.f32 %v5477_v57, %v5376_v0 }
 0x1c9   :  { %v3161_v23 = vpop.f32.mrf.mxu1  ;;  %3266 = vst [vmem:[%s5758_s3] sm:$0xff] %v3234_v29  ;;  %v3235_v52 = vmax.f32 %v3158_v26, 0.0  ;;  %v3160_v31 = vadd.f32 %v3159_v41, %v3047_v16  ;;  %v3049_v39 = vadd.f32 %v3048_v47, %v2936_v9  ;;  %v2946_v4 = vadd.f32 %v5467_v58, %v2833_v3 }
 0x1ca   :  { %v3052_v30 = vpop.f32.mrf.mxu0  ;;  %v2952_v41 = vadd.f32 %v5475_v54, %v2839_v43  ;;  %v2843_v16 = vadd.f32 %v5481_v60, %v5379_v7  ;;  %v2954_v28 = vadd.f32 %v5479_v5, %v2841_v35 }
 0x1cb   :  { %v3165_v12 = vpop.f32.mrf.mxu1  ;;  %3267 = vst [vmem:[%s5758_s3 + $0x8] sm:$0xff] %v3235_v52  ;;  %v3236_v19 = vmax.f32 %v3160_v31, 0.0  ;;  %v3162_v37 = vadd.f32 %v3161_v23, %v3049_v39  ;;  %v3053_v48 = vadd.f32 %v3052_v30, %v2940_v59  ;;  %v2847_v59 = vadd.f32 %v5485_v13, %v5382_v11 }
 0x1cc   :  { %v3054_v26 = vpop.f32.mrf.mxu0  ;;  %v2849_v52 = vadd.f32 %v5489_v8, %v5385_v18 }
 0x1cd   :  { %v3167_v36 = vpop.f32.mrf.mxu1  ;;  %3268 = vst [vmem:[%s5758_s3 + $0x10] sm:$0xff] %v3236_v19  ;;  %v3237_v33 = vmax.f32 %v3162_v37, 0.0  ;;  %v3166_v44 = vadd.f32 %v3165_v12, %v3053_v48  ;;  %v3055_v49 = vadd.f32 %v3054_v26, %v2942_v53  ;;  %v2956_v53 = vadd.f32 %v5483_v62, %v2843_v16 }
 0x1ce   :  { %v3056_v63 = vpop.f32.mrf.mxu0  ;;  %v2960_v30 = vadd.f32 %v5487_v2, %v2847_v59  ;;  %v2851_v19 = vadd.f32 %v5493_v6, %v5388_v25  ;;  %v2962_v37 = vadd.f32 %v5491_v21, %v2849_v52  ;;  %v2853_v26 = vadd.f32 %v5497_v27, %v5391_v32  ;;  %v5810_v52 = vld [vmem:[#allocation5_spill] sm:$0xff] }
 0x1cf   :  { %v3169_v24 = vpop.f32.mrf.mxu1  ;;  %3269 = vst [vmem:[%s5758_s3 + $0x18] sm:$0xff] %v3237_v33  ;;  %v3238_v51 = vmax.f32 %v3166_v44, 0.0  ;;  %v3168_v42 = vadd.f32 %v3167_v36, %v3055_v49  ;;  %v3057_v46 = vadd.f32 %v3056_v63, %v2944_v55  ;;  %v2857_v36 = vadd.f32 %v5501_v20, %v5394_v38 }
 0x1d0   :  { %v3058_v34 = vpop.f32.mrf.mxu0  ;;  %v2964_v44 = vadd.f32 %v5495_v15, %v2851_v19  ;;  %v2859_v49 = vadd.f32 %v5505_v61, %v5397_v45  ;;  %v5813_v19 = vld [vmem:[#allocation22_spill] sm:$0xff] }
 0x1d1   :  { %v3171_v10 = vpop.f32.mrf.mxu1  ;;  %3270 = vst [vmem:[%s5758_s3 + $0x20] sm:$0xff] %v3238_v51  ;;  %v3239_v56 = vmax.f32 %v3168_v42, 0.0  ;;  %v3170_v58 = vadd.f32 %v3169_v24, %v3057_v46  ;;  %v3059_v1 = vadd.f32 %v3058_v34, %v2946_v4  ;;  %v2966_v24 = vadd.f32 %v5499_v14, %v2853_v26  ;;  %v5802_v46 = vld [vmem:[#allocation2_spill] sm:$0xff] }
 0x1d2   :  { %v3062_v9 = vpop.f32.mrf.mxu0  ;;  %v2970_v4 = vadd.f32 %v5503_v17, %v2857_v36 }
 0x1d3   :  { %v3175_v29 = vpop.f32.mrf.mxu1  ;;  %3271 = vst [vmem:[%s5758_s3 + $0x28] sm:$0xff] %v3239_v56  ;;  %v3240_v50 = vmax.f32 %v3170_v58, 0.0  ;;  %v3172_v0 = vadd.f32 %v3171_v10, %v3059_v1  ;;  %v3063_v57 = vadd.f32 %v3062_v9, %v2950_v22  ;;  %v5803_v22 = vld [vmem:[#allocation17_spill] sm:$0xff]  ;;  %v5804_v10 = vld [vmem:[#allocation16_spill] sm:$0xff]  ;;  %v5805_v1 = vld [vmem:[#allocation3_spill] sm:$0xff] }
 0x1d4   :  { %v3064_v47 = vpop.f32.mrf.mxu0  ;;  %v2861_v34 = vadd.f32 %v5803_v22, %v5802_v46  ;;  %v2972_v35 = vadd.f32 %v5804_v10, %v2859_v49 }
 0x1d5   :  { %v3177_v23 = vpop.f32.mrf.mxu1  ;;  %3272 = vst [vmem:[%s5758_s3 + $0x30] sm:$0xff] %v3240_v50  ;;  %v3241_v54 = vmax.f32 %v3172_v0, 0.0  ;;  %v3176_v7 = vadd.f32 %v3175_v29, %v3063_v57  ;;  %v3065_v60 = vadd.f32 %v3064_v47, %v2952_v41  ;;  %v5806_v41 = vld [vmem:[#allocation19_spill] sm:$0xff]  ;;  %v5807_v50 = vld [vmem:[#allocation4_spill] sm:$0xff]  ;;  %v5808_v0 = vld [vmem:[#allocation21_spill] sm:$0xff] }
 0x1d6   :  { %v3066_v31 = vpop.f32.mrf.mxu0  ;;  %v2863_v9 = vadd.f32 %v5806_v41, %v5805_v1  ;;  %v2867_v57 = vadd.f32 %v5808_v0, %v5807_v50  ;;  %v5826_v50 = vld [vmem:[#allocation10_spill] sm:$0xff]  ;;  %v5827_v0 = vld [vmem:[#allocation33_spill] sm:$0xff] }
 0x1d7   :  { %v3179_v39 = vpop.f32.mrf.mxu1  ;;  %3273 = vst [vmem:[%s5758_s3 + $0x38] sm:$0xff] %v3241_v54  ;;  %v3242_v11 = vmax.f32 %v3176_v7, 0.0  ;;  %v3178_v5 = vadd.f32 %v3177_v23, %v3065_v60  ;;  %v3067_v13 = vadd.f32 %v3066_v31, %v2954_v28  ;;  %v5809_v23 = vld [vmem:[#allocation18_spill] sm:$0xff]  ;;  %v5811_v31 = vld [vmem:[#allocation23_spill] sm:$0xff] }
 0x1d8   :  { %v3068_v12 = vpop.f32.mrf.mxu0  ;;  %v2974_v28 = vadd.f32 %v5809_v23, %v2861_v34  ;;  %v5822_v34 = vld [vmem:[#allocation9_spill] sm:$0xff] }
 0x1d9   :  { %v3181_v3 = vpop.f32.mrf.mxu1  ;;  %3274 = vst [vmem:[%s5758_s3 + $0x40] sm:$0xff] %v3242_v11  ;;  %v3243_v18 = vmax.f32 %v3178_v5, 0.0  ;;  %v3180_v62 = vadd.f32 %v3179_v39, %v3067_v13  ;;  %v3069_v8 = vadd.f32 %v3068_v12, %v2956_v53  ;;  %v2869_v39 = vadd.f32 %v5811_v31, %v5810_v52  ;;  %v5812_v5 = vld [vmem:[#allocation20_spill] sm:$0xff]  ;;  %v5829_v52 = vld [vmem:[#allocation11_spill] sm:$0xff] }
 0x1da   :  { %v3072_v48 = vpop.f32.mrf.mxu0  ;;  %v2976_v13 = vadd.f32 %v5812_v5, %v2863_v9  ;;  %v5825_v9 = vld [vmem:[#allocation30_spill] sm:$0xff]  ;;  %v5830_v31 = vld [vmem:[#allocation35_spill] sm:$0xff] }
 0x1db   :  { %v3185_v40 = vpop.f32.mrf.mxu1  ;;  %3275 = vst [vmem:[%s5758_s3 + $0x48] sm:$0xff] %v3243_v18  ;;  %v3244_v2 = vmax.f32 %v3180_v62, 0.0  ;;  %v3182_v25 = vadd.f32 %v3181_v3, %v3069_v8  ;;  %v3073_v6 = vadd.f32 %v3072_v48, %v2960_v30  ;;  %v2980_v18 = vadd.f32 %v5813_v19, %v2867_v57  ;;  %v5815_v48 = vld [vmem:[#allocation25_spill] sm:$0xff] }
 0x1dc   :  { %v3074_v55 = vpop.f32.mrf.mxu0  ;;  %v2881_v57 = vadd.f32 %v5827_v0, %v5826_v50  ;;  %v5844_v0 = vld [vmem:[#allocation44_spill] sm:$0xff] }
 0x1dd   :  { %v3187_v33 = vpop.f32.mrf.mxu1  ;;  %3276 = vst [vmem:[%s5758_s3 + $0x50] sm:$0xff] %v3244_v2  ;;  %v3245_v21 = vmax.f32 %v3182_v25, 0.0  ;;  %v3186_v32 = vadd.f32 %v3185_v40, %v3073_v6  ;;  %v3075_v27 = vadd.f32 %v3074_v55, %v2962_v37  ;;  %v5814_v37 = vld [vmem:[#allocation6_spill] sm:$0xff]  ;;  %v5816_v6 = vld [vmem:[#allocation24_spill] sm:$0xff] }
 0x1de   :  { %v3076_v43 = vpop.f32.mrf.mxu0  ;;  %v2871_v40 = vadd.f32 %v5815_v48, %v5814_v37  ;;  %v2982_v36 = vadd.f32 %v5816_v6, %v2869_v39  ;;  %v2883_v39 = vadd.f32 %v5830_v31, %v5829_v52 }
 0x1df   :  { %v3189_v63 = vpop.f32.mrf.mxu1  ;;  %3277 = vst [vmem:[%s5758_s3 + $0x58] sm:$0xff] %v3245_v21  ;;  %v3246_v38 = vmax.f32 %v3186_v32, 0.0  ;;  %v3188_v20 = vadd.f32 %v3187_v33, %v3075_v27  ;;  %v3077_v15 = vadd.f32 %v3076_v43, %v2964_v44  ;;  %v5817_v44 = vld [vmem:[#allocation7_spill] sm:$0xff] }
 0x1e0   :  { %v3078_v51 = vpop.f32.mrf.mxu0  ;;  %v5818_v21 = vld [vmem:[#allocation27_spill] sm:$0xff] }
 0x1e1   :  { %v3191_v42 = vpop.f32.mrf.mxu1  ;;  %3278 = vst [vmem:[%s5758_s3 + $0x60] sm:$0xff] %v3246_v38  ;;  %v3247_v45 = vmax.f32 %v3188_v20, 0.0  ;;  %v3190_v61 = vadd.f32 %v3189_v63, %v3077_v15  ;;  %v3079_v14 = vadd.f32 %v3078_v51, %v2966_v24  ;;  %v2873_v32 = vadd.f32 %v5818_v21, %v5817_v44  ;;  %v5819_v63 = vld [vmem:[#allocation8_spill] sm:$0xff]  ;;  %v5820_v24 = vld [vmem:[#allocation29_spill] sm:$0xff] }
 0x1e2   :  { %v3082_v56 = vpop.f32.mrf.mxu0  ;;  %v2877_v38 = vadd.f32 %v5820_v24, %v5819_v63  ;;  %v5838_v63 = vld [vmem:[#allocation14_spill] sm:$0xff]  ;;  %v5839_v24 = vld [vmem:[#allocation41_spill] sm:$0xff] }
 0x1e3   :  { %v3195_v58 = vpop.f32.mrf.mxu1  ;;  %3279 = vst [vmem:[%s5758_s3 + $0x68] sm:$0xff] %v3247_v45  ;;  %v3248_v17 = vmax.f32 %v3190_v61, 0.0  ;;  %v3192_v29 = vadd.f32 %v3191_v42, %v3079_v14  ;;  %v3083_v16 = vadd.f32 %v3082_v56, %v2970_v4  ;;  %v5821_v4 = vld [vmem:[#allocation26_spill] sm:$0xff]  ;;  %v5823_v45 = vld [vmem:[#allocation31_spill] sm:$0xff] }
 0x1e4   :  { %v3084_v59 = vpop.f32.mrf.mxu0  ;;  %v2984_v51 = vadd.f32 %v5821_v4, %v2871_v40  ;;  %v2879_v61 = vadd.f32 %v5823_v45, %v5822_v34  ;;  %v5834_v40 = vld [vmem:[#allocation13_spill] sm:$0xff]  ;;  %v5841_v34 = vld [vmem:[#allocation15_spill] sm:$0xff] }
 0x1e5   :  { %v3197_v47 = vpop.f32.mrf.mxu1  ;;  %3280 = vst [vmem:[%s5758_s3 + $0x70] sm:$0xff] %v3248_v17  ;;  %v3249_v54 = vmax.f32 %v3192_v29, 0.0  ;;  %v3196_v7 = vadd.f32 %v3195_v58, %v3083_v16  ;;  %v3085_v60 = vadd.f32 %v3084_v59, %v2972_v35  ;;  %v5824_v35 = vld [vmem:[#allocation28_spill] sm:$0xff]  ;;  %v2990_v17 = vadd.f32 %v5825_v9, %v2877_v38  ;;  %v5842_v45 = vld [vmem:[#allocation43_spill] sm:$0xff] }
 0x1e6   :  { %v3086_v53 = vpop.f32.mrf.mxu0  ;;  %v2986_v56 = vadd.f32 %v5824_v35, %v2873_v32  ;;  %v5837_v32 = vld [vmem:[#allocation38_spill] sm:$0xff]  ;;  %v2891_v38 = vadd.f32 %v5839_v24, %v5838_v63 }
 0x1e7   :  { %v3199_v11 = vpop.f32.mrf.mxu1  ;;  %3281 = vst [vmem:[%s5758_s3 + $0x78] sm:$0xff] %v3249_v54  ;;  %v3250_v30 = vmax.f32 %v3196_v7, 0.0  ;;  %v3198_v12 = vadd.f32 %v3197_v47, %v3085_v60  ;;  %v3087_v3 = vadd.f32 %v3086_v53, %v2974_v28  ;;  %v5828_v28 = vld [vmem:[#allocation32_spill] sm:$0xff] }
 0x1e8   :  { %v3088_v62 = vpop.f32.mrf.mxu0  ;;  %v2992_v54 = vadd.f32 %v5828_v28, %v2879_v61  ;;  %v2893_v61 = vadd.f32 %v5842_v45, %v5841_v34 }
 0x1e9   :  { %v3201_v8 = vpop.f32.mrf.mxu1  ;;  %3282 = vst [vmem:[%s5758_s3 + $0x80] sm:$0xff] %v3250_v30  ;;  %v3251_v26 = vmax.f32 %v3198_v12, 0.0  ;;  %v3200_v2 = vadd.f32 %v3199_v11, %v3087_v3  ;;  %v3089_v25 = vadd.f32 %v3088_v62, %v2976_v13  ;;  %v5831_v13 = vld [vmem:[#allocation12_spill] sm:$0xff]  ;;  %v5832_v30 = vld [vmem:[#allocation37_spill] sm:$0xff] }
 0x1ea   :  { %v3092_v55 = vpop.f32.mrf.mxu0  ;;  %v2887_v12 = vadd.f32 %v5832_v30, %v5831_v13 }
 0x1eb   :  { %v3205_v33 = vpop.f32.mrf.mxu1  ;;  %3283 = vst [vmem:[%s5758_s3 + $0x88] sm:$0xff] %v3251_v26  ;;  %v3252_v27 = vmax.f32 %v3200_v2, 0.0  ;;  %v3202_v49 = vadd.f32 %v3201_v8, %v3089_v25  ;;  %v3093_v43 = vadd.f32 %v3092_v55, %v2980_v18  ;;  %v5833_v18 = vld [vmem:[#allocation34_spill] sm:$0xff]  ;;  %v5835_v26 = vld [vmem:[#allocation39_spill] sm:$0xff] }
 0x1ec   :  { %v3094_v20 = vpop.f32.mrf.mxu0  ;;  %v2994_v62 = vadd.f32 %v5833_v18, %v2881_v57  ;;  %v2889_v2 = vadd.f32 %v5835_v26, %v5834_v40  ;;  %v3006_v57 = vadd.f32 %v5844_v0, %v2893_v61 }
 0x1ed   :  { %v3207_v15 = vpop.f32.mrf.mxu1  ;;  %3284 = vst [vmem:[%s5758_s3 + $0x90] sm:$0xff] %v3252_v27  ;;  %v3253_v42 = vmax.f32 %v3202_v49, 0.0  ;;  %v3206_v46 = vadd.f32 %v3205_v33, %v3093_v43  ;;  %v3095_v22 = vadd.f32 %v3094_v20, %v2982_v36  ;;  %v5836_v36 = vld [vmem:[#allocation36_spill] sm:$0xff]  ;;  %v3000_v27 = vadd.f32 %v5837_v32, %v2887_v12 }
 0x1ee   :  { %v3096_v14 = vpop.f32.mrf.mxu0  ;;  %v2996_v55 = vadd.f32 %v5836_v36, %v2883_v39 }
 0x1ef   :  { %v3209_v10 = vpop.f32.mrf.mxu1  ;;  %3285 = vst [vmem:[%s5758_s3 + $0x98] sm:$0xff] %v3253_v42  ;;  %v3254_v58 = vmax.f32 %v3206_v46, 0.0  ;;  %v3208_v1 = vadd.f32 %v3207_v15, %v3095_v22  ;;  %v3097_v41 = vadd.f32 %v3096_v14, %v2984_v51  ;;  %v5840_v51 = vld [vmem:[#allocation40_spill] sm:$0xff] }
 0x1f0   :  { %v3098_v29 = vpop.f32.mrf.mxu0  ;;  %v3002_v42 = vadd.f32 %v5840_v51, %v2889_v2 }
 0x1f1   :  { %v3211_v16 = vpop.f32.mrf.mxu1  ;;  %3286 = vst [vmem:[%s5758_s3 + $0xa0] sm:$0xff] %v3254_v58  ;;  %v3255_v59 = vmax.f32 %v3208_v1, 0.0  ;;  %v3210_v47 = vadd.f32 %v3209_v10, %v3097_v41  ;;  %v3099_v23 = vadd.f32 %v3098_v29, %v2986_v56  ;;  %v5843_v1 = vld [vmem:[#allocation42_spill] sm:$0xff] }
 0x1f2   :  { %v3102_v7 = vpop.f32.mrf.mxu0  ;;  %v3004_v41 = vadd.f32 %v5843_v1, %v2891_v38 }
 0x1f3   :  { %v3215_v60 = vpop.f32.mrf.mxu1  ;;  %3287 = vst [vmem:[%s5758_s3 + $0xa8] sm:$0xff] %v3255_v59  ;;  %v3256_v53 = vmax.f32 %v3210_v47, 0.0  ;;  %v3212_v11 = vadd.f32 %v3211_v16, %v3099_v23  ;;  %v3103_v5 = vadd.f32 %v3102_v7, %v2990_v17 }
 0x1f4   :  { %v3104_v3 = vpop.f32.mrf.mxu0 }
 0x1f5   :  { %v3217_v19 = vpop.f32.mrf.mxu1  ;;  %3288 = vst [vmem:[%s5758_s3 + $0xb0] sm:$0xff] %v3256_v53  ;;  %v3257_v8 = vmax.f32 %v3212_v11, 0.0  ;;  %v3216_v37 = vadd.f32 %v3215_v60, %v3103_v5  ;;  %v3105_v48 = vadd.f32 %v3104_v3, %v2992_v54 }
 0x1f6   :  { %v3106_v25 = vpop.f32.mrf.mxu0 }
 0x1f7   :  { %v3219_v6 = vpop.f32.mrf.mxu1  ;;  %3289 = vst [vmem:[%s5758_s3 + $0xb8] sm:$0xff] %v3257_v8  ;;  %v3258_v33 = vmax.f32 %v3216_v37, 0.0  ;;  %v3218_v44 = vadd.f32 %v3217_v19, %v3105_v48  ;;  %v3107_v21 = vadd.f32 %v3106_v25, %v2994_v62 }
 0x1f8   :  { %v3108_v49 = vpop.f32.mrf.mxu0 }
 0x1f9   :  { %v3221_v43 = vpop.f32.mrf.mxu1  ;;  %3290 = vst [vmem:[%s5758_s3 + $0xc0] sm:$0xff] %v3258_v33  ;;  %v3259_v20 = vmax.f32 %v3218_v44, 0.0  ;;  %v3220_v15 = vadd.f32 %v3219_v6, %v3107_v21  ;;  %v3109_v4 = vadd.f32 %v3108_v49, %v2996_v55 }
 0x1fa   :  { %v3112_v46 = vpop.f32.mrf.mxu0 }
 0x1fb   :  { %v3225_v22 = vpop.f32.mrf.mxu1  ;;  %3291 = vst [vmem:[%s5758_s3 + $0xc8] sm:$0xff] %v3259_v20  ;;  %v3260_v14 = vmax.f32 %v3220_v15, 0.0  ;;  %v3222_v10 = vadd.f32 %v3221_v43, %v3109_v4  ;;  %v3113_v35 = vadd.f32 %v3112_v46, %v3000_v27 }
 0x1fc   :  { %v3114_v56 = vpop.f32.mrf.mxu0 }
 0x1fd   :  { %v3227_v58 = vpop.f32.mrf.mxu1  ;;  %3292 = vst [vmem:[%s5758_s3 + $0xd0] sm:$0xff] %v3260_v14  ;;  %v3261_v9 = vmax.f32 %v3222_v10, 0.0  ;;  %v3226_v17 = vadd.f32 %v3225_v22, %v3113_v35  ;;  %v3115_v29 = vadd.f32 %v3114_v56, %v3002_v42 }
 0x1fe   :  { %v3116_v16 = vpop.f32.mrf.mxu0 }
 0x1ff   :  { %v3229_v50 = vpop.f32.mrf.mxu1  ;;  %3293 = vst [vmem:[%s5758_s3 + $0xd8] sm:$0xff] %v3261_v9  ;;  %v3262_v59 = vmax.f32 %v3226_v17, 0.0  ;;  %v3228_v47 = vadd.f32 %v3227_v58, %v3115_v29  ;;  %v3117_v23 = vadd.f32 %v3116_v16, %v3004_v41 }
 0x200   :  { %v3118_v28 = vpop.f32.mrf.mxu0 }
 0x201   :  { %3294 = vst [vmem:[%s5758_s3 + $0xe0] sm:$0xff] %v3262_v59  ;;  %v3263_v54 = vmax.f32 %v3228_v47, 0.0  ;;  %v3230_v7 = vadd.f32 %v3229_v50, %v3117_v23  ;;  %v3119_v60 = vadd.f32 %v3118_v28, %v3006_v57  ;;  %v3231_v52 = vpop.f32.mrf.mxu1 }
 0x203   :  { %3295 = vst [vmem:[%s5758_s3 + $0xe8] sm:$0xff] %v3263_v54  ;;  %v3264_v31 = vmax.f32 %v3230_v7, 0.0  ;;  %v3232_v39 = vadd.f32 %v3231_v52, %v3119_v60 }
 0x205   :  { %3296 = vst [vmem:[%s5758_s3 + $0xf0] sm:$0xff] %v3264_v31  ;;  %v3265_v53 = vmax.f32 %v3232_v39, 0.0 }
 0x207   :  { %3297 = vst [vmem:[%s5758_s3 + $0xf8] sm:$0xff] %v3265_v53 }

</bundles_post_ra>
